<compile_context>
chip_gen: v5e
topology: v5e:2x2
jax: 0.10.0
libtpu: 0.0.40
codegen_flags: <defaults>
</compile_context>

<pallas_src>
import jax
import jax.numpy as jnp
from jax.experimental import pallas as pl
from jax.experimental.pallas import tpu as pltpu

EPS = 1e-5
LANE = 128


# ---------------------------------------------------------------------------
# helpers
# ---------------------------------------------------------------------------
def _round_up(x, m):
    return ((x + m - 1) // m) * m


def _pad_dim(a, axis, target, value=0.0):
    cur = a.shape[axis]
    if cur == target:
        return a
    cfg = [(0, 0)] * a.ndim
    cfg[axis] = (0, target - cur)
    return jnp.pad(a, cfg, constant_values=value)


def _row_tile(total):
    """Largest row tile <= 1024 that divides total (multiple of 8)."""
    for t in (1024, 512, 256, 128, 64, 32, 16, 8):
        if t <= total and total % t == 0:
            return t
    return total


def _cparams(block_bytes, scratch_bytes=0):
    # 2x for Pallas double-buffering of grid blocks + scratch + headroom for
    # Mosaic internal scratch / semaphores.  Capped below v7x's 64 MiB VMEM.
    vmem = int(2 * block_bytes + scratch_bytes) + (4 << 20)
    vmem = max(16 << 20, min(vmem, 48 << 20))
    return pltpu.CompilerParams(
        dimension_semantics=("parallel",),
        vmem_limit_bytes=vmem,
    )


def _bn_affine(stats, gamma, beta, count):
    """Fold batch statistics + BN affine params into per-channel scale/shift."""
    # TODO(synk): E[x^2]-E[x]^2 in f32 can cancel for |mean| >> std.
    s = jnp.sum(stats.astype(jnp.float32), axis=0)        # (2, C)
    mean = s[0] / count
    var = jnp.maximum(s[1] / count - mean * mean, 0.0)
    scale = gamma * jax.lax.rsqrt(var + EPS)
    shift = beta - mean * scale
    return scale.reshape(1, -1), shift.reshape(1, -1)


# ---------------------------------------------------------------------------
# kernels
# ---------------------------------------------------------------------------
def _conv1x1_stats_kernel(x_ref, w_ref, y_ref, st_ref):
    """1x1 conv (row-tiled matmul, bf16 MXU) + per-block BN partial sums."""
    acc = jnp.dot(x_ref[...], w_ref[...], preferred_element_type=jnp.float32)
    st_ref[0:1, :] = jnp.sum(acc, axis=0, keepdims=True)
    st_ref[1:2, :] = jnp.sum(acc * acc, axis=0, keepdims=True)
    y_ref[...] = acc.astype(y_ref.dtype)


def _bn_relu_conv3x3_stats_kernel(sc_ref, sh_ref, x_ref, w_ref, y_ref, st_ref,
                                  xp_ref, col_ref):
    """BN(prev)+ReLU fused in, 3x3 conv (pad=1, stride=1) via im2col + stats."""
    H, W, Cin = x_ref.shape
    Cout = y_ref.shape[-1]
    C0 = 8  # sublane-aligned interior start column inside the padded scratch
    # BN of the previous stage in f32, ReLU, cast to bf16 for the MXU.
    a = x_ref[...].astype(jnp.float32) * sc_ref[...] + sh_ref[...]
    a = jnp.maximum(a, 0.0).astype(jnp.bfloat16)
    # Zero only the 1-pixel halo the taps actually read (cheap, and correct
    # even when the batch grid axis is split across TensorCores).
    xp_ref[0:1, C0 - 1:C0 + W + 1, :] = jnp.zeros((1, W + 2, Cin), jnp.bfloat16)
    xp_ref[H + 1:H + 2, C0 - 1:C0 + W + 1, :] = jnp.zeros((1, W + 2, Cin),
                                                          jnp.bfloat16)
    xp_ref[1:H + 1, C0 - 1:C0, :] = jnp.zeros((H, 1, Cin), jnp.bfloat16)
    xp_ref[1:H + 1, C0 + W:C0 + W + 1, :] = jnp.zeros((H, 1, Cin), jnp.bfloat16)
    # Sublane-aligned (offset 8) interior store: unmasked vst.
    xp_ref[1:H + 1, C0:C0 + W, :] = a
    # im2col: build one (H*W, 9*Cin) tile, then a single K=9*Cin matmul.
    for t in range(9):
        ky, kx = divmod(t, 3)
        c = C0 - 1 + kx
        patch = xp_ref[ky:ky + H, c:c + W, :]
        col_ref[:, t * Cin:(t + 1) * Cin] = patch.reshape(H * W, Cin)
    acc = jnp.dot(col_ref[...], w_ref[...], preferred_element_type=jnp.float32)
    st_ref[0:1, :] = jnp.sum(acc, axis=0, keepdims=True)
    st_ref[1:2, :] = jnp.sum(acc * acc, axis=0, keepdims=True)
    y_ref[...] = acc.reshape(H, W, Cout).astype(y_ref.dtype)


def _bn_relu_conv1x1_stats_kernel(sc_ref, sh_ref, x_ref, w_ref, y_ref, st_ref):
    """BN(prev)+ReLU fused in, 1x1 conv (row-tiled matmul) + BN partial sums."""
    a = x_ref[...].astype(jnp.float32) * sc_ref[...] + sh_ref[...]
    a = jnp.maximum(a, 0.0).astype(jnp.bfloat16)
    acc = jnp.dot(a, w_ref[...], preferred_element_type=jnp.float32)
    st_ref[0:1, :] = jnp.sum(acc, axis=0, keepdims=True)
    st_ref[1:2, :] = jnp.sum(acc * acc, axis=0, keepdims=True)
    y_ref[...] = acc.astype(y_ref.dtype)


def _bn_add_relu_kernel(sc_ref, sh_ref, x_ref, id_ref, o_ref):
    """Final BN + residual add + ReLU (elementwise, f32 math)."""
    y = x_ref[...].astype(jnp.float32) * sc_ref[...] + sh_ref[...]
    o_ref[...] = jnp.maximum(y + id_ref[...].astype(jnp.float32),
                             0.0).astype(o_ref.dtype)


# ---------------------------------------------------------------------------
# forward
# ---------------------------------------------------------------------------
def bottleneck_forward(x_nchw, params):
    """Bottleneck.forward with stride=1, groups=1, downsample=None."""
    N, C, H, W = x_nchw.shape
    w1, w2, w3 = params["w1"], params["w2"], params["w3"]
    width = w1.shape[1]
    cout = w3.shape[1]
    assert C == cout, "identity path requires inplanes == planes * expansion"

    ci = _round_up(C, LANE)        # padded inplanes (== padded cout)
    cw = _round_up(width, LANE)    # padded bottleneck width
    co = _round_up(cout, LANE)
    M = N * H * W                  # BN statistics count (no padded rows)
    TM = _row_tile(M)              # rows per grid step for the 1x1 stages
    G = M // TM

    # ---- layout prep: NCHW -> NHWC, lane padding, bf16 ----
    xf = _pad_dim(jnp.transpose(x_nchw, (0, 2, 3, 1)).astype(jnp.bfloat16),
                  3, ci)
    x2d = xf.reshape(M, ci)
    w1p = _pad_dim(_pad_dim(w1, 0, ci), 1, cw).astype(jnp.bfloat16)
    w2p = _pad_dim(_pad_dim(w2, 2, cw), 3, cw).reshape(9 * cw, cw).astype(
        jnp.bfloat16)
    w3p = _pad_dim(_pad_dim(w3, 0, cw), 1, co).astype(jnp.bfloat16)
    g1 = _pad_dim(params["g1"].astype(jnp.float32), 0, cw, 1.0)
    b1 = _pad_dim(params["b1"].astype(jnp.float32), 0, cw, 0.0)
    g2 = _pad_dim(params["g2"].astype(jnp.float32), 0, cw, 1.0)
    b2 = _pad_dim(params["b2"].astype(jnp.float32), 0, cw, 0.0)
    g3 = _pad_dim(params["g3"].astype(jnp.float32), 0, co, 1.0)
    b3 = _pad_dim(params["b3"].astype(jnp.float32), 0, co, 0.0)

    def row_spec(c):
        return pl.BlockSpec((TM, c), lambda i: (i, 0))

    def const_spec(shape):
        nd = len(shape)
        return pl.BlockSpec(shape, lambda i: (0,) * nd)

    def stats_spec(c):
        return pl.BlockSpec((None, 2, c), lambda i: (i, 0, 0))

    def img_spec(c):
        return pl.BlockSpec((None, H, W, c), lambda n: (n, 0, 0, 0))

    # ---- stage 1: conv1 (1x1) + BN partial stats -----------------------
    blk1 = TM * (ci + cw) * 2 + 2 * cw * 4
    y1, st1 = pl.pallas_call(
        _conv1x1_stats_kernel,
        grid=(G,),
        in_specs=[row_spec(ci), const_spec((ci, cw))],
        out_specs=(row_spec(cw), stats_spec(cw)),
        out_shape=(jax.ShapeDtypeStruct((M, cw), jnp.bfloat16),
                   jax.ShapeDtypeStruct((G, 2, cw), jnp.float32)),
        compiler_params=_cparams(blk1 + ci * cw * 2),
        cost_estimate=pl.CostEstimate(
            flops=2 * M * ci * cw, transcendentals=0,
            bytes_accessed=M * (ci + cw) * 2 + ci * cw * 2 + G * 2 * cw * 4),
    )(x2d, w1p)
    sc1, sh1 = _bn_affine(st1, g1, b1, M)

    # ---- stage 2: bn1+relu fused into conv2 (3x3, im2col) + stats -------
    y1_img = y1.reshape(N, H, W, cw)
    blk2 = 2 * (H * W * cw * 2) + 2 * cw * 4 + 2 * cw * 4
    scratch2 = ((H + 2) * (W + 16) * cw * 2          # padded scratch (bf16)
                + H * W * 9 * cw * 2                 # im2col tile (bf16)
                + H * W * cw * 4)                    # f32 accumulator
    y2, st2 = pl.pallas_call(
        _bn_relu_conv3x3_stats_kernel,
        grid=(N,),
        in_specs=[const_spec((1, cw)), const_spec((1, cw)),
                  img_spec(cw), const_spec((9 * cw, cw))],
        out_specs=(img_spec(cw), stats_spec(cw)),
        out_shape=(jax.ShapeDtypeStruct((N, H, W, cw), jnp.bfloat16),
                   jax.ShapeDtypeStruct((N, 2, cw), jnp.float32)),
        scratch_shapes=[pltpu.VMEM((H + 2, W + 16, cw), jnp.bfloat16),
                        pltpu.VMEM((H * W, 9 * cw), jnp.bfloat16)],
        compiler_params=_cparams(blk2 + 9 * cw * cw * 2, scratch2),
        cost_estimate=pl.CostEstimate(
            flops=2 * M * 9 * cw * cw, transcendentals=0,
            bytes_accessed=(2 * M * cw * 2 + 9 * cw * cw * 2
                            + N * 2 * cw * 4 + 2 * cw * 4 * 2)),
    )(sc1, sh1, y1_img, w2p)
    sc2, sh2 = _bn_affine(st2, g2, b2, M)

    # ---- stage 3: bn2+relu fused into conv3 (1x1) + BN partial stats ----
    y2_2d = y2.reshape(M, cw)
    blk3 = TM * (cw + co) * 2 + 2 * co * 4 + 2 * cw * 4
    y3, st3 = pl.pallas_call(
        _bn_relu_conv1x1_stats_kernel,
        grid=(G,),
        in_specs=[const_spec((1, cw)), const_spec((1, cw)),
                  row_spec(cw), const_spec((cw, co))],
        out_specs=(row_spec(co), stats_spec(co)),
        out_shape=(jax.ShapeDtypeStruct((M, co), jnp.bfloat16),
                   jax.ShapeDtypeStruct((G, 2, co), jnp.float32)),
        compiler_params=_cparams(blk3 + cw * co * 2),
        cost_estimate=pl.CostEstimate(
            flops=2 * M * cw * co, transcendentals=0,
            bytes_accessed=(M * (cw + co) * 2 + cw * co * 2
                            + G * 2 * co * 4 + 2 * cw * 4 * 2)),
    )(sc2, sh2, y2_2d, w3p)
    sc3, sh3 = _bn_affine(st3, g3, b3, M)

    # ---- stage 4: bn3 + residual add + relu -----------------------------
    blk4 = TM * (co * 2 + ci * 2 + co * 4) + 2 * co * 4
    outp = pl.pallas_call(
        _bn_add_relu_kernel,
        grid=(G,),
        in_specs=[const_spec((1, co)), const_spec((1, co)),
                  row_spec(co), row_spec(ci)],
        out_specs=row_spec(co),
        out_shape=jax.ShapeDtypeStruct((M, co), jnp.float32),
        compiler_params=_cparams(blk4),
        cost_estimate=pl.CostEstimate(
            flops=4 * M * co, transcendentals=0,
            bytes_accessed=(M * (co * 2 + ci * 2 + co * 4)
                            + 2 * co * 4 * 2)),
    )(sc3, sh3, y3, x2d)

    out_img = outp.reshape(N, H, W, co)
    return jnp.transpose(out_img[..., :cout], (0, 3, 1, 2))


# ---------------------------------------------------------------------------
# params + pure-JAX reference
# ---------------------------------------------------------------------------
def make_params(key, inplanes, planes, base_width=64, groups=1, expansion=4):
    width = int(planes * (base_width / 64.0)) * groups
    cout = planes * expansion
    ks = jax.random.split(key, 9)
    return {
        # PyTorch conv weights are (Cout, Cin, kh, kw); stored here as
        # (Cin, Cout) for 1x1 and (kh, kw, Cin, Cout) (HWIO) for 3x3.
        "w1": 0.2 * jax.random.normal(ks[0], (inplanes, width), jnp.float32),
        "w2": 0.2 * jax.random.normal(ks[1], (3, 3, width, width), jnp.float32),
        "w3": 0.2 * jax.random.normal(ks[2], (width, cout), jnp.float32),
        "g1": 1.0 + 0.1 * jax.random.normal(ks[3], (width,), jnp.float32),
        "b1": 0.1 * jax.random.normal(ks[4], (width,), jnp.float32),
        "g2": 1.0 + 0.1 * jax.random.normal(ks[5], (width,), jnp.float32),
        "b2": 0.1 * jax.random.normal(ks[6], (width,), jnp.float32),
        "g3": 1.0 + 0.1 * jax.random.normal(ks[7], (cout,), jnp.float32),
        "b3": 0.1 * jax.random.normal(ks[8], (cout,), jnp.float32),
    }


def reference_forward(x_nchw, params):
    """Pure-JAX f32 reference (training-mode BN, biased variance)."""
    def bn(y, g, b):
        mu = y.mean(axis=(0, 1, 2), keepdims=True)
        var = jnp.square(y - mu).mean(axis=(0, 1, 2), keepdims=True)
        return (y - mu) * jax.lax.rsqrt(var + EPS) * g + b

    x = jnp.transpose(x_nchw, (0, 2, 3, 1)).astype(jnp.float32)
    y = jnp.einsum("nhwc,cd->nhwd", x, params["w1"])
    y = jax.nn.relu(bn(y, params["g1"], params["b1"]))
    y = jax.lax.conv_general_dilated(
        y, params["w2"], window_strides=(1, 1), padding="SAME",
        dimension_numbers=("NHWC", "HWIO", "NHWC"))
    y = jax.nn.relu(bn(y, params["g2"], params["b2"]))
    y = jnp.einsum("nhwc,cd->nhwd", y, params["w3"])
    y = jax.nn.relu(bn(y, params["g3"], params["b3"]) + x)
    return jnp.transpose(y, (0, 3, 1, 2))


if __name__ == "__main__":
    # Default Bottleneck config (stride=1, groups=1, downsample=None):
    # inplanes == planes * expansion so the identity path is well-typed.
    inplanes, planes = 64, 16
    N, H, W = 2, 16, 16

    key = jax.random.PRNGKey(0)
    k_x, k_p = jax.random.split(key)
    x = jax.random.normal(k_x, (N, inplanes, H, W), jnp.float32)  # NCHW input
    params = make_params(k_p, inplanes, planes)

    fwd = jax.jit(bottleneck_forward)
    out = jax.block_until_ready(fwd(x, params))
    ref = jax.block_until_ready(reference_forward(x, params))

    assert out.shape == (N, planes * 4, H, W), out.shape
    # bf16 MXU matmuls + bf16 intermediate storage vs f32 reference
    assert bool(jnp.allclose(out, ref, rtol=5e-2, atol=5e-2)), (
        float(jnp.max(jnp.abs(out - ref))))
    print("KERNEL_OK")
</pallas_src>

<mosaic_0001>
module attributes {stable_mosaic.version = 11 : i64} {
  func.func @_conv1x1_stats_kernel(%arg0: i32, %arg1: memref<512x128xbf16, #tpu.memory_space<vmem>>, %arg2: memref<128x128xbf16, #tpu.memory_space<vmem>>, %arg3: memref<512x128xbf16, #tpu.memory_space<vmem>>, %arg4: memref<1x2x128xf32, #tpu.memory_space<vmem>>) attributes {dimension_semantics = [#tpu.dimension_semantics<parallel>], iteration_bounds = array<i64: 1>, scalar_prefetch = 0 : i64, scratch_operands = 0 : i64, tpu.core_type = #tpu.core_type<tc>, window_params = [{transform_indices = @transform_0, window_bounds = array<i64: 512, 128>}, {pipeline_mode = #tpu.pipeline_mode<synchronous>, transform_indices = @transform_1, window_bounds = array<i64: 128, 128>}, {transform_indices = @transform_2, window_bounds = array<i64: 512, 128>}, {transform_indices = @transform_3, window_bounds = array<i64: 1, 2, 128>}]} {
    %c0 = arith.constant 0 : index
    %c0_0 = arith.constant 0 : index
    %0 = vector.load %arg1[%c0, %c0_0] : memref<512x128xbf16, #tpu.memory_space<vmem>>, vector<512x128xbf16>
    %c0_1 = arith.constant 0 : index
    %c0_2 = arith.constant 0 : index
    %1 = vector.load %arg2[%c0_1, %c0_2] : memref<128x128xbf16, #tpu.memory_space<vmem>>, vector<128x128xbf16>
    %cst = arith.constant dense<0.000000e+00> : vector<512x128xf32>
    %2 = tpu.matmul %0, %1, %cst {dimension_numbers = #tpu.dot_dimension_numbers<[1], [0], [0], [1], [0, 0, 1, 1], [], []>} : vector<512x128xbf16>, vector<128x128xbf16>, vector<512x128xf32> -> vector<512x128xf32>
    %cst_3 = arith.constant dense<0.000000e+00> : vector<128xf32>
    %3 = vector.multi_reduction <add>, %2, %cst_3 [0] : vector<512x128xf32> to vector<128xf32>
    %4 = vector.shape_cast %3 : vector<128xf32> to vector<1x128xf32>
    %c0_4 = arith.constant 0 : index
    %c0_5 = arith.constant 0 : index
    %c0_6 = arith.constant 0 : index
    %5 = vector.load %arg4[%c0_4, %c0_5, %c0_6] : memref<1x2x128xf32, #tpu.memory_space<vmem>>, vector<1x1x128xf32>
    %6 = vector.shape_cast %5 : vector<1x1x128xf32> to vector<1x128xf32>
    %7 = vector.shape_cast %4 : vector<1x128xf32> to vector<1x1x128xf32>
    tpu.vector_store %arg4[%c0_4, %c0_5, %c0_6], %7 {strides = array<i32>} : memref<1x2x128xf32, #tpu.memory_space<vmem>>, vector<1x1x128xf32>,
    %8 = arith.mulf %2, %2 : vector<512x128xf32>
    %cst_7 = arith.constant dense<0.000000e+00> : vector<128xf32>
    %9 = vector.multi_reduction <add>, %8, %cst_7 [0] : vector<512x128xf32> to vector<128xf32>
    %10 = vector.shape_cast %9 : vector<128xf32> to vector<1x128xf32>
    %c0_8 = arith.constant 0 : index
    %c1 = arith.constant 1 : index
    %c0_9 = arith.constant 0 : index
    %11 = vector.load %arg4[%c0_8, %c1, %c0_9] : memref<1x2x128xf32, #tpu.memory_space<vmem>>, vector<1x1x128xf32>
    %12 = vector.shape_cast %11 : vector<1x1x128xf32> to vector<1x128xf32>
    %13 = vector.shape_cast %10 : vector<1x128xf32> to vector<1x1x128xf32>
    tpu.vector_store %arg4[%c0_8, %c1, %c0_9], %13 {strides = array<i32>} : memref<1x2x128xf32, #tpu.memory_space<vmem>>, vector<1x1x128xf32>,
    %14 = arith.truncf %2 : vector<512x128xf32> to vector<512x128xbf16>
    %c0_10 = arith.constant 0 : index
    %c0_11 = arith.constant 0 : index
    %15 = vector.load %arg3[%c0_10, %c0_11] : memref<512x128xbf16, #tpu.memory_space<vmem>>, vector<512x128xbf16>
    tpu.vector_store %arg3[%c0_10, %c0_11], %14 {strides = array<i32>} : memref<512x128xbf16, #tpu.memory_space<vmem>>, vector<512x128xbf16>,
    return
  }
  func.func @transform_0(%arg0: i32) -> (i32, i32) {
    %c0_i32 = arith.constant 0 : i32
    %c0_i32_0 = arith.constant 0 : i32
    return %arg0, %c0_i32 : i32, i32
  }
  func.func @transform_1(%arg0: i32) -> (i32, i32) {
    %c0_i32 = arith.constant 0 : i32
    %c0_i32_0 = arith.constant 0 : i32
    %c0_i32_1 = arith.constant 0 : i32
    return %c0_i32, %c0_i32_0 : i32, i32
  }
  func.func @transform_2(%arg0: i32) -> (i32, i32) {
    %c0_i32 = arith.constant 0 : i32
    %c0_i32_0 = arith.constant 0 : i32
    return %arg0, %c0_i32 : i32, i32
  }
  func.func @transform_3(%arg0: i32) -> (i32, i32, i32) {
    %c0_i32 = arith.constant 0 : i32
    %c0_i32_0 = arith.constant 0 : i32
    %c0_i32_1 = arith.constant 0 : i32
    return %arg0, %c0_i32, %c0_i32_0 : i32, i32, i32
  }
}

module attributes {stable_mosaic.version = 11 : i64} {
  func.func @_bn_relu_conv1x1_stats_kernel(%arg0: i32, %arg1: memref<1x128xf32, #tpu.memory_space<vmem>>, %arg2: memref<1x128xf32, #tpu.memory_space<vmem>>, %arg3: memref<512x128xbf16, #tpu.memory_space<vmem>>, %arg4: memref<128x128xbf16, #tpu.memory_space<vmem>>, %arg5: memref<512x128xbf16, #tpu.memory_space<vmem>>, %arg6: memref<1x2x128xf32, #tpu.memory_space<vmem>>) attributes {dimension_semantics = [#tpu.dimension_semantics<parallel>], iteration_bounds = array<i64: 1>, scalar_prefetch = 0 : i64, scratch_operands = 0 : i64, tpu.core_type = #tpu.core_type<tc>, window_params = [{pipeline_mode = #tpu.pipeline_mode<synchronous>, transform_indices = @transform_0, window_bounds = array<i64: 1, 128>}, {pipeline_mode = #tpu.pipeline_mode<synchronous>, transform_indices = @transform_1, window_bounds = array<i64: 1, 128>}, {transform_indices = @transform_2, window_bounds = array<i64: 512, 128>}, {pipeline_mode = #tpu.pipeline_mode<synchronous>, transform_indices = @transform_3, window_bounds = array<i64: 128, 128>}, {transform_indices = @transform_4, window_bounds = array<i64: 512, 128>}, {transform_indices = @transform_5, window_bounds = array<i64: 1, 2, 128>}]} {
    %c0 = arith.constant 0 : index
    %c0_0 = arith.constant 0 : index
    %0 = vector.load %arg3[%c0, %c0_0] : memref<512x128xbf16, #tpu.memory_space<vmem>>, vector<512x128xbf16>
    %1 = arith.extf %0 : vector<512x128xbf16> to vector<512x128xf32>
    %c0_1 = arith.constant 0 : index
    %c0_2 = arith.constant 0 : index
    %2 = vector.load %arg1[%c0_1, %c0_2] : memref<1x128xf32, #tpu.memory_space<vmem>>, vector<1x128xf32>
    %3 = vector.broadcast %2 : vector<1x128xf32> to vector<512x128xf32>
    %4 = arith.mulf %1, %3 : vector<512x128xf32>
    %c0_3 = arith.constant 0 : index
    %c0_4 = arith.constant 0 : index
    %5 = vector.load %arg2[%c0_3, %c0_4] : memref<1x128xf32, #tpu.memory_space<vmem>>, vector<1x128xf32>
    %6 = vector.broadcast %5 : vector<1x128xf32> to vector<512x128xf32>
    %7 = arith.addf %4, %6 : vector<512x128xf32>
    %cst = arith.constant 0.000000e+00 : f32
    %8 = vector.broadcast %cst : f32 to vector<512x128xf32>
    %9 = arith.maximumf %7, %8 : vector<512x128xf32>
    %10 = arith.truncf %9 : vector<512x128xf32> to vector<512x128xbf16>
    %c0_5 = arith.constant 0 : index
    %c0_6 = arith.constant 0 : index
    %11 = vector.load %arg4[%c0_5, %c0_6] : memref<128x128xbf16, #tpu.memory_space<vmem>>, vector<128x128xbf16>
    %cst_7 = arith.constant dense<0.000000e+00> : vector<512x128xf32>
    %12 = tpu.matmul %10, %11, %cst_7 {dimension_numbers = #tpu.dot_dimension_numbers<[1], [0], [0], [1], [0, 0, 1, 1], [], []>} : vector<512x128xbf16>, vector<128x128xbf16>, vector<512x128xf32> -> vector<512x128xf32>
    %cst_8 = arith.constant dense<0.000000e+00> : vector<128xf32>
    %13 = vector.multi_reduction <add>, %12, %cst_8 [0] : vector<512x128xf32> to vector<128xf32>
    %14 = vector.shape_cast %13 : vector<128xf32> to vector<1x128xf32>
    %c0_9 = arith.constant 0 : index
    %c0_10 = arith.constant 0 : index
    %c0_11 = arith.constant 0 : index
    %15 = vector.load %arg6[%c0_9, %c0_10, %c0_11] : memref<1x2x128xf32, #tpu.memory_space<vmem>>, vector<1x1x128xf32>
    %16 = vector.shape_cast %15 : vector<1x1x128xf32> to vector<1x128xf32>
    %17 = vector.shape_cast %14 : vector<1x128xf32> to vector<1x1x128xf32>
    tpu.vector_store %arg6[%c0_9, %c0_10, %c0_11], %17 {strides = array<i32>} : memref<1x2x128xf32, #tpu.memory_space<vmem>>, vector<1x1x128xf32>,
    %18 = arith.mulf %12, %12 : vector<512x128xf32>
    %cst_12 = arith.constant dense<0.000000e+00> : vector<128xf32>
    %19 = vector.multi_reduction <add>, %18, %cst_12 [0] : vector<512x128xf32> to vector<128xf32>
    %20 = vector.shape_cast %19 : vector<128xf32> to vector<1x128xf32>
    %c0_13 = arith.constant 0 : index
    %c1 = arith.constant 1 : index
    %c0_14 = arith.constant 0 : index
    %21 = vector.load %arg6[%c0_13, %c1, %c0_14] : memref<1x2x128xf32, #tpu.memory_space<vmem>>, vector<1x1x128xf32>
    %22 = vector.shape_cast %21 : vector<1x1x128xf32> to vector<1x128xf32>
    %23 = vector.shape_cast %20 : vector<1x128xf32> to vector<1x1x128xf32>
    tpu.vector_store %arg6[%c0_13, %c1, %c0_14], %23 {strides = array<i32>} : memref<1x2x128xf32, #tpu.memory_space<vmem>>, vector<1x1x128xf32>,
    %24 = arith.truncf %12 : vector<512x128xf32> to vector<512x128xbf16>
    %c0_15 = arith.constant 0 : index
    %c0_16 = arith.constant 0 : index
    %25 = vector.load %arg5[%c0_15, %c0_16] : memref<512x128xbf16, #tpu.memory_space<vmem>>, vector<512x128xbf16>
    tpu.vector_store %arg5[%c0_15, %c0_16], %24 {strides = array<i32>} : memref<512x128xbf16, #tpu.memory_space<vmem>>, vector<512x128xbf16>,
    return
  }
  func.func @transform_0(%arg0: i32) -> (i32, i32) {
    %c0_i32 = arith.constant 0 : i32
    %c0_i32_0 = arith.constant 0 : i32
    %c0_i32_1 = arith.constant 0 : i32
    return %c0_i32, %c0_i32_0 : i32, i32
  }
  func.func @transform_1(%arg0: i32) -> (i32, i32) {
    %c0_i32 = arith.constant 0 : i32
    %c0_i32_0 = arith.constant 0 : i32
    %c0_i32_1 = arith.constant 0 : i32
    return %c0_i32, %c0_i32_0 : i32, i32
  }
  func.func @transform_2(%arg0: i32) -> (i32, i32) {
    %c0_i32 = arith.constant 0 : i32
    %c0_i32_0 = arith.constant 0 : i32
    return %arg0, %c0_i32 : i32, i32
  }
  func.func @transform_3(%arg0: i32) -> (i32, i32) {
    %c0_i32 = arith.constant 0 : i32
    %c0_i32_0 = arith.constant 0 : i32
    %c0_i32_1 = arith.constant 0 : i32
    return %c0_i32, %c0_i32_0 : i32, i32
  }
  func.func @transform_4(%arg0: i32) -> (i32, i32) {
    %c0_i32 = arith.constant 0 : i32
    %c0_i32_0 = arith.constant 0 : i32
    return %arg0, %c0_i32 : i32, i32
  }
  func.func @transform_5(%arg0: i32) -> (i32, i32, i32) {
    %c0_i32 = arith.constant 0 : i32
    %c0_i32_0 = arith.constant 0 : i32
    %c0_i32_1 = arith.constant 0 : i32
    return %arg0, %c0_i32, %c0_i32_0 : i32, i32, i32
  }
}

module attributes {stable_mosaic.version = 11 : i64} {
  func.func @_bn_relu_conv3x3_stats_kernel(%arg0: i32, %arg1: memref<1x128xf32, #tpu.memory_space<vmem>>, %arg2: memref<1x128xf32, #tpu.memory_space<vmem>>, %arg3: memref<1x16x16x128xbf16, #tpu.memory_space<vmem>>, %arg4: memref<1152x128xbf16, #tpu.memory_space<vmem>>, %arg5: memref<1x16x16x128xbf16, #tpu.memory_space<vmem>>, %arg6: memref<1x2x128xf32, #tpu.memory_space<vmem>>, %arg7: memref<18x32x128xbf16, #tpu.memory_space<vmem>>, %arg8: memref<256x1152xbf16, #tpu.memory_space<vmem>>) attributes {dimension_semantics = [#tpu.dimension_semantics<parallel>], iteration_bounds = array<i64: 2>, scalar_prefetch = 0 : i64, scratch_operands = 2 : i64, tpu.core_type = #tpu.core_type<tc>, window_params = [{pipeline_mode = #tpu.pipeline_mode<synchronous>, transform_indices = @transform_0, window_bounds = array<i64: 1, 128>}, {pipeline_mode = #tpu.pipeline_mode<synchronous>, transform_indices = @transform_1, window_bounds = array<i64: 1, 128>}, {transform_indices = @transform_2, window_bounds = array<i64: 1, 16, 16, 128>}, {pipeline_mode = #tpu.pipeline_mode<synchronous>, transform_indices = @transform_3, window_bounds = array<i64: 1152, 128>}, {transform_indices = @transform_4, window_bounds = array<i64: 1, 16, 16, 128>}, {transform_indices = @transform_5, window_bounds = array<i64: 1, 2, 128>}]} {
    %c0 = arith.constant 0 : index
    %c0_0 = arith.constant 0 : index
    %c0_1 = arith.constant 0 : index
    %c0_2 = arith.constant 0 : index
    %0 = vector.load %arg3[%c0, %c0_0, %c0_1, %c0_2] : memref<1x16x16x128xbf16, #tpu.memory_space<vmem>>, vector<1x16x16x128xbf16>
    %1 = vector.shape_cast %0 : vector<1x16x16x128xbf16> to vector<16x16x128xbf16>
    %2 = arith.extf %1 : vector<16x16x128xbf16> to vector<16x16x128xf32>
    %c0_3 = arith.constant 0 : index
    %c0_4 = arith.constant 0 : index
    %3 = vector.load %arg1[%c0_3, %c0_4] : memref<1x128xf32, #tpu.memory_space<vmem>>, vector<1x128xf32>
    %4 = vector.shape_cast %3 : vector<1x128xf32> to vector<1x1x128xf32>
    %5 = vector.broadcast %4 : vector<1x1x128xf32> to vector<16x16x128xf32>
    %6 = arith.mulf %2, %5 : vector<16x16x128xf32>
    %c0_5 = arith.constant 0 : index
    %c0_6 = arith.constant 0 : index
    %7 = vector.load %arg2[%c0_5, %c0_6] : memref<1x128xf32, #tpu.memory_space<vmem>>, vector<1x128xf32>
    %8 = vector.shape_cast %7 : vector<1x128xf32> to vector<1x1x128xf32>
    %9 = vector.broadcast %8 : vector<1x1x128xf32> to vector<16x16x128xf32>
    %10 = arith.addf %6, %9 : vector<16x16x128xf32>
    %cst = arith.constant 0.000000e+00 : f32
    %11 = vector.broadcast %cst : f32 to vector<16x16x128xf32>
    %12 = arith.maximumf %10, %11 : vector<16x16x128xf32>
    %13 = arith.truncf %12 : vector<16x16x128xf32> to vector<16x16x128xbf16>
    %cst_7 = arith.constant 0.000000e+00 : bf16
    %14 = vector.broadcast %cst_7 : bf16 to vector<1x18x128xbf16>
    %c0_8 = arith.constant 0 : index
    %c7 = arith.constant 7 : index
    %c0_9 = arith.constant 0 : index
    %15 = vector.load %arg7[%c0_8, %c7, %c0_9] : memref<18x32x128xbf16, #tpu.memory_space<vmem>>, vector<1x18x128xbf16>
    tpu.vector_store %arg7[%c0_8, %c7, %c0_9], %14 {strides = array<i32>} : memref<18x32x128xbf16, #tpu.memory_space<vmem>>, vector<1x18x128xbf16>,
    %cst_10 = arith.constant 0.000000e+00 : bf16
    %16 = vector.broadcast %cst_10 : bf16 to vector<1x18x128xbf16>
    %c17 = arith.constant 17 : index
    %c7_11 = arith.constant 7 : index
    %c0_12 = arith.constant 0 : index
    %17 = vector.load %arg7[%c17, %c7_11, %c0_12] : memref<18x32x128xbf16, #tpu.memory_space<vmem>>, vector<1x18x128xbf16>
    tpu.vector_store %arg7[%c17, %c7_11, %c0_12], %16 {strides = array<i32>} : memref<18x32x128xbf16, #tpu.memory_space<vmem>>, vector<1x18x128xbf16>,
    %cst_13 = arith.constant 0.000000e+00 : bf16
    %18 = vector.broadcast %cst_13 : bf16 to vector<16x1x128xbf16>
    %c1 = arith.constant 1 : index
    %c7_14 = arith.constant 7 : index
    %c0_15 = arith.constant 0 : index
    %19 = vector.load %arg7[%c1, %c7_14, %c0_15] : memref<18x32x128xbf16, #tpu.memory_space<vmem>>, vector<16x1x128xbf16>
    tpu.vector_store %arg7[%c1, %c7_14, %c0_15], %18 {strides = array<i32>} : memref<18x32x128xbf16, #tpu.memory_space<vmem>>, vector<16x1x128xbf16>,
    %cst_16 = arith.constant 0.000000e+00 : bf16
    %20 = vector.broadcast %cst_16 : bf16 to vector<16x1x128xbf16>
    %c1_17 = arith.constant 1 : index
    %c24 = arith.constant 24 : index
    %c0_18 = arith.constant 0 : index
    %21 = vector.load %arg7[%c1_17, %c24, %c0_18] : memref<18x32x128xbf16, #tpu.memory_space<vmem>>, vector<16x1x128xbf16>
    tpu.vector_store %arg7[%c1_17, %c24, %c0_18], %20 {strides = array<i32>} : memref<18x32x128xbf16, #tpu.memory_space<vmem>>, vector<16x1x128xbf16>,
    %c1_19 = arith.constant 1 : index
    %c8 = arith.constant 8 : index
    %c0_20 = arith.constant 0 : index
    %22 = vector.load %arg7[%c1_19, %c8, %c0_20] : memref<18x32x128xbf16, #tpu.memory_space<vmem>>, vector<16x16x128xbf16>
    tpu.vector_store %arg7[%c1_19, %c8, %c0_20], %13 {strides = array<i32>} : memref<18x32x128xbf16, #tpu.memory_space<vmem>>, vector<16x16x128xbf16>,
    %c0_21 = arith.constant 0 : index
    %c7_22 = arith.constant 7 : index
    %c0_23 = arith.constant 0 : index
    %23 = vector.load %arg7[%c0_21, %c7_22, %c0_23] : memref<18x32x128xbf16, #tpu.memory_space<vmem>>, vector<16x16x128xbf16>
    %24 = vector.shape_cast %23 : vector<16x16x128xbf16> to vector<256x128xbf16>
    %c0_24 = arith.constant 0 : index
    %c0_25 = arith.constant 0 : index
    %25 = vector.load %arg8[%c0_24, %c0_25] : memref<256x1152xbf16, #tpu.memory_space<vmem>>, vector<256x128xbf16>
    tpu.vector_store %arg8[%c0_24, %c0_25], %24 {strides = array<i32>} : memref<256x1152xbf16, #tpu.memory_space<vmem>>, vector<256x128xbf16>,
    %c0_26 = arith.constant 0 : index
    %c8_27 = arith.constant 8 : index
    %c0_28 = arith.constant 0 : index
    %26 = vector.load %arg7[%c0_26, %c8_27, %c0_28] : memref<18x32x128xbf16, #tpu.memory_space<vmem>>, vector<16x16x128xbf16>
    %27 = vector.shape_cast %26 : vector<16x16x128xbf16> to vector<256x128xbf16>
    %c0_29 = arith.constant 0 : index
    %c128 = arith.constant 128 : index
    %28 = vector.load %arg8[%c0_29, %c128] : memref<256x1152xbf16, #tpu.memory_space<vmem>>, vector<256x128xbf16>
    tpu.vector_store %arg8[%c0_29, %c128], %27 {strides = array<i32>} : memref<256x1152xbf16, #tpu.memory_space<vmem>>, vector<256x128xbf16>,
    %c0_30 = arith.constant 0 : index
    %c9 = arith.constant 9 : index
    %c0_31 = arith.constant 0 : index
    %29 = vector.load %arg7[%c0_30, %c9, %c0_31] : memref<18x32x128xbf16, #tpu.memory_space<vmem>>, vector<16x16x128xbf16>
    %30 = vector.shape_cast %29 : vector<16x16x128xbf16> to vector<256x128xbf16>
    %c0_32 = arith.constant 0 : index
    %c256 = arith.constant 256 : index
    %31 = vector.load %arg8[%c0_32, %c256] : memref<256x1152xbf16, #tpu.memory_space<vmem>>, vector<256x128xbf16>
    tpu.vector_store %arg8[%c0_32, %c256], %30 {strides = array<i32>} : memref<256x1152xbf16, #tpu.memory_space<vmem>>, vector<256x128xbf16>,
    %c1_33 = arith.constant 1 : index
    %c7_34 = arith.constant 7 : index
    %c0_35 = arith.constant 0 : index
    %32 = vector.load %arg7[%c1_33, %c7_34, %c0_35] : memref<18x32x128xbf16, #tpu.memory_space<vmem>>, vector<16x16x128xbf16>
    %33 = vector.shape_cast %32 : vector<16x16x128xbf16> to vector<256x128xbf16>
    %c0_36 = arith.constant 0 : index
    %c384 = arith.constant 384 : index
    %34 = vector.load %arg8[%c0_36, %c384] : memref<256x1152xbf16, #tpu.memory_space<vmem>>, vector<256x128xbf16>
    tpu.vector_store %arg8[%c0_36, %c384], %33 {strides = array<i32>} : memref<256x1152xbf16, #tpu.memory_space<vmem>>, vector<256x128xbf16>,
    %c1_37 = arith.constant 1 : index
    %c8_38 = arith.constant 8 : index
    %c0_39 = arith.constant 0 : index
    %35 = vector.load %arg7[%c1_37, %c8_38, %c0_39] : memref<18x32x128xbf16, #tpu.memory_space<vmem>>, vector<16x16x128xbf16>
    %36 = vector.shape_cast %35 : vector<16x16x128xbf16> to vector<256x128xbf16>
    %c0_40 = arith.constant 0 : index
    %c512 = arith.constant 512 : index
    %37 = vector.load %arg8[%c0_40, %c512] : memref<256x1152xbf16, #tpu.memory_space<vmem>>, vector<256x128xbf16>
    tpu.vector_store %arg8[%c0_40, %c512], %36 {strides = array<i32>} : memref<256x1152xbf16, #tpu.memory_space<vmem>>, vector<256x128xbf16>,
    %c1_41 = arith.constant 1 : index
    %c9_42 = arith.constant 9 : index
    %c0_43 = arith.constant 0 : index
    %38 = vector.load %arg7[%c1_41, %c9_42, %c0_43] : memref<18x32x128xbf16, #tpu.memory_space<vmem>>, vector<16x16x128xbf16>
    %39 = vector.shape_cast %38 : vector<16x16x128xbf16> to vector<256x128xbf16>
    %c0_44 = arith.constant 0 : index
    %c640 = arith.constant 640 : index
    %40 = vector.load %arg8[%c0_44, %c640] : memref<256x1152xbf16, #tpu.memory_space<vmem>>, vector<256x128xbf16>
    tpu.vector_store %arg8[%c0_44, %c640], %39 {strides = array<i32>} : memref<256x1152xbf16, #tpu.memory_space<vmem>>, vector<256x128xbf16>,
    %c2 = arith.constant 2 : index
    %c7_45 = arith.constant 7 : index
    %c0_46 = arith.constant 0 : index
    %41 = vector.load %arg7[%c2, %c7_45, %c0_46] : memref<18x32x128xbf16, #tpu.memory_space<vmem>>, vector<16x16x128xbf16>
    %42 = vector.shape_cast %41 : vector<16x16x128xbf16> to vector<256x128xbf16>
    %c0_47 = arith.constant 0 : index
    %c768 = arith.constant 768 : index
    %43 = vector.load %arg8[%c0_47, %c768] : memref<256x1152xbf16, #tpu.memory_space<vmem>>, vector<256x128xbf16>
    tpu.vector_store %arg8[%c0_47, %c768], %42 {strides = array<i32>} : memref<256x1152xbf16, #tpu.memory_space<vmem>>, vector<256x128xbf16>,
    %c2_48 = arith.constant 2 : index
    %c8_49 = arith.constant 8 : index
    %c0_50 = arith.constant 0 : index
    %44 = vector.load %arg7[%c2_48, %c8_49, %c0_50] : memref<18x32x128xbf16, #tpu.memory_space<vmem>>, vector<16x16x128xbf16>
    %45 = vector.shape_cast %44 : vector<16x16x128xbf16> to vector<256x128xbf16>
    %c0_51 = arith.constant 0 : index
    %c896 = arith.constant 896 : index
    %46 = vector.load %arg8[%c0_51, %c896] : memref<256x1152xbf16, #tpu.memory_space<vmem>>, vector<256x128xbf16>
    tpu.vector_store %arg8[%c0_51, %c896], %45 {strides = array<i32>} : memref<256x1152xbf16, #tpu.memory_space<vmem>>, vector<256x128xbf16>,
    %c2_52 = arith.constant 2 : index
    %c9_53 = arith.constant 9 : index
    %c0_54 = arith.constant 0 : index
    %47 = vector.load %arg7[%c2_52, %c9_53, %c0_54] : memref<18x32x128xbf16, #tpu.memory_space<vmem>>, vector<16x16x128xbf16>
    %48 = vector.shape_cast %47 : vector<16x16x128xbf16> to vector<256x128xbf16>
    %c0_55 = arith.constant 0 : index
    %c1024 = arith.constant 1024 : index
    %49 = vector.load %arg8[%c0_55, %c1024] : memref<256x1152xbf16, #tpu.memory_space<vmem>>, vector<256x128xbf16>
    tpu.vector_store %arg8[%c0_55, %c1024], %48 {strides = array<i32>} : memref<256x1152xbf16, #tpu.memory_space<vmem>>, vector<256x128xbf16>,
    %c0_56 = arith.constant 0 : index
    %c0_57 = arith.constant 0 : index
    %50 = vector.load %arg8[%c0_56, %c0_57] : memref<256x1152xbf16, #tpu.memory_space<vmem>>, vector<256x1152xbf16>
    %c0_58 = arith.constant 0 : index
    %c0_59 = arith.constant 0 : index
    %51 = vector.load %arg4[%c0_58, %c0_59] : memref<1152x128xbf16, #tpu.memory_space<vmem>>, vector<1152x128xbf16>
    %cst_60 = arith.constant dense<0.000000e+00> : vector<256x128xf32>
    %52 = tpu.matmul %50, %51, %cst_60 {dimension_numbers = #tpu.dot_dimension_numbers<[1], [0], [0], [1], [0, 0, 1, 1], [], []>} : vector<256x1152xbf16>, vector<1152x128xbf16>, vector<256x128xf32> -> vector<256x128xf32>
    %cst_61 = arith.constant dense<0.000000e+00> : vector<128xf32>
    %53 = vector.multi_reduction <add>, %52, %cst_61 [0] : vector<256x128xf32> to vector<128xf32>
    %54 = vector.shape_cast %53 : vector<128xf32> to vector<1x128xf32>
    %c0_62 = arith.constant 0 : index
    %c0_63 = arith.constant 0 : index
    %c0_64 = arith.constant 0 : index
    %55 = vector.load %arg6[%c0_62, %c0_63, %c0_64] : memref<1x2x128xf32, #tpu.memory_space<vmem>>, vector<1x1x128xf32>
    %56 = vector.shape_cast %55 : vector<1x1x128xf32> to vector<1x128xf32>
    %57 = vector.shape_cast %54 : vector<1x128xf32> to vector<1x1x128xf32>
    tpu.vector_store %arg6[%c0_62, %c0_63, %c0_64], %57 {strides = array<i32>} : memref<1x2x128xf32, #tpu.memory_space<vmem>>, vector<1x1x128xf32>,
    %58 = arith.mulf %52, %52 : vector<256x128xf32>
    %cst_65 = arith.constant dense<0.000000e+00> : vector<128xf32>
    %59 = vector.multi_reduction <add>, %58, %cst_65 [0] : vector<256x128xf32> to vector<128xf32>
    %60 = vector.shape_cast %59 : vector<128xf32> to vector<1x128xf32>
    %c0_66 = arith.constant 0 : index
    %c1_67 = arith.constant 1 : index
    %c0_68 = arith.constant 0 : index
    %61 = vector.load %arg6[%c0_66, %c1_67, %c0_68] : memref<1x2x128xf32, #tpu.memory_space<vmem>>, vector<1x1x128xf32>
    %62 = vector.shape_cast %61 : vector<1x1x128xf32> to vector<1x128xf32>
    %63 = vector.shape_cast %60 : vector<1x128xf32> to vector<1x1x128xf32>
    tpu.vector_store %arg6[%c0_66, %c1_67, %c0_68], %63 {strides = array<i32>} : memref<1x2x128xf32, #tpu.memory_space<vmem>>, vector<1x1x128xf32>,
    %64 = vector.shape_cast %52 : vector<256x128xf32> to vector<16x16x128xf32>
    %65 = arith.truncf %64 : vector<16x16x128xf32> to vector<16x16x128xbf16>
    %c0_69 = arith.constant 0 : index
    %c0_70 = arith.constant 0 : index
    %c0_71 = arith.constant 0 : index
    %c0_72 = arith.constant 0 : index
    %66 = vector.load %arg5[%c0_69, %c0_70, %c0_71, %c0_72] : memref<1x16x16x128xbf16, #tpu.memory_space<vmem>>, vector<1x16x16x128xbf16>
    %67 = vector.shape_cast %66 : vector<1x16x16x128xbf16> to vector<16x16x128xbf16>
    %68 = vector.shape_cast %65 : vector<16x16x128xbf16> to vector<1x16x16x128xbf16>
    tpu.vector_store %arg5[%c0_69, %c0_70, %c0_71, %c0_72], %68 {strides = array<i32>} : memref<1x16x16x128xbf16, #tpu.memory_space<vmem>>, vector<1x16x16x128xbf16>,
    return
  }
  func.func @transform_0(%arg0: i32) -> (i32, i32) {
    %c0_i32 = arith.constant 0 : i32
    %c0_i32_0 = arith.constant 0 : i32
    %c0_i32_1 = arith.constant 0 : i32
    return %c0_i32, %c0_i32_0 : i32, i32
  }
  func.func @transform_1(%arg0: i32) -> (i32, i32) {
    %c0_i32 = arith.constant 0 : i32
    %c0_i32_0 = arith.constant 0 : i32
    %c0_i32_1 = arith.constant 0 : i32
    return %c0_i32, %c0_i32_0 : i32, i32
  }
  func.func @transform_2(%arg0: i32) -> (i32, i32, i32, i32) {
    %c0_i32 = arith.constant 0 : i32
    %c0_i32_0 = arith.constant 0 : i32
    %c0_i32_1 = arith.constant 0 : i32
    %c0_i32_2 = arith.constant 0 : i32
    return %arg0, %c0_i32, %c0_i32_0, %c0_i32_1 : i32, i32, i32, i32
  }
  func.func @transform_3(%arg0: i32) -> (i32, i32) {
    %c0_i32 = arith.constant 0 : i32
    %c0_i32_0 = arith.constant 0 : i32
    %c0_i32_1 = arith.constant 0 : i32
    return %c0_i32, %c0_i32_0 : i32, i32
  }
  func.func @transform_4(%arg0: i32) -> (i32, i32, i32, i32) {
    %c0_i32 = arith.constant 0 : i32
    %c0_i32_0 = arith.constant 0 : i32
    %c0_i32_1 = arith.constant 0 : i32
    %c0_i32_2 = arith.constant 0 : i32
    return %arg0, %c0_i32, %c0_i32_0, %c0_i32_1 : i32, i32, i32, i32
  }
  func.func @transform_5(%arg0: i32) -> (i32, i32, i32) {
    %c0_i32 = arith.constant 0 : i32
    %c0_i32_0 = arith.constant 0 : i32
    %c0_i32_1 = arith.constant 0 : i32
    return %arg0, %c0_i32, %c0_i32_0 : i32, i32, i32
  }
}

module attributes {stable_mosaic.version = 11 : i64} {
  func.func @_bn_add_relu_kernel(%arg0: i32, %arg1: memref<1x128xf32, #tpu.memory_space<vmem>>, %arg2: memref<1x128xf32, #tpu.memory_space<vmem>>, %arg3: memref<512x128xbf16, #tpu.memory_space<vmem>>, %arg4: memref<512x128xbf16, #tpu.memory_space<vmem>>, %arg5: memref<512x128xf32, #tpu.memory_space<vmem>>) attributes {dimension_semantics = [#tpu.dimension_semantics<parallel>], iteration_bounds = array<i64: 1>, scalar_prefetch = 0 : i64, scratch_operands = 0 : i64, tpu.core_type = #tpu.core_type<tc>, window_params = [{pipeline_mode = #tpu.pipeline_mode<synchronous>, transform_indices = @transform_0, window_bounds = array<i64: 1, 128>}, {pipeline_mode = #tpu.pipeline_mode<synchronous>, transform_indices = @transform_1, window_bounds = array<i64: 1, 128>}, {transform_indices = @transform_2, window_bounds = array<i64: 512, 128>}, {transform_indices = @transform_3, window_bounds = array<i64: 512, 128>}, {transform_indices = @transform_4, window_bounds = array<i64: 512, 128>}]} {
    %c0 = arith.constant 0 : index
    %c0_0 = arith.constant 0 : index
    %0 = vector.load %arg3[%c0, %c0_0] : memref<512x128xbf16, #tpu.memory_space<vmem>>, vector<512x128xbf16>
    %1 = arith.extf %0 : vector<512x128xbf16> to vector<512x128xf32>
    %c0_1 = arith.constant 0 : index
    %c0_2 = arith.constant 0 : index
    %2 = vector.load %arg1[%c0_1, %c0_2] : memref<1x128xf32, #tpu.memory_space<vmem>>, vector<1x128xf32>
    %3 = vector.broadcast %2 : vector<1x128xf32> to vector<512x128xf32>
    %4 = arith.mulf %1, %3 : vector<512x128xf32>
    %c0_3 = arith.constant 0 : index
    %c0_4 = arith.constant 0 : index
    %5 = vector.load %arg2[%c0_3, %c0_4] : memref<1x128xf32, #tpu.memory_space<vmem>>, vector<1x128xf32>
    %6 = vector.broadcast %5 : vector<1x128xf32> to vector<512x128xf32>
    %7 = arith.addf %4, %6 : vector<512x128xf32>
    %c0_5 = arith.constant 0 : index
    %c0_6 = arith.constant 0 : index
    %8 = vector.load %arg4[%c0_5, %c0_6] : memref<512x128xbf16, #tpu.memory_space<vmem>>, vector<512x128xbf16>
    %9 = arith.extf %8 : vector<512x128xbf16> to vector<512x128xf32>
    %10 = arith.addf %7, %9 : vector<512x128xf32>
    %cst = arith.constant 0.000000e+00 : f32
    %11 = vector.broadcast %cst : f32 to vector<512x128xf32>
    %12 = arith.maximumf %10, %11 : vector<512x128xf32>
    %c0_7 = arith.constant 0 : index
    %c0_8 = arith.constant 0 : index
    %13 = vector.load %arg5[%c0_7, %c0_8] : memref<512x128xf32, #tpu.memory_space<vmem>>, vector<512x128xf32>
    tpu.vector_store %arg5[%c0_7, %c0_8], %12 {strides = array<i32>} : memref<512x128xf32, #tpu.memory_space<vmem>>, vector<512x128xf32>,
    return
  }
  func.func @transform_0(%arg0: i32) -> (i32, i32) {
    %c0_i32 = arith.constant 0 : i32
    %c0_i32_0 = arith.constant 0 : i32
    %c0_i32_1 = arith.constant 0 : i32
    return %c0_i32, %c0_i32_0 : i32, i32
  }
  func.func @transform_1(%arg0: i32) -> (i32, i32) {
    %c0_i32 = arith.constant 0 : i32
    %c0_i32_0 = arith.constant 0 : i32
    %c0_i32_1 = arith.constant 0 : i32
    return %c0_i32, %c0_i32_0 : i32, i32
  }
  func.func @transform_2(%arg0: i32) -> (i32, i32) {
    %c0_i32 = arith.constant 0 : i32
    %c0_i32_0 = arith.constant 0 : i32
    return %arg0, %c0_i32 : i32, i32
  }
  func.func @transform_3(%arg0: i32) -> (i32, i32) {
    %c0_i32 = arith.constant 0 : i32
    %c0_i32_0 = arith.constant 0 : i32
    return %arg0, %c0_i32 : i32, i32
  }
  func.func @transform_4(%arg0: i32) -> (i32, i32) {
    %c0_i32 = arith.constant 0 : i32
    %c0_i32_0 = arith.constant 0 : i32
    return %arg0, %c0_i32 : i32, i32
  }
}

</mosaic_0001>

<bundles_post_ra>
// kernel: bottleneck_forward.6
= control target key start
LH: loop header
LB: loop body
LE: loop exit
PB: predicated region body
PF: predicated region fallthrough
CT: control target
= control target key end

     0   :  { %s2046_s3 = inlined_call_operand.vmem [shape: bf16[128,128], index: 3, kind: input, shape index: {}]   ;;  %s2047_s0 = inlined_call_operand.vmem [shape: f32[1,128], index: 0, kind: input, shape index: {}]   ;;  %s2048_s1 = inlined_call_operand.vmem [shape: f32[1,128], index: 1, kind: input, shape index: {}]   ;;  %s2049_s2 = inlined_call_operand.vmem [shape: bf16[512,128], index: 2, kind: input, shape index: {}]   ;;  %s2050_s4 = inlined_call_operand.vmem [shape: bf16[512,128], index: 4, kind: output, shape index: {0}]   ;;  %s2051_s5 = inlined_call_operand.vmem [shape: f32[1,2,128], index: 5, kind: output, shape index: {1}]  }
   0x1   :  { %v991_v0 = vld [vmem:[%s2046_s3 + $0x38] sm:$0xff]  ;;  %v990_v1 = vld [vmem:[%s2046_s3 + $0x30] sm:$0xff]  ;;  %v989_v2 = vld [vmem:[%s2046_s3 + $0x28] sm:$0xff] }
   0x2   :  { %443 = vmatpush.bf16.msra.mxu0 %v991_v0  ;;  %1342 = vmatpush.bf16.msra.mxu1 %v991_v0  ;;  %v988_v3 = vld [vmem:[%s2046_s3 + $0x20] sm:$0xff]  ;;  %v987_v8 = vld [vmem:[%s2046_s3 + $0x18] sm:$0xff]  ;;  %v986_v17 = vld [vmem:[%s2046_s3 + $0x10] sm:$0xff] }
   0x3   :  { %1343 = vmatpush.bf16.msra.mxu2 %v991_v0  ;;  %1344 = vmatpush.bf16.msra.mxu3 %v991_v0  ;;  %v993_v4 = vld [vmem:[%s2049_s2] sm:$0xff]   ;;  %v985_v22 = vld [vmem:[%s2046_s3 + $0x8] sm:$0xff]  ;;  %v1281_v47 = vld [vmem:[%s2049_s2 + $0x10] sm:$0xff]  }
   0x4   :  { %v994_v5 = vunpack.c.l.bf16 %v993_v4  ;;  %v995_v6 = vunpack.c.h.bf16 %v993_v4  ;;  %v1416_v7 = vld [vmem:[%s2047_s0] ss:$0 sm:$0xff]  ;;  %v1280_v25 = vld [vmem:[%s2049_s2 + $0x8] sm:$0xff]   ;;  %v1002_v54 = vunpack.c.l.bf16 %v1281_v47  ;;  %v1003_v55 = vunpack.c.h.bf16 %v1281_v47  ;;  %v1289_v60 = vld [vmem:[%s2049_s2 + $0x50] sm:$0xff]  }
   0x5   :  { %v1287_v9 = vld [vmem:[%s2049_s2 + $0x40] sm:$0xff]   ;;  %v998_v29 = vunpack.c.l.bf16 %v1280_v25  ;;  %v999_v30 = vunpack.c.h.bf16 %v1280_v25  ;;  %v1288_v33 = vld [vmem:[%s2049_s2 + $0x48] sm:$0xff]   ;;  %v1034_v63 = vunpack.c.l.bf16 %v1289_v60  ;;  %v1035_v0 = vunpack.c.h.bf16 %v1289_v60 }
   0x6   :  { %444 = vmatpush.bf16.msra.mxu0 %v990_v1  ;;  %1345 = vmatpush.bf16.msra.mxu1 %v990_v1  ;;  %v1026_v10 = vunpack.c.l.bf16 %v1287_v9  ;;  %v1027_v11 = vunpack.c.h.bf16 %v1287_v9  ;;  %v151_v12 = vmul.f32 %v1416_v7, %v994_v5  ;;  %v152_v13 = vmul.f32 %v1416_v7, %v995_v6  ;;  %v1429_v14 = vld [vmem:[%s2048_s1] ss:$0 sm:$0xff] }
   0x7   :  { %1346 = vmatpush.bf16.msra.mxu2 %v990_v1  ;;  %1347 = vmatpush.bf16.msra.mxu3 %v990_v1  ;;  %v984_v28 = vld [vmem:[%s2046_s3] sm:$0xff]  ;;  %v1030_v34 = vunpack.c.l.bf16 %v1288_v33  ;;  %v1031_v35 = vunpack.c.h.bf16 %v1288_v33  ;;  %v153_v36 = vmul.f32 %v1416_v7, %v998_v29  ;;  %v154_v37 = vmul.f32 %v1416_v7, %v999_v30 }
   0x8   :  { %v167_v15 = vmul.f32 %v1416_v7, %v1026_v10  ;;  %v168_v16 = vmul.f32 %v1416_v7, %v1027_v11  ;;  %v219_v18 = vadd.f32 %v1429_v14, %v151_v12  ;;  %v220_v19 = vadd.f32 %v1429_v14, %v152_v13  ;;  %v1295_v46 = vld [vmem:[%s2049_s2 + $0x80] sm:$0xff]   ;;  %v1296_v13 = vld [vmem:[%s2049_s2 + $0x88] sm:$0xff]  }
   0x9   :  { %v169_v38 = vmul.f32 %v1416_v7, %v1030_v34  ;;  %v170_v39 = vmul.f32 %v1416_v7, %v1031_v35  ;;  %v221_v40 = vadd.f32 %v1429_v14, %v153_v36  ;;  %v222_v41 = vadd.f32 %v1429_v14, %v154_v37  ;;  %v1303_v47 = vld [vmem:[%s2049_s2 + $0xc0] sm:$0xff]  }
   0xa   :  { %445 = vmatpush.bf16.msra.mxu0 %v989_v2  ;;  %1348 = vmatpush.bf16.msra.mxu1 %v989_v2  ;;  %v235_v20 = vadd.f32 %v1429_v14, %v167_v15  ;;  %v236_v21 = vadd.f32 %v1429_v14, %v168_v16  ;;  %v283_v23 = vmax.f32 %v219_v18, 0.0  ;;  %v284_v24 = vmax.f32 %v220_v19, 0.0  ;;  %v1282_v15 = vld [vmem:[%s2049_s2 + $0x18] sm:$0xff]  }
   0xb   :  { %1349 = vmatpush.bf16.msra.mxu2 %v989_v2  ;;  %1350 = vmatpush.bf16.msra.mxu3 %v989_v2  ;;  %v237_v42 = vadd.f32 %v1429_v14, %v169_v38  ;;  %v238_v43 = vadd.f32 %v1429_v14, %v170_v39  ;;  %v285_v44 = vmax.f32 %v221_v40, 0.0  ;;  %v286_v45 = vmax.f32 %v222_v41, 0.0 }
   0xc   :  { %v299_v26 = vmax.f32 %v235_v20, 0.0  ;;  %v300_v27 = vmax.f32 %v236_v21, 0.0  ;;  %v347_v31 = vpack.c.bf16 %v284_v24, %v283_v23  ;;  %v1058_v50 = vunpack.c.l.bf16 %v1295_v46 }
   0xd   :  { %v301_v48 = vmax.f32 %v237_v42, 0.0  ;;  %v302_v49 = vmax.f32 %v238_v43, 0.0  ;;  %v1059_v51 = vunpack.c.h.bf16 %v1295_v46  ;;  %v348_v56 = vpack.c.bf16 %v286_v45, %v285_v44  ;;  %v1297_v46 = vld [vmem:[%s2049_s2 + $0x90] sm:$0xff]  }
   0xe   :  { %446 = vmatpush.bf16.msra.mxu0 %v988_v3  ;;  %1351 = vmatpush.bf16.msra.mxu1 %v988_v3  ;;  %v355_v32 = vpack.c.bf16 %v300_v27, %v299_v26  ;;  %v183_v52 = vmul.f32 %v1416_v7, %v1058_v50  ;;  %v155_v1 = vmul.f32 %v1416_v7, %v1002_v54  ;;  %v1062_v18 = vunpack.c.l.bf16 %v1296_v13 }
   0xf   :  { %1352 = vmatpush.bf16.msra.mxu2 %v988_v3  ;;  %1353 = vmatpush.bf16.msra.mxu3 %v988_v3  ;;  %v184_v53 = vmul.f32 %v1416_v7, %v1059_v51  ;;  %v356_v57 = vpack.c.bf16 %v302_v49, %v301_v48  ;;  %v156_v2 = vmul.f32 %v1416_v7, %v1003_v55  ;;  %v1063_v19 = vunpack.c.h.bf16 %v1296_v13  ;;  %v1283_v48 = vld [vmem:[%s2049_s2 + $0x20] sm:$0xff]  }
  0x10   :  { %v251_v58 = vadd.f32 %v1429_v14, %v183_v52  ;;  %v171_v4 = vmul.f32 %v1416_v7, %v1034_v63  ;;  %v172_v5 = vmul.f32 %v1416_v7, %v1035_v0  ;;  %v223_v6 = vadd.f32 %v1429_v14, %v155_v1  ;;  %v1291_v1 = vld [vmem:[%s2049_s2 + $0x60] sm:$0xff]  }
  0x11   :  { %v252_v59 = vadd.f32 %v1429_v14, %v184_v53  ;;  %v185_v20 = vmul.f32 %v1416_v7, %v1062_v18  ;;  %v186_v21 = vmul.f32 %v1416_v7, %v1063_v19  ;;  %v1007_v23 = vunpack.c.h.bf16 %v1282_v15 }
  0x12   :  { %447 = vmatpush.bf16.msra.mxu0 %v987_v8  ;;  %1354 = vmatpush.bf16.msra.mxu1 %v987_v8  ;;  %v315_v61 = vmax.f32 %v251_v58, 0.0  ;;  %v239_v9 = vadd.f32 %v1429_v14, %v171_v4  ;;  %v240_v10 = vadd.f32 %v1429_v14, %v172_v5  ;;  %v287_v11 = vmax.f32 %v223_v6, 0.0 }
  0x13   :  { %1355 = vmatpush.bf16.msra.mxu2 %v987_v8  ;;  %1356 = vmatpush.bf16.msra.mxu3 %v987_v8  ;;  %v316_v62 = vmax.f32 %v252_v59, 0.0  ;;  %v224_v8 = vadd.f32 %v1429_v14, %v156_v2  ;;  %v253_v26 = vadd.f32 %v1429_v14, %v185_v20  ;;  %v254_v27 = vadd.f32 %v1429_v14, %v186_v21 }
  0x14   :  { %v303_v16 = vmax.f32 %v239_v9, 0.0  ;;  %v158_v34 = vmul.f32 %v1416_v7, %v1007_v23  ;;  %v1066_v49 = vunpack.c.l.bf16 %v1297_v46  ;;  %v1067_v50 = vunpack.c.h.bf16 %v1297_v46 }
  0x15   :  { %v363_v3 = vpack.c.bf16 %v316_v62, %v315_v61  ;;  %v288_v12 = vmax.f32 %v224_v8, 0.0  ;;  %v317_v29 = vmax.f32 %v253_v26, 0.0  ;;  %v318_v30 = vmax.f32 %v254_v27, 0.0  ;;  %v1284_v26 = vld [vmem:[%s2049_s2 + $0x28] sm:$0xff]  }
  0x16   :  { %448 = vmatpush.bf16.msra.mxu0 %v986_v17  ;;  %1357 = vmatpush.bf16.msra.mxu1 %v986_v17  ;;  %v226_v39 = vadd.f32 %v1429_v14, %v158_v34  ;;  %v1090_v51 = vunpack.c.l.bf16 %v1303_v47  ;;  %v1091_v52 = vunpack.c.h.bf16 %v1303_v47  ;;  %v187_v53 = vmul.f32 %v1416_v7, %v1066_v49 }
  0x17   :  { %1358 = vmatpush.bf16.msra.mxu2 %v986_v17  ;;  %1359 = vmatpush.bf16.msra.mxu3 %v986_v17  ;;  %v304_v17 = vmax.f32 %v240_v10, 0.0  ;;  %v349_v24 = vpack.c.bf16 %v288_v12, %v287_v11  ;;  %v364_v35 = vpack.c.bf16 %v318_v30, %v317_v29  ;;  %v188_v54 = vmul.f32 %v1416_v7, %v1067_v50 }
  0x18   :  { %v290_v43 = vmax.f32 %v226_v39, 0.0  ;;  %v199_v55 = vmul.f32 %v1416_v7, %v1090_v51  ;;  %v1010_v58 = vunpack.c.l.bf16 %v1283_v48  ;;  %v1011_v59 = vunpack.c.h.bf16 %v1283_v48 }
  0x19   :  { %v357_v25 = vpack.c.bf16 %v304_v17, %v303_v16  ;;  %v255_v61 = vadd.f32 %v1429_v14, %v187_v53  ;;  %v256_v62 = vadd.f32 %v1429_v14, %v188_v54  ;;  %v1042_v9 = vunpack.c.l.bf16 %v1291_v1 }
  0x1a   :  { %449 = vmatpush.bf16.msra.mxu0 %v985_v22  ;;  %1360 = vmatpush.bf16.msra.mxu1 %v985_v22  ;;  %v267_v63 = vadd.f32 %v1429_v14, %v199_v55  ;;  %v159_v6 = vmul.f32 %v1416_v7, %v1010_v58  ;;  %v160_v8 = vmul.f32 %v1416_v7, %v1011_v59  ;;  %v1043_v10 = vunpack.c.h.bf16 %v1291_v1  ;;  %v1305_v1 = vld [vmem:[%s2049_s2 + $0xd0] sm:$0xff]  }
  0x1b   :  { %1361 = vmatpush.bf16.msra.mxu2 %v985_v22  ;;  %1362 = vmatpush.bf16.msra.mxu3 %v985_v22  ;;  %v1006_v22 = vunpack.c.l.bf16 %v1282_v15  ;;  %v319_v2 = vmax.f32 %v255_v61, 0.0  ;;  %v175_v13 = vmul.f32 %v1416_v7, %v1042_v9 }
  0x1c   :  { %v331_v4 = vmax.f32 %v267_v63, 0.0  ;;  %v176_v15 = vmul.f32 %v1416_v7, %v1043_v10  ;;  %v227_v16 = vadd.f32 %v1429_v14, %v159_v6  ;;  %v228_v17 = vadd.f32 %v1429_v14, %v160_v8 }
  0x1d   :  { %v157_v33 = vmul.f32 %v1416_v7, %v1006_v22  ;;  %v243_v18 = vadd.f32 %v1429_v14, %v175_v13  ;;  %v1099_v6 = vunpack.c.h.bf16 %v1305_v1 }
  0x1e   :  { %450 = vmatpush.bf16.msra.mxu0 %v984_v28  ;;  %1363 = vmatpush.bf16.msra.mxu1 %v984_v28  ;;  %v244_v19 = vadd.f32 %v1429_v14, %v176_v15  ;;  %v291_v20 = vmax.f32 %v227_v16, 0.0  ;;  %v292_v21 = vmax.f32 %v228_v17, 0.0 }
  0x1f   :  { %1364 = vmatpush.bf16.msra.mxu2 %v984_v28  ;;  %1365 = vmatpush.bf16.msra.mxu3 %v984_v28  ;;  %v1290_v28 = vld [vmem:[%s2049_s2 + $0x58] sm:$0xff]   ;;  %v225_v38 = vadd.f32 %v1429_v14, %v157_v33  ;;  %v307_v22 = vmax.f32 %v243_v18, 0.0 }
  0x20   :  { %v308_v23 = vmax.f32 %v244_v19, 0.0 }
  0x21   :  { %451 = vmatmul.bf16.vlgmr.msra.gmra.mxu0 %v347_v31  ;;  %491 = vmatmul.bf16.vlgmr.msra.gmra.mxu1 %v355_v32  ;;  %v1038_v31 = vunpack.c.l.bf16 %v1290_v28  ;;  %v1039_v32 = vunpack.c.h.bf16 %v1290_v28  ;;  %v289_v42 = vmax.f32 %v225_v38, 0.0 }
  0x22   :  { %531 = vmatmul.bf16.vlgmr.msra.gmra.mxu2 %v363_v3  ;;  %v320_v3 = vmax.f32 %v256_v62, 0.0  ;;  %v359_v38 = vpack.c.bf16 %v308_v23, %v307_v22 }
  0x23   :  { %v173_v36 = vmul.f32 %v1416_v7, %v1038_v31  ;;  %v174_v37 = vmul.f32 %v1416_v7, %v1039_v32 }
  0x24   :  { %v365_v11 = vpack.c.bf16 %v320_v3, %v319_v2  ;;  %v1285_v2 = vld [vmem:[%s2049_s2 + $0x30] sm:$0xff]  }
  0x25   :  { %v241_v40 = vadd.f32 %v1429_v14, %v173_v36  ;;  %v242_v41 = vadd.f32 %v1429_v14, %v174_v37  ;;  %v1014_v36 = vunpack.c.l.bf16 %v1284_v26  ;;  %v1015_v37 = vunpack.c.h.bf16 %v1284_v26 }
  0x26   :  { %v1018_v13 = vunpack.c.l.bf16 %v1285_v2  ;;  %v1019_v15 = vunpack.c.h.bf16 %v1285_v2 }
  0x27   :  { %v305_v44 = vmax.f32 %v241_v40, 0.0  ;;  %v306_v45 = vmax.f32 %v242_v41, 0.0  ;;  %v161_v48 = vmul.f32 %v1416_v7, %v1014_v36  ;;  %v162_v49 = vmul.f32 %v1416_v7, %v1015_v37 }
  0x28   :  { %v163_v26 = vmul.f32 %v1416_v7, %v1018_v13 }
  0x29   :  { %v358_v60 = vpack.c.bf16 %v306_v45, %v305_v44 }
  0x31   :  { %456 = vmatmul.bf16.gmra.mxu0 %v348_v56  ;;  %496 = vmatmul.bf16.gmra.mxu1 %v356_v57  ;;  %v200_v56 = vmul.f32 %v1416_v7, %v1091_v52  ;;  %v350_v57 = vpack.c.bf16 %v290_v43, %v289_v42  ;;  %v1292_v43 = vld [vmem:[%s2049_s2 + $0x68] sm:$0xff]  }
  0x32   :  { %536 = vmatmul.bf16.gmra.mxu2 %v364_v35  ;;  %v351_v35 = vpack.c.bf16 %v292_v21, %v291_v20  ;;  %v1046_v50 = vunpack.c.l.bf16 %v1292_v43  ;;  %v1047_v51 = vunpack.c.h.bf16 %v1292_v43  ;;  %v1293_v21 = vld [vmem:[%s2049_s2 + $0x70] sm:$0xff]   ;;  %v1306_v43 = vld [vmem:[%s2049_s2 + $0xd8] sm:$0xff]  }
  0x33   :  { %v268_v0 = vadd.f32 %v1429_v14, %v200_v56  ;;  %v229_v56 = vadd.f32 %v1429_v14, %v161_v48  ;;  %v1103_v48 = vunpack.c.h.bf16 %v1306_v43 }
  0x34   :  { %v177_v54 = vmul.f32 %v1416_v7, %v1046_v50  ;;  %v178_v55 = vmul.f32 %v1416_v7, %v1047_v51 }
  0x35   :  { %v332_v5 = vmax.f32 %v268_v0, 0.0  ;;  %v1299_v0 = vld [vmem:[%s2049_s2 + $0xa0] sm:$0xff]  }
  0x36   :  { %v245_v58 = vadd.f32 %v1429_v14, %v177_v54  ;;  %v246_v59 = vadd.f32 %v1429_v14, %v178_v55  ;;  %v1074_v3 = vunpack.c.l.bf16 %v1299_v0 }
  0x37   :  { %v371_v12 = vpack.c.bf16 %v332_v5, %v331_v4  ;;  %v1075_v4 = vunpack.c.h.bf16 %v1299_v0  ;;  %v1098_v5 = vunpack.c.l.bf16 %v1305_v1 }
  0x38   :  { %v309_v62 = vmax.f32 %v245_v58, 0.0  ;;  %v310_v63 = vmax.f32 %v246_v59, 0.0  ;;  %v191_v8 = vmul.f32 %v1416_v7, %v1074_v3 }
  0x39   :  { %571 = vmatmul.bf16.vlgmr.msra.gmra.mxu3 %v371_v12  ;;  %v192_v9 = vmul.f32 %v1416_v7, %v1075_v4  ;;  %v203_v10 = vmul.f32 %v1416_v7, %v1098_v5 }
  0x3a   :  { %v360_v16 = vpack.c.bf16 %v310_v63, %v309_v62  ;;  %v259_v17 = vadd.f32 %v1429_v14, %v191_v8 }
  0x3b   :  { %v260_v18 = vadd.f32 %v1429_v14, %v192_v9  ;;  %v271_v19 = vadd.f32 %v1429_v14, %v203_v10 }
  0x3c   :  { %v323_v22 = vmax.f32 %v259_v17, 0.0 }
  0x3d   :  { %v324_v23 = vmax.f32 %v260_v18, 0.0 }
  0x41   :  { %461 = vmatmul.bf16.gmra.mxu0 %v349_v24  ;;  %501 = vmatmul.bf16.gmra.mxu1 %v357_v25  ;;  %v1298_v24 = vld [vmem:[%s2049_s2 + $0x98] sm:$0xff]   ;;  %v1304_v25 = vld [vmem:[%s2049_s2 + $0xc8] sm:$0xff]  }
  0x42   :  { %541 = vmatmul.bf16.gmra.mxu2 %v365_v11  ;;  %v1070_v27 = vunpack.c.l.bf16 %v1298_v24  ;;  %v1071_v28 = vunpack.c.h.bf16 %v1298_v24  ;;  %v1094_v29 = vunpack.c.l.bf16 %v1304_v25  ;;  %v1095_v30 = vunpack.c.h.bf16 %v1304_v25 }
  0x43   :  { %v204_v11 = vmul.f32 %v1416_v7, %v1099_v6  ;;  %v335_v24 = vmax.f32 %v271_v19, 0.0 }
  0x44   :  { %v189_v31 = vmul.f32 %v1416_v7, %v1070_v27  ;;  %v190_v32 = vmul.f32 %v1416_v7, %v1071_v28  ;;  %v201_v33 = vmul.f32 %v1416_v7, %v1094_v29  ;;  %v202_v34 = vmul.f32 %v1416_v7, %v1095_v30 }
  0x45   :  { %v272_v20 = vadd.f32 %v1429_v14, %v204_v11  ;;  %v164_v27 = vmul.f32 %v1416_v7, %v1019_v15  ;;  %v1050_v28 = vunpack.c.l.bf16 %v1293_v21  ;;  %v1051_v29 = vunpack.c.h.bf16 %v1293_v21  ;;  %v1307_v21 = vld [vmem:[%s2049_s2 + $0xe0] sm:$0xff]  }
  0x46   :  { %v257_v39 = vadd.f32 %v1429_v14, %v189_v31  ;;  %v258_v40 = vadd.f32 %v1429_v14, %v190_v32  ;;  %v269_v41 = vadd.f32 %v1429_v14, %v201_v33  ;;  %v270_v42 = vadd.f32 %v1429_v14, %v202_v34 }
  0x47   :  { %v336_v25 = vmax.f32 %v272_v20, 0.0  ;;  %v367_v30 = vpack.c.bf16 %v324_v23, %v323_v22  ;;  %v179_v32 = vmul.f32 %v1416_v7, %v1050_v28  ;;  %v180_v33 = vmul.f32 %v1416_v7, %v1051_v29  ;;  %v1301_v20 = vld [vmem:[%s2049_s2 + $0xb0] sm:$0xff]  }
  0x48   :  { %v321_v44 = vmax.f32 %v257_v39, 0.0  ;;  %v322_v45 = vmax.f32 %v258_v40, 0.0  ;;  %v333_v46 = vmax.f32 %v269_v41, 0.0  ;;  %v334_v47 = vmax.f32 %v270_v42, 0.0  ;;  %v1300_v42 = vld [vmem:[%s2049_s2 + $0xa8] sm:$0xff]  }
  0x49   :  { %v373_v31 = vpack.c.bf16 %v336_v25, %v335_v24  ;;  %v231_v34 = vadd.f32 %v1429_v14, %v163_v26  ;;  %v247_v36 = vadd.f32 %v1429_v14, %v179_v32  ;;  %v248_v37 = vadd.f32 %v1429_v14, %v180_v33 }
  0x4a   :  { %v366_v52 = vpack.c.bf16 %v322_v45, %v321_v44  ;;  %v372_v53 = vpack.c.bf16 %v334_v47, %v333_v46  ;;  %v1286_v44 = vld [vmem:[%s2049_s2 + $0x38] sm:$0xff]   ;;  %v1078_v45 = vunpack.c.l.bf16 %v1300_v42  ;;  %v1079_v46 = vunpack.c.h.bf16 %v1300_v42 }
  0x4b   :  { %v311_v40 = vmax.f32 %v247_v36, 0.0  ;;  %v312_v41 = vmax.f32 %v248_v37, 0.0  ;;  %v1102_v47 = vunpack.c.l.bf16 %v1306_v43  ;;  %v1022_v54 = vunpack.c.l.bf16 %v1286_v44  ;;  %v1302_v42 = vld [vmem:[%s2049_s2 + $0xb8] sm:$0xff]   ;;  %v1308_v43 = vld [vmem:[%s2049_s2 + $0xe8] sm:$0xff]  }
  0x4c   :  { %576 = vmatmul.bf16.gmra.mxu3 %v372_v53  ;;  %v194_v50 = vmul.f32 %v1416_v7, %v1079_v46  ;;  %v1023_v55 = vunpack.c.h.bf16 %v1286_v44  ;;  %v1082_v22 = vunpack.c.l.bf16 %v1301_v20  ;;  %v1083_v23 = vunpack.c.h.bf16 %v1301_v20 }
  0x4d   :  { %v205_v51 = vmul.f32 %v1416_v7, %v1102_v47  ;;  %v165_v2 = vmul.f32 %v1416_v7, %v1022_v54  ;;  %v1106_v24 = vunpack.c.l.bf16 %v1307_v21  ;;  %v1107_v25 = vunpack.c.h.bf16 %v1307_v21 }
  0x4e   :  { %v262_v58 = vadd.f32 %v1429_v14, %v194_v50  ;;  %v166_v3 = vmul.f32 %v1416_v7, %v1023_v55  ;;  %v195_v26 = vmul.f32 %v1416_v7, %v1082_v22  ;;  %v1086_v44 = vunpack.c.l.bf16 %v1302_v42 }
  0x4f   :  { %v273_v59 = vadd.f32 %v1429_v14, %v205_v51  ;;  %v233_v11 = vadd.f32 %v1429_v14, %v165_v2  ;;  %v207_v28 = vmul.f32 %v1416_v7, %v1106_v24  ;;  %v208_v29 = vmul.f32 %v1416_v7, %v1107_v25 }
  0x50   :  { %v326_v63 = vmax.f32 %v262_v58, 0.0  ;;  %v263_v32 = vadd.f32 %v1429_v14, %v195_v26  ;;  %v1110_v46 = vunpack.c.l.bf16 %v1308_v43  ;;  %v1111_v47 = vunpack.c.h.bf16 %v1308_v43 }
  0x51   :  { %466 = vmatmul.bf16.gmra.mxu0 %v350_v57  ;;  %506 = vmatmul.bf16.gmra.mxu1 %v358_v60  ;;  %v230_v57 = vadd.f32 %v1429_v14, %v162_v49  ;;  %v293_v60 = vmax.f32 %v229_v56, 0.0  ;;  %v193_v49 = vmul.f32 %v1416_v7, %v1078_v45  ;;  %v361_v56 = vpack.c.bf16 %v312_v41, %v311_v40 }
  0x52   :  { %546 = vmatmul.bf16.gmra.mxu2 %v366_v52  ;;  %v206_v52 = vmul.f32 %v1416_v7, %v1103_v48  ;;  %v337_v0 = vmax.f32 %v273_v59, 0.0  ;;  %v327_v36 = vmax.f32 %v263_v32, 0.0  ;;  %v1087_v45 = vunpack.c.h.bf16 %v1302_v42  ;;  %v1310_v32 = vld [vmem:[%s2049_s2 + $0xf8] sm:$0xff]  }
  0x53   :  { %v294_v61 = vmax.f32 %v230_v57, 0.0  ;;  %v261_v57 = vadd.f32 %v1429_v14, %v193_v49  ;;  %v197_v48 = vmul.f32 %v1416_v7, %v1086_v44  ;;  %v209_v50 = vmul.f32 %v1416_v7, %v1110_v46 }
  0x54   :  { %v198_v49 = vmul.f32 %v1416_v7, %v1087_v45  ;;  %v210_v51 = vmul.f32 %v1416_v7, %v1111_v47 }
  0x55   :  { %v352_v12 = vpack.c.bf16 %v294_v61, %v293_v60  ;;  %v274_v60 = vadd.f32 %v1429_v14, %v206_v52  ;;  %v1294_v61 = vld [vmem:[%s2049_s2 + $0x78] sm:$0xff]   ;;  %v325_v62 = vmax.f32 %v261_v57, 0.0  ;;  %v265_v52 = vadd.f32 %v1429_v14, %v197_v48 }
  0x56   :  { %v1054_v4 = vunpack.c.l.bf16 %v1294_v61  ;;  %v1055_v5 = vunpack.c.h.bf16 %v1294_v61  ;;  %v277_v54 = vadd.f32 %v1429_v14, %v209_v50  ;;  %v278_v55 = vadd.f32 %v1429_v14, %v210_v51 }
  0x57   :  { %v338_v1 = vmax.f32 %v274_v60, 0.0  ;;  %v368_v6 = vpack.c.bf16 %v326_v63, %v325_v62  ;;  %v329_v58 = vmax.f32 %v265_v52, 0.0 }
  0x58   :  { %v181_v9 = vmul.f32 %v1416_v7, %v1054_v4  ;;  %v182_v10 = vmul.f32 %v1416_v7, %v1055_v5  ;;  %v341_v60 = vmax.f32 %v277_v54, 0.0  ;;  %v342_v61 = vmax.f32 %v278_v55, 0.0 }
  0x59   :  { %v374_v8 = vpack.c.bf16 %v338_v1, %v337_v0 }
  0x5a   :  { %v249_v13 = vadd.f32 %v1429_v14, %v181_v9  ;;  %v250_v15 = vadd.f32 %v1429_v14, %v182_v10  ;;  %v376_v63 = vpack.c.bf16 %v342_v61, %v341_v60 }
  0x5c   :  { %581 = vmatmul.bf16.gmra.mxu3 %v373_v31  ;;  %v313_v18 = vmax.f32 %v249_v13, 0.0  ;;  %v314_v19 = vmax.f32 %v250_v15, 0.0 }
  0x5e   :  { %v362_v31 = vpack.c.bf16 %v314_v19, %v313_v18 }
  0x61   :  { %471 = vmatmul.bf16.gmra.mxu0 %v351_v35  ;;  %511 = vmatmul.bf16.gmra.mxu1 %v359_v38  ;;  %v232_v35 = vadd.f32 %v1429_v14, %v164_v27  ;;  %v295_v38 = vmax.f32 %v231_v34, 0.0  ;;  %v196_v27 = vmul.f32 %v1416_v7, %v1083_v23  ;;  %v275_v34 = vadd.f32 %v1429_v14, %v207_v28 }
  0x62   :  { %551 = vmatmul.bf16.gmra.mxu2 %v367_v30 }
  0x63   :  { %v296_v39 = vmax.f32 %v232_v35, 0.0  ;;  %v264_v33 = vadd.f32 %v1429_v14, %v196_v27  ;;  %v276_v35 = vadd.f32 %v1429_v14, %v208_v29 }
  0x65   :  { %v353_v53 = vpack.c.bf16 %v296_v39, %v295_v38  ;;  %v328_v37 = vmax.f32 %v264_v33, 0.0  ;;  %v339_v38 = vmax.f32 %v275_v34, 0.0  ;;  %v340_v39 = vmax.f32 %v276_v35, 0.0 }
  0x66   :  { %v1118_v34 = vunpack.c.l.bf16 %v1310_v32  ;;  %v1119_v35 = vunpack.c.h.bf16 %v1310_v32 }
  0x67   :  { %v369_v40 = vpack.c.bf16 %v328_v37, %v327_v36  ;;  %v375_v41 = vpack.c.bf16 %v340_v39, %v339_v38 }
  0x68   :  { %v213_v36 = vmul.f32 %v1416_v7, %v1118_v34  ;;  %v214_v37 = vmul.f32 %v1416_v7, %v1119_v35 }
  0x6a   :  { %v281_v38 = vadd.f32 %v1429_v14, %v213_v36  ;;  %v282_v39 = vadd.f32 %v1429_v14, %v214_v37 }
  0x6c   :  { %586 = vmatmul.bf16.gmra.mxu3 %v374_v8  ;;  %v1309_v8 = vld [vmem:[%s2049_s2 + $0xf0] sm:$0xff]   ;;  %v345_v45 = vmax.f32 %v281_v38, 0.0  ;;  %v346_v47 = vmax.f32 %v282_v39, 0.0 }
  0x6d   :  { %v1114_v10 = vunpack.c.l.bf16 %v1309_v8 }
  0x71   :  { %476 = vmatmul.bf16.gmra.mxu0 %v352_v12  ;;  %516 = vmatmul.bf16.gmra.mxu1 %v360_v16  ;;  %v234_v12 = vadd.f32 %v1429_v14, %v166_v3  ;;  %v297_v16 = vmax.f32 %v233_v11, 0.0  ;;  %v1115_v11 = vunpack.c.h.bf16 %v1309_v8 }
  0x72   :  { %556 = vmatmul.bf16.gmra.mxu2 %v368_v6 }
  0x73   :  { %v298_v17 = vmax.f32 %v234_v12, 0.0  ;;  %v211_v12 = vmul.f32 %v1416_v7, %v1114_v10  ;;  %v212_v13 = vmul.f32 %v1416_v7, %v1115_v11  ;;  %v378_v7 = vpack.c.bf16 %v346_v47, %v345_v45 }
  0x75   :  { %v354_v30 = vpack.c.bf16 %v298_v17, %v297_v16  ;;  %v279_v15 = vadd.f32 %v1429_v14, %v211_v12  ;;  %v280_v16 = vadd.f32 %v1429_v14, %v212_v13 }
  0x77   :  { %v343_v21 = vmax.f32 %v279_v15, 0.0  ;;  %v344_v22 = vmax.f32 %v280_v16, 0.0 }
  0x79   :  { %v377_v24 = vpack.c.bf16 %v344_v22, %v343_v21 }
  0x7c   :  { %591 = vmatmul.bf16.gmra.mxu3 %v375_v41 }
  0x81   :  { %481 = vmatmul.bf16.gmra.mxu0 %v353_v53  ;;  %521 = vmatmul.bf16.gmra.mxu1 %v361_v56  ;;  %v266_v53 = vadd.f32 %v1429_v14, %v198_v49 }
  0x82   :  { %561 = vmatmul.bf16.gmra.mxu2 %v369_v40 }
  0x83   :  { %v330_v59 = vmax.f32 %v266_v53, 0.0 }
  0x85   :  { %v370_v62 = vpack.c.bf16 %v330_v59, %v329_v58 }
  0x8c   :  { %596 = vmatmul.bf16.gmra.mxu3 %v376_v63 }
  0x91   :  { %486 = vmatmul.bf16.gmra.mxu0 %v354_v30  ;;  %526 = vmatmul.bf16.gmra.mxu1 %v362_v31 }
  0x92   :  { %566 = vmatmul.bf16.gmra.mxu2 %v370_v62 }
  0x9c   :  { %601 = vmatmul.bf16.gmra.mxu3 %v377_v24 }
  0x9e   :  { %v452_v56 = vpop.f32.mrf.mxu0  ;;  %v1642_v57 = vpop.f32.mrf.mxu1 }
  0x9f   :  { %v682_v2 = vmul.f32 %v452_v56, %v452_v56 }
  0xa5   :  { %v1665_v30 = vpop.f32.mrf.mxu2 }
  0xa6   :  { %v454_v0 = vpop.f32.mrf.mxu0  ;;  %v1644_v1 = vpop.f32.mrf.mxu1 }
  0xa7   :  { %v612_v3 = vadd.f32 %v454_v0, %v452_v56  ;;  %v683_v4 = vmul.f32 %v454_v0, %v454_v0  ;;  %v1123_v5 = vpack.c.bf16 %v454_v0, %v452_v56  ;;  %v1163_v6 = vpack.c.bf16 %v1644_v1, %v1642_v57 }
  0xa9   :  { %v746_v9 = vadd.f32 %v683_v4, %v682_v2  ;;  %1124 = vst [vmem:[%s2050_s4] sm:$0xff] %v1123_v5  }
  0xaa   :  { %1318 = vst [vmem:[%s2050_s4 + $0x40] sm:$0xff] %v1163_v6  }
  0xac   :  { %606 = vmatmul.bf16.gmra.mxu3 %v378_v7 }
  0xad   :  { %v1686_v44 = vpop.f32.mrf.mxu2 }
  0xae   :  { %v457_v17 = vpop.f32.mrf.mxu0  ;;  %v1661_v18 = vpop.f32.mrf.mxu1  ;;  %v1203_v46 = vpack.c.bf16 %v1686_v44, %v1665_v30 }
  0xaf   :  { %v613_v19 = vadd.f32 %v612_v3, %v457_v17  ;;  %v684_v20 = vmul.f32 %v457_v17, %v457_v17 }
  0xb0   :  { %1326 = vst [vmem:[%s2050_s4 + $0x80] sm:$0xff] %v1203_v46  }
  0xb1   :  { %v747_v23 = vadd.f32 %v746_v9, %v684_v20 }
  0xb5   :  { %v1697_v51 = vpop.f32.mrf.mxu2 }
  0xb6   :  { %v459_v25 = vpop.f32.mrf.mxu0  ;;  %v1663_v26 = vpop.f32.mrf.mxu1 }
  0xb7   :  { %v614_v27 = vadd.f32 %v613_v19, %v459_v25  ;;  %v685_v28 = vmul.f32 %v459_v25, %v459_v25  ;;  %v1128_v29 = vpack.c.bf16 %v459_v25, %v457_v17  ;;  %v1168_v31 = vpack.c.bf16 %v1663_v26, %v1661_v18 }
  0xb9   :  { %v748_v33 = vadd.f32 %v747_v23, %v685_v28  ;;  %1311 = vst [vmem:[%s2050_s4 + $0x8] sm:$0xff] %v1128_v29  }
  0xba   :  { %1319 = vst [vmem:[%s2050_s4 + $0x48] sm:$0xff] %v1168_v31  }
  0xbc   :  { %v1720_v62 = vpop.f32.mrf.mxu3 }
  0xbd   :  { %v1709_v55 = vpop.f32.mrf.mxu2 }
  0xbe   :  { %v462_v40 = vpop.f32.mrf.mxu0  ;;  %v1682_v41 = vpop.f32.mrf.mxu1  ;;  %v1208_v56 = vpack.c.bf16 %v1709_v55, %v1697_v51 }
  0xbf   :  { %v1684_v42 = vadd.f32 %v614_v27, %v462_v40  ;;  %v686_v43 = vmul.f32 %v462_v40, %v462_v40 }
  0xc0   :  { %1327 = vst [vmem:[%s2050_s4 + $0x88] sm:$0xff] %v1208_v56  }
  0xc1   :  { %v1690_v48 = vadd.f32 %v748_v33, %v686_v43 }
  0xc4   :  { %v1734_v4 = vpop.f32.mrf.mxu3 }
  0xc5   :  { %v1718_v61 = vpop.f32.mrf.mxu2  ;;  %v1243_v6 = vpack.c.bf16 %v1734_v4, %v1720_v62 }
  0xc6   :  { %v464_v14 = vpop.f32.mrf.mxu0  ;;  %v1695_v49 = vpop.f32.mrf.mxu1 }
  0xc7   :  { %v1133_v50 = vpack.c.bf16 %v464_v14, %v462_v40  ;;  %v1173_v52 = vpack.c.bf16 %v1695_v49, %v1682_v41  ;;  %1334 = vst [vmem:[%s2050_s4 + $0xc0] sm:$0xff] %v1243_v6   ;;  %v687_v35 = vmul.f32 %v464_v14, %v464_v14  ;;  %v616_v37 = vadd.f32 %v1684_v42, %v464_v14 }
  0xc9   :  { %1312 = vst [vmem:[%s2050_s4 + $0x10] sm:$0xff] %v1133_v50   ;;  %v750_v39 = vadd.f32 %v1690_v48, %v687_v35 }
  0xca   :  { %1320 = vst [vmem:[%s2050_s4 + $0x50] sm:$0xff] %v1173_v52  }
  0xcd   :  { %v1732_v3 = vpop.f32.mrf.mxu2 }
  0xce   :  { %v467_v53 = vpop.f32.mrf.mxu0  ;;  %v1707_v54 = vpop.f32.mrf.mxu1  ;;  %v1213_v5 = vpack.c.bf16 %v1732_v3, %v1718_v61 }
  0xcf   :  { %v1750_v12 = vpop.f32.mrf.mxu3  ;;  %v688_v38 = vmul.f32 %v467_v53, %v467_v53  ;;  %v617_v40 = vadd.f32 %v616_v37, %v467_v53 }
  0xd0   :  { %1328 = vst [vmem:[%s2050_s4 + $0x90] sm:$0xff] %v1213_v5  }
  0xd1   :  { %v751_v47 = vadd.f32 %v750_v39, %v688_v38 }
  0xd5   :  { %v1748_v11 = vpop.f32.mrf.mxu2 }
  0xd6   :  { %v469_v58 = vpop.f32.mrf.mxu0  ;;  %v1716_v59 = vpop.f32.mrf.mxu1 }
  0xd7   :  { %v1138_v60 = vpack.c.bf16 %v469_v58, %v467_v53  ;;  %v1178_v63 = vpack.c.bf16 %v1716_v59, %v1707_v54  ;;  %v1764_v19 = vpop.f32.mrf.mxu3  ;;  %v689_v43 = vmul.f32 %v469_v58, %v469_v58  ;;  %v618_v7 = vadd.f32 %v617_v40, %v469_v58 }
  0xd8   :  { %v1248_v21 = vpack.c.bf16 %v1764_v19, %v1750_v12 }
  0xd9   :  { %1313 = vst [vmem:[%s2050_s4 + $0x18] sm:$0xff] %v1138_v60   ;;  %v752_v14 = vadd.f32 %v751_v47, %v689_v43 }
  0xda   :  { %1321 = vst [vmem:[%s2050_s4 + $0x58] sm:$0xff] %v1178_v63  }
  0xdb   :  { %1335 = vst [vmem:[%s2050_s4 + $0xc8] sm:$0xff] %v1248_v21  }
  0xdd   :  { %v1762_v17 = vpop.f32.mrf.mxu2 }
  0xde   :  { %v472_v0 = vpop.f32.mrf.mxu0  ;;  %v1730_v2 = vpop.f32.mrf.mxu1  ;;  %v1218_v20 = vpack.c.bf16 %v1762_v17, %v1748_v11 }
  0xdf   :  { %v1780_v27 = vpop.f32.mrf.mxu3  ;;  %v690_v50 = vmul.f32 %v472_v0, %v472_v0  ;;  %v619_v63 = vadd.f32 %v618_v7, %v472_v0 }
  0xe0   :  { %1329 = vst [vmem:[%s2050_s4 + $0x98] sm:$0xff] %v1218_v20  }
  0xe1   :  { %v753_v48 = vadd.f32 %v752_v14, %v690_v50 }
  0xe5   :  { %v1778_v25 = vpop.f32.mrf.mxu2 }
  0xe6   :  { %v474_v8 = vpop.f32.mrf.mxu0  ;;  %v1746_v9 = vpop.f32.mrf.mxu1 }
  0xe7   :  { %v1143_v10 = vpack.c.bf16 %v474_v8, %v472_v0  ;;  %v1183_v13 = vpack.c.bf16 %v1746_v9, %v1730_v2  ;;  %v1794_v33 = vpop.f32.mrf.mxu3  ;;  %v691_v5 = vmul.f32 %v474_v8, %v474_v8  ;;  %v620_v53 = vadd.f32 %v619_v63, %v474_v8 }
  0xe8   :  { %v1253_v36 = vpack.c.bf16 %v1794_v33, %v1780_v27 }
  0xe9   :  { %1314 = vst [vmem:[%s2050_s4 + $0x20] sm:$0xff] %v1143_v10   ;;  %v754_v6 = vadd.f32 %v753_v48, %v691_v5  ;;  %v698_v48 = vmul.f32 %v1642_v57, %v1642_v57 }
  0xea   :  { %1322 = vst [vmem:[%s2050_s4 + $0x60] sm:$0xff] %v1183_v13  }
  0xeb   :  { %1336 = vst [vmem:[%s2050_s4 + $0xd0] sm:$0xff] %v1253_v36  }
  0xed   :  { %v1792_v32 = vpop.f32.mrf.mxu2 }
  0xee   :  { %v477_v15 = vpop.f32.mrf.mxu0  ;;  %v1760_v16 = vpop.f32.mrf.mxu1  ;;  %v1223_v34 = vpack.c.bf16 %v1792_v32, %v1778_v25 }
  0xef   :  { %v1812_v60 = vpop.f32.mrf.mxu3  ;;  %v692_v58 = vmul.f32 %v477_v15, %v477_v15  ;;  %v621_v10 = vadd.f32 %v620_v53, %v477_v15 }
  0xf0   :  { %1330 = vst [vmem:[%s2050_s4 + $0xa0] sm:$0xff] %v1223_v34  }
  0xf5   :  { %v1810_v56 = vpop.f32.mrf.mxu2 }
  0xf6   :  { %v479_v22 = vpop.f32.mrf.mxu0  ;;  %v1776_v23 = vpop.f32.mrf.mxu1 }
  0xf7   :  { %v1148_v24 = vpack.c.bf16 %v479_v22, %v477_v15  ;;  %v1188_v28 = vpack.c.bf16 %v1776_v23, %v1760_v16  ;;  %v693_v13 = vmul.f32 %v479_v22, %v479_v22  ;;  %v622_v0 = vadd.f32 %v621_v10, %v479_v22  ;;  %v1826_v35 = vpop.f32.mrf.mxu3 }
  0xf8   :  { %v1258_v15 = vpack.c.bf16 %v1826_v35, %v1812_v60 }
  0xf9   :  { %1315 = vst [vmem:[%s2050_s4 + $0x28] sm:$0xff] %v1148_v24   ;;  %v755_v24 = vadd.f32 %v754_v6, %v692_v58  ;;  %v699_v6 = vmul.f32 %v1644_v1, %v1644_v1 }
  0xfa   :  { %1323 = vst [vmem:[%s2050_s4 + $0x68] sm:$0xff] %v1188_v28  }
  0xfb   :  { %v756_v37 = vadd.f32 %v755_v24, %v693_v13  ;;  %1337 = vst [vmem:[%s2050_s4 + $0xd8] sm:$0xff] %v1258_v15  }
  0xfd   :  { %v1824_v34 = vpop.f32.mrf.mxu2 }
  0xfe   :  { %v482_v29 = vpop.f32.mrf.mxu0  ;;  %v1790_v31 = vpop.f32.mrf.mxu1  ;;  %v1228_v36 = vpack.c.bf16 %v1824_v34, %v1810_v56 }
  0xff   :  { %v694_v28 = vmul.f32 %v482_v29, %v482_v29  ;;  %v623_v38 = vadd.f32 %v622_v0, %v482_v29  ;;  %v1842_v5 = vpop.f32.mrf.mxu3  ;;  %v701_v0 = vmul.f32 %v1663_v26, %v1663_v26 }
 0x100   :  { %1331 = vst [vmem:[%s2050_s4 + $0xa8] sm:$0xff] %v1228_v36  }
 0x101   :  { %v757_v39 = vadd.f32 %v756_v37, %v694_v28 }
 0x105   :  { %v1840_v63 = vpop.f32.mrf.mxu2 }
 0x106   :  { %v484_v45 = vpop.f32.mrf.mxu0  ;;  %v1808_v46 = vpop.f32.mrf.mxu1 }
 0x107   :  { %v1153_v52 = vpack.c.bf16 %v484_v45, %v482_v29  ;;  %v1193_v42 = vpack.c.bf16 %v1808_v46, %v1790_v31  ;;  %v695_v8 = vmul.f32 %v484_v45, %v484_v45  ;;  %v624_v22 = vadd.f32 %v623_v38, %v484_v45  ;;  %v1866_v38 = vpop.f32.mrf.mxu3 }
 0x109   :  { %1316 = vst [vmem:[%s2050_s4 + $0x30] sm:$0xff] %v1153_v52   ;;  %v758_v43 = vadd.f32 %v757_v39, %v695_v8  ;;  %v1263_v8 = vpack.c.bf16 %v1866_v38, %v1842_v5 }
 0x10a   :  { %1324 = vst [vmem:[%s2050_s4 + $0x70] sm:$0xff] %v1193_v42  }
 0x10b   :  { %1338 = vst [vmem:[%s2050_s4 + $0xe0] sm:$0xff] %v1263_v8   ;;  %v711_v8 = vmul.f32 %v1808_v46, %v1808_v46 }
 0x10d   :  { %v1864_v37 = vpop.f32.mrf.mxu2 }
 0x10e   :  { %v487_v20 = vpop.f32.mrf.mxu0  ;;  %v1822_v21 = vpop.f32.mrf.mxu1 }
 0x10f   :  { %v696_v40 = vmul.f32 %v487_v20, %v487_v20  ;;  %v625_v47 = vadd.f32 %v624_v22, %v487_v20 }
 0x111   :  { %v759_v29 = vadd.f32 %v758_v43, %v696_v40  ;;  %v704_v43 = vmul.f32 %v1707_v54, %v1707_v54 }
 0x116   :  { %v489_v7 = vpop.f32.mrf.mxu0  ;;  %v1838_v50 = vpop.f32.mrf.mxu1 }
 0x117   :  { %v626_v52 = vadd.f32 %v625_v47, %v489_v7  ;;  %v697_v42 = vmul.f32 %v489_v7, %v489_v7  ;;  %v1158_v14 = vpack.c.bf16 %v489_v7, %v487_v20  ;;  %v1198_v45 = vpack.c.bf16 %v1838_v50, %v1822_v21 }
 0x118   :  { %v700_v20 = vmul.f32 %v1661_v18, %v1661_v18  ;;  %v705_v7 = vmul.f32 %v1716_v59, %v1716_v59 }
 0x119   :  { %v627_v53 = vadd.f32 %v626_v52, %v1642_v57  ;;  %v760_v58 = vadd.f32 %v759_v29, %v697_v42  ;;  %1317 = vst [vmem:[%s2050_s4 + $0x38] sm:$0xff] %v1158_v14   ;;  %v1890_v42 = vpop.f32.mrf.mxu2  ;;  %v706_v14 = vmul.f32 %v1730_v2, %v1730_v2 }
 0x11a   :  { %1325 = vst [vmem:[%s2050_s4 + $0x78] sm:$0xff] %v1198_v45  }
 0x11b   :  { %v628_v10 = vadd.f32 %v627_v53, %v1644_v1  ;;  %v761_v13 = vadd.f32 %v760_v58, %v698_v48  ;;  %v1233_v1 = vpack.c.bf16 %v1864_v37, %v1840_v63  ;;  %v707_v53 = vmul.f32 %v1746_v9, %v1746_v9 }
 0x11d   :  { %v629_v57 = vadd.f32 %v628_v10, %v1661_v18  ;;  %v762_v24 = vadd.f32 %v761_v13, %v699_v6  ;;  %v702_v18 = vmul.f32 %v1682_v41, %v1682_v41  ;;  %1332 = vst [vmem:[%s2050_s4 + $0xb0] sm:$0xff] %v1233_v1   ;;  %v709_v13 = vmul.f32 %v1776_v23, %v1776_v23 }
 0x11f   :  { %v630_v28 = vadd.f32 %v629_v57, %v1663_v26  ;;  %v763_v36 = vadd.f32 %v762_v24, %v700_v20  ;;  %v703_v26 = vmul.f32 %v1695_v49, %v1695_v49 }
 0x121   :  { %v631_v15 = vadd.f32 %v630_v28, %v1682_v41  ;;  %v764_v39 = vadd.f32 %v763_v36, %v701_v0 }
 0x123   :  { %v632_v22 = vadd.f32 %v631_v15, %v1695_v49  ;;  %v765_v40 = vadd.f32 %v764_v39, %v702_v18  ;;  %v1892_v49 = vpop.f32.mrf.mxu3 }
 0x125   :  { %v766_v47 = vadd.f32 %v765_v40, %v703_v26  ;;  %v633_v41 = vadd.f32 %v632_v22, %v1707_v54  ;;  %v713_v22 = vmul.f32 %v1838_v50, %v1838_v50 }
 0x127   :  { %v634_v29 = vadd.f32 %v633_v41, %v1716_v59  ;;  %v767_v52 = vadd.f32 %v766_v47, %v704_v43  ;;  %v708_v59 = vmul.f32 %v1760_v16, %v1760_v16  ;;  %v715_v41 = vmul.f32 %v1686_v44, %v1686_v44 }
 0x129   :  { %v635_v45 = vadd.f32 %v634_v29, %v1730_v2  ;;  %v768_v48 = vadd.f32 %v767_v52, %v705_v7  ;;  %v1906_v2 = vpop.f32.mrf.mxu2  ;;  %v716_v29 = vmul.f32 %v1697_v51, %v1697_v51 }
 0x12b   :  { %v636_v54 = vadd.f32 %v635_v45, %v1746_v9  ;;  %v769_v58 = vadd.f32 %v768_v48, %v706_v14  ;;  %v1908_v24 = vpop.f32.mrf.mxu3  ;;  %v1238_v9 = vpack.c.bf16 %v1906_v2, %v1890_v42  ;;  %v717_v14 = vmul.f32 %v1709_v55, %v1709_v55 }
 0x12c   :  { %v1268_v0 = vpack.c.bf16 %v1908_v24, %v1892_v49 }
 0x12d   :  { %v637_v6 = vadd.f32 %v636_v54, %v1760_v16  ;;  %v770_v10 = vadd.f32 %v769_v58, %v707_v53  ;;  %v710_v16 = vmul.f32 %v1790_v31, %v1790_v31  ;;  %1333 = vst [vmem:[%s2050_s4 + $0xb8] sm:$0xff] %v1238_v9  }
 0x12e   :  { %1339 = vst [vmem:[%s2050_s4 + $0xe8] sm:$0xff] %v1268_v0   ;;  %v722_v0 = vmul.f32 %v1778_v25, %v1778_v25 }
 0x12f   :  { %v638_v20 = vadd.f32 %v637_v6, %v1776_v23  ;;  %v771_v57 = vadd.f32 %v770_v10, %v708_v59  ;;  %v720_v6 = vmul.f32 %v1748_v11, %v1748_v11 }
 0x131   :  { %v639_v28 = vadd.f32 %v638_v20, %v1790_v31  ;;  %v772_v36 = vadd.f32 %v771_v57, %v709_v13  ;;  %v712_v31 = vmul.f32 %v1822_v21, %v1822_v21 }
 0x133   :  { %v773_v23 = vadd.f32 %v772_v36, %v710_v16  ;;  %v640_v1 = vadd.f32 %v639_v28, %v1808_v46  ;;  %v1932_v40 = vpop.f32.mrf.mxu3  ;;  %v714_v46 = vmul.f32 %v1665_v30, %v1665_v30  ;;  %v723_v16 = vmul.f32 %v1792_v32, %v1792_v32 }
 0x135   :  { %v774_v18 = vadd.f32 %v773_v23, %v711_v8  ;;  %v641_v15 = vadd.f32 %v640_v1, %v1822_v21  ;;  %v724_v23 = vmul.f32 %v1810_v56, %v1810_v56 }
 0x137   :  { %v775_v39 = vadd.f32 %v774_v18, %v712_v31  ;;  %v642_v26 = vadd.f32 %v641_v15, %v1838_v50  ;;  %v725_v18 = vmul.f32 %v1824_v34, %v1824_v34 }
 0x139   :  { %v643_v43 = vadd.f32 %v642_v26, %v1665_v30  ;;  %v776_v47 = vadd.f32 %v775_v39, %v713_v22 }
 0x13b   :  { %v644_v7 = vadd.f32 %v643_v43, %v1686_v44  ;;  %v777_v21 = vadd.f32 %v776_v47, %v714_v46  ;;  %v1946_v30 = vpop.f32.mrf.mxu3  ;;  %v718_v44 = vmul.f32 %v1718_v61, %v1718_v61  ;;  %v728_v47 = vmul.f32 %v1890_v42, %v1890_v42 }
 0x13c   :  { %v1273_v53 = vpack.c.bf16 %v1946_v30, %v1932_v40 }
 0x13d   :  { %v645_v52 = vadd.f32 %v644_v7, %v1697_v51  ;;  %v778_v50 = vadd.f32 %v777_v21, %v715_v41  ;;  %v719_v51 = vmul.f32 %v1732_v3, %v1732_v3  ;;  %v730_v21 = vmul.f32 %v1720_v62, %v1720_v62 }
 0x13e   :  { %1340 = vst [vmem:[%s2050_s4 + $0xf0] sm:$0xff] %v1273_v53  }
 0x13f   :  { %v646_v45 = vadd.f32 %v645_v52, %v1709_v55  ;;  %v779_v48 = vadd.f32 %v778_v50, %v716_v29 }
 0x141   :  { %v647_v54 = vadd.f32 %v646_v45, %v1718_v61  ;;  %v780_v58 = vadd.f32 %v779_v48, %v717_v14  ;;  %v721_v61 = vmul.f32 %v1762_v17, %v1762_v17 }
 0x143   :  { %v648_v55 = vadd.f32 %v647_v54, %v1732_v3  ;;  %v781_v59 = vadd.f32 %v780_v58, %v718_v44  ;;  %v1965_v9 = vpop.f32.mrf.mxu3 }
 0x145   :  { %v782_v10 = vadd.f32 %v781_v59, %v719_v51  ;;  %v649_v13 = vadd.f32 %v648_v55, %v1748_v11 }
 0x147   :  { %v650_v20 = vadd.f32 %v649_v13, %v1762_v17  ;;  %v783_v57 = vadd.f32 %v782_v10, %v720_v6 }
 0x149   :  { %v651_v3 = vadd.f32 %v650_v20, %v1778_v25  ;;  %v784_v28 = vadd.f32 %v783_v57, %v721_v61 }
 0x14b   :  { %v652_v36 = vadd.f32 %v651_v3, %v1792_v32  ;;  %v785_v11 = vadd.f32 %v784_v28, %v722_v0  ;;  %v609_v25 = vpop.f32.mrf.mxu3  ;;  %v726_v32 = vmul.f32 %v1840_v63, %v1840_v63 }
 0x14c   :  { %v1278_v31 = vpack.c.bf16 %v609_v25, %v1965_v9 }
 0x14d   :  { %v653_v17 = vadd.f32 %v652_v36, %v1810_v56  ;;  %v786_v1 = vadd.f32 %v785_v11, %v723_v16  ;;  %v741_v16 = vmul.f32 %v1908_v24, %v1908_v24 }
 0x14e   :  { %1341 = vst [vmem:[%s2050_s4 + $0xf8] sm:$0xff] %v1278_v31   ;;  %v745_v31 = vmul.f32 %v609_v25, %v609_v25 }
 0x14f   :  { %v654_v8 = vadd.f32 %v653_v17, %v1824_v34  ;;  %v787_v15 = vadd.f32 %v786_v1, %v724_v23  ;;  %v727_v34 = vmul.f32 %v1864_v37, %v1864_v37  ;;  %v742_v23 = vmul.f32 %v1932_v40, %v1932_v40 }
 0x150   :  { %v743_v1 = vmul.f32 %v1946_v30, %v1946_v30 }
 0x151   :  { %v788_v39 = vadd.f32 %v787_v15, %v725_v18  ;;  %v655_v26 = vadd.f32 %v654_v8, %v1840_v63  ;;  %v729_v63 = vmul.f32 %v1906_v2, %v1906_v2  ;;  %v744_v18 = vmul.f32 %v1965_v9, %v1965_v9 }
 0x153   :  { %v789_v56 = vadd.f32 %v788_v39, %v726_v32  ;;  %v656_v22 = vadd.f32 %v655_v26, %v1864_v37  ;;  %v731_v37 = vmul.f32 %v1734_v4, %v1734_v4 }
 0x155   :  { %v790_v46 = vadd.f32 %v789_v56, %v727_v34  ;;  %v657_v43 = vadd.f32 %v656_v22, %v1890_v42  ;;  %v732_v42 = vmul.f32 %v1750_v12, %v1750_v12 }
 0x157   :  { %v791_v41 = vadd.f32 %v790_v46, %v728_v47  ;;  %v658_v7 = vadd.f32 %v657_v43, %v1906_v2  ;;  %v733_v2 = vmul.f32 %v1764_v19, %v1764_v19 }
 0x159   :  { %v659_v29 = vadd.f32 %v658_v7, %v1720_v62  ;;  %v792_v52 = vadd.f32 %v791_v41, %v729_v63  ;;  %v734_v62 = vmul.f32 %v1780_v27, %v1780_v27 }
 0x15b   :  { %v660_v50 = vadd.f32 %v659_v29, %v1734_v4  ;;  %v793_v14 = vadd.f32 %v792_v52, %v730_v21  ;;  %v735_v4 = vmul.f32 %v1794_v33, %v1794_v33 }
 0x15d   :  { %v661_v45 = vadd.f32 %v660_v50, %v1750_v12  ;;  %v794_v48 = vadd.f32 %v793_v14, %v731_v37  ;;  %v736_v12 = vmul.f32 %v1812_v60, %v1812_v60 }
 0x15f   :  { %v662_v53 = vadd.f32 %v661_v45, %v1764_v19  ;;  %v795_v44 = vadd.f32 %v794_v48, %v732_v42  ;;  %v737_v19 = vmul.f32 %v1826_v35, %v1826_v35 }
 0x161   :  { %v663_v54 = vadd.f32 %v662_v53, %v1780_v27  ;;  %v796_v58 = vadd.f32 %v795_v44, %v733_v2  ;;  %v738_v27 = vmul.f32 %v1842_v5, %v1842_v5 }
 0x163   :  { %v664_v51 = vadd.f32 %v663_v54, %v1794_v33  ;;  %v797_v55 = vadd.f32 %v796_v58, %v734_v62  ;;  %v739_v33 = vmul.f32 %v1866_v38, %v1866_v38 }
 0x165   :  { %v798_v59 = vadd.f32 %v797_v55, %v735_v4  ;;  %v665_v6 = vadd.f32 %v664_v51, %v1812_v60  ;;  %v740_v60 = vmul.f32 %v1892_v49, %v1892_v49 }
 0x167   :  { %v666_v10 = vadd.f32 %v665_v6, %v1826_v35  ;;  %v799_v13 = vadd.f32 %v798_v59, %v736_v12 }
 0x169   :  { %v667_v61 = vadd.f32 %v666_v10, %v1842_v5  ;;  %v800_v20 = vadd.f32 %v799_v13, %v737_v19 }
 0x16b   :  { %v668_v57 = vadd.f32 %v667_v61, %v1866_v38  ;;  %v801_v0 = vadd.f32 %v800_v20, %v738_v27 }
 0x16d   :  { %v669_v3 = vadd.f32 %v668_v57, %v1892_v49  ;;  %v802_v28 = vadd.f32 %v801_v0, %v739_v33 }
 0x16f   :  { %v670_v35 = vadd.f32 %v669_v3, %v1908_v24  ;;  %v803_v36 = vadd.f32 %v802_v28, %v740_v60 }
 0x171   :  { %v804_v5 = vadd.f32 %v803_v36, %v741_v16  ;;  %v671_v11 = vadd.f32 %v670_v35, %v1932_v40 }
 0x173   :  { %v805_v38 = vadd.f32 %v804_v5, %v742_v23  ;;  %v672_v17 = vadd.f32 %v671_v11, %v1946_v30 }
 0x175   :  { %v806_v49 = vadd.f32 %v805_v38, %v743_v1  ;;  %v673_v8 = vadd.f32 %v672_v17, %v1965_v9 }
 0x177   :  { %v807_v24 = vadd.f32 %v806_v49, %v744_v18  ;;  %v674_v15 = vadd.f32 %v673_v8, %v609_v25 }
 0x179   :  { %v675_v39 = vrot.slane %v674_v15, 4  ;;  %v808_v26 = vadd.f32 %v807_v24, %v745_v31 }
 0x17b   :  { %v676_v32 = vadd.f32 %v675_v39, %v674_v15  ;;  %v809_v56 = vrot.slane %v808_v26, 4 }
 0x17d   :  { %v677_v40 = vrot.slane %v676_v32, 2  ;;  %v810_v22 = vadd.f32 %v809_v56, %v808_v26 }
 0x17f   :  { %v678_v34 = vadd.f32 %v677_v40, %v676_v32  ;;  %v811_v46 = vrot.slane %v810_v22, 2 }
 0x181   :  { %v679_v43 = vrot.slane %v678_v34, 1  ;;  %v812_v47 = vadd.f32 %v811_v46, %v810_v22 }
 0x183   :  { %v680_v30 = vadd.f32 %v679_v43, %v678_v34  ;;  %v813_v41 = vrot.slane %v812_v47, 1 }
 0x185   :  { %681 = vst [vmem:[%s2051_s5] sm:$0x1] %v680_v30  ;;  %v814_v9 = vadd.f32 %v813_v41, %v812_v47 }
 0x187   :  { %815 = vst [vmem:[%s2051_s5 + $0x1] sm:$0x1] %v814_v9 }

// kernel: bottleneck_forward.4
= control target key start
LH: loop header
LB: loop body
LE: loop exit
PB: predicated region body
PF: predicated region fallthrough
CT: control target
= control target key end

     0   :  { %s1787_s1 = inlined_call_operand.vmem [shape: bf16[128,128], index: 1, kind: input, shape index: {}]   ;;  %s1788_s0 = inlined_call_operand.vmem [shape: bf16[512,128], index: 0, kind: input, shape index: {}]   ;;  %s1789_s2 = inlined_call_operand.vmem [shape: bf16[512,128], index: 2, kind: output, shape index: {0}]   ;;  %s1790_s3 = inlined_call_operand.vmem [shape: f32[1,2,128], index: 3, kind: output, shape index: {1}]  }
   0x1   :  { %v1041_v0 = vld [vmem:[%s1787_s1 + $0x38] sm:$0xff]  ;;  %v1040_v1 = vld [vmem:[%s1787_s1 + $0x30] sm:$0xff]  ;;  %v1039_v2 = vld [vmem:[%s1787_s1 + $0x28] sm:$0xff] }
   0x2   :  { %333 = vmatpush.bf16.msra.mxu0 %v1041_v0  ;;  %1233 = vmatpush.bf16.msra.mxu1 %v1041_v0  ;;  %v1038_v3 = vld [vmem:[%s1787_s1 + $0x20] sm:$0xff]  ;;  %v1037_v4 = vld [vmem:[%s1787_s1 + $0x18] sm:$0xff]  ;;  %v1036_v5 = vld [vmem:[%s1787_s1 + $0x10] sm:$0xff] }
   0x3   :  { %1234 = vmatpush.bf16.msra.mxu2 %v1041_v0  ;;  %1235 = vmatpush.bf16.msra.mxu3 %v1041_v0  ;;  %v1035_v6 = vld [vmem:[%s1787_s1 + $0x8] sm:$0xff]  ;;  %v1034_v7 = vld [vmem:[%s1787_s1] sm:$0xff]  ;;  %v1004_v13 = vld [vmem:[%s1788_s0 + $0x10] sm:$0xff] }
   0x4   :  { %v1002_v8 = vld [vmem:[%s1788_s0] sm:$0xff]  ;;  %v1003_v10 = vld [vmem:[%s1788_s0 + $0x8] sm:$0xff]  ;;  %v1012_v14 = vld [vmem:[%s1788_s0 + $0x50] sm:$0xff] }
   0x5   :  { %v1010_v9 = vld [vmem:[%s1788_s0 + $0x40] sm:$0xff]  ;;  %v1011_v11 = vld [vmem:[%s1788_s0 + $0x48] sm:$0xff]  ;;  %v1005_v16 = vld [vmem:[%s1788_s0 + $0x18] sm:$0xff] }
   0x6   :  { %334 = vmatpush.bf16.msra.mxu0 %v1040_v1  ;;  %1236 = vmatpush.bf16.msra.mxu1 %v1040_v1  ;;  %v1018_v12 = vld [vmem:[%s1788_s0 + $0x80] sm:$0xff]  ;;  %v1019_v15 = vld [vmem:[%s1788_s0 + $0x88] sm:$0xff]  ;;  %v1013_v17 = vld [vmem:[%s1788_s0 + $0x58] sm:$0xff] }
   0x7   :  { %1237 = vmatpush.bf16.msra.mxu2 %v1040_v1  ;;  %1238 = vmatpush.bf16.msra.mxu3 %v1040_v1  ;;  %v1020_v18 = vld [vmem:[%s1788_s0 + $0x90] sm:$0xff]  ;;  %v1026_v19 = vld [vmem:[%s1788_s0 + $0xc0] sm:$0xff]  ;;  %v1021_v22 = vld [vmem:[%s1788_s0 + $0x98] sm:$0xff] }
   0x8   :  { %v1006_v20 = vld [vmem:[%s1788_s0 + $0x20] sm:$0xff]  ;;  %v1027_v23 = vld [vmem:[%s1788_s0 + $0xc8] sm:$0xff]  ;;  %v1028_v27 = vld [vmem:[%s1788_s0 + $0xd0] sm:$0xff] }
   0x9   :  { %v1014_v21 = vld [vmem:[%s1788_s0 + $0x60] sm:$0xff]  ;;  %v1007_v24 = vld [vmem:[%s1788_s0 + $0x28] sm:$0xff]  ;;  %v1008_v28 = vld [vmem:[%s1788_s0 + $0x30] sm:$0xff] }
   0xa   :  { %335 = vmatpush.bf16.msra.mxu0 %v1039_v2  ;;  %1239 = vmatpush.bf16.msra.mxu1 %v1039_v2  ;;  %v1015_v25 = vld [vmem:[%s1788_s0 + $0x68] sm:$0xff]  ;;  %v1022_v26 = vld [vmem:[%s1788_s0 + $0xa0] sm:$0xff]  ;;  %v1016_v29 = vld [vmem:[%s1788_s0 + $0x70] sm:$0xff] }
   0xb   :  { %1240 = vmatpush.bf16.msra.mxu2 %v1039_v2  ;;  %1241 = vmatpush.bf16.msra.mxu3 %v1039_v2  ;;  %v1023_v30 = vld [vmem:[%s1788_s0 + $0xa8] sm:$0xff]  ;;  %v1029_v31 = vld [vmem:[%s1788_s0 + $0xd8] sm:$0xff]  ;;  %v1024_v34 = vld [vmem:[%s1788_s0 + $0xb0] sm:$0xff] }
   0xc   :  { %v1009_v32 = vld [vmem:[%s1788_s0 + $0x38] sm:$0xff]  ;;  %v1030_v35 = vld [vmem:[%s1788_s0 + $0xe0] sm:$0xff]  ;;  %v1031_v39 = vld [vmem:[%s1788_s0 + $0xe8] sm:$0xff] }
   0xd   :  { %v1017_v33 = vld [vmem:[%s1788_s0 + $0x78] sm:$0xff]  ;;  %v1032_v53 = vld [vmem:[%s1788_s0 + $0xf0] sm:$0xff] }
   0xe   :  { %336 = vmatpush.bf16.msra.mxu0 %v1038_v3  ;;  %1242 = vmatpush.bf16.msra.mxu1 %v1038_v3  ;;  %v1025_v38 = vld [vmem:[%s1788_s0 + $0xb8] sm:$0xff] }
   0xf   :  { %1243 = vmatpush.bf16.msra.mxu2 %v1038_v3  ;;  %1244 = vmatpush.bf16.msra.mxu3 %v1038_v3 }
  0x12   :  { %337 = vmatpush.bf16.msra.mxu0 %v1037_v4  ;;  %1245 = vmatpush.bf16.msra.mxu1 %v1037_v4 }
  0x13   :  { %1246 = vmatpush.bf16.msra.mxu2 %v1037_v4  ;;  %1247 = vmatpush.bf16.msra.mxu3 %v1037_v4 }
  0x16   :  { %338 = vmatpush.bf16.msra.mxu0 %v1036_v5  ;;  %1248 = vmatpush.bf16.msra.mxu1 %v1036_v5 }
  0x17   :  { %1249 = vmatpush.bf16.msra.mxu2 %v1036_v5  ;;  %1250 = vmatpush.bf16.msra.mxu3 %v1036_v5  ;;  %v1033_v5 = vld [vmem:[%s1788_s0 + $0xf8] sm:$0xff] }
  0x1a   :  { %339 = vmatpush.bf16.msra.mxu0 %v1035_v6  ;;  %1251 = vmatpush.bf16.msra.mxu1 %v1035_v6 }
  0x1b   :  { %1252 = vmatpush.bf16.msra.mxu2 %v1035_v6  ;;  %1253 = vmatpush.bf16.msra.mxu3 %v1035_v6 }
  0x1e   :  { %340 = vmatpush.bf16.msra.mxu0 %v1034_v7  ;;  %1254 = vmatpush.bf16.msra.mxu1 %v1034_v7 }
  0x1f   :  { %1255 = vmatpush.bf16.msra.mxu2 %v1034_v7  ;;  %1256 = vmatpush.bf16.msra.mxu3 %v1034_v7 }
  0x21   :  { %341 = vmatmul.bf16.vlgmr.msra.gmra.mxu0 %v1002_v8  ;;  %381 = vmatmul.bf16.vlgmr.msra.gmra.mxu1 %v1010_v9 }
  0x22   :  { %421 = vmatmul.bf16.vlgmr.msra.gmra.mxu2 %v1018_v12  ;;  %461 = vmatmul.bf16.vlgmr.msra.gmra.mxu3 %v1026_v19 }
  0x31   :  { %346 = vmatmul.bf16.gmra.mxu0 %v1003_v10  ;;  %386 = vmatmul.bf16.gmra.mxu1 %v1011_v11 }
  0x32   :  { %426 = vmatmul.bf16.gmra.mxu2 %v1019_v15  ;;  %466 = vmatmul.bf16.gmra.mxu3 %v1027_v23 }
  0x41   :  { %351 = vmatmul.bf16.gmra.mxu0 %v1004_v13  ;;  %391 = vmatmul.bf16.gmra.mxu1 %v1012_v14 }
  0x42   :  { %431 = vmatmul.bf16.gmra.mxu2 %v1020_v18  ;;  %471 = vmatmul.bf16.gmra.mxu3 %v1028_v27 }
  0x51   :  { %356 = vmatmul.bf16.gmra.mxu0 %v1005_v16  ;;  %396 = vmatmul.bf16.gmra.mxu1 %v1013_v17 }
  0x52   :  { %436 = vmatmul.bf16.gmra.mxu2 %v1021_v22  ;;  %476 = vmatmul.bf16.gmra.mxu3 %v1029_v31 }
  0x61   :  { %361 = vmatmul.bf16.gmra.mxu0 %v1006_v20  ;;  %401 = vmatmul.bf16.gmra.mxu1 %v1014_v21 }
  0x62   :  { %441 = vmatmul.bf16.gmra.mxu2 %v1022_v26  ;;  %481 = vmatmul.bf16.gmra.mxu3 %v1030_v35 }
  0x71   :  { %366 = vmatmul.bf16.gmra.mxu0 %v1007_v24  ;;  %406 = vmatmul.bf16.gmra.mxu1 %v1015_v25 }
  0x72   :  { %446 = vmatmul.bf16.gmra.mxu2 %v1023_v30  ;;  %486 = vmatmul.bf16.gmra.mxu3 %v1031_v39 }
  0x81   :  { %371 = vmatmul.bf16.gmra.mxu0 %v1008_v28  ;;  %411 = vmatmul.bf16.gmra.mxu1 %v1016_v29 }
  0x82   :  { %451 = vmatmul.bf16.gmra.mxu2 %v1024_v34  ;;  %491 = vmatmul.bf16.gmra.mxu3 %v1032_v53 }
  0x91   :  { %376 = vmatmul.bf16.gmra.mxu0 %v1009_v32  ;;  %416 = vmatmul.bf16.gmra.mxu1 %v1017_v33 }
  0x92   :  { %456 = vmatmul.bf16.gmra.mxu2 %v1025_v38  ;;  %496 = vmatmul.bf16.gmra.mxu3 %v1033_v5 }
  0x9e   :  { %v342_v36 = vpop.f32.mrf.mxu0  ;;  %v1385_v37 = vpop.f32.mrf.mxu1 }
  0x9f   :  { %v572_v42 = vmul.f32 %v342_v36, %v342_v36 }
  0xa5   :  { %v1410_v59 = vpop.f32.mrf.mxu2  ;;  %v1461_v19 = vpop.f32.mrf.mxu3 }
  0xa6   :  { %v344_v40 = vpop.f32.mrf.mxu0  ;;  %v1393_v41 = vpop.f32.mrf.mxu1 }
  0xa7   :  { %v502_v43 = vadd.f32 %v344_v40, %v342_v36  ;;  %v573_v44 = vmul.f32 %v344_v40, %v344_v40  ;;  %v1045_v45 = vpack.c.bf16 %v344_v40, %v342_v36  ;;  %v1085_v46 = vpack.c.bf16 %v1393_v41, %v1385_v37 }
  0xa9   :  { %v636_v47 = vadd.f32 %v573_v44, %v572_v42  ;;  %1046 = vst [vmem:[%s1789_s2] sm:$0xff] %v1045_v45  }
  0xaa   :  { %1209 = vst [vmem:[%s1789_s2 + $0x40] sm:$0xff] %v1085_v46  }
  0xad   :  { %v1424_v2 = vpop.f32.mrf.mxu2  ;;  %v1475_v24 = vpop.f32.mrf.mxu3 }
  0xae   :  { %v347_v48 = vpop.f32.mrf.mxu0  ;;  %v1403_v49 = vpop.f32.mrf.mxu1  ;;  %v1125_v3 = vpack.c.bf16 %v1424_v2, %v1410_v59  ;;  %v1165_v26 = vpack.c.bf16 %v1475_v24, %v1461_v19 }
  0xaf   :  { %v503_v50 = vadd.f32 %v502_v43, %v347_v48  ;;  %v574_v51 = vmul.f32 %v347_v48, %v347_v48 }
  0xb0   :  { %1217 = vst [vmem:[%s1789_s2 + $0x80] sm:$0xff] %v1125_v3  }
  0xb1   :  { %v637_v52 = vadd.f32 %v636_v47, %v574_v51  ;;  %1225 = vst [vmem:[%s1789_s2 + $0xc0] sm:$0xff] %v1165_v26  }
  0xb5   :  { %v1438_v9 = vpop.f32.mrf.mxu2  ;;  %v1491_v31 = vpop.f32.mrf.mxu3 }
  0xb6   :  { %v349_v54 = vpop.f32.mrf.mxu0  ;;  %v1408_v55 = vpop.f32.mrf.mxu1 }
  0xb7   :  { %v504_v56 = vadd.f32 %v503_v50, %v349_v54  ;;  %v575_v57 = vmul.f32 %v349_v54, %v349_v54  ;;  %v1050_v58 = vpack.c.bf16 %v349_v54, %v347_v48  ;;  %v1090_v60 = vpack.c.bf16 %v1408_v55, %v1403_v49 }
  0xb9   :  { %v638_v61 = vadd.f32 %v637_v52, %v575_v57  ;;  %1202 = vst [vmem:[%s1789_s2 + $0x8] sm:$0xff] %v1050_v58  }
  0xba   :  { %1210 = vst [vmem:[%s1789_s2 + $0x48] sm:$0xff] %v1090_v60  }
  0xbd   :  { %v1450_v13 = vpop.f32.mrf.mxu2  ;;  %v1505_v36 = vpop.f32.mrf.mxu3 }
  0xbe   :  { %v352_v62 = vpop.f32.mrf.mxu0  ;;  %v1420_v63 = vpop.f32.mrf.mxu1  ;;  %v1130_v14 = vpack.c.bf16 %v1450_v13, %v1438_v9  ;;  %v1170_v39 = vpack.c.bf16 %v1505_v36, %v1491_v31 }
  0xbf   :  { %v1422_v0 = vadd.f32 %v504_v56, %v352_v62  ;;  %v576_v1 = vmul.f32 %v352_v62, %v352_v62 }
  0xc0   :  { %1218 = vst [vmem:[%s1789_s2 + $0x88] sm:$0xff] %v1130_v14  }
  0xc1   :  { %v1428_v4 = vadd.f32 %v638_v61, %v576_v1  ;;  %1226 = vst [vmem:[%s1789_s2 + $0xc8] sm:$0xff] %v1170_v39  }
  0xc5   :  { %v1459_v18 = vpop.f32.mrf.mxu2  ;;  %v1521_v45 = vpop.f32.mrf.mxu3 }
  0xc6   :  { %v354_v6 = vpop.f32.mrf.mxu0  ;;  %v1436_v7 = vpop.f32.mrf.mxu1 }
  0xc7   :  { %v1055_v8 = vpack.c.bf16 %v354_v6, %v352_v62  ;;  %v1095_v10 = vpack.c.bf16 %v1436_v7, %v1420_v63  ;;  %v577_v53 = vmul.f32 %v354_v6, %v354_v6  ;;  %v506_v56 = vadd.f32 %v1422_v0, %v354_v6 }
  0xc9   :  { %1203 = vst [vmem:[%s1789_s2 + $0x10] sm:$0xff] %v1055_v8   ;;  %v640_v58 = vadd.f32 %v1428_v4, %v577_v53 }
  0xca   :  { %1211 = vst [vmem:[%s1789_s2 + $0x50] sm:$0xff] %v1095_v10  }
  0xcd   :  { %v1473_v23 = vpop.f32.mrf.mxu2  ;;  %v1535_v51 = vpop.f32.mrf.mxu3 }
  0xce   :  { %v357_v11 = vpop.f32.mrf.mxu0  ;;  %v1448_v12 = vpop.f32.mrf.mxu1  ;;  %v1135_v25 = vpack.c.bf16 %v1473_v23, %v1459_v18  ;;  %v1175_v54 = vpack.c.bf16 %v1535_v51, %v1521_v45 }
  0xcf   :  { %v578_v57 = vmul.f32 %v357_v11, %v357_v11  ;;  %v507_v60 = vadd.f32 %v506_v56, %v357_v11 }
  0xd0   :  { %1219 = vst [vmem:[%s1789_s2 + $0x90] sm:$0xff] %v1135_v25  }
  0xd1   :  { %1227 = vst [vmem:[%s1789_s2 + $0xd0] sm:$0xff] %v1175_v54   ;;  %v641_v3 = vadd.f32 %v640_v58, %v578_v57 }
  0xd5   :  { %v1489_v30 = vpop.f32.mrf.mxu2 }
  0xd6   :  { %v359_v15 = vpop.f32.mrf.mxu0  ;;  %v1457_v16 = vpop.f32.mrf.mxu1 }
  0xd7   :  { %v1060_v17 = vpack.c.bf16 %v359_v15, %v357_v11  ;;  %v1100_v20 = vpack.c.bf16 %v1457_v16, %v1448_v12  ;;  %v579_v61 = vmul.f32 %v359_v15, %v359_v15  ;;  %v508_v5 = vadd.f32 %v507_v60, %v359_v15 }
  0xd9   :  { %1204 = vst [vmem:[%s1789_s2 + $0x18] sm:$0xff] %v1060_v17   ;;  %v1553_v17 = vpop.f32.mrf.mxu3  ;;  %v642_v6 = vadd.f32 %v641_v3, %v579_v61 }
  0xda   :  { %1212 = vst [vmem:[%s1789_s2 + $0x58] sm:$0xff] %v1100_v20  }
  0xdd   :  { %v1503_v35 = vpop.f32.mrf.mxu2 }
  0xde   :  { %v362_v21 = vpop.f32.mrf.mxu0  ;;  %v1471_v22 = vpop.f32.mrf.mxu1  ;;  %v1140_v38 = vpack.c.bf16 %v1503_v35, %v1489_v30 }
  0xdf   :  { %v580_v8 = vmul.f32 %v362_v21, %v362_v21  ;;  %v509_v20 = vadd.f32 %v508_v5, %v362_v21 }
  0xe0   :  { %1220 = vst [vmem:[%s1789_s2 + $0x98] sm:$0xff] %v1140_v38  }
  0xe1   :  { %v643_v4 = vadd.f32 %v642_v6, %v580_v8  ;;  %v1567_v53 = vpop.f32.mrf.mxu3 }
  0xe5   :  { %v1519_v44 = vpop.f32.mrf.mxu2 }
  0xe6   :  { %v364_v27 = vpop.f32.mrf.mxu0  ;;  %v1487_v28 = vpop.f32.mrf.mxu1 }
  0xe7   :  { %v1065_v29 = vpack.c.bf16 %v364_v27, %v362_v21  ;;  %v1105_v32 = vpack.c.bf16 %v1487_v28, %v1471_v22  ;;  %v581_v25 = vmul.f32 %v364_v27, %v364_v27  ;;  %v510_v11 = vadd.f32 %v509_v20, %v364_v27 }
  0xe9   :  { %1205 = vst [vmem:[%s1789_s2 + $0x20] sm:$0xff] %v1065_v29   ;;  %v644_v26 = vadd.f32 %v643_v4, %v581_v25  ;;  %v1583_v25 = vpop.f32.mrf.mxu3  ;;  %v588_v4 = vmul.f32 %v1385_v37, %v1385_v37 }
  0xea   :  { %1213 = vst [vmem:[%s1789_s2 + $0x60] sm:$0xff] %v1105_v32  }
  0xed   :  { %v1533_v50 = vpop.f32.mrf.mxu2 }
  0xee   :  { %v367_v33 = vpop.f32.mrf.mxu0  ;;  %v1501_v34 = vpop.f32.mrf.mxu1  ;;  %v1145_v52 = vpack.c.bf16 %v1533_v50, %v1519_v44 }
  0xef   :  { %v582_v15 = vmul.f32 %v367_v33, %v367_v33  ;;  %v511_v29 = vadd.f32 %v510_v11, %v367_v33 }
  0xf0   :  { %1221 = vst [vmem:[%s1789_s2 + $0xa0] sm:$0xff] %v1145_v52  }
  0xf5   :  { %v1551_v14 = vpop.f32.mrf.mxu2 }
  0xf6   :  { %v369_v40 = vpop.f32.mrf.mxu0  ;;  %v1517_v42 = vpop.f32.mrf.mxu1 }
  0xf7   :  { %v1070_v43 = vpack.c.bf16 %v369_v40, %v367_v33  ;;  %v1110_v46 = vpack.c.bf16 %v1517_v42, %v1501_v34  ;;  %v583_v32 = vmul.f32 %v369_v40, %v369_v40  ;;  %v512_v21 = vadd.f32 %v511_v29, %v369_v40 }
  0xf8   :  { %v1180_v33 = vpack.c.bf16 %v1567_v53, %v1553_v17 }
  0xf9   :  { %1206 = vst [vmem:[%s1789_s2 + $0x28] sm:$0xff] %v1070_v43   ;;  %v645_v43 = vadd.f32 %v644_v26, %v582_v15  ;;  %v589_v26 = vmul.f32 %v1393_v41, %v1393_v41 }
  0xfa   :  { %1214 = vst [vmem:[%s1789_s2 + $0x68] sm:$0xff] %v1110_v46  }
  0xfb   :  { %v646_v56 = vadd.f32 %v645_v43, %v583_v32  ;;  %1228 = vst [vmem:[%s1789_s2 + $0xd8] sm:$0xff] %v1180_v33  }
  0xfd   :  { %v1565_v52 = vpop.f32.mrf.mxu2 }
  0xfe   :  { %v372_v47 = vpop.f32.mrf.mxu0  ;;  %v1531_v48 = vpop.f32.mrf.mxu1  ;;  %v1150_v54 = vpack.c.bf16 %v1565_v52, %v1551_v14 }
  0xff   :  { %v584_v46 = vmul.f32 %v372_v47, %v372_v47  ;;  %v513_v57 = vadd.f32 %v512_v21, %v372_v47  ;;  %v591_v21 = vmul.f32 %v1408_v55, %v1408_v55 }
 0x100   :  { %1222 = vst [vmem:[%s1789_s2 + $0xa8] sm:$0xff] %v1150_v54  }
 0x101   :  { %v647_v58 = vadd.f32 %v646_v56, %v584_v46 }
 0x105   :  { %v1581_v20 = vpop.f32.mrf.mxu2 }
 0x106   :  { %v374_v62 = vpop.f32.mrf.mxu0  ;;  %v1549_v1 = vpop.f32.mrf.mxu1 }
 0x107   :  { %v1075_v10 = vpack.c.bf16 %v374_v62, %v372_v47  ;;  %v1115_v0 = vpack.c.bf16 %v1549_v1, %v1531_v48  ;;  %v585_v27 = vmul.f32 %v374_v62, %v374_v62  ;;  %v514_v40 = vadd.f32 %v513_v57, %v374_v62  ;;  %v1607_v57 = vpop.f32.mrf.mxu3 }
 0x109   :  { %1207 = vst [vmem:[%s1789_s2 + $0x30] sm:$0xff] %v1075_v10   ;;  %v648_v61 = vadd.f32 %v647_v58, %v585_v27  ;;  %v1185_v27 = vpack.c.bf16 %v1607_v57, %v1583_v25 }
 0x10a   :  { %1215 = vst [vmem:[%s1789_s2 + $0x70] sm:$0xff] %v1115_v0  }
 0x10b   :  { %1229 = vst [vmem:[%s1789_s2 + $0xe0] sm:$0xff] %v1185_v27   ;;  %v601_v27 = vmul.f32 %v1549_v1, %v1549_v1 }
 0x10d   :  { %v1605_v56 = vpop.f32.mrf.mxu2 }
 0x10e   :  { %v377_v38 = vpop.f32.mrf.mxu0  ;;  %v1563_v39 = vpop.f32.mrf.mxu1 }
 0x10f   :  { %v586_v60 = vmul.f32 %v377_v38, %v377_v38  ;;  %v515_v3 = vadd.f32 %v514_v40, %v377_v38 }
 0x111   :  { %v649_v47 = vadd.f32 %v648_v61, %v586_v60  ;;  %v594_v61 = vmul.f32 %v1448_v12, %v1448_v12 }
 0x116   :  { %v379_v5 = vpop.f32.mrf.mxu0  ;;  %v1579_v8 = vpop.f32.mrf.mxu1 }
 0x117   :  { %v516_v10 = vadd.f32 %v515_v3, %v379_v5  ;;  %v587_v0 = vmul.f32 %v379_v5, %v379_v5  ;;  %v1080_v6 = vpack.c.bf16 %v379_v5, %v377_v38  ;;  %v1120_v62 = vpack.c.bf16 %v1579_v8, %v1563_v39 }
 0x118   :  { %v590_v38 = vmul.f32 %v1403_v49, %v1403_v49  ;;  %v595_v5 = vmul.f32 %v1457_v16, %v1457_v16 }
 0x119   :  { %v517_v11 = vadd.f32 %v516_v10, %v1385_v37  ;;  %v650_v15 = vadd.f32 %v649_v47, %v587_v0  ;;  %1208 = vst [vmem:[%s1789_s2 + $0x38] sm:$0xff] %v1080_v6   ;;  %v1631_v0 = vpop.f32.mrf.mxu2  ;;  %v596_v6 = vmul.f32 %v1471_v22, %v1471_v22 }
 0x11a   :  { %1216 = vst [vmem:[%s1789_s2 + $0x78] sm:$0xff] %v1120_v62  }
 0x11b   :  { %v518_v29 = vadd.f32 %v517_v11, %v1393_v41  ;;  %v651_v32 = vadd.f32 %v650_v15, %v588_v4  ;;  %v1155_v41 = vpack.c.bf16 %v1605_v56, %v1581_v20  ;;  %v597_v11 = vmul.f32 %v1487_v28, %v1487_v28 }
 0x11d   :  { %v519_v37 = vadd.f32 %v518_v29, %v1403_v49  ;;  %v652_v43 = vadd.f32 %v651_v32, %v589_v26  ;;  %v592_v49 = vmul.f32 %v1420_v63, %v1420_v63  ;;  %1223 = vst [vmem:[%s1789_s2 + $0xb0] sm:$0xff] %v1155_v41   ;;  %v599_v32 = vmul.f32 %v1517_v42, %v1517_v42 }
 0x11f   :  { %v520_v46 = vadd.f32 %v519_v37, %v1408_v55  ;;  %v653_v54 = vadd.f32 %v652_v43, %v590_v38  ;;  %v593_v55 = vmul.f32 %v1436_v7, %v1436_v7 }
 0x121   :  { %v521_v33 = vadd.f32 %v520_v46, %v1420_v63  ;;  %v654_v58 = vadd.f32 %v653_v54, %v591_v21 }
 0x123   :  { %v522_v40 = vadd.f32 %v521_v33, %v1436_v7  ;;  %v655_v60 = vadd.f32 %v654_v58, %v592_v49  ;;  %v1633_v7 = vpop.f32.mrf.mxu3 }
 0x125   :  { %v656_v3 = vadd.f32 %v655_v60, %v593_v55  ;;  %v523_v63 = vadd.f32 %v522_v40, %v1448_v12  ;;  %v603_v40 = vmul.f32 %v1579_v8, %v1579_v8 }
 0x127   :  { %v524_v47 = vadd.f32 %v523_v63, %v1457_v16  ;;  %v657_v10 = vadd.f32 %v656_v3, %v594_v61  ;;  %v598_v16 = vmul.f32 %v1501_v34, %v1501_v34  ;;  %v605_v63 = vmul.f32 %v1424_v2, %v1424_v2 }
 0x129   :  { %v525_v62 = vadd.f32 %v524_v47, %v1471_v22  ;;  %v658_v4 = vadd.f32 %v657_v10, %v595_v5  ;;  %v1647_v22 = vpop.f32.mrf.mxu2  ;;  %v606_v47 = vmul.f32 %v1438_v9, %v1438_v9 }
 0x12b   :  { %v526_v12 = vadd.f32 %v525_v62, %v1487_v28  ;;  %v659_v15 = vadd.f32 %v658_v4, %v596_v6  ;;  %v1649_v43 = vpop.f32.mrf.mxu3  ;;  %v1160_v28 = vpack.c.bf16 %v1647_v22, %v1631_v0  ;;  %v607_v6 = vmul.f32 %v1450_v13, %v1450_v13 }
 0x12c   :  { %v1190_v21 = vpack.c.bf16 %v1649_v43, %v1633_v7 }
 0x12d   :  { %v527_v26 = vadd.f32 %v526_v12, %v1501_v34  ;;  %v660_v29 = vadd.f32 %v659_v15, %v597_v11  ;;  %v600_v34 = vmul.f32 %v1531_v48, %v1531_v48  ;;  %1224 = vst [vmem:[%s1789_s2 + $0xb8] sm:$0xff] %v1160_v28  }
 0x12e   :  { %1230 = vst [vmem:[%s1789_s2 + $0xe8] sm:$0xff] %v1190_v21   ;;  %v612_v21 = vmul.f32 %v1519_v44, %v1519_v44 }
 0x12f   :  { %v528_v38 = vadd.f32 %v527_v26, %v1517_v42  ;;  %v661_v37 = vadd.f32 %v660_v29, %v598_v16  ;;  %v610_v26 = vmul.f32 %v1489_v30, %v1489_v30 }
 0x131   :  { %v529_v46 = vadd.f32 %v528_v38, %v1531_v48  ;;  %v662_v54 = vadd.f32 %v661_v37, %v599_v32  ;;  %v602_v48 = vmul.f32 %v1563_v39, %v1563_v39 }
 0x133   :  { %v663_v42 = vadd.f32 %v662_v54, %v600_v34  ;;  %v530_v41 = vadd.f32 %v529_v46, %v1549_v1  ;;  %v1673_v60 = vpop.f32.mrf.mxu3  ;;  %v604_v1 = vmul.f32 %v1410_v59, %v1410_v59  ;;  %v613_v34 = vmul.f32 %v1533_v50, %v1533_v50 }
 0x135   :  { %v664_v49 = vadd.f32 %v663_v42, %v601_v27  ;;  %v531_v33 = vadd.f32 %v530_v41, %v1563_v39  ;;  %v614_v42 = vmul.f32 %v1551_v14, %v1551_v14 }
 0x137   :  { %v665_v58 = vadd.f32 %v664_v49, %v602_v48  ;;  %v532_v55 = vadd.f32 %v531_v33, %v1579_v8  ;;  %v615_v49 = vmul.f32 %v1565_v52, %v1565_v52 }
 0x139   :  { %v533_v61 = vadd.f32 %v532_v55, %v1410_v59  ;;  %v666_v3 = vadd.f32 %v665_v58, %v603_v40 }
 0x13b   :  { %v534_v5 = vadd.f32 %v533_v61, %v1424_v2  ;;  %v667_v39 = vadd.f32 %v666_v3, %v604_v1  ;;  %v1687_v59 = vpop.f32.mrf.mxu3  ;;  %v608_v2 = vmul.f32 %v1459_v18, %v1459_v18  ;;  %v618_v3 = vmul.f32 %v1631_v0, %v1631_v0 }
 0x13c   :  { %v1195_v11 = vpack.c.bf16 %v1687_v59, %v1673_v60 }
 0x13d   :  { %v535_v10 = vadd.f32 %v534_v5, %v1438_v9  ;;  %v668_v8 = vadd.f32 %v667_v39, %v605_v63  ;;  %v609_v9 = vmul.f32 %v1473_v23, %v1473_v23  ;;  %v620_v39 = vmul.f32 %v1461_v19, %v1461_v19 }
 0x13e   :  { %1231 = vst [vmem:[%s1789_s2 + $0xf0] sm:$0xff] %v1195_v11  }
 0x13f   :  { %v536_v62 = vadd.f32 %v535_v10, %v1450_v13  ;;  %v669_v4 = vadd.f32 %v668_v8, %v606_v47 }
 0x141   :  { %v537_v12 = vadd.f32 %v536_v62, %v1459_v18  ;;  %v670_v15 = vadd.f32 %v669_v4, %v607_v6  ;;  %v611_v18 = vmul.f32 %v1503_v35, %v1503_v35 }
 0x143   :  { %v538_v13 = vadd.f32 %v537_v12, %v1473_v23  ;;  %v671_v16 = vadd.f32 %v670_v15, %v608_v2  ;;  %v1706_v28 = vpop.f32.mrf.mxu3 }
 0x145   :  { %v672_v29 = vadd.f32 %v671_v16, %v609_v9  ;;  %v539_v32 = vadd.f32 %v538_v13, %v1489_v30 }
 0x147   :  { %v540_v38 = vadd.f32 %v539_v32, %v1503_v35  ;;  %v673_v37 = vadd.f32 %v672_v29, %v610_v26 }
 0x149   :  { %v541_v23 = vadd.f32 %v540_v38, %v1519_v44  ;;  %v674_v46 = vadd.f32 %v673_v37, %v611_v18 }
 0x14b   :  { %v542_v54 = vadd.f32 %v541_v23, %v1533_v50  ;;  %v675_v30 = vadd.f32 %v674_v46, %v612_v21  ;;  %v499_v44 = vpop.f32.mrf.mxu3  ;;  %v616_v50 = vmul.f32 %v1581_v20, %v1581_v20 }
 0x14c   :  { %v1200_v48 = vpack.c.bf16 %v499_v44, %v1706_v28 }
 0x14d   :  { %v543_v35 = vadd.f32 %v542_v54, %v1551_v14  ;;  %v676_v41 = vadd.f32 %v675_v30, %v613_v34  ;;  %v631_v34 = vmul.f32 %v1649_v43, %v1649_v43 }
 0x14e   :  { %1232 = vst [vmem:[%s1789_s2 + $0xf8] sm:$0xff] %v1200_v48   ;;  %v635_v48 = vmul.f32 %v499_v44, %v499_v44 }
 0x14f   :  { %v544_v27 = vadd.f32 %v543_v35, %v1565_v52  ;;  %v677_v33 = vadd.f32 %v676_v41, %v614_v42  ;;  %v617_v52 = vmul.f32 %v1605_v56, %v1605_v56  ;;  %v632_v42 = vmul.f32 %v1673_v60, %v1673_v60 }
 0x150   :  { %v633_v41 = vmul.f32 %v1687_v59, %v1687_v59 }
 0x151   :  { %v678_v58 = vadd.f32 %v677_v33, %v615_v49  ;;  %v545_v55 = vadd.f32 %v544_v27, %v1581_v20  ;;  %v619_v20 = vmul.f32 %v1647_v22, %v1647_v22  ;;  %v634_v49 = vmul.f32 %v1706_v28, %v1706_v28 }
 0x153   :  { %v679_v14 = vadd.f32 %v678_v58, %v616_v50  ;;  %v546_v40 = vadd.f32 %v545_v55, %v1605_v56  ;;  %v621_v56 = vmul.f32 %v1475_v24, %v1475_v24 }
 0x155   :  { %v680_v1 = vadd.f32 %v679_v14, %v617_v52  ;;  %v547_v61 = vadd.f32 %v546_v40, %v1631_v0  ;;  %v622_v0 = vmul.f32 %v1491_v31, %v1491_v31 }
 0x157   :  { %v681_v63 = vadd.f32 %v680_v1, %v618_v3  ;;  %v548_v5 = vadd.f32 %v547_v61, %v1647_v22  ;;  %v623_v22 = vmul.f32 %v1505_v36, %v1505_v36 }
 0x159   :  { %v549_v47 = vadd.f32 %v548_v5, %v1461_v19  ;;  %v682_v10 = vadd.f32 %v681_v63, %v619_v20  ;;  %v624_v19 = vmul.f32 %v1521_v45, %v1521_v45 }
 0x15b   :  { %v550_v8 = vadd.f32 %v549_v47, %v1475_v24  ;;  %v683_v6 = vadd.f32 %v682_v10, %v620_v39  ;;  %v625_v24 = vmul.f32 %v1535_v51, %v1535_v51 }
 0x15d   :  { %v551_v62 = vadd.f32 %v550_v8, %v1491_v31  ;;  %v684_v4 = vadd.f32 %v683_v6, %v621_v56  ;;  %v626_v31 = vmul.f32 %v1553_v17, %v1553_v17 }
 0x15f   :  { %v552_v11 = vadd.f32 %v551_v62, %v1505_v36  ;;  %v685_v2 = vadd.f32 %v684_v4, %v622_v0  ;;  %v627_v36 = vmul.f32 %v1567_v53, %v1567_v53 }
 0x161   :  { %v553_v12 = vadd.f32 %v552_v11, %v1521_v45  ;;  %v686_v15 = vadd.f32 %v685_v2, %v623_v22  ;;  %v628_v45 = vmul.f32 %v1583_v25, %v1583_v25 }
 0x163   :  { %v554_v9 = vadd.f32 %v553_v12, %v1535_v51  ;;  %v687_v13 = vadd.f32 %v686_v15, %v624_v19  ;;  %v629_v51 = vmul.f32 %v1607_v57, %v1607_v57 }
 0x165   :  { %v688_v16 = vadd.f32 %v687_v13, %v625_v24  ;;  %v555_v26 = vadd.f32 %v554_v9, %v1553_v17  ;;  %v630_v17 = vmul.f32 %v1633_v7, %v1633_v7 }
 0x167   :  { %v556_v29 = vadd.f32 %v555_v26, %v1567_v53  ;;  %v689_v32 = vadd.f32 %v688_v16, %v626_v31 }
 0x169   :  { %v557_v18 = vadd.f32 %v556_v29, %v1583_v25  ;;  %v690_v38 = vadd.f32 %v689_v32, %v627_v36 }
 0x16b   :  { %v558_v37 = vadd.f32 %v557_v18, %v1607_v57  ;;  %v691_v21 = vadd.f32 %v690_v38, %v628_v45 }
 0x16d   :  { %v559_v23 = vadd.f32 %v558_v37, %v1633_v7  ;;  %v692_v46 = vadd.f32 %v691_v21, %v629_v51 }
 0x16f   :  { %v560_v53 = vadd.f32 %v559_v23, %v1649_v43  ;;  %v693_v54 = vadd.f32 %v692_v46, %v630_v17 }
 0x171   :  { %v694_v25 = vadd.f32 %v693_v54, %v631_v34  ;;  %v561_v30 = vadd.f32 %v560_v53, %v1673_v60 }
 0x173   :  { %v695_v57 = vadd.f32 %v694_v25, %v632_v42  ;;  %v562_v35 = vadd.f32 %v561_v30, %v1687_v59 }
 0x175   :  { %v696_v7 = vadd.f32 %v695_v57, %v633_v41  ;;  %v563_v27 = vadd.f32 %v562_v35, %v1706_v28 }
 0x177   :  { %v697_v43 = vadd.f32 %v696_v7, %v634_v49  ;;  %v564_v33 = vadd.f32 %v563_v27, %v499_v44 }
 0x179   :  { %v565_v58 = vrot.slane %v564_v33, 4  ;;  %v698_v55 = vadd.f32 %v697_v43, %v635_v48 }
 0x17b   :  { %v566_v50 = vadd.f32 %v565_v58, %v564_v33  ;;  %v699_v14 = vrot.slane %v698_v55, 4 }
 0x17d   :  { %v567_v60 = vrot.slane %v566_v50, 2  ;;  %v700_v40 = vadd.f32 %v699_v14, %v698_v55 }
 0x17f   :  { %v568_v52 = vadd.f32 %v567_v60, %v566_v50  ;;  %v701_v1 = vrot.slane %v700_v40, 2 }
 0x181   :  { %v569_v61 = vrot.slane %v568_v52, 1  ;;  %v702_v3 = vadd.f32 %v701_v1, %v700_v40 }
 0x183   :  { %v570_v59 = vadd.f32 %v569_v61, %v568_v52  ;;  %v703_v63 = vrot.slane %v702_v3, 1 }
 0x185   :  { %571 = vst [vmem:[%s1790_s3] sm:$0x1] %v570_v59  ;;  %v704_v28 = vadd.f32 %v703_v63, %v702_v3 }
 0x187   :  { %705 = vst [vmem:[%s1790_s3 + $0x1] sm:$0x1] %v704_v28 }

// kernel: bottleneck_forward.7
= control target key start
LH: loop header
LB: loop body
LE: loop exit
PB: predicated region body
PF: predicated region fallthrough
CT: control target
= control target key end

     0   :  { %s1472_s0 = inlined_call_operand.vmem [shape: f32[1,128], index: 0, kind: input, shape index: {}]   ;;  %s1473_s1 = inlined_call_operand.vmem [shape: f32[1,128], index: 1, kind: input, shape index: {}]   ;;  %s1474_s2 = inlined_call_operand.vmem [shape: bf16[512,128], index: 2, kind: input, shape index: {}]   ;;  %s1475_s3 = inlined_call_operand.vmem [shape: bf16[512,128], index: 3, kind: input, shape index: {}]   ;;  %s1476_s4 = inlined_call_operand.vmem [shape: f32[512,128], index: 4, kind: output, shape index: {}]  }
   0x1   :  { %v606_v0 = vld [vmem:[%s1474_s2] sm:$0xff]   ;;  %v861_v8 = vld [vmem:[%s1474_s2 + $0x8] sm:$0xff]   ;;  %v862_v10 = vld [vmem:[%s1474_s2 + $0x10] sm:$0xff]  }
   0x2   :  { %v956_v1 = vld [vmem:[%s1472_s0] ss:$0 sm:$0xff]  ;;  %v607_v2 = vunpack.c.l.bf16 %v606_v0  ;;  %v608_v5 = vunpack.c.h.bf16 %v606_v0  ;;  %v892_v9 = vld [vmem:[%s1475_s3 + $0x8] sm:$0xff]   ;;  %v611_v13 = vunpack.c.l.bf16 %v861_v8  ;;  %v893_v15 = vld [vmem:[%s1475_s3 + $0x10] sm:$0xff]   ;;  %v612_v17 = vunpack.c.h.bf16 %v861_v8 }
   0x3   :  { %v961_v3 = vld [vmem:[%s1473_s1] ss:$0 sm:$0xff]  ;;  %v739_v14 = vunpack.c.l.bf16 %v892_v9  ;;  %v863_v16 = vld [vmem:[%s1474_s2 + $0x18] sm:$0xff]   ;;  %v740_v18 = vunpack.c.h.bf16 %v892_v9  ;;  %v615_v19 = vunpack.c.l.bf16 %v862_v10  ;;  %v743_v20 = vunpack.c.l.bf16 %v893_v15  ;;  %v865_v52 = vld [vmem:[%s1474_s2 + $0x28] sm:$0xff]  }
   0x4   :  { %v734_v4 = vld [vmem:[%s1475_s3] sm:$0xff]   ;;  %v149_v11 = vmul.f32 %v956_v1, %v607_v2  ;;  %v150_v12 = vmul.f32 %v956_v1, %v608_v5  ;;  %v151_v23 = vmul.f32 %v956_v1, %v611_v13  ;;  %v616_v24 = vunpack.c.h.bf16 %v862_v10  ;;  %v894_v25 = vld [vmem:[%s1475_s3 + $0x18] sm:$0xff]   ;;  %v896_v57 = vld [vmem:[%s1475_s3 + $0x28] sm:$0xff]  }
   0x5   :  { %v735_v6 = vunpack.c.l.bf16 %v734_v4  ;;  %v736_v7 = vunpack.c.h.bf16 %v734_v4  ;;  %v152_v26 = vmul.f32 %v956_v1, %v612_v17  ;;  %v153_v27 = vmul.f32 %v956_v1, %v615_v19  ;;  %v864_v38 = vld [vmem:[%s1474_s2 + $0x20] sm:$0xff]   ;;  %v866_v62 = vld [vmem:[%s1474_s2 + $0x30] sm:$0xff]  }
   0x6   :  { %v217_v21 = vadd.f32 %v961_v3, %v149_v11  ;;  %v218_v22 = vadd.f32 %v961_v3, %v150_v12  ;;  %v744_v28 = vunpack.c.h.bf16 %v893_v15  ;;  %v619_v29 = vunpack.c.l.bf16 %v863_v16  ;;  %v895_v47 = vld [vmem:[%s1475_s3 + $0x20] sm:$0xff]   ;;  %v897_v5 = vld [vmem:[%s1475_s3 + $0x30] sm:$0xff]  }
   0x7   :  { %v219_v32 = vadd.f32 %v961_v3, %v151_v23  ;;  %v154_v33 = vmul.f32 %v956_v1, %v616_v24  ;;  %v220_v34 = vadd.f32 %v961_v3, %v152_v26  ;;  %v221_v35 = vadd.f32 %v961_v3, %v153_v27  ;;  %v898_v23 = vld [vmem:[%s1475_s3 + $0x38] sm:$0xff]  }
   0x8   :  { %v409_v30 = vadd.f32 %v735_v6, %v217_v21  ;;  %v410_v31 = vadd.f32 %v736_v7, %v218_v22  ;;  %v155_v36 = vmul.f32 %v956_v1, %v619_v29  ;;  %v747_v37 = vunpack.c.l.bf16 %v894_v25 }
   0x9   :  { %v411_v41 = vadd.f32 %v739_v14, %v219_v32  ;;  %v222_v42 = vadd.f32 %v961_v3, %v154_v33  ;;  %v412_v43 = vadd.f32 %v740_v18, %v220_v34  ;;  %v413_v44 = vadd.f32 %v743_v20, %v221_v35  ;;  %v867_v18 = vld [vmem:[%s1474_s2 + $0x38] sm:$0xff]   ;;  %v868_v32 = vld [vmem:[%s1474_s2 + $0x40] sm:$0xff]  }
   0xa   :  { %v473_v39 = vmax.f32 %v409_v30, 0.0  ;;  %v474_v40 = vmax.f32 %v410_v31, 0.0  ;;  %v223_v45 = vadd.f32 %v961_v3, %v155_v36  ;;  %v620_v46 = vunpack.c.h.bf16 %v863_v16 }
   0xb   :  { %v475_v48 = vmax.f32 %v411_v41, 0.0  ;;  %v414_v49 = vadd.f32 %v744_v28, %v222_v42  ;;  %v748_v50 = vunpack.c.h.bf16 %v894_v25  ;;  %v623_v51 = vunpack.c.l.bf16 %v864_v38 }
   0xc   :  { %537 = vst [vmem:[%s1476_s4] sm:$0xff] %v473_v39  ;;  %v476_v53 = vmax.f32 %v412_v43, 0.0  ;;  %v477_v54 = vmax.f32 %v413_v44, 0.0  ;;  %v415_v55 = vadd.f32 %v747_v37, %v223_v45  ;;  %v156_v56 = vmul.f32 %v956_v1, %v620_v46  ;;  %v899_v37 = vld [vmem:[%s1475_s3 + $0x40] sm:$0xff]   ;;  %v869_v46 = vld [vmem:[%s1474_s2 + $0x48] sm:$0xff]  }
   0xd   :  { %538 = vst [vmem:[%s1476_s4 + $0x8] sm:$0xff] %v474_v40  ;;  %v478_v58 = vmax.f32 %v414_v49, 0.0  ;;  %v157_v59 = vmul.f32 %v956_v1, %v623_v51  ;;  %v751_v60 = vunpack.c.l.bf16 %v895_v47  ;;  %v624_v61 = vunpack.c.h.bf16 %v864_v38 }
   0xe   :  { %539 = vst [vmem:[%s1476_s4 + $0x10] sm:$0xff] %v475_v48  ;;  %v479_v63 = vmax.f32 %v415_v55, 0.0  ;;  %v224_v0 = vadd.f32 %v961_v3, %v156_v56  ;;  %v752_v2 = vunpack.c.h.bf16 %v895_v47  ;;  %v627_v4 = vunpack.c.l.bf16 %v865_v52  ;;  %v900_v47 = vld [vmem:[%s1475_s3 + $0x48] sm:$0xff]   ;;  %v870_v56 = vld [vmem:[%s1474_s2 + $0x50] sm:$0xff]  }
   0xf   :  { %540 = vst [vmem:[%s1476_s4 + $0x18] sm:$0xff] %v476_v53  ;;  %v225_v6 = vadd.f32 %v961_v3, %v157_v59  ;;  %v158_v7 = vmul.f32 %v956_v1, %v624_v61  ;;  %v755_v8 = vunpack.c.l.bf16 %v896_v57  ;;  %v628_v9 = vunpack.c.h.bf16 %v865_v52 }
  0x10   :  { %541 = vst [vmem:[%s1476_s4 + $0x20] sm:$0xff] %v477_v54  ;;  %v416_v10 = vadd.f32 %v748_v50, %v224_v0  ;;  %v159_v11 = vmul.f32 %v956_v1, %v627_v4  ;;  %v756_v12 = vunpack.c.h.bf16 %v896_v57  ;;  %v631_v13 = vunpack.c.l.bf16 %v866_v62 }
  0x11   :  { %542 = vst [vmem:[%s1476_s4 + $0x28] sm:$0xff] %v478_v58  ;;  %v417_v14 = vadd.f32 %v751_v60, %v225_v6  ;;  %v226_v15 = vadd.f32 %v961_v3, %v158_v7  ;;  %v160_v16 = vmul.f32 %v956_v1, %v628_v9  ;;  %v759_v17 = vunpack.c.l.bf16 %v897_v5 }
  0x12   :  { %543 = vst [vmem:[%s1476_s4 + $0x30] sm:$0xff] %v479_v63  ;;  %v480_v19 = vmax.f32 %v416_v10, 0.0  ;;  %v227_v20 = vadd.f32 %v961_v3, %v159_v11  ;;  %v161_v21 = vmul.f32 %v956_v1, %v631_v13  ;;  %v632_v22 = vunpack.c.h.bf16 %v866_v62 }
  0x13   :  { %v481_v24 = vmax.f32 %v417_v14, 0.0  ;;  %v418_v25 = vadd.f32 %v752_v2, %v226_v15  ;;  %v228_v26 = vadd.f32 %v961_v3, %v160_v16  ;;  %v760_v27 = vunpack.c.h.bf16 %v897_v5  ;;  %v901_v2 = vld [vmem:[%s1475_s3 + $0x50] sm:$0xff]  }
  0x14   :  { %544 = vst [vmem:[%s1476_s4 + $0x38] sm:$0xff] %v480_v19  ;;  %v419_v28 = vadd.f32 %v755_v8, %v227_v20  ;;  %v229_v29 = vadd.f32 %v961_v3, %v161_v21  ;;  %v162_v30 = vmul.f32 %v956_v1, %v632_v22  ;;  %v635_v31 = vunpack.c.l.bf16 %v867_v18 }
  0x15   :  { %545 = vst [vmem:[%s1476_s4 + $0x40] sm:$0xff] %v481_v24  ;;  %v482_v33 = vmax.f32 %v418_v25, 0.0  ;;  %v420_v34 = vadd.f32 %v756_v12, %v228_v26  ;;  %v763_v35 = vunpack.c.l.bf16 %v898_v23  ;;  %v636_v36 = vunpack.c.h.bf16 %v867_v18  ;;  %v871_v12 = vld [vmem:[%s1474_s2 + $0x58] sm:$0xff]   ;;  %v872_v26 = vld [vmem:[%s1474_s2 + $0x60] sm:$0xff]  }
  0x16   :  { %v483_v38 = vmax.f32 %v419_v28, 0.0  ;;  %v421_v39 = vadd.f32 %v759_v17, %v229_v29  ;;  %v230_v40 = vadd.f32 %v961_v3, %v162_v30  ;;  %v163_v41 = vmul.f32 %v956_v1, %v635_v31  ;;  %v902_v17 = vld [vmem:[%s1475_s3 + $0x58] sm:$0xff]   ;;  %v903_v31 = vld [vmem:[%s1475_s3 + $0x60] sm:$0xff]  }
  0x17   :  { %546 = vst [vmem:[%s1476_s4 + $0x48] sm:$0xff] %v482_v33  ;;  %v484_v42 = vmax.f32 %v420_v34, 0.0  ;;  %v164_v43 = vmul.f32 %v956_v1, %v636_v36  ;;  %v764_v44 = vunpack.c.h.bf16 %v898_v23  ;;  %v639_v45 = vunpack.c.l.bf16 %v868_v32 }
  0x18   :  { %547 = vst [vmem:[%s1476_s4 + $0x50] sm:$0xff] %v483_v38  ;;  %v485_v48 = vmax.f32 %v421_v39, 0.0  ;;  %v422_v49 = vadd.f32 %v760_v27, %v230_v40  ;;  %v231_v50 = vadd.f32 %v961_v3, %v163_v41  ;;  %v767_v51 = vunpack.c.l.bf16 %v899_v37  ;;  %v873_v40 = vld [vmem:[%s1474_s2 + $0x68] sm:$0xff]  }
  0x19   :  { %548 = vst [vmem:[%s1476_s4 + $0x58] sm:$0xff] %v484_v42  ;;  %v232_v52 = vadd.f32 %v961_v3, %v164_v43  ;;  %v165_v53 = vmul.f32 %v956_v1, %v639_v45  ;;  %v640_v54 = vunpack.c.h.bf16 %v868_v32  ;;  %v768_v55 = vunpack.c.h.bf16 %v899_v37  ;;  %v904_v41 = vld [vmem:[%s1475_s3 + $0x68] sm:$0xff]  }
  0x1a   :  { %549 = vst [vmem:[%s1476_s4 + $0x60] sm:$0xff] %v485_v48  ;;  %v486_v57 = vmax.f32 %v422_v49, 0.0  ;;  %v423_v58 = vadd.f32 %v763_v35, %v231_v50  ;;  %v643_v59 = vunpack.c.l.bf16 %v869_v46  ;;  %v771_v60 = vunpack.c.l.bf16 %v900_v47  ;;  %v874_v50 = vld [vmem:[%s1474_s2 + $0x70] sm:$0xff]  }
  0x1b   :  { %v424_v61 = vadd.f32 %v764_v44, %v232_v52  ;;  %v233_v62 = vadd.f32 %v961_v3, %v165_v53  ;;  %v166_v63 = vmul.f32 %v956_v1, %v640_v54  ;;  %v644_v0 = vunpack.c.h.bf16 %v869_v46 }
  0x1c   :  { %550 = vst [vmem:[%s1476_s4 + $0x68] sm:$0xff] %v486_v57  ;;  %v487_v4 = vmax.f32 %v423_v58, 0.0  ;;  %v167_v5 = vmul.f32 %v956_v1, %v643_v59  ;;  %v772_v6 = vunpack.c.h.bf16 %v900_v47  ;;  %v647_v7 = vunpack.c.l.bf16 %v870_v56  ;;  %v905_v59 = vld [vmem:[%s1475_s3 + $0x70] sm:$0xff]  }
  0x1d   :  { %v488_v8 = vmax.f32 %v424_v61, 0.0  ;;  %v425_v9 = vadd.f32 %v767_v51, %v233_v62  ;;  %v234_v10 = vadd.f32 %v961_v3, %v166_v63  ;;  %v168_v11 = vmul.f32 %v956_v1, %v644_v0 }
  0x1e   :  { %551 = vst [vmem:[%s1476_s4 + $0x70] sm:$0xff] %v487_v4  ;;  %v235_v13 = vadd.f32 %v961_v3, %v167_v5  ;;  %v169_v14 = vmul.f32 %v956_v1, %v647_v7  ;;  %v775_v15 = vunpack.c.l.bf16 %v901_v2  ;;  %v648_v16 = vunpack.c.h.bf16 %v870_v56 }
  0x1f   :  { %552 = vst [vmem:[%s1476_s4 + $0x78] sm:$0xff] %v488_v8  ;;  %v489_v18 = vmax.f32 %v425_v9, 0.0  ;;  %v426_v19 = vadd.f32 %v768_v55, %v234_v10  ;;  %v236_v20 = vadd.f32 %v961_v3, %v168_v11  ;;  %v776_v21 = vunpack.c.h.bf16 %v901_v2  ;;  %v906_v11 = vld [vmem:[%s1475_s3 + $0x78] sm:$0xff]  }
  0x20   :  { %v427_v22 = vadd.f32 %v771_v60, %v235_v13  ;;  %v237_v23 = vadd.f32 %v961_v3, %v169_v14  ;;  %v170_v24 = vmul.f32 %v956_v1, %v648_v16  ;;  %v651_v25 = vunpack.c.l.bf16 %v871_v12 }
  0x21   :  { %553 = vst [vmem:[%s1476_s4 + $0x80] sm:$0xff] %v489_v18  ;;  %v490_v27 = vmax.f32 %v426_v19, 0.0  ;;  %v428_v28 = vadd.f32 %v772_v6, %v236_v20  ;;  %v779_v29 = vunpack.c.l.bf16 %v902_v17  ;;  %v652_v30 = vunpack.c.h.bf16 %v871_v12  ;;  %v875_v6 = vld [vmem:[%s1474_s2 + $0x78] sm:$0xff]   ;;  %v876_v20 = vld [vmem:[%s1474_s2 + $0x80] sm:$0xff]  }
  0x22   :  { %v491_v32 = vmax.f32 %v427_v22, 0.0  ;;  %v429_v33 = vadd.f32 %v775_v15, %v237_v23  ;;  %v238_v34 = vadd.f32 %v961_v3, %v170_v24  ;;  %v171_v35 = vmul.f32 %v956_v1, %v651_v25  ;;  %v907_v25 = vld [vmem:[%s1475_s3 + $0x80] sm:$0xff]  }
  0x23   :  { %554 = vst [vmem:[%s1476_s4 + $0x88] sm:$0xff] %v490_v27  ;;  %v492_v36 = vmax.f32 %v428_v28, 0.0  ;;  %v172_v37 = vmul.f32 %v956_v1, %v652_v30  ;;  %v780_v38 = vunpack.c.h.bf16 %v902_v17  ;;  %v655_v39 = vunpack.c.l.bf16 %v872_v26 }
  0x24   :  { %555 = vst [vmem:[%s1476_s4 + $0x90] sm:$0xff] %v491_v32  ;;  %v493_v42 = vmax.f32 %v429_v33, 0.0  ;;  %v430_v43 = vadd.f32 %v776_v21, %v238_v34  ;;  %v239_v44 = vadd.f32 %v961_v3, %v171_v35  ;;  %v783_v45 = vunpack.c.l.bf16 %v903_v31  ;;  %v877_v34 = vld [vmem:[%s1474_s2 + $0x88] sm:$0xff]  }
  0x25   :  { %556 = vst [vmem:[%s1476_s4 + $0x98] sm:$0xff] %v492_v36  ;;  %v240_v46 = vadd.f32 %v961_v3, %v172_v37  ;;  %v173_v47 = vmul.f32 %v956_v1, %v655_v39  ;;  %v656_v48 = vunpack.c.h.bf16 %v872_v26  ;;  %v784_v49 = vunpack.c.h.bf16 %v903_v31  ;;  %v908_v35 = vld [vmem:[%s1475_s3 + $0x88] sm:$0xff]  }
  0x26   :  { %557 = vst [vmem:[%s1476_s4 + $0xa0] sm:$0xff] %v493_v42  ;;  %v494_v51 = vmax.f32 %v430_v43, 0.0  ;;  %v431_v52 = vadd.f32 %v779_v29, %v239_v44  ;;  %v659_v53 = vunpack.c.l.bf16 %v873_v40  ;;  %v787_v54 = vunpack.c.l.bf16 %v904_v41  ;;  %v878_v44 = vld [vmem:[%s1474_s2 + $0x90] sm:$0xff]  }
  0x27   :  { %v432_v55 = vadd.f32 %v780_v38, %v240_v46  ;;  %v241_v56 = vadd.f32 %v961_v3, %v173_v47  ;;  %v174_v57 = vmul.f32 %v956_v1, %v656_v48  ;;  %v660_v58 = vunpack.c.h.bf16 %v873_v40 }
  0x28   :  { %558 = vst [vmem:[%s1476_s4 + $0xa8] sm:$0xff] %v494_v51  ;;  %v495_v60 = vmax.f32 %v431_v52, 0.0  ;;  %v175_v61 = vmul.f32 %v956_v1, %v659_v53  ;;  %v788_v62 = vunpack.c.h.bf16 %v904_v41  ;;  %v663_v63 = vunpack.c.l.bf16 %v874_v50  ;;  %v909_v53 = vld [vmem:[%s1475_s3 + $0x90] sm:$0xff]  }
  0x29   :  { %v496_v0 = vmax.f32 %v432_v55, 0.0  ;;  %v433_v2 = vadd.f32 %v783_v45, %v241_v56  ;;  %v242_v4 = vadd.f32 %v961_v3, %v174_v57  ;;  %v176_v5 = vmul.f32 %v956_v1, %v660_v58 }
  0x2a   :  { %559 = vst [vmem:[%s1476_s4 + $0xb0] sm:$0xff] %v495_v60  ;;  %v243_v7 = vadd.f32 %v961_v3, %v175_v61  ;;  %v177_v8 = vmul.f32 %v956_v1, %v663_v63  ;;  %v791_v9 = vunpack.c.l.bf16 %v905_v59  ;;  %v664_v10 = vunpack.c.h.bf16 %v874_v50 }
  0x2b   :  { %560 = vst [vmem:[%s1476_s4 + $0xb8] sm:$0xff] %v496_v0  ;;  %v497_v12 = vmax.f32 %v433_v2, 0.0  ;;  %v434_v13 = vadd.f32 %v784_v49, %v242_v4  ;;  %v244_v14 = vadd.f32 %v961_v3, %v176_v5  ;;  %v792_v15 = vunpack.c.h.bf16 %v905_v59  ;;  %v910_v5 = vld [vmem:[%s1475_s3 + $0x98] sm:$0xff]  }
  0x2c   :  { %v435_v16 = vadd.f32 %v787_v54, %v243_v7  ;;  %v245_v17 = vadd.f32 %v961_v3, %v177_v8  ;;  %v178_v18 = vmul.f32 %v956_v1, %v664_v10  ;;  %v667_v19 = vunpack.c.l.bf16 %v875_v6 }
  0x2d   :  { %561 = vst [vmem:[%s1476_s4 + $0xc0] sm:$0xff] %v497_v12  ;;  %v498_v21 = vmax.f32 %v434_v13, 0.0  ;;  %v436_v22 = vadd.f32 %v788_v62, %v244_v14  ;;  %v795_v23 = vunpack.c.l.bf16 %v906_v11  ;;  %v668_v24 = vunpack.c.h.bf16 %v875_v6  ;;  %v879_v62 = vld [vmem:[%s1474_s2 + $0x98] sm:$0xff]   ;;  %v880_v14 = vld [vmem:[%s1474_s2 + $0xa0] sm:$0xff]  }
  0x2e   :  { %v499_v26 = vmax.f32 %v435_v16, 0.0  ;;  %v437_v27 = vadd.f32 %v791_v9, %v245_v17  ;;  %v246_v28 = vadd.f32 %v961_v3, %v178_v18  ;;  %v179_v29 = vmul.f32 %v956_v1, %v667_v19  ;;  %v911_v19 = vld [vmem:[%s1475_s3 + $0xa0] sm:$0xff]  }
  0x2f   :  { %562 = vst [vmem:[%s1476_s4 + $0xc8] sm:$0xff] %v498_v21  ;;  %v500_v30 = vmax.f32 %v436_v22, 0.0  ;;  %v180_v31 = vmul.f32 %v956_v1, %v668_v24  ;;  %v796_v32 = vunpack.c.h.bf16 %v906_v11  ;;  %v671_v33 = vunpack.c.l.bf16 %v876_v20 }
  0x30   :  { %563 = vst [vmem:[%s1476_s4 + $0xd0] sm:$0xff] %v499_v26  ;;  %v501_v36 = vmax.f32 %v437_v27, 0.0  ;;  %v438_v37 = vadd.f32 %v792_v15, %v246_v28  ;;  %v247_v38 = vadd.f32 %v961_v3, %v179_v29  ;;  %v799_v39 = vunpack.c.l.bf16 %v907_v25  ;;  %v881_v28 = vld [vmem:[%s1474_s2 + $0xa8] sm:$0xff]  }
  0x31   :  { %564 = vst [vmem:[%s1476_s4 + $0xd8] sm:$0xff] %v500_v30  ;;  %v248_v40 = vadd.f32 %v961_v3, %v180_v31  ;;  %v181_v41 = vmul.f32 %v956_v1, %v671_v33  ;;  %v672_v42 = vunpack.c.h.bf16 %v876_v20  ;;  %v800_v43 = vunpack.c.h.bf16 %v907_v25  ;;  %v912_v29 = vld [vmem:[%s1475_s3 + $0xa8] sm:$0xff]  }
  0x32   :  { %565 = vst [vmem:[%s1476_s4 + $0xe0] sm:$0xff] %v501_v36  ;;  %v502_v45 = vmax.f32 %v438_v37, 0.0  ;;  %v439_v46 = vadd.f32 %v795_v23, %v247_v38  ;;  %v675_v47 = vunpack.c.l.bf16 %v877_v34  ;;  %v803_v48 = vunpack.c.l.bf16 %v908_v35  ;;  %v882_v38 = vld [vmem:[%s1474_s2 + $0xb0] sm:$0xff]  }
  0x33   :  { %v440_v49 = vadd.f32 %v796_v32, %v248_v40  ;;  %v249_v50 = vadd.f32 %v961_v3, %v181_v41  ;;  %v182_v51 = vmul.f32 %v956_v1, %v672_v42  ;;  %v676_v52 = vunpack.c.h.bf16 %v877_v34 }
  0x34   :  { %566 = vst [vmem:[%s1476_s4 + $0xe8] sm:$0xff] %v502_v45  ;;  %v503_v54 = vmax.f32 %v439_v46, 0.0  ;;  %v183_v55 = vmul.f32 %v956_v1, %v675_v47  ;;  %v804_v56 = vunpack.c.h.bf16 %v908_v35  ;;  %v679_v57 = vunpack.c.l.bf16 %v878_v44  ;;  %v913_v47 = vld [vmem:[%s1475_s3 + $0xb0] sm:$0xff]  }
  0x35   :  { %v504_v58 = vmax.f32 %v440_v49, 0.0  ;;  %v441_v59 = vadd.f32 %v799_v39, %v249_v50  ;;  %v250_v60 = vadd.f32 %v961_v3, %v182_v51  ;;  %v184_v61 = vmul.f32 %v956_v1, %v676_v52 }
  0x36   :  { %567 = vst [vmem:[%s1476_s4 + $0xf0] sm:$0xff] %v503_v54  ;;  %v251_v63 = vadd.f32 %v961_v3, %v183_v55  ;;  %v185_v0 = vmul.f32 %v956_v1, %v679_v57  ;;  %v807_v2 = vunpack.c.l.bf16 %v909_v53  ;;  %v680_v4 = vunpack.c.h.bf16 %v878_v44 }
  0x37   :  { %568 = vst [vmem:[%s1476_s4 + $0xf8] sm:$0xff] %v504_v58  ;;  %v505_v6 = vmax.f32 %v441_v59, 0.0  ;;  %v442_v7 = vadd.f32 %v800_v43, %v250_v60  ;;  %v252_v8 = vadd.f32 %v961_v3, %v184_v61  ;;  %v808_v9 = vunpack.c.h.bf16 %v909_v53  ;;  %v914_v61 = vld [vmem:[%s1475_s3 + $0xb8] sm:$0xff]  }
  0x38   :  { %v443_v10 = vadd.f32 %v803_v48, %v251_v63  ;;  %v253_v11 = vadd.f32 %v961_v3, %v185_v0  ;;  %v186_v12 = vmul.f32 %v956_v1, %v680_v4  ;;  %v683_v13 = vunpack.c.l.bf16 %v879_v62 }
  0x39   :  { %569 = vst [vmem:[%s1476_s4 + $0x100] sm:$0xff] %v505_v6  ;;  %v506_v15 = vmax.f32 %v442_v7, 0.0  ;;  %v444_v16 = vadd.f32 %v804_v56, %v252_v8  ;;  %v811_v17 = vunpack.c.l.bf16 %v910_v5  ;;  %v684_v18 = vunpack.c.h.bf16 %v879_v62  ;;  %v883_v56 = vld [vmem:[%s1474_s2 + $0xb8] sm:$0xff]   ;;  %v884_v8 = vld [vmem:[%s1474_s2 + $0xc0] sm:$0xff]  }
  0x3a   :  { %v507_v20 = vmax.f32 %v443_v10, 0.0  ;;  %v445_v21 = vadd.f32 %v807_v2, %v253_v11  ;;  %v254_v22 = vadd.f32 %v961_v3, %v186_v12  ;;  %v187_v23 = vmul.f32 %v956_v1, %v683_v13  ;;  %v915_v13 = vld [vmem:[%s1475_s3 + $0xc0] sm:$0xff]  }
  0x3b   :  { %570 = vst [vmem:[%s1476_s4 + $0x108] sm:$0xff] %v506_v15  ;;  %v508_v24 = vmax.f32 %v444_v16, 0.0  ;;  %v188_v25 = vmul.f32 %v956_v1, %v684_v18  ;;  %v812_v26 = vunpack.c.h.bf16 %v910_v5  ;;  %v687_v27 = vunpack.c.l.bf16 %v880_v14 }
  0x3c   :  { %571 = vst [vmem:[%s1476_s4 + $0x110] sm:$0xff] %v507_v20  ;;  %v509_v30 = vmax.f32 %v445_v21, 0.0  ;;  %v446_v31 = vadd.f32 %v808_v9, %v254_v22  ;;  %v255_v32 = vadd.f32 %v961_v3, %v187_v23  ;;  %v815_v33 = vunpack.c.l.bf16 %v911_v19  ;;  %v885_v22 = vld [vmem:[%s1474_s2 + $0xc8] sm:$0xff]  }
  0x3d   :  { %572 = vst [vmem:[%s1476_s4 + $0x118] sm:$0xff] %v508_v24  ;;  %v256_v34 = vadd.f32 %v961_v3, %v188_v25  ;;  %v189_v35 = vmul.f32 %v956_v1, %v687_v27  ;;  %v688_v36 = vunpack.c.h.bf16 %v880_v14  ;;  %v816_v37 = vunpack.c.h.bf16 %v911_v19  ;;  %v916_v23 = vld [vmem:[%s1475_s3 + $0xc8] sm:$0xff]  }
  0x3e   :  { %573 = vst [vmem:[%s1476_s4 + $0x120] sm:$0xff] %v509_v30  ;;  %v510_v39 = vmax.f32 %v446_v31, 0.0  ;;  %v447_v40 = vadd.f32 %v811_v17, %v255_v32  ;;  %v691_v41 = vunpack.c.l.bf16 %v881_v28  ;;  %v819_v42 = vunpack.c.l.bf16 %v912_v29  ;;  %v886_v32 = vld [vmem:[%s1474_s2 + $0xd0] sm:$0xff]  }
  0x3f   :  { %v448_v43 = vadd.f32 %v812_v26, %v256_v34  ;;  %v257_v44 = vadd.f32 %v961_v3, %v189_v35  ;;  %v190_v45 = vmul.f32 %v956_v1, %v688_v36  ;;  %v692_v46 = vunpack.c.h.bf16 %v881_v28 }
  0x40   :  { %574 = vst [vmem:[%s1476_s4 + $0x128] sm:$0xff] %v510_v39  ;;  %v511_v48 = vmax.f32 %v447_v40, 0.0  ;;  %v191_v49 = vmul.f32 %v956_v1, %v691_v41  ;;  %v820_v50 = vunpack.c.h.bf16 %v912_v29  ;;  %v695_v51 = vunpack.c.l.bf16 %v882_v38  ;;  %v917_v41 = vld [vmem:[%s1475_s3 + $0xd0] sm:$0xff]  }
  0x41   :  { %v512_v52 = vmax.f32 %v448_v43, 0.0  ;;  %v449_v53 = vadd.f32 %v815_v33, %v257_v44  ;;  %v258_v54 = vadd.f32 %v961_v3, %v190_v45  ;;  %v192_v55 = vmul.f32 %v956_v1, %v692_v46 }
  0x42   :  { %575 = vst [vmem:[%s1476_s4 + $0x130] sm:$0xff] %v511_v48  ;;  %v259_v57 = vadd.f32 %v961_v3, %v191_v49  ;;  %v193_v58 = vmul.f32 %v956_v1, %v695_v51  ;;  %v823_v59 = vunpack.c.l.bf16 %v913_v47  ;;  %v696_v60 = vunpack.c.h.bf16 %v882_v38 }
  0x43   :  { %576 = vst [vmem:[%s1476_s4 + $0x138] sm:$0xff] %v512_v52  ;;  %v513_v62 = vmax.f32 %v449_v53, 0.0  ;;  %v450_v63 = vadd.f32 %v816_v37, %v258_v54  ;;  %v260_v0 = vadd.f32 %v961_v3, %v192_v55  ;;  %v824_v2 = vunpack.c.h.bf16 %v913_v47  ;;  %v918_v55 = vld [vmem:[%s1475_s3 + $0xd8] sm:$0xff]  }
  0x44   :  { %v451_v4 = vadd.f32 %v819_v42, %v259_v57  ;;  %v261_v5 = vadd.f32 %v961_v3, %v193_v58  ;;  %v194_v6 = vmul.f32 %v956_v1, %v696_v60  ;;  %v699_v7 = vunpack.c.l.bf16 %v883_v56 }
  0x45   :  { %577 = vst [vmem:[%s1476_s4 + $0x140] sm:$0xff] %v513_v62  ;;  %v514_v9 = vmax.f32 %v450_v63, 0.0  ;;  %v452_v10 = vadd.f32 %v820_v50, %v260_v0  ;;  %v827_v11 = vunpack.c.l.bf16 %v914_v61  ;;  %v700_v12 = vunpack.c.h.bf16 %v883_v56  ;;  %v887_v50 = vld [vmem:[%s1474_s2 + $0xd8] sm:$0xff]   ;;  %v888_v0 = vld [vmem:[%s1474_s2 + $0xe0] sm:$0xff]  }
  0x46   :  { %v515_v14 = vmax.f32 %v451_v4, 0.0  ;;  %v453_v15 = vadd.f32 %v823_v59, %v261_v5  ;;  %v262_v16 = vadd.f32 %v961_v3, %v194_v6  ;;  %v195_v17 = vmul.f32 %v956_v1, %v699_v7  ;;  %v919_v7 = vld [vmem:[%s1475_s3 + $0xe0] sm:$0xff]  }
  0x47   :  { %578 = vst [vmem:[%s1476_s4 + $0x148] sm:$0xff] %v514_v9  ;;  %v516_v18 = vmax.f32 %v452_v10, 0.0  ;;  %v196_v19 = vmul.f32 %v956_v1, %v700_v12  ;;  %v828_v20 = vunpack.c.h.bf16 %v914_v61  ;;  %v703_v21 = vunpack.c.l.bf16 %v884_v8 }
  0x48   :  { %579 = vst [vmem:[%s1476_s4 + $0x150] sm:$0xff] %v515_v14  ;;  %v517_v24 = vmax.f32 %v453_v15, 0.0  ;;  %v454_v25 = vadd.f32 %v824_v2, %v262_v16  ;;  %v263_v26 = vadd.f32 %v961_v3, %v195_v17  ;;  %v831_v27 = vunpack.c.l.bf16 %v915_v13  ;;  %v889_v16 = vld [vmem:[%s1474_s2 + $0xe8] sm:$0xff]  }
  0x49   :  { %580 = vst [vmem:[%s1476_s4 + $0x158] sm:$0xff] %v516_v18  ;;  %v264_v28 = vadd.f32 %v961_v3, %v196_v19  ;;  %v197_v29 = vmul.f32 %v956_v1, %v703_v21  ;;  %v704_v30 = vunpack.c.h.bf16 %v884_v8  ;;  %v832_v31 = vunpack.c.h.bf16 %v915_v13  ;;  %v920_v17 = vld [vmem:[%s1475_s3 + $0xe8] sm:$0xff]  }
  0x4a   :  { %581 = vst [vmem:[%s1476_s4 + $0x160] sm:$0xff] %v517_v24  ;;  %v518_v33 = vmax.f32 %v454_v25, 0.0  ;;  %v455_v34 = vadd.f32 %v827_v11, %v263_v26  ;;  %v707_v35 = vunpack.c.l.bf16 %v885_v22  ;;  %v835_v36 = vunpack.c.l.bf16 %v916_v23  ;;  %v890_v26 = vld [vmem:[%s1474_s2 + $0xf0] sm:$0xff]  }
  0x4b   :  { %v456_v37 = vadd.f32 %v828_v20, %v264_v28  ;;  %v265_v38 = vadd.f32 %v961_v3, %v197_v29  ;;  %v198_v39 = vmul.f32 %v956_v1, %v704_v30  ;;  %v708_v40 = vunpack.c.h.bf16 %v885_v22 }
  0x4c   :  { %582 = vst [vmem:[%s1476_s4 + $0x168] sm:$0xff] %v518_v33  ;;  %v519_v42 = vmax.f32 %v455_v34, 0.0  ;;  %v199_v43 = vmul.f32 %v956_v1, %v707_v35  ;;  %v836_v44 = vunpack.c.h.bf16 %v916_v23  ;;  %v711_v45 = vunpack.c.l.bf16 %v886_v32  ;;  %v921_v35 = vld [vmem:[%s1475_s3 + $0xf0] sm:$0xff]  }
  0x4d   :  { %v520_v46 = vmax.f32 %v456_v37, 0.0  ;;  %v457_v47 = vadd.f32 %v831_v27, %v265_v38  ;;  %v266_v48 = vadd.f32 %v961_v3, %v198_v39  ;;  %v200_v49 = vmul.f32 %v956_v1, %v708_v40 }
  0x4e   :  { %583 = vst [vmem:[%s1476_s4 + $0x170] sm:$0xff] %v519_v42  ;;  %v267_v51 = vadd.f32 %v961_v3, %v199_v43  ;;  %v201_v52 = vmul.f32 %v956_v1, %v711_v45  ;;  %v839_v53 = vunpack.c.l.bf16 %v917_v41  ;;  %v712_v54 = vunpack.c.h.bf16 %v886_v32 }
  0x4f   :  { %584 = vst [vmem:[%s1476_s4 + $0x178] sm:$0xff] %v520_v46  ;;  %v521_v56 = vmax.f32 %v457_v47, 0.0  ;;  %v458_v57 = vadd.f32 %v832_v31, %v266_v48  ;;  %v268_v58 = vadd.f32 %v961_v3, %v200_v49  ;;  %v840_v59 = vunpack.c.h.bf16 %v917_v41  ;;  %v922_v49 = vld [vmem:[%s1475_s3 + $0xf8] sm:$0xff]  }
  0x50   :  { %v459_v60 = vadd.f32 %v835_v36, %v267_v51  ;;  %v269_v61 = vadd.f32 %v961_v3, %v201_v52  ;;  %v202_v62 = vmul.f32 %v956_v1, %v712_v54  ;;  %v715_v63 = vunpack.c.l.bf16 %v887_v50 }
  0x51   :  { %585 = vst [vmem:[%s1476_s4 + $0x180] sm:$0xff] %v521_v56  ;;  %v522_v2 = vmax.f32 %v458_v57, 0.0  ;;  %v460_v4 = vadd.f32 %v836_v44, %v268_v58  ;;  %v843_v5 = vunpack.c.l.bf16 %v918_v55  ;;  %v716_v6 = vunpack.c.h.bf16 %v887_v50  ;;  %v891_v44 = vld [vmem:[%s1474_s2 + $0xf8] sm:$0xff]  }
  0x52   :  { %v523_v8 = vmax.f32 %v459_v60, 0.0  ;;  %v461_v9 = vadd.f32 %v839_v53, %v269_v61  ;;  %v270_v10 = vadd.f32 %v961_v3, %v202_v62  ;;  %v203_v11 = vmul.f32 %v956_v1, %v715_v63 }
  0x53   :  { %586 = vst [vmem:[%s1476_s4 + $0x188] sm:$0xff] %v522_v2  ;;  %v524_v12 = vmax.f32 %v460_v4, 0.0  ;;  %v204_v13 = vmul.f32 %v956_v1, %v716_v6  ;;  %v844_v14 = vunpack.c.h.bf16 %v918_v55  ;;  %v719_v15 = vunpack.c.l.bf16 %v888_v0 }
  0x54   :  { %587 = vst [vmem:[%s1476_s4 + $0x190] sm:$0xff] %v523_v8  ;;  %v525_v18 = vmax.f32 %v461_v9, 0.0  ;;  %v462_v19 = vadd.f32 %v840_v59, %v270_v10  ;;  %v271_v20 = vadd.f32 %v961_v3, %v203_v11  ;;  %v847_v21 = vunpack.c.l.bf16 %v919_v7 }
  0x55   :  { %588 = vst [vmem:[%s1476_s4 + $0x198] sm:$0xff] %v524_v12  ;;  %v272_v22 = vadd.f32 %v961_v3, %v204_v13  ;;  %v205_v23 = vmul.f32 %v956_v1, %v719_v15  ;;  %v720_v24 = vunpack.c.h.bf16 %v888_v0  ;;  %v848_v25 = vunpack.c.h.bf16 %v919_v7 }
  0x56   :  { %589 = vst [vmem:[%s1476_s4 + $0x1a0] sm:$0xff] %v525_v18  ;;  %v526_v27 = vmax.f32 %v462_v19, 0.0  ;;  %v463_v28 = vadd.f32 %v843_v5, %v271_v20  ;;  %v723_v29 = vunpack.c.l.bf16 %v889_v16  ;;  %v851_v30 = vunpack.c.l.bf16 %v920_v17 }
  0x57   :  { %v464_v31 = vadd.f32 %v844_v14, %v272_v22  ;;  %v273_v32 = vadd.f32 %v961_v3, %v205_v23  ;;  %v206_v33 = vmul.f32 %v956_v1, %v720_v24  ;;  %v724_v34 = vunpack.c.h.bf16 %v889_v16 }
  0x58   :  { %590 = vst [vmem:[%s1476_s4 + $0x1a8] sm:$0xff] %v526_v27  ;;  %v527_v36 = vmax.f32 %v463_v28, 0.0  ;;  %v207_v37 = vmul.f32 %v956_v1, %v723_v29  ;;  %v852_v38 = vunpack.c.h.bf16 %v920_v17  ;;  %v727_v39 = vunpack.c.l.bf16 %v890_v26 }
  0x59   :  { %v528_v40 = vmax.f32 %v464_v31, 0.0  ;;  %v465_v41 = vadd.f32 %v847_v21, %v273_v32  ;;  %v274_v42 = vadd.f32 %v961_v3, %v206_v33  ;;  %v208_v43 = vmul.f32 %v956_v1, %v724_v34 }
  0x5a   :  { %591 = vst [vmem:[%s1476_s4 + $0x1b0] sm:$0xff] %v527_v36  ;;  %v275_v45 = vadd.f32 %v961_v3, %v207_v37  ;;  %v209_v46 = vmul.f32 %v956_v1, %v727_v39  ;;  %v855_v47 = vunpack.c.l.bf16 %v921_v35  ;;  %v728_v48 = vunpack.c.h.bf16 %v890_v26 }
  0x5b   :  { %592 = vst [vmem:[%s1476_s4 + $0x1b8] sm:$0xff] %v528_v40  ;;  %v529_v50 = vmax.f32 %v465_v41, 0.0  ;;  %v466_v51 = vadd.f32 %v848_v25, %v274_v42  ;;  %v276_v52 = vadd.f32 %v961_v3, %v208_v43  ;;  %v856_v53 = vunpack.c.h.bf16 %v921_v35 }
  0x5c   :  { %v467_v54 = vadd.f32 %v851_v30, %v275_v45  ;;  %v277_v55 = vadd.f32 %v961_v3, %v209_v46  ;;  %v210_v56 = vmul.f32 %v956_v1, %v728_v48  ;;  %v731_v57 = vunpack.c.l.bf16 %v891_v44 }
  0x5d   :  { %593 = vst [vmem:[%s1476_s4 + $0x1c0] sm:$0xff] %v529_v50  ;;  %v530_v58 = vmax.f32 %v466_v51, 0.0  ;;  %v468_v59 = vadd.f32 %v852_v38, %v276_v52  ;;  %v859_v60 = vunpack.c.l.bf16 %v922_v49  ;;  %v732_v61 = vunpack.c.h.bf16 %v891_v44 }
  0x5e   :  { %v531_v62 = vmax.f32 %v467_v54, 0.0  ;;  %v469_v63 = vadd.f32 %v855_v47, %v277_v55  ;;  %v278_v0 = vadd.f32 %v961_v3, %v210_v56  ;;  %v211_v2 = vmul.f32 %v956_v1, %v731_v57 }
  0x5f   :  { %594 = vst [vmem:[%s1476_s4 + $0x1c8] sm:$0xff] %v530_v58  ;;  %v532_v4 = vmax.f32 %v468_v59, 0.0  ;;  %v212_v5 = vmul.f32 %v956_v1, %v732_v61  ;;  %v860_v6 = vunpack.c.h.bf16 %v922_v49 }
  0x60   :  { %595 = vst [vmem:[%s1476_s4 + $0x1d0] sm:$0xff] %v531_v62  ;;  %v533_v7 = vmax.f32 %v469_v63, 0.0  ;;  %v470_v8 = vadd.f32 %v856_v53, %v278_v0  ;;  %v279_v9 = vadd.f32 %v961_v3, %v211_v2 }
  0x61   :  { %596 = vst [vmem:[%s1476_s4 + $0x1d8] sm:$0xff] %v532_v4  ;;  %v280_v10 = vadd.f32 %v961_v3, %v212_v5 }
  0x62   :  { %597 = vst [vmem:[%s1476_s4 + $0x1e0] sm:$0xff] %v533_v7  ;;  %v534_v1 = vmax.f32 %v470_v8, 0.0  ;;  %v471_v11 = vadd.f32 %v859_v60, %v279_v9 }
  0x63   :  { %v472_v12 = vadd.f32 %v860_v6, %v280_v10 }
  0x64   :  { %598 = vst [vmem:[%s1476_s4 + $0x1e8] sm:$0xff] %v534_v1  ;;  %v535_v13 = vmax.f32 %v471_v11, 0.0 }
  0x65   :  { %v536_v14 = vmax.f32 %v472_v12, 0.0 }
  0x66   :  { %599 = vst [vmem:[%s1476_s4 + $0x1f0] sm:$0xff] %v535_v13 }
  0x67   :  { %600 = vst [vmem:[%s1476_s4 + $0x1f8] sm:$0xff] %v536_v14 }

// kernel: bottleneck_forward.5
= control target key start
LH: loop header
LB: loop body
LE: loop exit
PB: predicated region body
PF: predicated region fallthrough
CT: control target
= control target key end

     0   :  { %s7592_s18 = smov 0   ;;  %s9070_s0 = inlined_call_operand.vmem [shape: f32[1,128], index: 0, kind: input, shape index: {}]   ;;  %s9071_s1 = inlined_call_operand.vmem [shape: f32[1,128], index: 1, kind: input, shape index: {}]   ;;  %s9072_s2 = inlined_call_operand.vmem [shape: bf16[2,16,16,128], index: 2, kind: input, shape index: {}]   ;;  %s9073_s3 = inlined_call_operand.vmem [shape: bf16[1152,128], index: 3, kind: input, shape index: {}]   ;;  %s9074_s4 = inlined_call_operand.vmem [shape: bf16[2,16,16,128], index: 4, kind: output, shape index: {0}]   ;;  %s9075_s5 = inlined_call_operand.vmem [shape: f32[2,2,128], index: 5, kind: output, shape index: {1}]  }
   0x1 LB: > { %s6198_s19 = sadd.s32 4294967295, %s7559_s18   ;;  %p6202_p0 = scmp.ge.s32.totalorder %s7559_s18, 1  ;;  %s7559_s18 = sphi %s7592_s18, %s16_s18  }
   0x2   : > { %p190_p1 = scmp.lt.s32.totalorder %s7559_s18, 3 }
   0x4   : > { %p191_p2 = pnand %p6202_p0, %p190_p1 }
   0x6   : > { %194 = sbr.rel (%p191_p2) target bundleno = 804 (0x324), region = 36 }
   0xb   : > { %v7275_v0 = vld [vmem:[%s9073_s3 + $0x38] sm:$0xff]  ;;  %p222_p3 = scmp.lt.s32.totalorder %s6198_s19, 1  ;;  %vm437_vm0 = vcmask 1043459   ;;  %vm438_vm1 = vsmask.f32 7950  ;;  %v7274_v1 = vld [vmem:[%s9073_s3 + $0x30] sm:$0xff] }
   0xc   : > { %7514 = vmatpush.bf16.msra.mxu1 %v7275_v0  ;;  %7515 = vmatpush.bf16.msra.mxu2 %v7275_v0  ;;  %v7612_v2 = vld [vmem:[%s9070_s0] ss:$0 sm:$0xff]  ;;  %vm7614_vm2 = vmand %vm437_vm0, %vm438_vm1  ;;  %v470_v4 = vld [vmem:[#allocation2 + $0x40] sm:$0x8]  ;;  %v7561_v23 = vmov 0   ;;  %vm445_vm6 = vcmask 1040384  }
   0xd   : > { %s9106_s19 = smov (!%p222_p3, %s6198_s19), 1  ;;  %7516 = vmatpush.bf16.msra.mxu3 %v7275_v0  ;;  %5139 = vmatpush.bf16.msra.mxu0 %v7275_v0  ;;  %v7628_v5 = vld [vmem:[%s9071_s1] ss:$0 sm:$0xff]  ;;  %v471_v6 = vsel %vm7614_vm2, 0, %v470_v4  ;;  %v482_v7 = vld [vmem:[#allocation2 + $0x80] sm:$0x8] }
   0xe   : > { %s7122_s24 = sshll.u32 %s9106_s19, 7  ;;  %v7273_v8 = vld [vmem:[%s9073_s3 + $0x28] sm:$0xff]  ;;  %472 = vst [vmem:[#allocation2 + $0x40] sm:$0x8] %v471_v6  ;;  %v483_v11 = vsel %vm7614_vm2, 0, %v482_v7  ;;  %v7272_v29 = vld [vmem:[%s9073_s3 + $0x20] sm:$0xff] }
   0xf   : > { %s7623_s29 = scalar_lea.vmem %s9072_s2, %s7122_s24  ;;  %484 = vst [vmem:[#allocation2 + $0x80] sm:$0x8] %v483_v11  ;;  %v494_v17 = vld [vmem:[#allocation2 + $0xc0] sm:$0x8]  ;;  %vm446_vm3 = vsmask.f32 256  ;;  %s8824_s9 = scalar_lea.vmem %s9074_s4, %s7122_s24 }
  0x10   : > { %7517 = vmatpush.bf16.msra.mxu1 %v7274_v1  ;;  %7518 = vmatpush.bf16.msra.mxu2 %v7274_v1  ;;  %v7486_v9 = vld [vmem:[%s7623_s29 + $0x18] sm:$0xff]   ;;  %v7487_v18 = vld [vmem:[%s7623_s29 + $0x20] sm:$0xff]   ;;  %v495_v21 = vsel %vm7614_vm2, 0, %v494_v17  ;;  %443 = vst [vmem:[#allocation2 + $0x4] sm:$0xf] %v7561_v23  ;;  %v7270_v58 = vld [vmem:[%s9073_s3 + $0x10] sm:$0xff] }
  0x11   : > { %v7490_v10 = vld [vmem:[%s7623_s29 + $0x38] sm:$0xff]   ;;  %7519 = vmatpush.bf16.msra.mxu3 %v7274_v1  ;;  %5140 = vmatpush.bf16.msra.mxu0 %v7274_v1  ;;  %v7354_v12 = vunpack.c.l.bf16 %v7486_v9  ;;  %v7355_v13 = vunpack.c.h.bf16 %v7486_v9  ;;  %v440_v22 = vld [vmem:[#allocation2] sm:$0x8]  ;;  %v7358_v24 = vunpack.c.l.bf16 %v7487_v18  ;;  %496 = vst [vmem:[#allocation2 + $0xc0] sm:$0x8] %v495_v21  ;;  %v7359_v33 = vunpack.c.h.bf16 %v7487_v18  ;;  %vm7996_vm7 = vmand %vm445_vm6, %vm446_vm3  ;;  %s6207_s24 = sshll.u32 %s9106_s19, 1 }
  0x12   : > { %v7370_v14 = vunpack.c.l.bf16 %v7490_v10  ;;  %v7371_v15 = vunpack.c.h.bf16 %v7490_v10  ;;  %v7494_v16 = vld [vmem:[%s7623_s29 + $0x58] sm:$0xff]   ;;  %v441_v32 = vsel %vm7614_vm2, 0, %v440_v22  ;;  %444 = vst [vmem:[#allocation2 + $0x8] sm:$0xf] %v7561_v23  ;;  %vm637_vm4 = vsmask.f32 4368  ;;  %s235_s12 = scalar_lea.vmem %s9075_s5, %s6207_s24 }
  0x13   : > { %v7386_v19 = vunpack.c.l.bf16 %v7494_v16  ;;  %v7387_v20 = vunpack.c.h.bf16 %v7494_v16  ;;  %v311_v25 = vmul.f32 %v7612_v2, %v7354_v12  ;;  %v312_v26 = vmul.f32 %v7612_v2, %v7355_v13  ;;  %442 = vst [vmem:[#allocation2] sm:$0x8] %v441_v32  ;;  %v7271_v41 = vld [vmem:[%s9073_s3 + $0x18] sm:$0xff]  ;;  %v7491_v57 = vld [vmem:[%s7623_s29 + $0x40] sm:$0xff]   ;;  %v473_v9 = vld [vmem:[#allocation2 + $0x50] sm:$0x8] }
  0x14   : > { %v319_v27 = vmul.f32 %v7612_v2, %v7370_v14  ;;  %v320_v28 = vmul.f32 %v7612_v2, %v7371_v15  ;;  %7520 = vmatpush.bf16.msra.mxu1 %v7273_v8  ;;  %7521 = vmatpush.bf16.msra.mxu2 %v7273_v8  ;;  %455 = vst [vmem:[#allocation2 + $0x114] sm:$0xf] %v7561_v23  ;;  %v7672_v0 = vld [vmem:[%s7623_s29 + $0x60] sm:$0xff]   ;;  %v7374_v13 = vunpack.c.l.bf16 %v7491_v57  ;;  %v7375_v14 = vunpack.c.h.bf16 %v7491_v57  ;;  %v7682_v22 = vld [vmem:[#allocation2 + $0x90] sm:$0x8]  ;;  %vm7693_vm5 = vmor %vm446_vm3, %vm637_vm4 }
  0x15   : > { %v327_v30 = vmul.f32 %v7612_v2, %v7386_v19  ;;  %v328_v31 = vmul.f32 %v7612_v2, %v7387_v20  ;;  %7522 = vmatpush.bf16.msra.mxu3 %v7273_v8  ;;  %5141 = vmatpush.bf16.msra.mxu0 %v7273_v8  ;;  %v347_v34 = vadd.f32 %v7628_v5, %v311_v25  ;;  %v601_v44 = vld [vmem:[#allocation2 + $0x40] sm:$0x8]  ;;  %v474_v32 = vsel %vm7614_vm2, 0, %v473_v9 }
  0x16   : > { %v348_v35 = vadd.f32 %v7628_v5, %v312_v26  ;;  %v355_v36 = vadd.f32 %v7628_v5, %v319_v27  ;;  %v356_v37 = vadd.f32 %v7628_v5, %v320_v28  ;;  %v313_v40 = vmul.f32 %v7612_v2, %v7358_v24  ;;  %v613_v49 = vld [vmem:[#allocation2 + $0x80] sm:$0x8]  ;;  %456 = vst [vmem:[#allocation2 + $0x118] sm:$0xf] %v7561_v23  ;;  %v7269_v28 = vld [vmem:[%s9073_s3 + $0x8] sm:$0xff] }
  0x17   : > { %v363_v38 = vadd.f32 %v7628_v5, %v327_v30  ;;  %v364_v39 = vadd.f32 %v7628_v5, %v328_v31  ;;  %v379_v42 = vmax.f32 %v347_v34, 0.0  ;;  %v314_v46 = vmul.f32 %v7612_v2, %v7359_v33  ;;  %v590_v56 = vld [vmem:[#allocation2 + $0x4] sm:$0xf]  ;;  %475 = vst [vmem:[#allocation2 + $0x50] sm:$0x8] %v474_v32 }
  0x18   : > { %v380_v43 = vmax.f32 %v348_v35, 0.0  ;;  %v387_v45 = vmax.f32 %v355_v36, 0.0  ;;  %7523 = vmatpush.bf16.msra.mxu1 %v7272_v29  ;;  %7524 = vmatpush.bf16.msra.mxu2 %v7272_v29  ;;  %v728_v47 = vshrl.u32 %v601_v44, 16  ;;  %v388_v48 = vmax.f32 %v356_v37, 0.0  ;;  %v625_v63 = vld [vmem:[#allocation2 + $0xc0] sm:$0x8] }
  0x19   : > { %v395_v50 = vmax.f32 %v363_v38, 0.0  ;;  %v396_v51 = vmax.f32 %v364_v39, 0.0  ;;  %7525 = vmatpush.bf16.msra.mxu3 %v7272_v29  ;;  %5142 = vmatpush.bf16.msra.mxu0 %v7272_v29  ;;  %v411_v52 = vpack.c.bf16 %v379_v42, %v379_v42  ;;  %v816_v55 = vshrl.u32 %v613_v49, 16  ;;  %v591_v6 = vld [vmem:[#allocation2 + $0x8] sm:$0xf]  ;;  %v7701_v37 = vld [vmem:[%s7623_s29] sm:$0xff]  }
  0x1a   : > { %v412_v53 = vpack.c.bf16 %v380_v43, %v380_v43  ;;  %v419_v54 = vpack.c.bf16 %v387_v45, %v387_v45  ;;  %v7669_v59 = vrot.slane %v728_v47, 11  ;;  %v420_v60 = vpack.c.bf16 %v388_v48, %v388_v48  ;;  %v589_v10 = vld [vmem:[#allocation2] sm:$0x8] }
  0x1b   : > { %v427_v61 = vpack.c.bf16 %v395_v50, %v395_v50  ;;  %v428_v62 = vpack.c.bf16 %v396_v51, %v396_v51  ;;  %563 = vst [vmem:[#allocation2 + $0x44] sm:$0xf] %v411_v52  ;;  %v7674_v1 = vrot.slane %v816_v55, 11  ;;  %v904_v4 = vshrl.u32 %v625_v63, 16  ;;  %v7268_v38 = vld [vmem:[%s9073_s3] sm:$0xff]  ;;  %v7291_v52 = vld [vmem:[%s9073_s3 + $0xb8] sm:$0xff] }
  0x1c   : > { %v349_v7 = vadd.f32 %v7628_v5, %v313_v40  ;;  %v350_v8 = vadd.f32 %v7628_v5, %v314_v46  ;;  %7526 = vmatpush.bf16.msra.mxu1 %v7271_v41  ;;  %7527 = vmatpush.bf16.msra.mxu2 %v7271_v41  ;;  %564 = vst [vmem:[#allocation2 + $0x48] sm:$0xf] %v412_v53  ;;  %v645_v11 = vshrl.u32 %v590_v56, 16  ;;  %v648_v12 = vshll.u32 %v590_v56, 16  ;;  %v7299_v53 = vld [vmem:[%s9073_s3 + $0xf8] sm:$0xff] }
  0x1d   : > { %7528 = vmatpush.bf16.msra.mxu3 %v7271_v41  ;;  %5143 = vmatpush.bf16.msra.mxu0 %v7271_v41  ;;  %571 = vst [vmem:[#allocation2 + $0x84] sm:$0xf] %v419_v54  ;;  %v7678_v15 = vrot.slane %v904_v4, 11  ;;  %v640_v16 = vshrl.u32 %v589_v10, 16  ;;  %v654_v17 = vshrl.u32 %v591_v6, 16  ;;  %v657_v18 = vshll.u32 %v591_v6, 16 }
  0x1e   : > { %572 = vst [vmem:[#allocation2 + $0x88] sm:$0xf] %v420_v60  ;;  %v647_v19 = vrot.slane %v645_v11, 7  ;;  %v321_v20 = vmul.f32 %v7612_v2, %v7374_v13  ;;  %v322_v21 = vmul.f32 %v7612_v2, %v7375_v14  ;;  %v7390_v23 = vunpack.c.l.bf16 %v7672_v0  ;;  %v7307_v13 = vld [vmem:[%s9073_s3 + $0x138] sm:$0xff] }
  0x1f   : > { %579 = vst [vmem:[#allocation2 + $0xc4] sm:$0xf] %v427_v61  ;;  %v6208_v24 = vrot.slane %v640_v16, 11  ;;  %v656_v25 = vrot.slane %v654_v17, 7  ;;  %v381_v26 = vmax.f32 %v349_v7, 0.0  ;;  %v7391_v27 = vunpack.c.h.bf16 %v7672_v0  ;;  %v7283_v61 = vld [vmem:[%s9073_s3 + $0x78] sm:$0xff] }
  0x20   : > { %7529 = vmatpush.bf16.msra.mxu1 %v7270_v58  ;;  %7530 = vmatpush.bf16.msra.mxu2 %v7270_v58  ;;  %580 = vst [vmem:[#allocation2 + $0xc8] sm:$0xf] %v428_v62  ;;  %v650_v29 = vor.u32 %v648_v12, %v647_v19  ;;  %v652_v30 = vrot.slane %v647_v19, 4  ;;  %v382_v31 = vmax.f32 %v350_v8, 0.0  ;;  %v7698_v36 = vadd.f32 %v7628_v5, %v321_v20  ;;  %v7290_v19 = vld [vmem:[%s9073_s3 + $0xb0] sm:$0xff] }
  0x21   : > { %7531 = vmatpush.bf16.msra.mxu3 %v7270_v58  ;;  %5144 = vmatpush.bf16.msra.mxu0 %v7270_v58  ;;  %v659_v34 = vor.u32 %v657_v18, %v656_v25  ;;  %v413_v35 = vpack.c.bf16 %v381_v26, %v381_v26  ;;  %v7709_v42 = vadd.f32 %v7628_v5, %v322_v21  ;;  %v486_v43 = vsel %vm7614_vm2, 0, %v7682_v22  ;;  %v7298_v25 = vld [vmem:[%s9073_s3 + $0xf0] sm:$0xff] }
  0x22   : > { %v602_v39 = vld [vmem:[#allocation2 + $0x44] sm:$0xf]  ;;  %v651_v40 = vsel %vm7693_vm5, %v6208_v24, %v650_v29  ;;  %v414_v41 = vpack.c.bf16 %v382_v31, %v382_v31  ;;  %v7717_v48 = vmul.f32 %v7612_v2, %v7390_v23  ;;  %v7726_v54 = vmul.f32 %v7612_v2, %v7391_v27  ;;  %v7282_v26 = vld [vmem:[%s9073_s3 + $0x70] sm:$0xff]  ;;  %487 = vst [vmem:[#allocation2 + $0x90] sm:$0x8] %v486_v43 }
  0x23   : > { %v603_v44 = vld [vmem:[#allocation2 + $0x48] sm:$0xf]  ;;  %v733_v45 = vshrl.u32 %v602_v39, 16  ;;  %v736_v46 = vshll.u32 %v602_v39, 16  ;;  %v660_v47 = vsel %vm7693_vm5, %v652_v30, %v659_v34  ;;  %1023 = vst [vmem:[#allocation3] sm:$0xf] %v651_v40  ;;  %v7342_v55 = vunpack.c.l.bf16 %v7701_v37 }
  0x24   : > { %7532 = vmatpush.bf16.msra.mxu1 %v7269_v28  ;;  %7533 = vmatpush.bf16.msra.mxu2 %v7269_v28  ;;  %v742_v49 = vshrl.u32 %v603_v44, 16  ;;  %v745_v50 = vshll.u32 %v603_v44, 16  ;;  %v614_v51 = vld [vmem:[#allocation2 + $0x84] sm:$0xf]  ;;  %1024 = vst [vmem:[#allocation3 + $0x24] sm:$0xf] %v660_v47 }
  0x25   : > { %7534 = vmatpush.bf16.msra.mxu3 %v7269_v28  ;;  %5145 = vmatpush.bf16.msra.mxu0 %v7269_v28  ;;  %v735_v56 = vrot.slane %v733_v45, 7  ;;  %v615_v57 = vld [vmem:[#allocation2 + $0x88] sm:$0xf]  ;;  %v821_v58 = vshrl.u32 %v614_v51, 16  ;;  %v824_v60 = vshll.u32 %v614_v51, 16  ;;  %v389_v62 = vmax.f32 %v7698_v36, 0.0 }
  0x26   : > { %v744_v63 = vrot.slane %v742_v49, 7  ;;  %v830_v0 = vshrl.u32 %v615_v57, 16  ;;  %v833_v4 = vshll.u32 %v615_v57, 16  ;;  %v626_v6 = vld [vmem:[#allocation2 + $0xc4] sm:$0xf]  ;;  %v390_v7 = vmax.f32 %v7709_v42, 0.0 }
  0x27   : > { %v738_v8 = vor.u32 %v736_v46, %v735_v56  ;;  %v740_v9 = vrot.slane %v735_v56, 4  ;;  %v823_v10 = vrot.slane %v821_v58, 7  ;;  %v627_v11 = vld [vmem:[#allocation2 + $0xc8] sm:$0xf]  ;;  %v909_v12 = vshrl.u32 %v626_v6, 16 }
  0x28   : > { %7535 = vmatpush.bf16.msra.mxu1 %v7268_v38  ;;  %7536 = vmatpush.bf16.msra.mxu2 %v7268_v38  ;;  %v747_v14 = vor.u32 %v745_v50, %v744_v63  ;;  %v832_v16 = vrot.slane %v830_v0, 7  ;;  %v912_v17 = vshll.u32 %v626_v6, 16  ;;  %v918_v18 = vshrl.u32 %v627_v11, 16  ;;  %565 = vst [vmem:[#allocation2 + $0x54] sm:$0xf] %v413_v35  ;;  %v7488_v46 = vld [vmem:[%s7623_s29 + $0x28] sm:$0xff]  }
  0x29   : > { %7537 = vmatpush.bf16.msra.mxu3 %v7268_v38  ;;  %5146 = vmatpush.bf16.msra.mxu0 %v7268_v38  ;;  %v739_v20 = vsel %vm7693_vm5, %v7669_v59, %v738_v8  ;;  %v826_v21 = vor.u32 %v824_v60, %v823_v10  ;;  %v828_v23 = vrot.slane %v823_v10, 4  ;;  %v911_v24 = vrot.slane %v909_v12, 7  ;;  %566 = vst [vmem:[#allocation2 + $0x58] sm:$0xf] %v414_v41  ;;  %v604_v27 = vld [vmem:[#allocation2 + $0x50] sm:$0x8] }
  0x2a   : > { %v7749_v28 = vld [vmem:[#allocation2 + $0xd0] sm:$0x8]  ;;  %v748_v29 = vsel %vm7693_vm5, %v740_v9, %v747_v14  ;;  %1031 = vst [vmem:[#allocation3 + $0x120] sm:$0xf] %v739_v20  ;;  %v835_v59 = vor.u32 %v833_v4, %v832_v16  ;;  %v920_v30 = vrot.slane %v918_v18, 7  ;;  %v921_v31 = vshll.u32 %v627_v11, 16 }
  0x2b   : > { %v6258_v32 = vld [vmem:[#allocation3] sm:$0xf]  ;;  %1032 = vst [vmem:[#allocation3 + $0x144] sm:$0xf] %v748_v29  ;;  %v827_v34 = vsel %vm7693_vm5, %v7674_v1, %v826_v21  ;;  %v914_v35 = vor.u32 %v912_v17, %v911_v24  ;;  %v916_v36 = vrot.slane %v911_v24, 4  ;;  %v750_v39 = vshrl.u32 %v604_v27, 16 }
  0x2c   : > { %5317 = vmatpush.bf16.msrb.mxu2 %v7291_v52  ;;  %v7128_v38 = vld [vmem:[#allocation3 + $0x20] sm:$0xf0]  ;;  %5228 = vmatpush.bf16.msrb.mxu1 %v7283_v61  ;;  %v836_v40 = vsel %vm7693_vm5, %v828_v23, %v835_v59  ;;  %1039 = vst [vmem:[#allocation3 + $0x240] sm:$0xf] %v827_v34  ;;  %v923_v41 = vor.u32 %v921_v31, %v920_v30  ;;  %v461_v45 = vld [vmem:[#allocation2 + $0x10] sm:$0x8]  ;;  %v7362_v60 = vunpack.c.l.bf16 %v7488_v46  ;;  %v7363_v4 = vunpack.c.h.bf16 %v7488_v46 }
  0x2d   : > { %5406 = vmatpush.bf16.msrb.mxu3 %v7299_v53  ;;  %5495 = vmatpush.bf16.msrb.mxu0 %v7307_v13  ;;  %v6259_v42 = vor.u32 %v7128_v38, %v6258_v32  ;;  %v421_v44 = vpack.c.bf16 %v389_v62, %v389_v62  ;;  %1040 = vst [vmem:[#allocation3 + $0x264] sm:$0xf] %v836_v40  ;;  %v7762_v47 = vrot.slane %v750_v39, 11  ;;  %v498_v53 = vsel %vm7614_vm2, 0, %v7749_v28  ;;  %v7775_v56 = vld [vmem:[%s7623_s29 + $0x48] sm:$0xff]   ;;  %v7288_v46 = vld [vmem:[%s9073_s3 + $0xa0] sm:$0xff] }
  0x2e   : > { %v915_v1 = vsel %vm7693_vm5, %v7678_v15, %v914_v35  ;;  %v422_v49 = vpack.c.bf16 %v390_v7, %v390_v7  ;;  %v365_v50 = vadd.f32 %v7628_v5, %v7717_v48  ;;  %v924_v51 = vsel %vm7693_vm5, %v916_v36, %v923_v41  ;;  %499 = vst [vmem:[#allocation2 + $0xd0] sm:$0x8] %v498_v53  ;;  %v7289_v16 = vld [vmem:[%s9073_s3 + $0xa8] sm:$0xff]  ;;  %v7306_v36 = vld [vmem:[%s9073_s3 + $0x130] sm:$0xff] }
  0x2f   : > { %1047 = vst [vmem:[#allocation3 + $0x360] sm:$0xf] %v915_v1  ;;  %5147 = vmatmul.bf16.vlgmr.msra.gmra.mxu0 %v6259_v42  ;;  %v366_v52 = vadd.f32 %v7628_v5, %v7726_v54  ;;  %v7343_v15 = vunpack.c.h.bf16 %v7701_v37  ;;  %v605_v48 = vld [vmem:[#allocation2 + $0x54] sm:$0xf]  ;;  %v305_v58 = vmul.f32 %v7612_v2, %v7342_v55  ;;  %v462_v54 = vsel %vm7614_vm2, 0, %v461_v45  ;;  %v7297_v30 = vld [vmem:[%s9073_s3 + $0xe8] sm:$0xff] }
  0x30   : > { %5318 = vmatpush.bf16.msrb.mxu2 %v7290_v19  ;;  %1048 = vst [vmem:[#allocation3 + $0x384] sm:$0xf] %v924_v51  ;;  %5229 = vmatpush.bf16.msrb.mxu1 %v7282_v26  ;;  %v397_v57 = vmax.f32 %v365_v50, 0.0  ;;  %v606_v61 = vld [vmem:[#allocation2 + $0x58] sm:$0xf]  ;;  %v755_v62 = vshrl.u32 %v605_v48, 16  ;;  %v315_v22 = vmul.f32 %v7612_v2, %v7362_v60  ;;  %v316_v17 = vmul.f32 %v7612_v2, %v7363_v4 }
  0x31   : > { %5407 = vmatpush.bf16.msrb.mxu3 %v7298_v25  ;;  %v758_v63 = vshll.u32 %v605_v48, 16  ;;  %v306_v0 = vmul.f32 %v7612_v2, %v7343_v15  ;;  %v6402_v6 = vld [vmem:[#allocation3 + $0x120] sm:$0xf]  ;;  %v764_v7 = vshrl.u32 %v606_v61, 16  ;;  %v767_v37 = vshll.u32 %v606_v61, 16  ;;  %v7796_v19 = vld [vmem:[%s7623_s29 + $0x68] sm:$0xff]   ;;  %5496 = vmatpush.bf16.msrb.mxu0 %v7306_v36 }
  0x32   : > { %573 = vst [vmem:[#allocation2 + $0x94] sm:$0xf] %v421_v44  ;;  %v429_v55 = vpack.c.bf16 %v397_v57, %v397_v57  ;;  %v341_v8 = vadd.f32 %v7628_v5, %v305_v58  ;;  %v7164_v9 = vld [vmem:[#allocation3 + $0x140] sm:$0xf0]  ;;  %v757_v10 = vrot.slane %v755_v62, 7  ;;  %v398_v11 = vmax.f32 %v366_v52, 0.0 }
  0x33   : > { %574 = vst [vmem:[#allocation2 + $0x98] sm:$0xf] %v422_v49  ;;  %v342_v12 = vadd.f32 %v7628_v5, %v306_v0  ;;  %v6403_v43 = vor.u32 %v7164_v9, %v6402_v6  ;;  %v6546_v13 = vld [vmem:[#allocation3 + $0x240] sm:$0xf]  ;;  %v766_v14 = vrot.slane %v764_v7, 7  ;;  %v7378_v18 = vunpack.c.l.bf16 %v7775_v56  ;;  %v7799_v26 = vld [vmem:[%s7623_s29 + $0x8] sm:$0xff]  }
  0x34   : > { %v7200_v20 = vld [vmem:[#allocation3 + $0x260] sm:$0xf0]  ;;  %v760_v21 = vor.u32 %v758_v63, %v757_v10  ;;  %v762_v23 = vrot.slane %v757_v10, 4  ;;  %v430_v24 = vpack.c.bf16 %v398_v11, %v398_v11  ;;  %581 = vst [vmem:[#allocation2 + $0xd4] sm:$0xf] %v429_v55  ;;  %v373_v25 = vmax.f32 %v341_v8, 0.0  ;;  %5319 = vmatpush.bf16.msrb.mxu2 %v7289_v16 }
  0x35   : > { %5167 = vmatmul.bf16.vlgmr.msra.gmra.mxu1 %v6403_v43  ;;  %v6547_v27 = vor.u32 %v7200_v20, %v6546_v13  ;;  %v769_v29 = vor.u32 %v767_v37, %v766_v14  ;;  %v374_v59 = vmax.f32 %v342_v12, 0.0  ;;  %463 = vst [vmem:[#allocation2 + $0x10] sm:$0x8] %v462_v54  ;;  %v7379_v31 = vunpack.c.h.bf16 %v7775_v56  ;;  %v7281_v38 = vld [vmem:[%s9073_s3 + $0x68] sm:$0xff]  ;;  %v616_v44 = vld [vmem:[#allocation2 + $0x90] sm:$0x8]  ;;  %5408 = vmatpush.bf16.msrb.mxu3 %v7297_v30 }
  0x36   : > { %v6690_v28 = vld [vmem:[#allocation3 + $0x360] sm:$0xf]  ;;  %v761_v34 = vsel %vm7693_vm5, %v7762_v47, %v760_v21  ;;  %582 = vst [vmem:[#allocation2 + $0xd8] sm:$0xf] %v430_v24  ;;  %v405_v35 = vpack.c.bf16 %v373_v25, %v373_v25  ;;  %v7815_v39 = vadd.f32 %v7628_v5, %v315_v22  ;;  %v7818_v40 = vadd.f32 %v7628_v5, %v316_v17  ;;  %v7305_v50 = vld [vmem:[%s9073_s3 + $0x128] sm:$0xff] }
  0x37   : > { %v7236_v32 = vld [vmem:[#allocation3 + $0x380] sm:$0xf0]  ;;  %5187 = vmatmul.bf16.vlgmr.msra.gmra.mxu2 %v6547_v27  ;;  %v770_v42 = vsel %vm7693_vm5, %v762_v23, %v769_v29  ;;  %1033 = vst [vmem:[#allocation3 + $0x168] sm:$0xf] %v761_v34  ;;  %v406_v45 = vpack.c.bf16 %v374_v59, %v374_v59  ;;  %v838_v49 = vshrl.u32 %v616_v44, 16  ;;  %5230 = vmatpush.bf16.msrb.mxu1 %v7281_v38  ;;  %v7394_v53 = vunpack.c.l.bf16 %v7796_v19 }
  0x38   : > { %v6691_v41 = vor.u32 %v7236_v32, %v6690_v28  ;;  %v7296_v1 = vld [vmem:[%s9073_s3 + $0xe0] sm:$0xff]  ;;  %1034 = vst [vmem:[#allocation3 + $0x18c] sm:$0xf] %v770_v42  ;;  %v323_v51 = vmul.f32 %v7612_v2, %v7378_v18  ;;  %v324_v52 = vmul.f32 %v7612_v2, %v7379_v31  ;;  %5320 = vmatpush.bf16.msrb.mxu2 %v7288_v46  ;;  %v7395_v57 = vunpack.c.h.bf16 %v7796_v19  ;;  %v628_v62 = vld [vmem:[#allocation2 + $0xd0] sm:$0x8] }
  0x39   : > { %v617_v47 = vld [vmem:[#allocation2 + $0x94] sm:$0xf]  ;;  %557 = vst [vmem:[#allocation2 + $0x14] sm:$0xf] %v405_v35  ;;  %v7346_v58 = vunpack.c.l.bf16 %v7799_v26  ;;  %v6217_v54 = vrot.slane %v838_v49, 11  ;;  %v7280_v63 = vld [vmem:[%s9073_s3 + $0x60] sm:$0xff]  ;;  %5409 = vmatpush.bf16.msrb.mxu3 %v7296_v1  ;;  %v331_v55 = vmul.f32 %v7612_v2, %v7394_v53  ;;  %5497 = vmatpush.bf16.msrb.mxu0 %v7305_v50 }
  0x3a   : > { %5207 = vmatmul.bf16.vlgmr.msra.gmra.mxu3 %v6691_v41  ;;  %v618_v15 = vld [vmem:[#allocation2 + $0x98] sm:$0xf]  ;;  %v843_v56 = vshrl.u32 %v617_v47, 16  ;;  %v846_v48 = vshll.u32 %v617_v47, 16  ;;  %v359_v0 = vadd.f32 %v7628_v5, %v323_v51  ;;  %v926_v7 = vshrl.u32 %v628_v62, 16 }
  0x3b   : > { %v852_v60 = vshrl.u32 %v618_v15, 16  ;;  %v855_v61 = vshll.u32 %v618_v15, 16  ;;  %v629_v6 = vld [vmem:[#allocation2 + $0xd4] sm:$0xf]  ;;  %558 = vst [vmem:[#allocation2 + $0x18] sm:$0xf] %v406_v45  ;;  %v7841_v37 = vadd.f32 %v7628_v5, %v324_v52  ;;  %5231 = vmatpush.bf16.msrb.mxu1 %v7280_v63  ;;  %v332_v1 = vmul.f32 %v7612_v2, %v7395_v57 }
  0x3c   : > { %v845_v4 = vrot.slane %v843_v56, 7  ;;  %v931_v9 = vshrl.u32 %v629_v6, 16  ;;  %v934_v10 = vshll.u32 %v629_v6, 16  ;;  %v592_v11 = vld [vmem:[#allocation2 + $0x10] sm:$0x8]  ;;  %v383_v12 = vmax.f32 %v7815_v39, 0.0 }
  0x3d   : > { %v854_v8 = vrot.slane %v852_v60, 7  ;;  %v630_v13 = vld [vmem:[#allocation2 + $0xd8] sm:$0xf]  ;;  %v6221_v14 = vrot.slane %v926_v7, 11  ;;  %v662_v16 = vshrl.u32 %v592_v11, 16  ;;  %v384_v28 = vmax.f32 %v7818_v40, 0.0 }
  0x3e   : > { %v848_v22 = vor.u32 %v846_v48, %v845_v4  ;;  %v850_v43 = vrot.slane %v845_v4, 4  ;;  %v476_v17 = vld [vmem:[#allocation2 + $0x60] sm:$0x8]  ;;  %v6438_v18 = vld [vmem:[#allocation3 + $0x168] sm:$0xf]  ;;  %v933_v20 = vrot.slane %v931_v9, 7  ;;  %v415_v29 = vpack.c.bf16 %v383_v12, %v383_v12 }
  0x3f   : > { %v857_v19 = vor.u32 %v855_v61, %v854_v8  ;;  %v940_v21 = vshrl.u32 %v630_v13, 16  ;;  %v943_v23 = vshll.u32 %v630_v13, 16  ;;  %v7173_v24 = vld [vmem:[#allocation3 + $0x188] sm:$0xf0]  ;;  %v6209_v27 = vrot.slane %v662_v16, 11  ;;  %v7489_v48 = vld [vmem:[%s7623_s29 + $0x30] sm:$0xff]  }
  0x40   : > { %v849_v25 = vsel %vm7693_vm5, %v6217_v54, %v848_v22  ;;  %v488_v59 = vld [vmem:[#allocation2 + $0xa0] sm:$0x8]  ;;  %v6439_v30 = vor.u32 %v7173_v24, %v6438_v18  ;;  %v936_v32 = vor.u32 %v934_v10, %v933_v20  ;;  %v938_v34 = vrot.slane %v933_v20, 4  ;;  %v593_v35 = vld [vmem:[#allocation2 + $0x14] sm:$0xf]  ;;  %v7287_v9 = vld [vmem:[%s9073_s3 + $0x98] sm:$0xff] }
  0x41   : > { %v858_v31 = vsel %vm7693_vm5, %v850_v43, %v857_v19  ;;  %1041 = vst [vmem:[#allocation3 + $0x288] sm:$0xf] %v849_v25  ;;  %v942_v36 = vrot.slane %v940_v21, 7  ;;  %v667_v38 = vshrl.u32 %v593_v35, 16  ;;  %v670_v39 = vshll.u32 %v593_v35, 16  ;;  %5321 = vmatpush.bf16.msrb.mxu2 %v7287_v9  ;;  %v7493_v19 = vld [vmem:[%s7623_s29 + $0x50] sm:$0xff]  }
  0x42   : > { %1042 = vst [vmem:[#allocation3 + $0x2ac] sm:$0xf] %v858_v31  ;;  %v416_v41 = vpack.c.bf16 %v384_v28, %v384_v28  ;;  %v7850_v42 = vld [vmem:[#allocation2 + $0xe0] sm:$0x8]  ;;  %v937_v40 = vsel %vm7693_vm5, %v6221_v14, %v936_v32  ;;  %v594_v44 = vld [vmem:[#allocation2 + $0x18] sm:$0xf]  ;;  %v367_v56 = vadd.f32 %v7628_v5, %v331_v55  ;;  %v7347_v10 = vunpack.c.h.bf16 %v7799_v26 }
  0x43   : > { %v477_v45 = vsel %vm7614_vm2, 0, %v476_v17  ;;  %567 = vst [vmem:[#allocation2 + $0x64] sm:$0xf] %v415_v29  ;;  %v391_v46 = vmax.f32 %v359_v0, 0.0  ;;  %v945_v47 = vor.u32 %v943_v23, %v942_v36  ;;  %v669_v49 = vrot.slane %v667_v38, 7  ;;  %v7896_v31 = vld [vmem:[%s7623_s29 + $0x70] sm:$0xff]  }
  0x44   : > { %1049 = vst [vmem:[#allocation3 + $0x3a8] sm:$0xf] %v937_v40  ;;  %v676_v50 = vshrl.u32 %v594_v44, 16  ;;  %v679_v51 = vshll.u32 %v594_v44, 16  ;;  %v392_v52 = vmax.f32 %v7841_v37, 0.0  ;;  %v489_v15 = vsel %vm7614_vm2, 0, %v488_v59 }
  0x45   : > { %478 = vst [vmem:[#allocation2 + $0x60] sm:$0x8] %v477_v45  ;;  %v423_v53 = vpack.c.bf16 %v391_v46, %v391_v46  ;;  %5172 = vmatmul.bf16.gmra.mxu1 %v6439_v30  ;;  %v946_v54 = vsel %vm7693_vm5, %v938_v34, %v945_v47  ;;  %v672_v57 = vor.u32 %v670_v39, %v669_v49  ;;  %v674_v60 = vrot.slane %v669_v49, 4  ;;  %v7864_v62 = vld [vmem:[#allocation2 + $0x20] sm:$0x8] }
  0x46   : > { %v678_v61 = vrot.slane %v676_v50, 7  ;;  %568 = vst [vmem:[#allocation2 + $0x68] sm:$0xf] %v416_v41  ;;  %v424_v63 = vpack.c.bf16 %v392_v52, %v392_v52  ;;  %v368_v0 = vadd.f32 %v7628_v5, %v332_v1  ;;  %v399_v4 = vmax.f32 %v367_v56, 0.0  ;;  %v7870_v7 = vld [vmem:[#allocation2 + $0x70] sm:$0x8] }
  0x47   : > { %1050 = vst [vmem:[#allocation3 + $0x3cc] sm:$0xf] %v946_v54  ;;  %v501_v6 = vsel %vm7614_vm2, 0, %v7850_v42  ;;  %v673_v55 = vsel %vm7693_vm5, %v6209_v27, %v672_v57  ;;  %v307_v11 = vmul.f32 %v7612_v2, %v7346_v58  ;;  %v465_v13 = vsel %vm7614_vm2, 0, %v7864_v62  ;;  %v7295_v54 = vld [vmem:[%s9073_s3 + $0xd8] sm:$0xff]  ;;  %v7304_v57 = vld [vmem:[%s9073_s3 + $0x120] sm:$0xff] }
  0x48   : > { %v6582_v37 = vld [vmem:[#allocation3 + $0x288] sm:$0xf]  ;;  %v681_v8 = vor.u32 %v679_v51, %v678_v61  ;;  %490 = vst [vmem:[#allocation2 + $0xa0] sm:$0x8] %v489_v15  ;;  %v400_v22 = vmax.f32 %v368_v0, 0.0  ;;  %v431_v43 = vpack.c.bf16 %v399_v4, %v399_v4  ;;  %v7366_v14 = vunpack.c.l.bf16 %v7489_v48  ;;  %5410 = vmatpush.bf16.msrb.mxu3 %v7295_v54  ;;  %5498 = vmatpush.bf16.msrb.mxu0 %v7304_v57  ;;  %v7485_v57 = vld [vmem:[%s7623_s29 + $0x10] sm:$0xff]  }
  0x49   : > { %v7209_v12 = vld [vmem:[#allocation3 + $0x2a8] sm:$0xf0]  ;;  %1025 = vst [vmem:[#allocation3 + $0x48] sm:$0xf] %v673_v55  ;;  %v308_v26 = vmul.f32 %v7612_v2, %v7347_v10  ;;  %v7367_v58 = vunpack.c.h.bf16 %v7489_v48  ;;  %v343_v25 = vadd.f32 %v7628_v5, %v307_v11  ;;  %v480_v30 = vsel %vm7614_vm2, 0, %v7870_v7  ;;  %v7279_v11 = vld [vmem:[%s9073_s3 + $0x58] sm:$0xff] }
  0x4a   : > { %v6583_v16 = vor.u32 %v7209_v12, %v6582_v37  ;;  %v682_v17 = vsel %vm7693_vm5, %v674_v60, %v681_v8  ;;  %v608_v18 = vld [vmem:[#allocation2 + $0x64] sm:$0xf]  ;;  %575 = vst [vmem:[#allocation2 + $0xa4] sm:$0xf] %v423_v53  ;;  %v432_v24 = vpack.c.bf16 %v400_v22, %v400_v22  ;;  %v317_v29 = vmul.f32 %v7612_v2, %v7366_v14 }
  0x4b   : > { %v6726_v20 = vld [vmem:[#allocation3 + $0x3a8] sm:$0xf]  ;;  %1026 = vst [vmem:[#allocation3 + $0x6c] sm:$0xf] %v682_v17  ;;  %v777_v21 = vshrl.u32 %v608_v18, 16  ;;  %v780_v23 = vshll.u32 %v608_v18, 16  ;;  %v344_v28 = vadd.f32 %v7628_v5, %v308_v26  ;;  %v318_v59 = vmul.f32 %v7612_v2, %v7367_v58  ;;  %5232 = vmatpush.bf16.msrb.mxu1 %v7279_v11 }
  0x4c   : > { %5192 = vmatmul.bf16.gmra.mxu2 %v6583_v16  ;;  %v607_v27 = vld [vmem:[#allocation2 + $0x60] sm:$0x8]  ;;  %576 = vst [vmem:[#allocation2 + $0xa8] sm:$0xf] %v424_v63  ;;  %v7382_v36 = vunpack.c.l.bf16 %v7493_v19  ;;  %v7383_v38 = vunpack.c.h.bf16 %v7493_v19  ;;  %v353_v40 = vadd.f32 %v7628_v5, %v317_v29  ;;  %v375_v53 = vmax.f32 %v343_v25, 0.0  ;;  %v7294_v17 = vld [vmem:[%s9073_s3 + $0xd0] sm:$0xff] }
  0x4d   : > { %v609_v32 = vld [vmem:[#allocation2 + $0x68] sm:$0xf]  ;;  %v772_v34 = vshrl.u32 %v607_v27, 16  ;;  %v779_v35 = vrot.slane %v777_v21, 7  ;;  %502 = vst [vmem:[#allocation2 + $0xe0] sm:$0x8] %v501_v6  ;;  %v7900_v44 = vadd.f32 %v7628_v5, %v318_v59  ;;  %v7398_v62 = vunpack.c.l.bf16 %v7896_v31  ;;  %5411 = vmatpush.bf16.msrb.mxu3 %v7294_v17 }
  0x4e   : > { %v7245_v39 = vld [vmem:[#allocation3 + $0x3c8] sm:$0xf0]  ;;  %v786_v41 = vshrl.u32 %v609_v32, 16  ;;  %v789_v42 = vshll.u32 %v609_v32, 16  ;;  %583 = vst [vmem:[#allocation2 + $0xe4] sm:$0xf] %v431_v43  ;;  %v325_v60 = vmul.f32 %v7612_v2, %v7382_v36  ;;  %v326_v61 = vmul.f32 %v7612_v2, %v7383_v38 }
  0x4f   : > { %v6727_v45 = vor.u32 %v7245_v39, %v6726_v20  ;;  %v6214_v46 = vrot.slane %v772_v34, 11  ;;  %v782_v1 = vor.u32 %v780_v23, %v779_v35  ;;  %v784_v47 = vrot.slane %v779_v35, 4  ;;  %v619_v49 = vld [vmem:[#allocation2 + $0xa0] sm:$0x8]  ;;  %584 = vst [vmem:[#allocation2 + $0xe8] sm:$0xf] %v432_v24 }
  0x50   : > { %v6294_v50 = vld [vmem:[#allocation3 + $0x48] sm:$0xf]  ;;  %v788_v51 = vrot.slane %v786_v41, 7  ;;  %v860_v52 = vshrl.u32 %v619_v49, 16  ;;  %v376_v15 = vmax.f32 %v344_v28, 0.0  ;;  %v407_v37 = vpack.c.bf16 %v375_v53, %v375_v53  ;;  %v7286_v2 = vld [vmem:[%s9073_s3 + $0x90] sm:$0xff] }
  0x51   : > { %5212 = vmatmul.bf16.gmra.mxu3 %v6727_v45  ;;  %v783_v56 = vsel %vm7693_vm5, %v6214_v46, %v782_v1  ;;  %v620_v48 = vld [vmem:[#allocation2 + $0xa4] sm:$0xf]  ;;  %466 = vst [vmem:[#allocation2 + $0x20] sm:$0x8] %v465_v13  ;;  %v385_v12 = vmax.f32 %v353_v40, 0.0  ;;  %v7303_v58 = vld [vmem:[%s9073_s3 + $0x118] sm:$0xff]  ;;  %v361_v20 = vadd.f32 %v7628_v5, %v325_v60  ;;  %v7399_v21 = vunpack.c.h.bf16 %v7896_v31  ;;  %5322 = vmatpush.bf16.msrb.mxu2 %v7286_v2 }
  0x52   : > { %v7137_v63 = vld [vmem:[#allocation3 + $0x68] sm:$0xf0]  ;;  %v791_v0 = vor.u32 %v789_v42, %v788_v51  ;;  %1035 = vst [vmem:[#allocation3 + $0x1b0] sm:$0xf] %v783_v56  ;;  %v6218_v4 = vrot.slane %v860_v52, 11  ;;  %v865_v6 = vshrl.u32 %v620_v48, 16  ;;  %v408_v10 = vpack.c.bf16 %v376_v15, %v376_v15  ;;  %5499 = vmatpush.bf16.msrb.mxu0 %v7303_v58 }
  0x53   : > { %v6295_v55 = vor.u32 %v7137_v63, %v6294_v50  ;;  %v621_v8 = vld [vmem:[#allocation2 + $0xa8] sm:$0xf]  ;;  %v868_v9 = vshll.u32 %v620_v48, 16  ;;  %v417_v19 = vpack.c.bf16 %v385_v12, %v385_v12  ;;  %v7278_v29 = vld [vmem:[%s9073_s3 + $0x50] sm:$0xff]  ;;  %559 = vst [vmem:[#allocation2 + $0x24] sm:$0xf] %v407_v37 }
  0x54   : > { %v792_v22 = vsel %vm7693_vm5, %v784_v47, %v791_v0  ;;  %v867_v43 = vrot.slane %v865_v6, 7  ;;  %v874_v13 = vshrl.u32 %v621_v8, 16  ;;  %v877_v14 = vshll.u32 %v621_v8, 16  ;;  %v631_v16 = vld [vmem:[#allocation2 + $0xe0] sm:$0x8]  ;;  %5233 = vmatpush.bf16.msrb.mxu1 %v7278_v29 }
  0x55   : > { %5152 = vmatmul.bf16.gmra.mxu0 %v6295_v55  ;;  %1036 = vst [vmem:[#allocation3 + $0x1d4] sm:$0xf] %v792_v22  ;;  %v632_v18 = vld [vmem:[#allocation2 + $0xe4] sm:$0xf]  ;;  %v948_v26 = vshrl.u32 %v631_v16, 16  ;;  %v386_v41 = vmax.f32 %v7900_v44, 0.0  ;;  %v7351_v22 = vunpack.c.h.bf16 %v7485_v57 }
  0x56   : > { %v870_v23 = vor.u32 %v868_v9, %v867_v43  ;;  %v872_v24 = vrot.slane %v867_v43, 4  ;;  %v876_v25 = vrot.slane %v874_v13, 7  ;;  %v633_v27 = vld [vmem:[#allocation2 + $0xe8] sm:$0xf]  ;;  %v953_v28 = vshrl.u32 %v632_v18, 16 }
  0x57   : > { %v6222_v59 = vrot.slane %v948_v26, 11  ;;  %v956_v32 = vshll.u32 %v632_v18, 16  ;;  %v962_v34 = vshrl.u32 %v633_v27, 16  ;;  %v965_v35 = vshll.u32 %v633_v27, 16  ;;  %v491_v5 = vld [vmem:[#allocation2 + $0xb0] sm:$0x8] }
  0x58   : > { %v871_v31 = vsel %vm7693_vm5, %v6218_v4, %v870_v23  ;;  %v879_v36 = vor.u32 %v877_v14, %v876_v25  ;;  %v955_v38 = vrot.slane %v953_v28, 7  ;;  %560 = vst [vmem:[#allocation2 + $0x28] sm:$0xf] %v408_v10  ;;  %v595_v39 = vld [vmem:[#allocation2 + $0x20] sm:$0x8]  ;;  %v418_v53 = vpack.c.bf16 %v386_v41, %v386_v41 }
  0x59   : > { %1043 = vst [vmem:[#allocation3 + $0x2d0] sm:$0xf] %v871_v31  ;;  %v964_v42 = vrot.slane %v962_v34, 7  ;;  %v684_v40 = vshrl.u32 %v595_v39, 16  ;;  %v7938_v45 = vld [vmem:[%s9071_s1] ss:$0 sm:$0xff]  ;;  %v7350_v10 = vunpack.c.l.bf16 %v7485_v57 }
  0x5a   : > { %v362_v46 = vadd.f32 %v7938_v45, %v326_v61  ;;  %v7550_v1 = vld [vmem:[%s9070_s0] ss:$0 sm:$0xff]  ;;  %v503_v49 = vld [vmem:[#allocation2 + $0xf0] sm:$0x8]  ;;  %v880_v44 = vsel %vm7693_vm5, %v872_v24, %v879_v36  ;;  %v958_v51 = vor.u32 %v956_v32, %v955_v38  ;;  %v960_v52 = vrot.slane %v955_v38, 4  ;;  %v7285_v34 = vld [vmem:[%s9073_s3 + $0x88] sm:$0xff] }
  0x5b   : > { %v333_v47 = vmul.f32 %v7550_v1, %v7398_v62  ;;  %v6474_v50 = vld [vmem:[#allocation3 + $0x1b0] sm:$0xf]  ;;  %481 = vst [vmem:[#allocation2 + $0x70] sm:$0x8] %v480_v30  ;;  %v967_v15 = vor.u32 %v965_v35, %v964_v42  ;;  %v7950_v56 = vrot.slane %v684_v40, 11  ;;  %v393_v48 = vmax.f32 %v361_v20, 0.0  ;;  %5323 = vmatpush.bf16.msrb.mxu2 %v7285_v34 }
  0x5c   : > { %1044 = vst [vmem:[#allocation3 + $0x2f4] sm:$0xf] %v880_v44  ;;  %v394_v54 = vmax.f32 %v362_v46, 0.0  ;;  %v7182_v60 = vld [vmem:[#allocation3 + $0x1d0] sm:$0xf0]  ;;  %v959_v61 = vsel %vm7693_vm5, %v6222_v59, %v958_v51  ;;  %v492_v62 = vsel %vm7614_vm2, 0, %v491_v5  ;;  %v334_v63 = vmul.f32 %v7550_v1, %v7399_v21 }
  0x5d   : > { %569 = vst [vmem:[#allocation2 + $0x74] sm:$0xf] %v417_v19  ;;  %v369_v0 = vadd.f32 %v7938_v45, %v333_v47  ;;  %v6475_v7 = vor.u32 %v7182_v60, %v6474_v50  ;;  %v968_v30 = vsel %vm7693_vm5, %v960_v52, %v967_v15  ;;  %v425_v4 = vpack.c.bf16 %v393_v48, %v393_v48  ;;  %v596_v37 = vld [vmem:[#allocation2 + $0x24] sm:$0xf]  ;;  %v7963_v17 = vld [vmem:[#allocation2 + $0x30] sm:$0x8] }
  0x5e   : > { %1051 = vst [vmem:[#allocation3 + $0x3f0] sm:$0xf] %v959_v61  ;;  %v426_v6 = vpack.c.bf16 %v394_v54, %v394_v54  ;;  %v370_v55 = vadd.f32 %v7938_v45, %v334_v63  ;;  %v504_v9 = vsel %vm7614_vm2, 0, %v503_v49  ;;  %v689_v2 = vshrl.u32 %v596_v37, 16 }
  0x5f   : > { %1052 = vst [vmem:[#allocation3 + $0x414] sm:$0xf] %v968_v30  ;;  %v401_v8 = vmax.f32 %v369_v0, 0.0  ;;  %5177 = vmatmul.bf16.gmra.mxu1 %v6475_v7  ;;  %v597_v11 = vld [vmem:[#allocation2 + $0x28] sm:$0xf]  ;;  %v692_v12 = vshll.u32 %v596_v37, 16  ;;  %v309_v16 = vmul.f32 %v7550_v1, %v7350_v10  ;;  %v310_v20 = vmul.f32 %v7550_v1, %v7351_v22 }
  0x60   : > { %570 = vst [vmem:[#allocation2 + $0x78] sm:$0xf] %v418_v53  ;;  %v6618_v43 = vld [vmem:[#allocation3 + $0x2d0] sm:$0xf]  ;;  %v698_v13 = vshrl.u32 %v597_v11, 16  ;;  %v701_v14 = vshll.u32 %v597_v11, 16 }
  0x61   : > { %493 = vst [vmem:[#allocation2 + $0xb0] sm:$0x8] %v492_v62  ;;  %v691_v18 = vrot.slane %v689_v2, 7  ;;  %v402_v58 = vmax.f32 %v370_v55, 0.0  ;;  %v433_v19 = vpack.c.bf16 %v401_v8, %v401_v8  ;;  %v345_v25 = vadd.f32 %v7938_v45, %v309_v16  ;;  %v7302_v10 = vld [vmem:[%s9073_s3 + $0x110] sm:$0xff]  ;;  %v7277_v11 = vld [vmem:[%s9073_s3 + $0x48] sm:$0xff] }
  0x62   : > { %v610_v26 = vld [vmem:[#allocation2 + $0x70] sm:$0x8]  ;;  %577 = vst [vmem:[#allocation2 + $0xb4] sm:$0xf] %v425_v4  ;;  %v700_v23 = vrot.slane %v698_v13, 7  ;;  %v346_v42 = vadd.f32 %v7938_v45, %v310_v20  ;;  %v468_v46 = vsel %vm7614_vm2, 0, %v7963_v17  ;;  %5500 = vmatpush.bf16.msrb.mxu0 %v7302_v10  ;;  %5234 = vmatpush.bf16.msrb.mxu1 %v7277_v11 }
  0x63   : > { %v7218_v21 = vld [vmem:[#allocation3 + $0x2f0] sm:$0xf0]  ;;  %v794_v24 = vshrl.u32 %v610_v26, 16  ;;  %578 = vst [vmem:[#allocation2 + $0xb8] sm:$0xf] %v426_v6  ;;  %v694_v28 = vor.u32 %v692_v12, %v691_v18  ;;  %v696_v29 = vrot.slane %v691_v18, 4  ;;  %v434_v32 = vpack.c.bf16 %v402_v58, %v402_v58 }
  0x64   : > { %v6619_v27 = vor.u32 %v7218_v21, %v6618_v43  ;;  %v611_v59 = vld [vmem:[#allocation2 + $0x74] sm:$0xf]  ;;  %505 = vst [vmem:[#allocation2 + $0xf0] sm:$0x8] %v504_v9  ;;  %v703_v5 = vor.u32 %v701_v14, %v700_v23  ;;  %v377_v40 = vmax.f32 %v345_v25, 0.0  ;;  %v378_v62 = vmax.f32 %v346_v42, 0.0 }
  0x65   : > { %v6762_v35 = vld [vmem:[#allocation3 + $0x3f0] sm:$0xf]  ;;  %v6215_v31 = vrot.slane %v794_v24, 11  ;;  %v799_v36 = vshrl.u32 %v611_v59, 16  ;;  %v802_v38 = vshll.u32 %v611_v59, 16  ;;  %v695_v41 = vsel %vm7693_vm5, %v7950_v56, %v694_v28  ;;  %v7293_v6 = vld [vmem:[%s9073_s3 + $0xc8] sm:$0xff] }
  0x66   : > { %5197 = vmatmul.bf16.gmra.mxu2 %v6619_v27  ;;  %v7254_v39 = vld [vmem:[#allocation3 + $0x410] sm:$0xf0]  ;;  %585 = vst [vmem:[#allocation2 + $0xf4] sm:$0xf] %v433_v19  ;;  %v704_v47 = vsel %vm7693_vm5, %v696_v29, %v703_v5  ;;  %v409_v48 = vpack.c.bf16 %v377_v40, %v377_v40  ;;  %v410_v9 = vpack.c.bf16 %v378_v62, %v378_v62  ;;  %v7284_v22 = vld [vmem:[%s9073_s3 + $0x80] sm:$0xff]  ;;  %v7301_v28 = vld [vmem:[%s9073_s3 + $0x108] sm:$0xff] }
  0x67   : > { %v6763_v1 = vor.u32 %v7254_v39, %v6762_v35  ;;  %1027 = vst [vmem:[#allocation3 + $0x90] sm:$0xf] %v695_v41  ;;  %v612_v49 = vld [vmem:[#allocation2 + $0x78] sm:$0xf]  ;;  %v801_v50 = vrot.slane %v799_v36, 7  ;;  %5412 = vmatpush.bf16.msrb.mxu3 %v7293_v6  ;;  %5324 = vmatpush.bf16.msrb.mxu2 %v7284_v22  ;;  %v7292_v27 = vld [vmem:[%s9073_s3 + $0xc0] sm:$0xff] }
  0x68   : > { %1028 = vst [vmem:[#allocation3 + $0xb4] sm:$0xf] %v704_v47  ;;  %v808_v44 = vshrl.u32 %v612_v49, 16  ;;  %v811_v51 = vshll.u32 %v612_v49, 16  ;;  %v622_v52 = vld [vmem:[#allocation2 + $0xb0] sm:$0x8]  ;;  %5501 = vmatpush.bf16.msrb.mxu0 %v7301_v28 }
  0x69   : > { %5217 = vmatmul.bf16.gmra.mxu3 %v6763_v1  ;;  %v804_v45 = vor.u32 %v802_v38, %v801_v50  ;;  %v806_v53 = vrot.slane %v801_v50, 4  ;;  %v623_v15 = vld [vmem:[#allocation2 + $0xb4] sm:$0xf]  ;;  %v882_v56 = vshrl.u32 %v622_v52, 16  ;;  %586 = vst [vmem:[#allocation2 + $0xf8] sm:$0xf] %v434_v32 }
  0x6a   : > { %v810_v54 = vrot.slane %v808_v44, 7  ;;  %v624_v57 = vld [vmem:[#allocation2 + $0xb8] sm:$0xf]  ;;  %v887_v60 = vshrl.u32 %v623_v15, 16  ;;  %v890_v61 = vshll.u32 %v623_v15, 16  ;;  %v7276_v35 = vld [vmem:[%s9073_s3 + $0x40] sm:$0xff] }
  0x6b   : > { %v805_v63 = vsel %vm7693_vm5, %v6215_v31, %v804_v45  ;;  %v6219_v0 = vrot.slane %v882_v56, 11  ;;  %v896_v7 = vshrl.u32 %v624_v57, 16  ;;  %v899_v30 = vshll.u32 %v624_v57, 16  ;;  %v634_v4 = vld [vmem:[#allocation2 + $0xf0] sm:$0x8]  ;;  %5413 = vmatpush.bf16.msrb.mxu3 %v7292_v27  ;;  %v7300_v5 = vld [vmem:[%s9073_s3 + $0x100] sm:$0xff]  ;;  %5235 = vmatpush.bf16.msrb.mxu1 %v7276_v35 }
  0x6c   : > { %v813_v37 = vor.u32 %v811_v51, %v810_v54  ;;  %1037 = vst [vmem:[#allocation3 + $0x1f8] sm:$0xf] %v805_v63  ;;  %v889_v55 = vrot.slane %v887_v60, 7  ;;  %v970_v8 = vshrl.u32 %v634_v4, 16  ;;  %v448_v43 = vld [vmem:[#allocation2 + $0xc] sm:$0x1]  ;;  %5502 = vmatpush.bf16.msrb.mxu0 %v7300_v5 }
  0x6d   : > { %v898_v2 = vrot.slane %v896_v7, 7  ;;  %v635_v12 = vld [vmem:[#allocation2 + $0xf4] sm:$0xf]  ;;  %469 = vst [vmem:[#allocation2 + $0x30] sm:$0x8] %v468_v46  ;;  %v449_v36 = vsel %vm7996_vm7, 0, %v448_v43 }
  0x6e   : > { %v6330_v13 = vld [vmem:[#allocation3 + $0x90] sm:$0xf]  ;;  %v814_v14 = vsel %vm7693_vm5, %v806_v53, %v813_v37  ;;  %v892_v16 = vor.u32 %v890_v61, %v889_v55  ;;  %v894_v17 = vrot.slane %v889_v55, 4  ;;  %v6223_v18 = vrot.slane %v970_v8, 11  ;;  %561 = vst [vmem:[#allocation2 + $0x34] sm:$0xf] %v409_v48 }
  0x6f   : > { %v7146_v26 = vld [vmem:[#allocation3 + $0xb0] sm:$0xf0]  ;;  %1038 = vst [vmem:[#allocation3 + $0x21c] sm:$0xf] %v814_v14  ;;  %v901_v58 = vor.u32 %v899_v30, %v898_v2  ;;  %v975_v19 = vshrl.u32 %v635_v12, 16  ;;  %v978_v20 = vshll.u32 %v635_v12, 16 }
  0x70   : > { %v6331_v23 = vor.u32 %v7146_v26, %v6330_v13  ;;  %v893_v24 = vsel %vm7693_vm5, %v6219_v0, %v892_v16  ;;  %v636_v25 = vld [vmem:[#allocation2 + $0xf8] sm:$0xf]  ;;  %562 = vst [vmem:[#allocation2 + $0x38] sm:$0xf] %v410_v9  ;;  %v1055_v31 = vld [vmem:[#allocation2 + $0x4] sm:$0xf] }
  0x71   : > { %v902_v29 = vsel %vm7693_vm5, %v894_v17, %v901_v58  ;;  %1045 = vst [vmem:[#allocation3 + $0x318] sm:$0xf] %v893_v24  ;;  %v977_v59 = vrot.slane %v975_v19, 7  ;;  %v984_v32 = vshrl.u32 %v636_v25, 16  ;;  %v987_v34 = vshll.u32 %v636_v25, 16  ;;  %v7323_v19 = vld [vmem:[%s9073_s3 + $0x1b8] sm:$0xff] }
  0x72   : > { %5157 = vmatmul.bf16.gmra.mxu0 %v6331_v23  ;;  %1046 = vst [vmem:[#allocation3 + $0x33c] sm:$0xf] %v902_v29  ;;  %v1056_v40 = vld [vmem:[#allocation2 + $0x8] sm:$0xf]  ;;  %v1119_v1 = vld [vmem:[#allocation2 + $0x4] sm:$0xf]  ;;  %5673 = vmatpush.bf16.msra.mxu2 %v7323_v19 }
  0x73   : > { %v6510_v38 = vld [vmem:[#allocation3 + $0x1f8] sm:$0xf]  ;;  %v980_v39 = vor.u32 %v978_v20, %v977_v59  ;;  %v982_v41 = vrot.slane %v977_v59, 4  ;;  %v986_v42 = vrot.slane %v984_v32, 7  ;;  %1087 = vst [vmem:[#allocation3 + $0x4] sm:$0xf] %v1055_v31 }
  0x74   : > { %v598_v46 = vld [vmem:[#allocation2 + $0x30] sm:$0x8]  ;;  %1088 = vst [vmem:[#allocation3 + $0x28] sm:$0xf] %v1056_v40  ;;  %v1171_v51 = vshrl.u32 %v1119_v1, 16  ;;  %v1174_v30 = vshll.u32 %v1119_v1, 16 }
  0x75   : > { %v981_v47 = vsel %vm7693_vm5, %v6223_v18, %v980_v39  ;;  %v989_v49 = vor.u32 %v987_v34, %v986_v42  ;;  %v599_v50 = vld [vmem:[#allocation2 + $0x34] sm:$0xf]  ;;  %v706_v44 = vshrl.u32 %v598_v46, 16  ;;  %450 = vst [vmem:[#allocation2 + $0xc] sm:$0x1] %v449_v36  ;;  %v7331_v20 = vld [vmem:[%s9073_s3 + $0x1f8] sm:$0xff] }
  0x76   : > { %v7191_v52 = vld [vmem:[#allocation3 + $0x218] sm:$0xf0]  ;;  %1053 = vst [vmem:[#allocation3 + $0x438] sm:$0xf] %v981_v47  ;;  %v711_v45 = vshrl.u32 %v599_v50, 16  ;;  %v714_v53 = vshll.u32 %v599_v50, 16  ;;  %5762 = vmatpush.bf16.msra.mxu3 %v7331_v20 }
  0x77   : > { %v6511_v15 = vor.u32 %v7191_v52, %v6510_v38  ;;  %v990_v56 = vsel %vm7693_vm5, %v982_v41, %v989_v49  ;;  %v600_v48 = vld [vmem:[#allocation2 + $0x38] sm:$0xf]  ;;  %v6211_v54 = vrot.slane %v706_v44, 11  ;;  %v1173_v57 = vrot.slane %v1171_v51, 4  ;;  %v1120_v7 = vld [vmem:[#allocation2 + $0x8] sm:$0xf] }
  0x78   : > { %v6654_v60 = vld [vmem:[#allocation3 + $0x318] sm:$0xf]  ;;  %1054 = vst [vmem:[#allocation3 + $0x45c] sm:$0xf] %v990_v56  ;;  %v713_v61 = vrot.slane %v711_v45, 7  ;;  %v720_v62 = vshrl.u32 %v600_v48, 16 }
  0x79   : > { %5182 = vmatmul.bf16.gmra.mxu1 %v6511_v15  ;;  %v7227_v63 = vld [vmem:[#allocation3 + $0x338] sm:$0xf0]  ;;  %v723_v0 = vshll.u32 %v600_v48, 16  ;;  %v1618_v8 = vld [vmem:[#allocation2 + $0x10] sm:$0x8]  ;;  %v1176_v2 = vrot.slane %v1174_v30, 5 }
  0x7a   : > { %v6655_v4 = vor.u32 %v7227_v63, %v6654_v60  ;;  %v716_v6 = vor.u32 %v714_v53, %v713_v61  ;;  %v718_v37 = vrot.slane %v713_v61, 4  ;;  %v722_v55 = vrot.slane %v720_v62, 7  ;;  %v1619_v9 = vld [vmem:[#allocation2 + $0x14] sm:$0xf]  ;;  %v1620_v22 = vld [vmem:[#allocation2 + $0x18] sm:$0xf] }
  0x7b   : > { %vm1167_vm8 = vsmask.f32 3328  ;;  %vm1168_vm9 = vsmask.f32 7440  ;;  %v1180_v12 = vshll.u32 %v1120_v7, 16  ;;  %v1184_v13 = vshrl.u32 %v1120_v7, 16 }
  0x7c   : > { %5202 = vmatmul.bf16.gmra.mxu2 %v6655_v4  ;;  %v717_v10 = vsel %vm7693_vm5, %v6211_v54, %v716_v6  ;;  %v725_v11 = vor.u32 %v723_v0, %v722_v55  ;;  %v1667_v14 = vshrl.u32 %v1618_v8, 16  ;;  %v1121_v17 = vld [vmem:[#allocation2 + $0xc] sm:$0x1]  ;;  %v1177_v18 = vor.u32 %v1176_v2, %v1173_v57  ;;  %v7124_v24 = vld [vmem:[#allocation3 + $0x4] sm:$0xf]  ;;  %vm8034_vm10 = vmor %vm1167_vm8, %vm1168_vm9 }
  0x7d   : > { %v6798_v43 = vld [vmem:[#allocation3 + $0x438] sm:$0xf]  ;;  %1029 = vst [vmem:[#allocation3 + $0xd8] sm:$0xf] %v717_v10  ;;  %v1182_v26 = vrot.slane %v1180_v12, 5  ;;  %v1672_v58 = vshrl.u32 %v1619_v9, 16 }
  0x7e   : > { %v726_v16 = vsel %vm7693_vm5, %v718_v37, %v725_v11  ;;  %v6260_v25 = vld [vmem:[#allocation3 + $0x24] sm:$0xf0]  ;;  %v1186_v28 = vrot.slane %v1184_v13, 4  ;;  %v1190_v29 = vshll.u32 %v1121_v17, 16  ;;  %v1178_v32 = vrot.slane %v1177_v18, 4  ;;  %v7315_v31 = vld [vmem:[%s9073_s3 + $0x178] sm:$0xff] }
  0x7f   : > { %v7263_v23 = vld [vmem:[#allocation3 + $0x458] sm:$0xf0]  ;;  %1030 = vst [vmem:[#allocation3 + $0xfc] sm:$0xf] %v726_v16  ;;  %v6224_v34 = vrot.slane %v1667_v14, 11  ;;  %v1674_v35 = vrot.slane %v1672_v58, 7  ;;  %5584 = vmatpush.bf16.msra.mxu1 %v7315_v31  ;;  %v6263_v45 = vor.u32 %v7124_v24, %v6260_v25 }
  0x80   : > { %v6799_v59 = vor.u32 %v7263_v23, %v6798_v43  ;;  %v2082_v5 = vld [vmem:[#allocation2 + $0x14] sm:$0xf]  ;;  %v1187_v36 = vor.u32 %v1186_v28, %v1182_v26  ;;  %v1192_v38 = vrot.slane %v1190_v29, 5  ;;  %v1675_v39 = vshll.u32 %v1619_v9, 16  ;;  %v2083_v42 = vld [vmem:[#allocation2 + $0x18] sm:$0xf] }
  0x81   : > { %v1681_v41 = vshrl.u32 %v1620_v22, 16  ;;  %v7339_v40 = vld [vmem:[%s9073_s3 + $0x238] sm:$0xff]  ;;  %v1183_v46 = vsel %vm8034_vm10, %v1178_v32, %v1182_v26  ;;  %v1684_v1 = vshll.u32 %v1620_v22, 16  ;;  %2114 = vst [vmem:[#allocation3 + $0x10] sm:$0xf] %v2082_v5  ;;  %v1679_v44 = vrot.slane %v1674_v35, 4 }
  0x82   : > { %5222 = vmatmul.bf16.gmra.mxu3 %v6799_v59  ;;  %v1057_v47 = vld [vmem:[#allocation2 + $0x14] sm:$0xf]  ;;  %v1188_v49 = vrot.slane %v1187_v36, 4  ;;  %1586 = vst [vmem:[#allocation3 + $0x8] sm:$0xf] %v1183_v46  ;;  %v1677_v50 = vor.u32 %v1675_v39, %v1674_v35  ;;  %5851 = vmatpush.bf16.msra.mxu0 %v7339_v40 }
  0x83   : > { %v1683_v51 = vrot.slane %v1681_v41, 7  ;;  %2115 = vst [vmem:[#allocation3 + $0x34] sm:$0xf] %v2083_v42  ;;  %v1058_v53 = vld [vmem:[#allocation2 + $0x18] sm:$0xf] }
  0x84   : > { %v6366_v52 = vld [vmem:[#allocation3 + $0xd8] sm:$0xf]  ;;  %v509_v15 = vld [vmem:[#allocation2 + $0x1c] sm:$0x1]  ;;  %v1193_v56 = vsel %vm8034_vm10, %v1188_v49, %v1192_v38  ;;  %v1678_v48 = vsel %vm7693_vm5, %v6224_v34, %v1677_v50  ;;  %1089 = vst [vmem:[#allocation3 + $0x4c] sm:$0xf] %v1057_v47 }
  0x85   : > { %v1686_v54 = vor.u32 %v1684_v1, %v1683_v51  ;;  %v510_v57 = vsel %vm7996_vm7, 0, %v509_v15  ;;  %v1122_v60 = vld [vmem:[#allocation2 + $0x14] sm:$0xf]  ;;  %1587 = vst [vmem:[#allocation3 + $0x2c] sm:$0xf] %v1193_v56 }
  0x86   : > { %v7155_v61 = vld [vmem:[#allocation3 + $0xf8] sm:$0xf0]  ;;  %v1123_v62 = vld [vmem:[#allocation2 + $0x18] sm:$0xf]  ;;  %2050 = vst [vmem:[#allocation3 + $0xc] sm:$0xf] %v1678_v48 }
  0x87   : > { %v6367_v63 = vor.u32 %v7155_v61, %v6366_v52  ;;  %v1687_v0 = vsel %vm7693_vm5, %v1679_v44, %v1686_v54  ;;  %v1195_v7 = vshrl.u32 %v1122_v60, 16  ;;  %v1198_v30 = vshll.u32 %v1122_v60, 16  ;;  %v1621_v4 = vld [vmem:[#allocation2 + $0x20] sm:$0x8]  ;;  %v1622_v55 = vld [vmem:[#allocation2 + $0x24] sm:$0xf] }
  0x88   : > { %2051 = vst [vmem:[#allocation3 + $0x30] sm:$0xf] %v1687_v0  ;;  %v1204_v6 = vshll.u32 %v1123_v62, 16  ;;  %v1208_v37 = vshrl.u32 %v1123_v62, 16  ;;  %v1623_v22 = vld [vmem:[#allocation2 + $0x28] sm:$0xf] }
  0x89   : > { %5162 = vmatmul.bf16.gmra.mxu0 %v6367_v63  ;;  %5236 = vmatmul.bf16.vlgmr.msrb.gmra.mxu1 %v6263_v45  ;;  %1090 = vst [vmem:[#allocation3 + $0x70] sm:$0xf] %v1058_v53  ;;  %v1197_v8 = vrot.slane %v1195_v7, 4  ;;  %v1200_v9 = vrot.slane %v1198_v30, 5  ;;  %v6266_v2 = vld [vmem:[#allocation3 + $0x8] sm:$0xf] }
  0x8a   : > { %511 = vst [vmem:[#allocation2 + $0x1c] sm:$0x1] %v510_v57  ;;  %v1206_v10 = vrot.slane %v1204_v6, 5  ;;  %v1210_v11 = vrot.slane %v1208_v37, 4  ;;  %v1689_v43 = vshrl.u32 %v1621_v4, 16  ;;  %v1694_v13 = vshrl.u32 %v1622_v55, 16 }
  0x8b   : > { %v1201_v12 = vor.u32 %v1200_v9, %v1197_v8  ;;  %v1697_v16 = vshll.u32 %v1622_v55, 16  ;;  %v1703_v17 = vshrl.u32 %v1623_v22, 16  ;;  %v2084_v18 = vld [vmem:[#allocation2 + $0x24] sm:$0xf]  ;;  %v1706_v23 = vshll.u32 %v1623_v22, 16  ;;  %v7322_v51 = vld [vmem:[%s9073_s3 + $0x1b0] sm:$0xff] }
  0x8c   : > { %v1211_v14 = vor.u32 %v1210_v11, %v1206_v10  ;;  %v7129_v26 = vld [vmem:[#allocation3 + $0x28] sm:$0xf0]  ;;  %v6225_v19 = vrot.slane %v1689_v43, 11  ;;  %v1696_v20 = vrot.slane %v1694_v13, 7  ;;  %v2085_v29 = vld [vmem:[#allocation2 + $0x28] sm:$0xf]  ;;  %5674 = vmatpush.bf16.msra.mxu2 %v7322_v51 }
  0x8d   : > { %v1202_v58 = vrot.slane %v1201_v12, 4  ;;  %v6267_v24 = vor.u32 %v7129_v26, %v6266_v2  ;;  %v7125_v25 = vld [vmem:[#allocation3 + $0xc] sm:$0xf]  ;;  %v1705_v28 = vrot.slane %v1703_v17, 7  ;;  %v6274_v32 = vld [vmem:[#allocation3 + $0x10] sm:$0xf] }
  0x8e   : > { %v7130_v34 = vld [vmem:[#allocation3 + $0x30] sm:$0xf0]  ;;  %v1212_v5 = vrot.slane %v1211_v14, 4  ;;  %v1699_v31 = vor.u32 %v1697_v16, %v1696_v20  ;;  %v1701_v36 = vrot.slane %v1696_v20, 4  ;;  %2116 = vst [vmem:[#allocation3 + $0x58] sm:$0xf] %v2084_v18 }
  0x8f   : > { %v6268_v59 = vld [vmem:[#allocation3 + $0x2c] sm:$0xf0]  ;;  %v1207_v35 = vsel %vm8034_vm10, %v1202_v58, %v1206_v10  ;;  %5325 = vmatmul.bf16.vlgmr.msrb.gmra.mxu2 %v6267_v24  ;;  %v7133_v39 = vld [vmem:[#allocation3 + $0x4c] sm:$0xf]  ;;  %v1708_v42 = vor.u32 %v1706_v23, %v1705_v28  ;;  %v1059_v40 = vld [vmem:[#allocation2 + $0x24] sm:$0xf]  ;;  %v6275_v53 = vor.u32 %v7130_v34, %v6274_v32 }
  0x90   : > { %v6271_v38 = vor.u32 %v7125_v25, %v6268_v59  ;;  %v6296_v41 = vld [vmem:[#allocation3 + $0x6c] sm:$0xf0]  ;;  %1588 = vst [vmem:[#allocation3 + $0x50] sm:$0xf] %v1207_v35  ;;  %v1700_v1 = vsel %vm7693_vm5, %v6225_v19, %v1699_v31  ;;  %v1060_v47 = vld [vmem:[#allocation2 + $0x28] sm:$0xf] }
  0x91   : > { %v1124_v46 = vld [vmem:[#allocation2 + $0x1c] sm:$0x1]  ;;  %2117 = vst [vmem:[#allocation3 + $0x7c] sm:$0xf] %v2085_v29  ;;  %v1709_v50 = vsel %vm7693_vm5, %v1701_v36, %v1708_v42  ;;  %v512_v44 = vld [vmem:[#allocation2 + $0x2c] sm:$0x1]  ;;  %v6299_v54 = vor.u32 %v7133_v39, %v6296_v41 }
  0x92   : > { %5414 = vmatmul.bf16.vlgmr.msrb.gmra.mxu3 %v6271_v38  ;;  %v1214_v49 = vshll.u32 %v1124_v46, 16  ;;  %2052 = vst [vmem:[#allocation3 + $0x54] sm:$0xf] %v1700_v1  ;;  %v513_v52 = vsel %vm7996_vm7, 0, %v512_v44  ;;  %v1125_v45 = vld [vmem:[#allocation2 + $0x24] sm:$0xf] }
  0x93   : > { %2053 = vst [vmem:[#allocation3 + $0x78] sm:$0xf] %v1709_v50  ;;  %v1126_v56 = vld [vmem:[#allocation2 + $0x28] sm:$0xf]  ;;  %v1219_v48 = vshrl.u32 %v1125_v45, 16  ;;  %v1222_v57 = vshll.u32 %v1125_v45, 16 }
  0x94   : > { %v1216_v15 = vrot.slane %v1214_v49, 5  ;;  %1091 = vst [vmem:[#allocation3 + $0x94] sm:$0xf] %v1059_v40  ;;  %v1228_v60 = vshll.u32 %v1126_v56, 16  ;;  %v1232_v61 = vshrl.u32 %v1126_v56, 16  ;;  %v7330_v12 = vld [vmem:[%s9073_s3 + $0x1f0] sm:$0xff] }
  0x95   : > { %1092 = vst [vmem:[#allocation3 + $0xb8] sm:$0xf] %v1060_v47  ;;  %v1221_v63 = vrot.slane %v1219_v48, 4  ;;  %v1224_v0 = vrot.slane %v1222_v57, 5  ;;  %v1624_v4 = vld [vmem:[#allocation2 + $0x30] sm:$0x8]  ;;  %5763 = vmatpush.bf16.msra.mxu3 %v7330_v12 }
  0x96   : > { %v1217_v62 = vsel %vm8034_vm10, %v1212_v5, %v1216_v15  ;;  %514 = vst [vmem:[#allocation2 + $0x2c] sm:$0x1] %v513_v52  ;;  %v1230_v7 = vrot.slane %v1228_v60, 5  ;;  %v1234_v30 = vrot.slane %v1232_v61, 4  ;;  %v1625_v37 = vld [vmem:[#allocation2 + $0x34] sm:$0xf] }
  0x97   : > { %1589 = vst [vmem:[#allocation3 + $0x74] sm:$0xf] %v1217_v62  ;;  %v1225_v6 = vor.u32 %v1224_v0, %v1221_v63  ;;  %v1626_v55 = vld [vmem:[#allocation2 + $0x38] sm:$0xf]  ;;  %v1711_v10 = vshrl.u32 %v1624_v4, 16  ;;  %v1716_v11 = vshrl.u32 %v1625_v37, 16 }
  0x98   : > { %v1235_v9 = vor.u32 %v1234_v30, %v1230_v7  ;;  %v1719_v2 = vshll.u32 %v1625_v37, 16  ;;  %v1725_v13 = vshrl.u32 %v1626_v55, 16  ;;  %v1728_v14 = vshll.u32 %v1626_v55, 16  ;;  %v7314_v16 = vld [vmem:[%s9073_s3 + $0x170] sm:$0xff]  ;;  %v2087_v31 = vld [vmem:[#allocation2 + $0x38] sm:$0xf] }
  0x99   : > { %5503 = vmatmul.bf16.vlgmr.msrb.gmra.mxu0 %v6275_v53  ;;  %5241 = vmatmul.bf16.gmra.mxu1 %v6299_v54  ;;  %v7134_v8 = vld [vmem:[#allocation3 + $0x54] sm:$0xf]  ;;  %v1226_v43 = vrot.slane %v1225_v6, 4  ;;  %v6302_v17 = vld [vmem:[#allocation3 + $0x50] sm:$0xf]  ;;  %v6226_v18 = vrot.slane %v1711_v10, 11 }
  0x9a   : > { %v6304_v22 = vld [vmem:[#allocation3 + $0x74] sm:$0xf0]  ;;  %v1718_v26 = vrot.slane %v1716_v11, 7  ;;  %v7338_v58 = vld [vmem:[%s9073_s3 + $0x230] sm:$0xff]  ;;  %v1236_v23 = vrot.slane %v1235_v9, 4  ;;  %v1727_v24 = vrot.slane %v1725_v13, 7  ;;  %5585 = vmatpush.bf16.msra.mxu1 %v7314_v16 }
  0x9b   : > { %v1231_v20 = vsel %vm8034_vm10, %v1226_v43, %v1230_v7  ;;  %v2086_v25 = vld [vmem:[#allocation2 + $0x34] sm:$0xf]  ;;  %v6307_v29 = vor.u32 %v7134_v8, %v6304_v22  ;;  %5852 = vmatpush.bf16.msra.mxu0 %v7338_v58  ;;  %v6310_v38 = vld [vmem:[#allocation3 + $0x58] sm:$0xf]  ;;  %v7139_v39 = vld [vmem:[#allocation3 + $0x78] sm:$0xf0] }
  0x9c   : > { %1590 = vst [vmem:[#allocation3 + $0x98] sm:$0xf] %v1231_v20  ;;  %v1721_v32 = vor.u32 %v1719_v2, %v1718_v26  ;;  %v1723_v34 = vrot.slane %v1718_v26, 4  ;;  %v1730_v5 = vor.u32 %v1728_v14, %v1727_v24  ;;  %v1061_v36 = vld [vmem:[#allocation2 + $0x34] sm:$0xf]  ;;  %v6311_v57 = vor.u32 %v7139_v39, %v6310_v38 }
  0x9d   : > { %v1127_v19 = vld [vmem:[#allocation2 + $0x2c] sm:$0x1]  ;;  %2118 = vst [vmem:[#allocation3 + $0xa0] sm:$0xf] %v2086_v25  ;;  %v7142_v41 = vld [vmem:[#allocation3 + $0x94] sm:$0xf] }
  0x9e   : > { %v7138_v28 = vld [vmem:[#allocation3 + $0x70] sm:$0xf0]  ;;  %v1238_v59 = vshll.u32 %v1127_v19, 16  ;;  %v6332_v42 = vld [vmem:[#allocation3 + $0xb4] sm:$0xf0]  ;;  %v1722_v46 = vsel %vm7693_vm5, %v6226_v18, %v1721_v32  ;;  %v1731_v47 = vsel %vm7693_vm5, %v1723_v34, %v1730_v5 }
  0x9f   : > { %v6303_v35 = vor.u32 %v7138_v28, %v6302_v17  ;;  %2119 = vst [vmem:[#allocation3 + $0xc4] sm:$0xf] %v2087_v31  ;;  %v1062_v1 = vld [vmem:[#allocation2 + $0x38] sm:$0xf]  ;;  %v515_v49 = vld [vmem:[#allocation2 + $0x3c] sm:$0x1]  ;;  %v6335_v60 = vor.u32 %v7142_v41, %v6332_v42 }
  0xa0   : > { %v1240_v40 = vrot.slane %v1238_v59, 5  ;;  %2054 = vst [vmem:[#allocation3 + $0x9c] sm:$0xf] %v1722_v46  ;;  %v1128_v50 = vld [vmem:[#allocation2 + $0x34] sm:$0xf]  ;;  %v516_v45 = vsel %vm7996_vm7, 0, %v515_v49 }
  0xa1   : > { %5330 = vmatmul.bf16.gmra.mxu2 %v6303_v35  ;;  %2055 = vst [vmem:[#allocation3 + $0xc0] sm:$0xf] %v1731_v47  ;;  %v1129_v51 = vld [vmem:[#allocation2 + $0x38] sm:$0xf]  ;;  %v1243_v52 = vshrl.u32 %v1128_v50, 16  ;;  %v1246_v53 = vshll.u32 %v1128_v50, 16 }
  0xa2   : > { %5419 = vmatmul.bf16.gmra.mxu3 %v6307_v29  ;;  %v1241_v44 = vsel %vm8034_vm10, %v1236_v23, %v1240_v40  ;;  %v1252_v15 = vshll.u32 %v1129_v51, 16  ;;  %v1256_v56 = vshrl.u32 %v1129_v51, 16  ;;  %1093 = vst [vmem:[#allocation3 + $0xdc] sm:$0xf] %v1061_v36  ;;  %v1627_v54 = vld [vmem:[#allocation2 + $0x40] sm:$0x8] }
  0xa3   : > { %1591 = vst [vmem:[#allocation3 + $0xbc] sm:$0xf] %v1241_v44  ;;  %v1245_v48 = vrot.slane %v1243_v52, 4  ;;  %v1248_v61 = vrot.slane %v1246_v53, 5  ;;  %v1733_v0 = vshrl.u32 %v1627_v54, 16 }
  0xa4   : > { %1094 = vst [vmem:[#allocation3 + $0x100] sm:$0xf] %v1062_v1  ;;  %v1254_v62 = vrot.slane %v1252_v15, 5  ;;  %v1258_v63 = vrot.slane %v1256_v56, 4  ;;  %v1628_v30 = vld [vmem:[#allocation2 + $0x44] sm:$0xf] }
  0xa5   : > { %517 = vst [vmem:[#allocation2 + $0x3c] sm:$0x1] %v516_v45  ;;  %v1249_v7 = vor.u32 %v1248_v61, %v1245_v48  ;;  %v1629_v4 = vld [vmem:[#allocation2 + $0x48] sm:$0xf]  ;;  %v6338_v6 = vld [vmem:[#allocation3 + $0x98] sm:$0xf] }
  0xa6   : > { %v1738_v37 = vshrl.u32 %v1628_v30, 16  ;;  %v2088_v55 = vld [vmem:[#allocation2 + $0x44] sm:$0xf]  ;;  %v1741_v10 = vshll.u32 %v1628_v30, 16  ;;  %v1747_v11 = vshrl.u32 %v1629_v4, 16  ;;  %v1750_v2 = vshll.u32 %v1629_v4, 16 }
  0xa7   : > { %v7143_v8 = vld [vmem:[#allocation3 + $0x9c] sm:$0xf]  ;;  %v1250_v9 = vrot.slane %v1249_v7, 4  ;;  %v1259_v22 = vor.u32 %v1258_v63, %v1254_v62  ;;  %v6227_v43 = vrot.slane %v1733_v0, 11  ;;  %v2089_v14 = vld [vmem:[#allocation2 + $0x48] sm:$0xf] }
  0xa8   : > { %v1740_v13 = vrot.slane %v1738_v37, 7  ;;  %v6340_v16 = vld [vmem:[#allocation3 + $0xbc] sm:$0xf0]  ;;  %v1749_v18 = vrot.slane %v1747_v11, 7  ;;  %2120 = vst [vmem:[#allocation3 + $0xe8] sm:$0xf] %v2088_v55 }
  0xa9   : > { %5508 = vmatmul.bf16.gmra.mxu0 %v6311_v57  ;;  %5246 = vmatmul.bf16.gmra.mxu1 %v6335_v60  ;;  %v1255_v17 = vsel %vm8034_vm10, %v1250_v9, %v1254_v62  ;;  %2121 = vst [vmem:[#allocation3 + $0x10c] sm:$0xf] %v2089_v14  ;;  %v1063_v24 = vld [vmem:[#allocation2 + $0x44] sm:$0xf]  ;;  %v6343_v25 = vor.u32 %v7143_v8, %v6340_v16  ;;  %v1260_v28 = vrot.slane %v1259_v22, 4  ;;  %v7321_v30 = vld [vmem:[%s9073_s3 + $0x1a8] sm:$0xff] }
  0xaa   : > { %v7147_v12 = vld [vmem:[#allocation3 + $0xb8] sm:$0xf0]  ;;  %1592 = vst [vmem:[#allocation3 + $0xe0] sm:$0xf] %v1255_v17  ;;  %v1743_v26 = vor.u32 %v1741_v10, %v1740_v13  ;;  %v1745_v58 = vrot.slane %v1740_v13, 4  ;;  %v1752_v23 = vor.u32 %v1750_v2, %v1749_v18  ;;  %5675 = vmatpush.bf16.msra.mxu2 %v7321_v30  ;;  %v7329_v16 = vld [vmem:[%s9073_s3 + $0x1e8] sm:$0xff] }
  0xab   : > { %v6339_v19 = vor.u32 %v7147_v12, %v6338_v6  ;;  %v1064_v32 = vld [vmem:[#allocation2 + $0x48] sm:$0xf]  ;;  %1095 = vst [vmem:[#allocation3 + $0x124] sm:$0xf] %v1063_v24  ;;  %v6346_v34 = vld [vmem:[#allocation3 + $0xa0] sm:$0xf]  ;;  %5764 = vmatpush.bf16.msra.mxu3 %v7329_v16 }
  0xac   : > { %v1130_v20 = vld [vmem:[#allocation2 + $0x3c] sm:$0x1]  ;;  %v1744_v59 = vsel %vm7693_vm5, %v6227_v43, %v1743_v26  ;;  %v7148_v35 = vld [vmem:[#allocation3 + $0xc0] sm:$0xf0]  ;;  %v1753_v5 = vsel %vm7693_vm5, %v1745_v58, %v1752_v23  ;;  %v518_v31 = vld [vmem:[#allocation2 + $0x4c] sm:$0x1] }
  0xad   : > { %v1262_v29 = vshll.u32 %v1130_v20, 16  ;;  %2056 = vst [vmem:[#allocation3 + $0xe4] sm:$0xf] %v1744_v59  ;;  %v1131_v36 = vld [vmem:[#allocation2 + $0x44] sm:$0xf]  ;;  %v519_v41 = vsel %vm7996_vm7, 0, %v518_v31  ;;  %v6347_v45 = vor.u32 %v7148_v35, %v6346_v34 }
  0xae   : > { %v7151_v38 = vld [vmem:[#allocation3 + $0xdc] sm:$0xf]  ;;  %2057 = vst [vmem:[#allocation3 + $0x108] sm:$0xf] %v1753_v5  ;;  %v1132_v42 = vld [vmem:[#allocation2 + $0x48] sm:$0xf] }
  0xaf   : > { %v1264_v39 = vrot.slane %v1262_v29, 5  ;;  %1096 = vst [vmem:[#allocation3 + $0x148] sm:$0xf] %v1064_v32  ;;  %v1267_v40 = vshrl.u32 %v1131_v36, 16  ;;  %v1270_v46 = vshll.u32 %v1131_v36, 16  ;;  %v1276_v1 = vshll.u32 %v1132_v42, 16 }
  0xb0   : > { %v1280_v47 = vshrl.u32 %v1132_v42, 16  ;;  %v6368_v49 = vld [vmem:[#allocation3 + $0xfc] sm:$0xf0]  ;;  %520 = vst [vmem:[#allocation2 + $0x4c] sm:$0x1] %v519_v41  ;;  %v7337_v23 = vld [vmem:[%s9073_s3 + $0x228] sm:$0xff] }
  0xb1   : > { %5335 = vmatmul.bf16.gmra.mxu2 %v6339_v19  ;;  %v1265_v50 = vsel %vm8034_vm10, %v1260_v28, %v1264_v39  ;;  %v1630_v44 = vld [vmem:[#allocation2 + $0x50] sm:$0x8]  ;;  %v1269_v51 = vrot.slane %v1267_v40, 4  ;;  %v1272_v52 = vrot.slane %v1270_v46, 5  ;;  %v1278_v53 = vrot.slane %v1276_v1, 5  ;;  %v7313_v19 = vld [vmem:[%s9073_s3 + $0x168] sm:$0xff]  ;;  %5853 = vmatpush.bf16.msra.mxu0 %v7337_v23 }
  0xb2   : > { %5424 = vmatmul.bf16.gmra.mxu3 %v6343_v25  ;;  %1593 = vst [vmem:[#allocation3 + $0x104] sm:$0xf] %v1265_v50  ;;  %v1282_v15 = vrot.slane %v1280_v47, 4  ;;  %v1631_v56 = vld [vmem:[#allocation2 + $0x54] sm:$0xf]  ;;  %v6371_v48 = vor.u32 %v7151_v38, %v6368_v49  ;;  %v1755_v60 = vshrl.u32 %v1630_v44, 16  ;;  %v8104_v18 = vpop.f32.mrf.mxu1  ;;  %5586 = vmatpush.bf16.msra.mxu1 %v7313_v19 }
  0xb3   : > { %v1273_v54 = vor.u32 %v1272_v52, %v1269_v51  ;;  %v1632_v57 = vld [vmem:[#allocation2 + $0x58] sm:$0xf]  ;;  %v1760_v61 = vshrl.u32 %v1631_v56, 16  ;;  %v1763_v63 = vshll.u32 %v1631_v56, 16  ;;  %v6374_v55 = vld [vmem:[#allocation3 + $0xe0] sm:$0xf] }
  0xb4   : > { %v1283_v62 = vor.u32 %v1282_v15, %v1278_v53  ;;  %v1769_v0 = vshrl.u32 %v1632_v57, 16  ;;  %v1772_v7 = vshll.u32 %v1632_v57, 16  ;;  %v6228_v6 = vrot.slane %v1755_v60, 11  ;;  %v2090_v10 = vld [vmem:[#allocation2 + $0x54] sm:$0xf] }
  0xb5   : > { %v1274_v4 = vrot.slane %v1273_v54, 4  ;;  %v1762_v37 = vrot.slane %v1760_v61, 7  ;;  %v7152_v11 = vld [vmem:[#allocation3 + $0xe4] sm:$0xf]  ;;  %v6376_v2 = vld [vmem:[#allocation3 + $0x104] sm:$0xf0] }
  0xb6   : > { %v1284_v8 = vrot.slane %v1283_v62, 4  ;;  %v1771_v9 = vrot.slane %v1769_v0, 7  ;;  %v2091_v14 = vld [vmem:[#allocation2 + $0x58] sm:$0xf]  ;;  %2122 = vst [vmem:[#allocation3 + $0x130] sm:$0xf] %v2090_v10  ;;  %v6379_v35 = vor.u32 %v7152_v11, %v6376_v2 }
  0xb7   : > { %v1133_v12 = vld [vmem:[#allocation2 + $0x4c] sm:$0x1]  ;;  %v1279_v22 = vsel %vm8034_vm10, %v1274_v4, %v1278_v53  ;;  %v1765_v43 = vor.u32 %v1763_v63, %v1762_v37  ;;  %v1767_v13 = vrot.slane %v1762_v37, 4  ;;  %v1065_v24 = vld [vmem:[#allocation2 + $0x54] sm:$0xf] }
  0xb8   : > { %v1286_v26 = vshll.u32 %v1133_v12, 16  ;;  %1594 = vst [vmem:[#allocation3 + $0x128] sm:$0xf] %v1279_v22  ;;  %v1774_v58 = vor.u32 %v1772_v7, %v1771_v9  ;;  %v1066_v29 = vld [vmem:[#allocation2 + $0x58] sm:$0xf] }
  0xb9   : > { %5513 = vmatmul.bf16.gmra.mxu0 %v6347_v45  ;;  %5251 = vmatmul.bf16.gmra.mxu1 %v6371_v48  ;;  %v7156_v17 = vld [vmem:[#allocation3 + $0x100] sm:$0xf0]  ;;  %v1766_v20 = vsel %vm7693_vm5, %v6228_v6, %v1765_v43  ;;  %v521_v32 = vld [vmem:[#allocation2 + $0x5c] sm:$0x1]  ;;  %v1134_v34 = vld [vmem:[#allocation2 + $0x54] sm:$0xf] }
  0xba   : > { %v1288_v25 = vrot.slane %v1286_v26, 5  ;;  %v1775_v28 = vsel %vm7693_vm5, %v1767_v13, %v1774_v58  ;;  %2058 = vst [vmem:[#allocation3 + $0x12c] sm:$0xf] %v1766_v20  ;;  %v6375_v59 = vor.u32 %v7156_v17, %v6374_v55  ;;  %v1135_v31 = vld [vmem:[#allocation2 + $0x58] sm:$0xf]  ;;  %v1291_v36 = vshrl.u32 %v1134_v34, 16  ;;  %v8120_v53 = vpop.f32.mrf.mxu2  ;;  %v8122_v57 = vpop.f32.mrf.mxu1 }
  0xbb   : > { %2059 = vst [vmem:[#allocation3 + $0x150] sm:$0xf] %v1775_v28  ;;  %v6382_v38 = vld [vmem:[#allocation3 + $0xe8] sm:$0xf]  ;;  %v7157_v39 = vld [vmem:[#allocation3 + $0x108] sm:$0xf0]  ;;  %v8128_v58 = vpop.f32.mrf.mxu0 }
  0xbc   : > { %v1289_v5 = vsel %vm8034_vm10, %v1284_v8, %v1288_v25  ;;  %2123 = vst [vmem:[#allocation3 + $0x154] sm:$0xf] %v2091_v14  ;;  %v522_v41 = vsel %vm7996_vm7, 0, %v521_v32  ;;  %v1294_v42 = vshll.u32 %v1134_v34, 16  ;;  %v1300_v40 = vshll.u32 %v1135_v31, 16 }
  0xbd   : > { %1595 = vst [vmem:[#allocation3 + $0x14c] sm:$0xf] %v1289_v5  ;;  %v1304_v46 = vshrl.u32 %v1135_v31, 16  ;;  %v1293_v1 = vrot.slane %v1291_v36, 4  ;;  %v1633_v47 = vld [vmem:[#allocation2 + $0x60] sm:$0x8]  ;;  %v6383_v54 = vor.u32 %v7157_v39, %v6382_v38  ;;  %v8126_v14 = vpop.f32.mrf.mxu3 }
  0xbe   : > { %1097 = vst [vmem:[#allocation3 + $0x16c] sm:$0xf] %v1065_v24  ;;  %v7160_v49 = vld [vmem:[#allocation3 + $0x124] sm:$0xf]  ;;  %v1296_v50 = vrot.slane %v1294_v42, 5  ;;  %v1302_v44 = vrot.slane %v1300_v40, 5 }
  0xbf   : > { %1098 = vst [vmem:[#allocation3 + $0x190] sm:$0xf] %v1066_v29  ;;  %v6404_v51 = vld [vmem:[#allocation3 + $0x144] sm:$0xf0]  ;;  %v1306_v52 = vrot.slane %v1304_v46, 4  ;;  %v1777_v45 = vshrl.u32 %v1633_v47, 16 }
  0xc0   : > { %523 = vst [vmem:[#allocation2 + $0x5c] sm:$0x1] %v522_v41  ;;  %v1297_v15 = vor.u32 %v1296_v50, %v1293_v1  ;;  %v1634_v56 = vld [vmem:[#allocation2 + $0x64] sm:$0xf]  ;;  %v1635_v48 = vld [vmem:[#allocation2 + $0x68] sm:$0xf]  ;;  %v6407_v63 = vor.u32 %v7160_v49, %v6404_v51 }
  0xc1   : > { %5340 = vmatmul.bf16.gmra.mxu2 %v6375_v59  ;;  %v1307_v60 = vor.u32 %v1306_v52, %v1302_v44  ;;  %v1782_v61 = vshrl.u32 %v1634_v56, 16  ;;  %v1785_v62 = vshll.u32 %v1634_v56, 16  ;;  %v1791_v7 = vshrl.u32 %v1635_v48, 16  ;;  %v2092_v37 = vld [vmem:[#allocation2 + $0x64] sm:$0xf] }
  0xc2   : > { %5429 = vmatmul.bf16.gmra.mxu3 %v6379_v35  ;;  %v1298_v0 = vrot.slane %v1297_v15, 4  ;;  %v1794_v30 = vshll.u32 %v1635_v48, 16  ;;  %v6229_v4 = vrot.slane %v1777_v45, 11  ;;  %v2093_v9 = vld [vmem:[#allocation2 + $0x68] sm:$0xf]  ;;  %v8136_v31 = vpop.f32.mrf.mxu2  ;;  %v8138_v42 = vpop.f32.mrf.mxu1 }
  0xc3   : > { %v1784_v6 = vrot.slane %v1782_v61, 7  ;;  %v1793_v8 = vrot.slane %v1791_v7, 7  ;;  %v6410_v10 = vld [vmem:[#allocation3 + $0x128] sm:$0xf]  ;;  %v1308_v2 = vrot.slane %v1307_v60, 4 }
  0xc4   : > { %v1303_v55 = vsel %vm8034_vm10, %v1298_v0, %v1302_v44  ;;  %v7165_v11 = vld [vmem:[#allocation3 + $0x148] sm:$0xf0]  ;;  %v6412_v13 = vld [vmem:[#allocation3 + $0x14c] sm:$0xf0]  ;;  %2124 = vst [vmem:[#allocation3 + $0x178] sm:$0xf] %v2092_v37 }
  0xc5   : > { %1596 = vst [vmem:[#allocation3 + $0x170] sm:$0xf] %v1303_v55  ;;  %v1787_v12 = vor.u32 %v1785_v62, %v1784_v6  ;;  %v1789_v22 = vrot.slane %v1784_v6, 4  ;;  %v7161_v43 = vld [vmem:[#allocation3 + $0x12c] sm:$0xf]  ;;  %v1796_v17 = vor.u32 %v1794_v30, %v1793_v8  ;;  %v6411_v5 = vor.u32 %v7165_v11, %v6410_v10  ;;  %v7320_v0 = vld [vmem:[%s9073_s3 + $0x1a0] sm:$0xff]  ;;  %v8145_v7 = vpop.f32.mrf.mxu3  ;;  %v8149_v8 = vpop.f32.mrf.mxu0 }
  0xc6   : > { %v524_v26 = vld [vmem:[#allocation2 + $0x6c] sm:$0x1]  ;;  %2125 = vst [vmem:[#allocation3 + $0x19c] sm:$0xf] %v2093_v9  ;;  %v1137_v24 = vld [vmem:[#allocation2 + $0x64] sm:$0xf]  ;;  %v6415_v41 = vor.u32 %v7161_v43, %v6412_v13  ;;  %5676 = vmatpush.bf16.msra.mxu2 %v7320_v0 }
  0xc7   : > { %v1136_v16 = vld [vmem:[#allocation2 + $0x5c] sm:$0x1]  ;;  %v1788_v20 = vsel %vm7693_vm5, %v6229_v4, %v1787_v12  ;;  %v525_v23 = vsel %vm7996_vm7, 0, %v524_v26  ;;  %v1797_v25 = vsel %vm7693_vm5, %v1789_v22, %v1796_v17  ;;  %v1138_v28 = vld [vmem:[#allocation2 + $0x68] sm:$0xf]  ;;  %v1315_v29 = vshrl.u32 %v1137_v24, 16 }
  0xc8   : > { %v1310_v19 = vshll.u32 %v1136_v16, 16  ;;  %2060 = vst [vmem:[#allocation3 + $0x174] sm:$0xf] %v1788_v20  ;;  %v1318_v59 = vshll.u32 %v1137_v24, 16  ;;  %v1067_v34 = vld [vmem:[#allocation2 + $0x64] sm:$0xf] }
  0xc9   : > { %5518 = vmatmul.bf16.gmra.mxu0 %v6383_v54  ;;  %5256 = vmatmul.bf16.gmra.mxu1 %v6407_v63  ;;  %2061 = vst [vmem:[#allocation3 + $0x198] sm:$0xf] %v1797_v25  ;;  %v1324_v35 = vshll.u32 %v1138_v28, 16  ;;  %v1068_v36 = vld [vmem:[#allocation2 + $0x68] sm:$0xf]  ;;  %v1317_v38 = vrot.slane %v1315_v29, 4 }
  0xca   : > { %v1312_v32 = vrot.slane %v1310_v19, 5  ;;  %1099 = vst [vmem:[#allocation3 + $0x1b4] sm:$0xf] %v1067_v34  ;;  %v1320_v39 = vrot.slane %v1318_v59, 5  ;;  %v1328_v1 = vshrl.u32 %v1138_v28, 16  ;;  %v8155_v24 = vpop.f32.mrf.mxu1  ;;  %v7328_v34 = vld [vmem:[%s9073_s3 + $0x1e0] sm:$0xff] }
  0xcb   : > { %1100 = vst [vmem:[#allocation3 + $0x1d8] sm:$0xf] %v1068_v36  ;;  %v1326_v46 = vrot.slane %v1324_v35, 5  ;;  %v1636_v47 = vld [vmem:[#allocation2 + $0x70] sm:$0x8]  ;;  %v7312_v35 = vld [vmem:[%s9073_s3 + $0x160] sm:$0xff]  ;;  %5765 = vmatpush.bf16.msra.mxu3 %v7328_v34 }
  0xcc   : > { %v1313_v40 = vsel %vm8034_vm10, %v1308_v2, %v1312_v32  ;;  %v6418_v49 = vld [vmem:[#allocation3 + $0x130] sm:$0xf]  ;;  %v1321_v50 = vor.u32 %v1320_v39, %v1317_v38  ;;  %v1637_v44 = vld [vmem:[#allocation2 + $0x74] sm:$0xf]  ;;  %526 = vst [vmem:[#allocation2 + $0x6c] sm:$0x1] %v525_v23  ;;  %5587 = vmatpush.bf16.msra.mxu1 %v7312_v35 }
  0xcd   : > { %1597 = vst [vmem:[#allocation3 + $0x194] sm:$0xf] %v1313_v40  ;;  %v7166_v51 = vld [vmem:[#allocation3 + $0x150] sm:$0xf0]  ;;  %v1330_v52 = vrot.slane %v1328_v1, 4  ;;  %v1799_v45 = vshrl.u32 %v1636_v47, 16 }
  0xce   : > { %v7169_v15 = vld [vmem:[#allocation3 + $0x16c] sm:$0xf]  ;;  %v1322_v56 = vrot.slane %v1321_v50, 4  ;;  %v1638_v48 = vld [vmem:[#allocation2 + $0x78] sm:$0xf]  ;;  %v1804_v54 = vshrl.u32 %v1637_v44, 16  ;;  %v6419_v55 = vor.u32 %v7166_v51, %v6418_v49 }
  0xcf   : > { %v6440_v60 = vld [vmem:[#allocation3 + $0x18c] sm:$0xf0]  ;;  %v1331_v61 = vor.u32 %v1330_v52, %v1326_v46  ;;  %v6230_v62 = vrot.slane %v1799_v45, 11  ;;  %v1807_v63 = vshll.u32 %v1637_v44, 16  ;;  %v1813_v6 = vshrl.u32 %v1638_v48, 16  ;;  %v8151_v13 = vpop.f32.mrf.mxu2 }
  0xd0   : > { %v1327_v30 = vsel %vm8034_vm10, %v1322_v56, %v1326_v46  ;;  %v1806_v4 = vrot.slane %v1804_v54, 7  ;;  %v1816_v37 = vshll.u32 %v1638_v48, 16  ;;  %v6443_v9 = vor.u32 %v7169_v15, %v6440_v60  ;;  %v2094_v12 = vld [vmem:[#allocation2 + $0x74] sm:$0xf]  ;;  %v2095_v43 = vld [vmem:[#allocation2 + $0x78] sm:$0xf] }
  0xd1   : > { %5345 = vmatmul.bf16.gmra.mxu2 %v6411_v5  ;;  %1598 = vst [vmem:[#allocation3 + $0x1b8] sm:$0xf] %v1327_v30  ;;  %v1815_v2 = vrot.slane %v1813_v6, 7  ;;  %v1332_v22 = vrot.slane %v1331_v61, 4  ;;  %v527_v19 = vld [vmem:[#allocation2 + $0x7c] sm:$0x1] }
  0xd2   : > { %5434 = vmatmul.bf16.gmra.mxu3 %v6415_v41  ;;  %v1809_v10 = vor.u32 %v1807_v63, %v1806_v4  ;;  %v1811_v11 = vrot.slane %v1806_v4, 4  ;;  %2126 = vst [vmem:[#allocation3 + $0x1c0] sm:$0xf] %v2094_v12  ;;  %v6446_v20 = vld [vmem:[#allocation3 + $0x170] sm:$0xf]  ;;  %v528_v28 = vsel %vm7996_vm7, 0, %v527_v19  ;;  %v8174_v48 = vpop.f32.mrf.mxu0 }
  0xd3   : > { %v1139_v16 = vld [vmem:[#allocation2 + $0x6c] sm:$0x1]  ;;  %v1818_v26 = vor.u32 %v1816_v37, %v1815_v2  ;;  %2127 = vst [vmem:[#allocation3 + $0x1e4] sm:$0xf] %v2095_v43  ;;  %v1140_v29 = vld [vmem:[#allocation2 + $0x74] sm:$0xf] }
  0xd4   : > { %v1810_v17 = vsel %vm7693_vm5, %v6230_v62, %v1809_v10  ;;  %v7174_v23 = vld [vmem:[#allocation3 + $0x190] sm:$0xf0]  ;;  %v1334_v25 = vshll.u32 %v1139_v16, 16  ;;  %v7336_v5 = vld [vmem:[%s9073_s3 + $0x220] sm:$0xff]  ;;  %529 = vst [vmem:[#allocation2 + $0x7c] sm:$0x1] %v528_v28  ;;  %v8172_v45 = vpop.f32.mrf.mxu3 }
  0xd5   : > { %2062 = vst [vmem:[#allocation3 + $0x1bc] sm:$0xf] %v1810_v17  ;;  %v7170_v59 = vld [vmem:[#allocation3 + $0x174] sm:$0xf]  ;;  %v1819_v32 = vsel %vm7693_vm5, %v1811_v11, %v1818_v26  ;;  %v1339_v36 = vshrl.u32 %v1140_v29, 16  ;;  %v1342_v41 = vshll.u32 %v1140_v29, 16  ;;  %5854 = vmatpush.bf16.msra.mxu0 %v7336_v5  ;;  %v6447_v52 = vor.u32 %v7174_v23, %v6446_v20 }
  0xd6   : > { %v1336_v38 = vrot.slane %v1334_v25, 5  ;;  %2063 = vst [vmem:[#allocation3 + $0x1e0] sm:$0xf] %v1819_v32  ;;  %v1141_v39 = vld [vmem:[#allocation2 + $0x78] sm:$0xf] }
  0xd7   : > { %v6448_v40 = vld [vmem:[#allocation3 + $0x194] sm:$0xf0]  ;;  %v1341_v46 = vrot.slane %v1339_v36, 4  ;;  %v1348_v1 = vshll.u32 %v1141_v39, 16  ;;  %v1352_v47 = vshrl.u32 %v1141_v39, 16  ;;  %v1344_v51 = vrot.slane %v1342_v41, 5  ;;  %v8176_v10 = vpop.f32.mrf.mxu2 }
  0xd8   : > { %v1337_v49 = vsel %vm8034_vm10, %v1332_v22, %v1336_v38  ;;  %v1069_v50 = vld [vmem:[#allocation2 + $0x74] sm:$0xf]  ;;  %v1070_v44 = vld [vmem:[#allocation2 + $0x78] sm:$0xf]  ;;  %v6451_v54 = vor.u32 %v7170_v59, %v6448_v40  ;;  %v1639_v61 = vld [vmem:[#allocation2 + $0x80] sm:$0x8] }
  0xd9   : > { %5523 = vmatmul.bf16.gmra.mxu0 %v6419_v55  ;;  %5261 = vmatmul.bf16.gmra.mxu1 %v6443_v9  ;;  %1599 = vst [vmem:[#allocation3 + $0x1dc] sm:$0xf] %v1337_v49  ;;  %v1350_v15 = vrot.slane %v1348_v1, 5  ;;  %v1354_v56 = vrot.slane %v1352_v47, 4  ;;  %v1345_v60 = vor.u32 %v1344_v51, %v1341_v46  ;;  %v6454_v62 = vld [vmem:[#allocation3 + $0x178] sm:$0xf] }
  0xda   : > { %1101 = vst [vmem:[#allocation3 + $0x1fc] sm:$0xf] %v1069_v50  ;;  %v7175_v63 = vld [vmem:[#allocation3 + $0x198] sm:$0xf0]  ;;  %v1640_v30 = vld [vmem:[#allocation2 + $0x84] sm:$0xf]  ;;  %v8190_v49 = vpop.f32.mrf.mxu0 }
  0xdb   : > { %1102 = vst [vmem:[#allocation3 + $0x220] sm:$0xf] %v1070_v44  ;;  %v1355_v0 = vor.u32 %v1354_v56, %v1350_v15  ;;  %v7178_v4 = vld [vmem:[#allocation3 + $0x1b4] sm:$0xf]  ;;  %v1142_v6 = vld [vmem:[#allocation2 + $0x7c] sm:$0x1]  ;;  %v6455_v59 = vor.u32 %v7175_v63, %v6454_v62 }
  0xdc   : > { %v1346_v37 = vrot.slane %v1345_v60, 4  ;;  %v1641_v55 = vld [vmem:[#allocation2 + $0x88] sm:$0xf]  ;;  %v1821_v9 = vshrl.u32 %v1639_v61, 16  ;;  %v6476_v11 = vld [vmem:[#allocation3 + $0x1d4] sm:$0xf0]  ;;  %v8178_v16 = vpop.f32.mrf.mxu1  ;;  %v8184_v41 = vpop.f32.mrf.mxu3 }
  0xdd   : > { %v1356_v2 = vrot.slane %v1355_v0, 4  ;;  %v1358_v12 = vshll.u32 %v1142_v6, 16  ;;  %v1826_v22 = vshrl.u32 %v1640_v30, 16  ;;  %v1829_v43 = vshll.u32 %v1640_v30, 16  ;;  %v2096_v19 = vld [vmem:[#allocation2 + $0x84] sm:$0xf] }
  0xde   : > { %v1351_v17 = vsel %vm8034_vm10, %v1346_v37, %v1350_v15  ;;  %v1835_v26 = vshrl.u32 %v1641_v55, 16  ;;  %v2097_v20 = vld [vmem:[#allocation2 + $0x88] sm:$0xf]  ;;  %v6231_v25 = vrot.slane %v1821_v9, 11  ;;  %v1838_v29 = vshll.u32 %v1641_v55, 16 }
  0xdf   : > { %v1360_v23 = vrot.slane %v1358_v12, 5  ;;  %1600 = vst [vmem:[#allocation3 + $0x200] sm:$0xf] %v1351_v17  ;;  %v1828_v28 = vrot.slane %v1826_v22, 7  ;;  %v6479_v34 = vor.u32 %v7178_v4, %v6476_v11  ;;  %v530_v39 = vld [vmem:[#allocation2 + $0x8c] sm:$0x1] }
  0xe0   : > { %v1837_v32 = vrot.slane %v1835_v26, 7  ;;  %2128 = vst [vmem:[#allocation3 + $0x208] sm:$0xf] %v2096_v19  ;;  %v531_v46 = vsel %vm7996_vm7, 0, %v530_v39  ;;  %v1143_v1 = vld [vmem:[#allocation2 + $0x84] sm:$0xf] }
  0xe1   : > { %5350 = vmatmul.bf16.gmra.mxu2 %v6447_v52  ;;  %v1361_v35 = vsel %vm8034_vm10, %v1356_v2, %v1360_v23  ;;  %v1831_v5 = vor.u32 %v1829_v43, %v1828_v28  ;;  %v1833_v36 = vrot.slane %v1828_v28, 4  ;;  %2129 = vst [vmem:[#allocation3 + $0x22c] sm:$0xf] %v2097_v20  ;;  %v1144_v47 = vld [vmem:[#allocation2 + $0x88] sm:$0xf]  ;;  %v1363_v51 = vshrl.u32 %v1143_v1, 16 }
  0xe2   : > { %5439 = vmatmul.bf16.gmra.mxu3 %v6451_v54  ;;  %1601 = vst [vmem:[#allocation3 + $0x224] sm:$0xf] %v1361_v35  ;;  %v1840_v38 = vor.u32 %v1838_v29, %v1837_v32  ;;  %v6482_v50 = vld [vmem:[#allocation3 + $0x1b8] sm:$0xf]  ;;  %v1366_v52 = vshll.u32 %v1143_v1, 16  ;;  %v1372_v15 = vshll.u32 %v1144_v47, 16 }
  0xe3   : > { %v1832_v40 = vsel %vm7693_vm5, %v6231_v25, %v1831_v5  ;;  %v7179_v56 = vld [vmem:[#allocation3 + $0x1bc] sm:$0xf]  ;;  %v6484_v54 = vld [vmem:[#allocation3 + $0x1dc] sm:$0xf0]  ;;  %v1376_v60 = vshrl.u32 %v1144_v47, 16  ;;  %v1365_v62 = vrot.slane %v1363_v51, 4 }
  0xe4   : > { %v1841_v44 = vsel %vm7693_vm5, %v1833_v36, %v1840_v38  ;;  %2064 = vst [vmem:[#allocation3 + $0x204] sm:$0xf] %v1832_v40  ;;  %v7183_v61 = vld [vmem:[#allocation3 + $0x1d8] sm:$0xf0]  ;;  %v1368_v63 = vrot.slane %v1366_v52, 5  ;;  %v1374_v30 = vrot.slane %v1372_v15, 5  ;;  %v8196_v55 = vpop.f32.mrf.mxu1  ;;  %v6487_v17 = vor.u32 %v7179_v56, %v6484_v54 }
  0xe5   : > { %2065 = vst [vmem:[#allocation3 + $0x228] sm:$0xf] %v1841_v44  ;;  %v1378_v4 = vrot.slane %v1376_v60, 4  ;;  %v1642_v6 = vld [vmem:[#allocation2 + $0x90] sm:$0x8]  ;;  %v6483_v12 = vor.u32 %v7183_v61, %v6482_v50 }
  0xe6   : > { %532 = vst [vmem:[#allocation2 + $0x8c] sm:$0x1] %v531_v46  ;;  %v1643_v37 = vld [vmem:[#allocation2 + $0x94] sm:$0xf]  ;;  %v1071_v9 = vld [vmem:[#allocation2 + $0x84] sm:$0xf]  ;;  %v1369_v2 = vor.u32 %v1368_v63, %v1365_v62 }
  0xe7   : > { %v1072_v11 = vld [vmem:[#allocation2 + $0x88] sm:$0xf]  ;;  %1103 = vst [vmem:[#allocation3 + $0x244] sm:$0xf] %v1071_v9  ;;  %v1379_v22 = vor.u32 %v1378_v4, %v1374_v30  ;;  %v1644_v43 = vld [vmem:[#allocation2 + $0x98] sm:$0xf] }
  0xe8   : > { %1104 = vst [vmem:[#allocation3 + $0x268] sm:$0xf] %v1072_v11  ;;  %v1370_v26 = vrot.slane %v1369_v2, 4  ;;  %v1843_v19 = vshrl.u32 %v1642_v6, 16  ;;  %v1848_v20 = vshrl.u32 %v1643_v37, 16  ;;  %v1851_v29 = vshll.u32 %v1643_v37, 16 }
  0xe9   : > { %5528 = vmatmul.bf16.gmra.mxu0 %v6455_v59  ;;  %5266 = vmatmul.bf16.gmra.mxu1 %v6479_v34  ;;  %v8194_v0 = vpop.f32.mrf.mxu2  ;;  %v6490_v23 = vld [vmem:[#allocation3 + $0x1c0] sm:$0xf]  ;;  %v7184_v25 = vld [vmem:[#allocation3 + $0x1e0] sm:$0xf0]  ;;  %v7187_v28 = vld [vmem:[#allocation3 + $0x1fc] sm:$0xf] }
  0xea   : > { %v1857_v59 = vshrl.u32 %v1644_v43, 16  ;;  %v1860_v32 = vshll.u32 %v1644_v43, 16  ;;  %v6512_v34 = vld [vmem:[#allocation3 + $0x21c] sm:$0xf0]  ;;  %v1375_v35 = vsel %vm8034_vm10, %v1370_v26, %v1374_v30  ;;  %v6232_v5 = vrot.slane %v1843_v19, 11 }
  0xeb   : > { %v1850_v36 = vrot.slane %v1848_v20, 7  ;;  %v2098_v38 = vld [vmem:[#allocation2 + $0x94] sm:$0xf]  ;;  %v1380_v46 = vrot.slane %v1379_v22, 4  ;;  %1602 = vst [vmem:[#allocation3 + $0x248] sm:$0xf] %v1375_v35  ;;  %v6491_v60 = vor.u32 %v7184_v25, %v6490_v23  ;;  %v6515_v61 = vor.u32 %v7187_v28, %v6512_v34 }
  0xec   : > { %v8200_v39 = vpop.f32.mrf.mxu3  ;;  %v1859_v1 = vrot.slane %v1857_v59, 7  ;;  %v2099_v52 = vld [vmem:[#allocation2 + $0x98] sm:$0xf]  ;;  %2130 = vst [vmem:[#allocation3 + $0x250] sm:$0xf] %v2098_v38 }
  0xed   : > { %v1145_v40 = vld [vmem:[#allocation2 + $0x8c] sm:$0x1]  ;;  %v1853_v44 = vor.u32 %v1851_v29, %v1850_v36  ;;  %v1855_v51 = vrot.slane %v1850_v36, 4  ;;  %2131 = vst [vmem:[#allocation3 + $0x274] sm:$0xf] %v2099_v52  ;;  %v7319_v22 = vld [vmem:[%s9073_s3 + $0x198] sm:$0xff] }
  0xee   : > { %v1382_v50 = vshll.u32 %v1145_v40, 16  ;;  %v1862_v15 = vor.u32 %v1860_v32, %v1859_v1  ;;  %v533_v56 = vld [vmem:[#allocation2 + $0x9c] sm:$0x1]  ;;  %v1146_v54 = vld [vmem:[#allocation2 + $0x94] sm:$0xf]  ;;  %5677 = vmatpush.bf16.msra.mxu2 %v7319_v22 }
  0xef   : > { %v8202_v47 = vpop.f32.mrf.mxu0  ;;  %v1854_v63 = vsel %vm7693_vm5, %v6232_v5, %v1853_v44  ;;  %v1147_v30 = vld [vmem:[#allocation2 + $0x98] sm:$0xf]  ;;  %v534_v37 = vsel %vm7996_vm7, 0, %v533_v56  ;;  %v1387_v9 = vshrl.u32 %v1146_v54, 16  ;;  %v1390_v11 = vshll.u32 %v1146_v54, 16 }
  0xf0   : > { %v1384_v62 = vrot.slane %v1382_v50, 5  ;;  %v1863_v6 = vsel %vm7693_vm5, %v1855_v51, %v1862_v15  ;;  %2066 = vst [vmem:[#allocation3 + $0x24c] sm:$0xf] %v1854_v63  ;;  %v1396_v43 = vshll.u32 %v1147_v30, 16  ;;  %v1645_v20 = vld [vmem:[#allocation2 + $0xa0] sm:$0x8] }
  0xf1   : > { %5355 = vmatmul.bf16.gmra.mxu2 %v6483_v12  ;;  %v8206_v4 = vpop.f32.mrf.mxu2  ;;  %2067 = vst [vmem:[#allocation3 + $0x270] sm:$0xf] %v1863_v6  ;;  %v1389_v26 = vrot.slane %v1387_v9, 4  ;;  %v1392_v19 = vrot.slane %v1390_v11, 5  ;;  %v6518_v28 = vld [vmem:[#allocation3 + $0x200] sm:$0xf] }
  0xf2   : > { %5444 = vmatmul.bf16.gmra.mxu3 %v6487_v17  ;;  %v1385_v12 = vsel %vm8034_vm10, %v1380_v46, %v1384_v62  ;;  %v1400_v17 = vshrl.u32 %v1147_v30, 16  ;;  %535 = vst [vmem:[#allocation2 + $0x9c] sm:$0x1] %v534_v37  ;;  %v1398_v23 = vrot.slane %v1396_v43, 5  ;;  %v7327_v29 = vld [vmem:[%s9073_s3 + $0x1d8] sm:$0xff]  ;;  %v1865_v5 = vshrl.u32 %v1645_v20, 16 }
  0xf3   : > { %1603 = vst [vmem:[#allocation3 + $0x26c] sm:$0xf] %v1385_v12  ;;  %v7311_v59 = vld [vmem:[%s9073_s3 + $0x158] sm:$0xff]  ;;  %v1393_v32 = vor.u32 %v1392_v19, %v1389_v26  ;;  %v7192_v34 = vld [vmem:[#allocation3 + $0x220] sm:$0xf0]  ;;  %5766 = vmatpush.bf16.msra.mxu3 %v7327_v29 }
  0xf4   : > { %v1402_v25 = vrot.slane %v1400_v17, 4  ;;  %v1646_v35 = vld [vmem:[#allocation2 + $0xa4] sm:$0xf]  ;;  %v8225_v36 = vpop.f32.mrf.mxu3  ;;  %v6520_v40 = vld [vmem:[#allocation3 + $0x224] sm:$0xf0]  ;;  %5588 = vmatpush.bf16.msra.mxu1 %v7311_v59  ;;  %v6519_v56 = vor.u32 %v7192_v34, %v6518_v28  ;;  %v7335_v63 = vld [vmem:[%s9073_s3 + $0x218] sm:$0xff] }
  0xf5   : > { %v7188_v38 = vld [vmem:[#allocation3 + $0x204] sm:$0xf]  ;;  %v1394_v46 = vrot.slane %v1393_v32, 4  ;;  %v1870_v50 = vshrl.u32 %v1646_v35, 16  ;;  %v1073_v51 = vld [vmem:[#allocation2 + $0x94] sm:$0xf]  ;;  %5855 = vmatpush.bf16.msra.mxu0 %v7335_v63 }
  0xf6   : > { %v8212_v2 = vpop.f32.mrf.mxu1  ;;  %v1403_v1 = vor.u32 %v1402_v25, %v1398_v23  ;;  %v1074_v52 = vld [vmem:[#allocation2 + $0x98] sm:$0xf]  ;;  %v1647_v15 = vld [vmem:[#allocation2 + $0xa8] sm:$0xf]  ;;  %1105 = vst [vmem:[#allocation3 + $0x28c] sm:$0xf] %v1073_v51 }
  0xf7   : > { %v8227_v44 = vpop.f32.mrf.mxu0  ;;  %v1399_v54 = vsel %vm8034_vm10, %v1394_v46, %v1398_v23  ;;  %1106 = vst [vmem:[#allocation3 + $0x2b0] sm:$0xf] %v1074_v52  ;;  %v6233_v30 = vrot.slane %v1865_v5, 11  ;;  %v1873_v6 = vshll.u32 %v1646_v35, 16  ;;  %v6526_v37 = vld [vmem:[#allocation3 + $0x208] sm:$0xf] }
  0xf8   : > { %v7193_v9 = vld [vmem:[#allocation3 + $0x228] sm:$0xf0]  ;;  %v1404_v22 = vrot.slane %v1403_v1, 4  ;;  %1604 = vst [vmem:[#allocation3 + $0x290] sm:$0xf] %v1399_v54  ;;  %v1879_v43 = vshrl.u32 %v1647_v15, 16 }
  0xf9   : > { %5533 = vmatmul.bf16.gmra.mxu0 %v6491_v60  ;;  %5271 = vmatmul.bf16.gmra.mxu1 %v6515_v61  ;;  %v1872_v60 = vrot.slane %v1870_v50, 7  ;;  %v6523_v61 = vor.u32 %v7188_v38, %v6520_v40  ;;  %v1148_v12 = vld [vmem:[#allocation2 + $0x9c] sm:$0x1]  ;;  %v7196_v17 = vld [vmem:[#allocation3 + $0x244] sm:$0xf]  ;;  %v1882_v20 = vshll.u32 %v1647_v15, 16  ;;  %v6527_v1 = vor.u32 %v7193_v9, %v6526_v37 }
  0xfa   : > { %v1406_v26 = vshll.u32 %v1148_v12, 16  ;;  %v2100_v23 = vld [vmem:[#allocation2 + $0xa4] sm:$0xf]  ;;  %v2101_v25 = vld [vmem:[#allocation2 + $0xa8] sm:$0xf]  ;;  %v1881_v29 = vrot.slane %v1879_v43, 7 }
  0xfb   : > { %v1875_v19 = vor.u32 %v1873_v6, %v1872_v60  ;;  %v1877_v28 = vrot.slane %v1872_v60, 4  ;;  %2132 = vst [vmem:[#allocation3 + $0x298] sm:$0xf] %v2100_v23  ;;  %v536_v59 = vld [vmem:[#allocation2 + $0xac] sm:$0x1] }
  0xfc   : > { %v6548_v32 = vld [vmem:[#allocation3 + $0x264] sm:$0xf0]  ;;  %v1408_v34 = vrot.slane %v1406_v26, 5  ;;  %2133 = vst [vmem:[#allocation3 + $0x2bc] sm:$0xf] %v2101_v25  ;;  %v537_v5 = vsel %vm7996_vm7, 0, %v536_v59  ;;  %v1884_v38 = vor.u32 %v1882_v20, %v1881_v29 }
  0xfd   : > { %v1876_v35 = vsel %vm7693_vm5, %v6233_v30, %v1875_v19  ;;  %v1149_v40 = vld [vmem:[#allocation2 + $0xa4] sm:$0xf]  ;;  %v1150_v46 = vld [vmem:[#allocation2 + $0xa8] sm:$0xf]  ;;  %538 = vst [vmem:[#allocation2 + $0xac] sm:$0x1] %v537_v5 }
  0xfe   : > { %v8231_v62 = vpop.f32.mrf.mxu1  ;;  %2068 = vst [vmem:[#allocation3 + $0x294] sm:$0xf] %v1876_v35  ;;  %v1409_v50 = vsel %vm8034_vm10, %v1404_v22, %v1408_v34  ;;  %v1411_v51 = vshrl.u32 %v1149_v40, 16  ;;  %v1414_v52 = vshll.u32 %v1149_v40, 16  ;;  %v1885_v54 = vsel %vm7693_vm5, %v1877_v28, %v1884_v38  ;;  %v1648_v22 = vld [vmem:[#allocation2 + $0xb0] sm:$0x8] }
  0xff   : > { %v8236_v11 = vpop.f32.mrf.mxu2  ;;  %1605 = vst [vmem:[#allocation3 + $0x2b4] sm:$0xf] %v1409_v50  ;;  %v1420_v60 = vshll.u32 %v1150_v46, 16  ;;  %v1649_v43 = vld [vmem:[#allocation2 + $0xb4] sm:$0xf] }
 0x100   : > { %2069 = vst [vmem:[#allocation3 + $0x2b8] sm:$0xf] %v1885_v54  ;;  %v1413_v6 = vrot.slane %v1411_v51, 4  ;;  %v1416_v37 = vrot.slane %v1414_v52, 5  ;;  %v6554_v26 = vld [vmem:[#allocation3 + $0x248] sm:$0xf] }
 0x101   : > { %5360 = vmatmul.bf16.gmra.mxu2 %v6519_v56  ;;  %v6551_v56 = vor.u32 %v7196_v17, %v6548_v32  ;;  %v1422_v9 = vrot.slane %v1420_v60, 5  ;;  %v1650_v20 = vld [vmem:[#allocation2 + $0xb8] sm:$0xf]  ;;  %v1887_v17 = vshrl.u32 %v1648_v22, 16  ;;  %v1892_v23 = vshrl.u32 %v1649_v43, 16 }
 0x102   : > { %5449 = vmatmul.bf16.gmra.mxu3 %v6523_v61  ;;  %v1424_v61 = vshrl.u32 %v1150_v46, 16  ;;  %v1417_v19 = vor.u32 %v1416_v37, %v1413_v6  ;;  %v7201_v28 = vld [vmem:[#allocation3 + $0x268] sm:$0xf0]  ;;  %v1895_v59 = vshll.u32 %v1649_v43, 16  ;;  %v1901_v32 = vshrl.u32 %v1650_v20, 16 }
 0x103   : > { %v1904_v34 = vshll.u32 %v1650_v20, 16  ;;  %v7197_v35 = vld [vmem:[#allocation3 + $0x24c] sm:$0xf]  ;;  %v6234_v38 = vrot.slane %v1887_v17, 11  ;;  %v1894_v40 = vrot.slane %v1892_v23, 7  ;;  %v6555_v52 = vor.u32 %v7201_v28, %v6554_v26 }
 0x104   : > { %v1426_v12 = vrot.slane %v1424_v61, 4  ;;  %v1418_v5 = vrot.slane %v1417_v19, 4  ;;  %v6556_v46 = vld [vmem:[#allocation3 + $0x26c] sm:$0xf0]  ;;  %v1151_v50 = vld [vmem:[#allocation2 + $0xac] sm:$0x1] }
 0x105   : > { %v8244_v15 = vpop.f32.mrf.mxu3  ;;  %v1903_v51 = vrot.slane %v1901_v32, 7  ;;  %v1075_v54 = vld [vmem:[#allocation2 + $0xa4] sm:$0xf]  ;;  %v1076_v60 = vld [vmem:[#allocation2 + $0xa8] sm:$0xf]  ;;  %v1897_v61 = vor.u32 %v1895_v59, %v1894_v40  ;;  %v1430_v37 = vshll.u32 %v1151_v50, 16  ;;  %v6559_v19 = vor.u32 %v7197_v35, %v6556_v46 }
 0x106   : > { %v8248_v63 = vpop.f32.mrf.mxu0  ;;  %v5237_v30 = vpop.f32.mrf.mxu1  ;;  %v1427_v29 = vor.u32 %v1426_v12, %v1422_v9  ;;  %1107 = vst [vmem:[#allocation3 + $0x2d4] sm:$0xf] %v1075_v54  ;;  %v1899_v12 = vrot.slane %v1894_v40, 4  ;;  %v539_v23 = vld [vmem:[#allocation2 + $0xbc] sm:$0x1] }
 0x107   : > { %v8250_v25 = vpop.f32.mrf.mxu2  ;;  %v1906_v22 = vor.u32 %v1904_v34, %v1903_v51  ;;  %1108 = vst [vmem:[#allocation3 + $0x2f8] sm:$0xf] %v1076_v60  ;;  %v1898_v26 = vsel %vm7693_vm5, %v6234_v38, %v1897_v61  ;;  %v1432_v17 = vrot.slane %v1430_v37, 5  ;;  %v6562_v28 = vld [vmem:[#allocation3 + $0x250] sm:$0xf]  ;;  %v540_v40 = vsel %vm7996_vm7, 0, %v539_v23 }
 0x108   : > { %v1428_v6 = vrot.slane %v1427_v29, 4  ;;  %v7202_v59 = vld [vmem:[#allocation3 + $0x270] sm:$0xf0]  ;;  %2070 = vst [vmem:[#allocation3 + $0x2dc] sm:$0xf] %v1898_v26 }
 0x109   : > { %5538 = vmatmul.bf16.gmra.mxu0 %v6527_v1  ;;  %5276 = vmatmul.bf16.gmra.mxu1 %v6551_v56  ;;  %v1423_v1 = vsel %vm8034_vm10, %v1418_v5, %v1422_v9  ;;  %v1907_v9 = vsel %vm7693_vm5, %v1899_v12, %v1906_v22  ;;  %v2102_v29 = vld [vmem:[#allocation2 + $0xb4] sm:$0xf]  ;;  %v7205_v32 = vld [vmem:[#allocation3 + $0x28c] sm:$0xf]  ;;  %v2103_v35 = vld [vmem:[#allocation2 + $0xb8] sm:$0xf]  ;;  %v5238_v5 = vadd.f32 %v5237_v30, %v8128_v58 }
 0x10a   : > { %1606 = vst [vmem:[#allocation3 + $0x2d8] sm:$0xf] %v1423_v1  ;;  %v1433_v34 = vsel %vm8034_vm10, %v1428_v6, %v1432_v17  ;;  %v6584_v38 = vld [vmem:[#allocation3 + $0x2ac] sm:$0xf0]  ;;  %v1152_v50 = vld [vmem:[#allocation2 + $0xb4] sm:$0xf]  ;;  %v6563_v1 = vor.u32 %v7202_v59, %v6562_v28 }
 0x10b   : > { %2071 = vst [vmem:[#allocation3 + $0x300] sm:$0xf] %v1907_v9  ;;  %v1153_v51 = vld [vmem:[#allocation2 + $0xb8] sm:$0xf]  ;;  %v1438_v60 = vshll.u32 %v1152_v50, 16  ;;  %v6587_v6 = vor.u32 %v7205_v32, %v6584_v38 }
 0x10c   : > { %1607 = vst [vmem:[#allocation3 + $0x2fc] sm:$0xf] %v1433_v34  ;;  %v1444_v37 = vshll.u32 %v1153_v51, 16  ;;  %v1448_v58 = vshrl.u32 %v1153_v51, 16  ;;  %v1651_v28 = vld [vmem:[#allocation2 + $0xc0] sm:$0x8] }
 0x10d   : > { %v8254_v56 = vpop.f32.mrf.mxu3  ;;  %2134 = vst [vmem:[#allocation3 + $0x2e0] sm:$0xf] %v2102_v29  ;;  %v1440_v17 = vrot.slane %v1438_v60, 5  ;;  %v6590_v59 = vld [vmem:[#allocation3 + $0x290] sm:$0xf] }
 0x10e   : > { %9084 = vst [vmem:[#allocation4_spill] sm:$0xff] %v8254_v56  ;;  %v8256_v43 = vpop.f32.mrf.mxu0  ;;  %v5239_v20 = vpop.f32.mrf.mxu1  ;;  %v1446_v23 = vrot.slane %v1444_v37, 5  ;;  %v1450_v29 = vrot.slane %v1448_v58, 4  ;;  %v1652_v34 = vld [vmem:[#allocation2 + $0xc4] sm:$0xf] }
 0x10f   : > { %2135 = vst [vmem:[#allocation3 + $0x304] sm:$0xf] %v2103_v35  ;;  %v1653_v35 = vld [vmem:[#allocation2 + $0xc8] sm:$0xf]  ;;  %v7210_v38 = vld [vmem:[#allocation3 + $0x2b0] sm:$0xf0] }
 0x110   : > { %541 = vst [vmem:[#allocation2 + $0xbc] sm:$0x1] %v540_v40  ;;  %v7326_v40 = vld [vmem:[%s9073_s3 + $0x1d0] sm:$0xff]  ;;  %v1914_v51 = vshrl.u32 %v1652_v34, 16  ;;  %v1923_v37 = vshrl.u32 %v1653_v35, 16 }
 0x111   : > { %5365 = vmatmul.bf16.gmra.mxu2 %v6555_v52  ;;  %v1435_v52 = vshrl.u32 %v1152_v50, 16  ;;  %v1909_v50 = vshrl.u32 %v1651_v28, 16  ;;  %5767 = vmatpush.bf16.msra.mxu3 %v7326_v40 }
 0x112   : > { %5454 = vmatmul.bf16.gmra.mxu3 %v6559_v19  ;;  %v5326_v46 = vpop.f32.mrf.mxu2  ;;  %v7318_v19 = vld [vmem:[%s9073_s3 + $0x190] sm:$0xff]  ;;  %v1925_v56 = vrot.slane %v1923_v37, 7 }
 0x113   : > { %v5327_v54 = vadd.f32 %v5326_v46, %v5238_v5  ;;  %v1437_v26 = vrot.slane %v1435_v52, 4  ;;  %5678 = vmatpush.bf16.msra.mxu2 %v7318_v19  ;;  %v1451_v46 = vor.u32 %v1450_v29, %v1446_v23  ;;  %v7206_v52 = vld [vmem:[#allocation3 + $0x294] sm:$0xf]  ;;  %v1078_v29 = vld [vmem:[#allocation2 + $0xb8] sm:$0xf] }
 0x114   : > { %1110 = vst [vmem:[#allocation3 + $0x340] sm:$0xf] %v1078_v29 }
 0x115   : > { %v5415_v61 = vpop.f32.mrf.mxu3  ;;  %v1441_v32 = vor.u32 %v1440_v17, %v1437_v26  ;;  %v1452_v58 = vrot.slane %v1451_v46, 4  ;;  %v6591_v26 = vor.u32 %v7210_v38, %v6590_v59  ;;  %v1077_v17 = vld [vmem:[#allocation2 + $0xb4] sm:$0xf]  ;;  %v6598_v38 = vld [vmem:[#allocation3 + $0x298] sm:$0xf] }
 0x116   : > { %v5504_v30 = vpop.f32.mrf.mxu0  ;;  %v5416_v12 = vadd.f32 %v5415_v61, %v5327_v54  ;;  %v5242_v22 = vpop.f32.mrf.mxu1  ;;  %v5240_v54 = vadd.f32 %v5239_v20, %v8149_v8  ;;  %v1917_v61 = vshll.u32 %v1652_v34, 16  ;;  %1109 = vst [vmem:[#allocation3 + $0x31c] sm:$0xf] %v1077_v17  ;;  %v7334_v59 = vld [vmem:[%s9073_s3 + $0x210] sm:$0xff] }
 0x117   : > { %v8271_v9 = vadd.f32 %v5242_v22, %v8174_v48  ;;  %v7310_v48 = vld [vmem:[%s9073_s3 + $0x150] sm:$0xff]  ;;  %v1442_v60 = vrot.slane %v1441_v32, 4  ;;  %v1926_v22 = vshll.u32 %v1653_v35, 16  ;;  %v1154_v28 = vld [vmem:[#allocation2 + $0xbc] sm:$0x1]  ;;  %5856 = vmatpush.bf16.msra.mxu0 %v7334_v59 }
 0x118   : > { %v8273_v5 = vadd.f32 %v5504_v30, %v5416_v12  ;;  %5589 = vmatpush.bf16.msra.mxu1 %v7310_v48  ;;  %v6235_v30 = vrot.slane %v1909_v50, 11  ;;  %v1916_v12 = vrot.slane %v1914_v51, 7  ;;  %v1454_v32 = vshll.u32 %v1154_v28, 16  ;;  %v2104_v35 = vld [vmem:[#allocation2 + $0xc4] sm:$0xf] }
 0x119   : > { %5543 = vmatmul.bf16.gmra.mxu0 %v6563_v1  ;;  %5281 = vmatmul.bf16.gmra.mxu1 %v6587_v6  ;;  %v6592_v6 = vld [vmem:[#allocation3 + $0x2b4] sm:$0xf0]  ;;  %v1447_v8 = vsel %vm8034_vm10, %v1442_v60, %v1446_v23  ;;  %v1928_v60 = vor.u32 %v1926_v22, %v1925_v56  ;;  %2136 = vst [vmem:[#allocation3 + $0x328] sm:$0xf] %v2104_v35  ;;  %v1156_v22 = vld [vmem:[#allocation2 + $0xc8] sm:$0xf] }
 0x11a   : > { %9085 = vst [vmem:[#allocation5_spill] sm:$0xff] %v8273_v5  ;;  %v5328_v1 = vpop.f32.mrf.mxu2  ;;  %v1919_v34 = vor.u32 %v1917_v61, %v1916_v12  ;;  %v1921_v5 = vrot.slane %v1916_v12, 4  ;;  %v6595_v46 = vor.u32 %v7206_v52, %v6592_v6  ;;  %v1456_v23 = vrot.slane %v1454_v32, 5  ;;  %v7211_v61 = vld [vmem:[#allocation3 + $0x2b8] sm:$0xf0] }
 0x11b   : > { %v5329_v19 = vadd.f32 %v5328_v1, %v5240_v54  ;;  %1608 = vst [vmem:[#allocation3 + $0x320] sm:$0xf] %v1447_v8  ;;  %v542_v52 = vld [vmem:[#allocation2 + $0xcc] sm:$0x1]  ;;  %v7214_v1 = vld [vmem:[#allocation3 + $0x2d4] sm:$0xf]  ;;  %v6599_v17 = vor.u32 %v7211_v61, %v6598_v38 }
 0x11c   : > { %v1920_v54 = vsel %vm7693_vm5, %v6235_v30, %v1919_v34  ;;  %v1457_v6 = vsel %vm8034_vm10, %v1452_v58, %v1456_v23  ;;  %v2105_v12 = vld [vmem:[#allocation2 + $0xc8] sm:$0xf]  ;;  %v543_v56 = vsel %vm7996_vm7, 0, %v542_v52  ;;  %v1155_v30 = vld [vmem:[#allocation2 + $0xc4] sm:$0xf]  ;;  %v1472_v32 = vshrl.u32 %v1156_v22, 16 }
 0x11d   : > { %v5417_v20 = vpop.f32.mrf.mxu3  ;;  %2072 = vst [vmem:[#allocation3 + $0x324] sm:$0xf] %v1920_v54  ;;  %v1459_v29 = vshrl.u32 %v1155_v30, 16  ;;  %v1462_v28 = vshll.u32 %v1155_v30, 16  ;;  %v1654_v54 = vld [vmem:[#allocation2 + $0xd0] sm:$0x8] }
 0x11e   : > { %v5506_v40 = vpop.f32.mrf.mxu0  ;;  %v5418_v48 = vadd.f32 %v5417_v20, %v5329_v19  ;;  %v5244_v50 = vpop.f32.mrf.mxu1  ;;  %v6620_v19 = vld [vmem:[#allocation3 + $0x2f4] sm:$0xf0]  ;;  %1609 = vst [vmem:[#allocation3 + $0x344] sm:$0xf] %v1457_v6  ;;  %v1468_v20 = vshll.u32 %v1156_v22, 16  ;;  %v1474_v23 = vrot.slane %v1472_v32, 4 }
 0x11f   : > { %v8288_v51 = vadd.f32 %v5244_v50, %v8190_v49  ;;  %v1929_v49 = vsel %vm7693_vm5, %v1921_v5, %v1928_v60  ;;  %2137 = vst [vmem:[#allocation3 + $0x34c] sm:$0xf] %v2105_v12  ;;  %v6623_v5 = vor.u32 %v7214_v1, %v6620_v19  ;;  %v1655_v50 = vld [vmem:[#allocation2 + $0xd4] sm:$0xf]  ;;  %v6626_v60 = vld [vmem:[#allocation3 + $0x2d8] sm:$0xf] }
 0x120   : > { %v8292_v37 = vadd.f32 %v5506_v40, %v5418_v48  ;;  %2073 = vst [vmem:[#allocation3 + $0x348] sm:$0xf] %v1929_v49  ;;  %v1461_v48 = vrot.slane %v1459_v29, 4  ;;  %v1470_v38 = vrot.slane %v1468_v20, 5  ;;  %v1931_v52 = vshrl.u32 %v1654_v54, 16 }
 0x121   : > { %5370 = vmatmul.bf16.gmra.mxu2 %v6591_v26  ;;  %544 = vst [vmem:[#allocation2 + $0xcc] sm:$0x1] %v543_v56  ;;  %v1936_v1 = vshrl.u32 %v1655_v50, 16  ;;  %v7219_v6 = vld [vmem:[#allocation3 + $0x2f8] sm:$0xf0]  ;;  %v1939_v12 = vshll.u32 %v1655_v50, 16 }
 0x122   : > { %5459 = vmatmul.bf16.gmra.mxu3 %v6595_v46  ;;  %v1464_v46 = vrot.slane %v1462_v28, 5  ;;  %v1475_v49 = vor.u32 %v1474_v23, %v1470_v38  ;;  %v6236_v22 = vrot.slane %v1931_v52, 11  ;;  %v6628_v29 = vld [vmem:[#allocation3 + $0x2fc] sm:$0xf0]  ;;  %v6627_v32 = vor.u32 %v7219_v6, %v6626_v60 }
 0x123   : > { %v6634_v6 = vld [vmem:[#allocation3 + $0x2e0] sm:$0xf] }
 0x124   : > { %v5331_v26 = vpop.f32.mrf.mxu2  ;;  %v1465_v61 = vor.u32 %v1464_v46, %v1461_v48  ;;  %v1476_v28 = vrot.slane %v1475_v49, 4  ;;  %v1080_v48 = vld [vmem:[#allocation2 + $0xc8] sm:$0xf] }
 0x125   : > { %v5332_v58 = vadd.f32 %v5331_v26, %v8271_v9  ;;  %v5420_v8 = vpop.f32.mrf.mxu3  ;;  %v1656_v9 = vld [vmem:[#allocation2 + $0xd8] sm:$0xf]  ;;  %v1938_v26 = vrot.slane %v1936_v1, 7  ;;  %1112 = vst [vmem:[#allocation3 + $0x388] sm:$0xf] %v1080_v48 }
 0x126   : > { %v5509_v34 = vpop.f32.mrf.mxu0  ;;  %v5247_v40 = vpop.f32.mrf.mxu1  ;;  %v1945_v19 = vshrl.u32 %v1656_v9, 16  ;;  %v1948_v56 = vshll.u32 %v1656_v9, 16  ;;  %v1466_v30 = vrot.slane %v1465_v61, 4 }
 0x127   : > { %v5421_v59 = vadd.f32 %v5420_v8, %v5332_v58  ;;  %v8302_v35 = vadd.f32 %v5247_v40, %v8202_v47  ;;  %v7215_v47 = vld [vmem:[#allocation3 + $0x2dc] sm:$0xf]  ;;  %v1079_v40 = vld [vmem:[#allocation2 + $0xc4] sm:$0xf]  ;;  %v1941_v46 = vor.u32 %v1939_v12, %v1938_v26  ;;  %v1943_v61 = vrot.slane %v1938_v26, 4 }
 0x128   : > { %v1947_v58 = vrot.slane %v1945_v19, 7  ;;  %1111 = vst [vmem:[#allocation3 + $0x364] sm:$0xf] %v1079_v40  ;;  %v6631_v1 = vor.u32 %v7215_v47, %v6628_v29  ;;  %v545_v12 = vld [vmem:[#allocation2 + $0xdc] sm:$0x1] }
 0x129   : > { %5548 = vmatmul.bf16.gmra.mxu0 %v6599_v17  ;;  %5286 = vmatmul.bf16.gmra.mxu1 %v6623_v5  ;;  %v8304_v8 = vadd.f32 %v5509_v34, %v5421_v59  ;;  %v1157_v17 = vld [vmem:[#allocation2 + $0xcc] sm:$0x1]  ;;  %v1471_v5 = vsel %vm8034_vm10, %v1466_v30, %v1470_v38  ;;  %v1942_v59 = vsel %vm7693_vm5, %v6236_v22, %v1941_v46  ;;  %v7220_v19 = vld [vmem:[#allocation3 + $0x300] sm:$0xf0]  ;;  %v7223_v30 = vld [vmem:[#allocation3 + $0x31c] sm:$0xf] }
 0x12a   : > { %v1478_v54 = vshll.u32 %v1157_v17, 16  ;;  %v1950_v9 = vor.u32 %v1948_v56, %v1947_v58  ;;  %1610 = vst [vmem:[#allocation3 + $0x368] sm:$0xf] %v1471_v5  ;;  %v2106_v56 = vld [vmem:[#allocation2 + $0xd4] sm:$0xf]  ;;  %v546_v29 = vsel %vm7996_vm7, 0, %v545_v12  ;;  %v6635_v40 = vor.u32 %v7220_v19, %v6634_v6 }
 0x12b   : > { %2074 = vst [vmem:[#allocation3 + $0x36c] sm:$0xf] %v1942_v59  ;;  %v2107_v22 = vld [vmem:[#allocation2 + $0xd8] sm:$0xf]  ;;  %v1158_v58 = vld [vmem:[#allocation2 + $0xd4] sm:$0xf] }
 0x12c   : > { %v5333_v20 = vpop.f32.mrf.mxu2  ;;  %v1480_v38 = vrot.slane %v1478_v54, 5  ;;  %2138 = vst [vmem:[#allocation3 + $0x370] sm:$0xf] %v2106_v56  ;;  %v1486_v17 = vshll.u32 %v1158_v58, 16  ;;  %v1658_v12 = vld [vmem:[#allocation2 + $0xe4] sm:$0xf] }
 0x12d   : > { %v5334_v50 = vadd.f32 %v5333_v20, %v8288_v51  ;;  %v5422_v23 = vpop.f32.mrf.mxu3  ;;  %v1951_v51 = vsel %vm7693_vm5, %v1943_v61, %v1950_v9  ;;  %v1159_v20 = vld [vmem:[#allocation2 + $0xd8] sm:$0xf]  ;;  %2139 = vst [vmem:[#allocation3 + $0x394] sm:$0xf] %v2107_v22  ;;  %v7317_v9 = vld [vmem:[%s9073_s3 + $0x188] sm:$0xff] }
 0x12e   : > { %v5511_v52 = vpop.f32.mrf.mxu0  ;;  %v5249_v34 = vpop.f32.mrf.mxu1  ;;  %v1481_v26 = vsel %vm8034_vm10, %v1476_v28, %v1480_v38  ;;  %2075 = vst [vmem:[#allocation3 + $0x390] sm:$0xf] %v1951_v51  ;;  %v6662_v38 = vld [vmem:[#allocation3 + $0x320] sm:$0xf]  ;;  %5679 = vmatpush.bf16.msra.mxu2 %v7317_v9  ;;  %v1659_v19 = vld [vmem:[#allocation2 + $0xe8] sm:$0xf] }
 0x12f   : > { %v5423_v60 = vadd.f32 %v5422_v23, %v5334_v50  ;;  %v8312_v49 = vadd.f32 %v5249_v34, %v8227_v44  ;;  %v6656_v44 = vld [vmem:[#allocation3 + $0x33c] sm:$0xf0]  ;;  %1611 = vst [vmem:[#allocation3 + $0x38c] sm:$0xf] %v1481_v26  ;;  %v1492_v50 = vshll.u32 %v1159_v20, 16  ;;  %v1496_v23 = vshrl.u32 %v1159_v20, 16 }
 0x130   : > { %v6659_v46 = vor.u32 %v7223_v30, %v6656_v44  ;;  %547 = vst [vmem:[#allocation2 + $0xdc] sm:$0x1] %v546_v29  ;;  %v7228_v56 = vld [vmem:[#allocation3 + $0x340] sm:$0xf0]  ;;  %v7325_v30 = vld [vmem:[%s9073_s3 + $0x1c8] sm:$0xff]  ;;  %v1958_v44 = vshrl.u32 %v1658_v12, 16 }
 0x131   : > { %5375 = vmatmul.bf16.gmra.mxu2 %v6627_v32  ;;  %v8318_v47 = vadd.f32 %v5511_v52, %v5423_v60  ;;  %v1483_v32 = vshrl.u32 %v1158_v58, 16  ;;  %v1494_v60 = vrot.slane %v1492_v50, 5  ;;  %v1498_v6 = vrot.slane %v1496_v23, 4  ;;  %v7224_v29 = vld [vmem:[#allocation3 + $0x324] sm:$0xf]  ;;  %5768 = vmatpush.bf16.msra.mxu3 %v7325_v30 }
 0x132   : > { %5464 = vmatmul.bf16.gmra.mxu3 %v6631_v1  ;;  %v1488_v1 = vrot.slane %v1486_v17, 5  ;;  %v1961_v20 = vshll.u32 %v1658_v12, 16  ;;  %v6663_v50 = vor.u32 %v7228_v56, %v6662_v38  ;;  %v1081_v23 = vld [vmem:[#allocation2 + $0xd4] sm:$0xf]  ;;  %v7333_v38 = vld [vmem:[%s9073_s3 + $0x208] sm:$0xff] }
 0x133   : > { %v1485_v52 = vrot.slane %v1483_v32, 4  ;;  %v1499_v26 = vor.u32 %v1498_v6, %v1494_v60  ;;  %v6664_v32 = vld [vmem:[#allocation3 + $0x344] sm:$0xf0]  ;;  %1113 = vst [vmem:[#allocation3 + $0x3ac] sm:$0xf] %v1081_v23  ;;  %5857 = vmatpush.bf16.msra.mxu0 %v7333_v38 }
 0x134   : > { %v5336_v48 = vpop.f32.mrf.mxu2  ;;  %v1161_v23 = vld [vmem:[#allocation2 + $0xe4] sm:$0xf] }
 0x135   : > { %v5337_v28 = vadd.f32 %v5336_v48, %v8302_v35  ;;  %v5425_v5 = vpop.f32.mrf.mxu3  ;;  %v1657_v35 = vld [vmem:[#allocation2 + $0xe0] sm:$0x8]  ;;  %v1489_v51 = vor.u32 %v1488_v1, %v1485_v52  ;;  %v1967_v48 = vshrl.u32 %v1659_v19, 16 }
 0x136   : > { %v5514_v54 = vpop.f32.mrf.mxu0  ;;  %v5252_v61 = vpop.f32.mrf.mxu1  ;;  %v1953_v22 = vshrl.u32 %v1657_v35, 16 }
 0x137   : > { %v5426_v34 = vadd.f32 %v5425_v5, %v5337_v28  ;;  %v8327_v59 = vadd.f32 %v5252_v61, %v8248_v63  ;;  %v7309_v63 = vld [vmem:[%s9073_s3 + $0x148] sm:$0xff]  ;;  %v1490_v58 = vrot.slane %v1489_v51, 4  ;;  %v1960_v28 = vrot.slane %v1958_v44, 7  ;;  %v1082_v61 = vld [vmem:[#allocation2 + $0xd8] sm:$0xf] }
 0x138   : > { %5590 = vmatpush.bf16.msra.mxu1 %v7309_v63  ;;  %v6237_v17 = vrot.slane %v1953_v22, 11  ;;  %v1970_v5 = vshll.u32 %v1659_v19, 16  ;;  %v1160_v9 = vld [vmem:[#allocation2 + $0xdc] sm:$0x1]  ;;  %1114 = vst [vmem:[#allocation3 + $0x3d0] sm:$0xf] %v1082_v61 }
 0x139   : > { %5553 = vmatmul.bf16.gmra.mxu0 %v6635_v40  ;;  %5291 = vmatmul.bf16.gmra.mxu1 %v6659_v46  ;;  %v1500_v40 = vrot.slane %v1499_v26, 4  ;;  %v1495_v52 = vsel %vm8034_vm10, %v1490_v58, %v1494_v60  ;;  %v8337_v1 = vadd.f32 %v5514_v54, %v5426_v34  ;;  %v1502_v51 = vshll.u32 %v1160_v9, 16  ;;  %v2108_v22 = vld [vmem:[#allocation2 + $0xe4] sm:$0xf]  ;;  %v6670_v54 = vld [vmem:[#allocation3 + $0x328] sm:$0xf] }
 0x13a   : > { %v1963_v12 = vor.u32 %v1961_v20, %v1960_v28  ;;  %v1965_v30 = vrot.slane %v1960_v28, 4  ;;  %v6667_v26 = vor.u32 %v7224_v29, %v6664_v32  ;;  %v1969_v56 = vrot.slane %v1967_v48, 7  ;;  %1612 = vst [vmem:[#allocation3 + $0x3b0] sm:$0xf] %v1495_v52  ;;  %v7229_v58 = vld [vmem:[#allocation3 + $0x348] sm:$0xf0] }
 0x13b   : > { %9086 = vst [vmem:[#allocation6_spill] sm:$0xff] %v8337_v1  ;;  %v548_v20 = vld [vmem:[#allocation2 + $0xec] sm:$0x1]  ;;  %v7232_v32 = vld [vmem:[#allocation3 + $0x364] sm:$0xf]  ;;  %v6671_v61 = vor.u32 %v7229_v58, %v6670_v54  ;;  %v1510_v52 = vshll.u32 %v1161_v23, 16 }
 0x13c   : > { %v5338_v46 = vpop.f32.mrf.mxu2  ;;  %v1964_v44 = vsel %vm7693_vm5, %v6237_v17, %v1963_v12  ;;  %v1972_v29 = vor.u32 %v1970_v5, %v1969_v56  ;;  %v2109_v28 = vld [vmem:[#allocation2 + $0xe8] sm:$0xf]  ;;  %2140 = vst [vmem:[#allocation3 + $0x3b8] sm:$0xf] %v2108_v22  ;;  %v549_v5 = vsel %vm7996_vm7, 0, %v548_v20 }
 0x13d   : > { %v5339_v6 = vadd.f32 %v5338_v46, %v8312_v49  ;;  %v5427_v35 = vpop.f32.mrf.mxu3  ;;  %v1504_v49 = vrot.slane %v1502_v51, 5  ;;  %2076 = vst [vmem:[#allocation3 + $0x3b4] sm:$0xf] %v1964_v44  ;;  %v1512_v38 = vrot.slane %v1510_v52, 5  ;;  %v1661_v56 = vld [vmem:[#allocation2 + $0xf4] sm:$0xf] }
 0x13e   : > { %v5516_v63 = vpop.f32.mrf.mxu0  ;;  %v5254_v19 = vpop.f32.mrf.mxu1  ;;  %v1973_v17 = vsel %vm7693_vm5, %v1965_v30, %v1972_v29  ;;  %2141 = vst [vmem:[#allocation3 + $0x3dc] sm:$0xf] %v2109_v28  ;;  %v8359_v54 = vld [vmem:[#allocation3 + $0x36c] sm:$0xf]  ;;  %v1660_v58 = vld [vmem:[#allocation2 + $0xf0] sm:$0x8] }
 0x13f   : > { %v5428_v60 = vadd.f32 %v5427_v35, %v5339_v6  ;;  %v8344_v34 = vadd.f32 %v5254_v19, %v8256_v43  ;;  %v1505_v48 = vsel %vm8034_vm10, %v1500_v40, %v1504_v49  ;;  %v6692_v43 = vld [vmem:[#allocation3 + $0x384] sm:$0xf0]  ;;  %2077 = vst [vmem:[#allocation3 + $0x3d8] sm:$0xf] %v1973_v17  ;;  %v1507_v40 = vshrl.u32 %v1161_v23, 16 }
 0x140   : > { %1613 = vst [vmem:[#allocation3 + $0x3d4] sm:$0xf] %v1505_v48  ;;  %v6695_v51 = vor.u32 %v7232_v32, %v6692_v43  ;;  %v1662_v20 = vld [vmem:[#allocation2 + $0xf8] sm:$0xf]  ;;  %v1975_v32 = vshrl.u32 %v1660_v58, 16  ;;  %v1980_v48 = vshrl.u32 %v1661_v56, 16 }
 0x141   : > { %5380 = vmatmul.bf16.gmra.mxu2 %v6663_v50  ;;  %v8350_v46 = vadd.f32 %v5516_v63, %v5428_v60  ;;  %v1162_v50 = vld [vmem:[#allocation2 + $0xe8] sm:$0xf]  ;;  %550 = vst [vmem:[#allocation2 + $0xec] sm:$0x1] %v549_v5  ;;  %v1509_v19 = vrot.slane %v1507_v40, 4  ;;  %v1983_v17 = vshll.u32 %v1661_v56, 16 }
 0x142   : > { %5469 = vmatmul.bf16.gmra.mxu3 %v6667_v26  ;;  %v1516_v12 = vshll.u32 %v1162_v50, 16  ;;  %v1520_v63 = vshrl.u32 %v1162_v50, 16  ;;  %v6698_v60 = vld [vmem:[#allocation3 + $0x368] sm:$0xf]  ;;  %v7237_v28 = vld [vmem:[#allocation3 + $0x388] sm:$0xf0] }
 0x143   : > { %9087 = vst [vmem:[#allocation7_spill] sm:$0xff] %v8350_v46  ;;  %v1513_v29 = vor.u32 %v1512_v38, %v1509_v19  ;;  %v1989_v5 = vshrl.u32 %v1662_v20, 16  ;;  %v1992_v23 = vshll.u32 %v1662_v20, 16  ;;  %v7498_v50 = vld [vmem:[%s7623_s29 + $0x78] sm:$0xff]   ;;  %v6238_v40 = vrot.slane %v1975_v32, 11 }
 0x144   : > { %v5341_v9 = vpop.f32.mrf.mxu2  ;;  %v1518_v49 = vrot.slane %v1516_v12, 5  ;;  %v1522_v44 = vrot.slane %v1520_v63, 4  ;;  %v1982_v52 = vrot.slane %v1980_v48, 7  ;;  %v7402_v63 = vunpack.c.l.bf16 %v7498_v50  ;;  %v1083_v58 = vld [vmem:[#allocation2 + $0xe4] sm:$0xf] }
 0x145   : > { %v5342_v6 = vadd.f32 %v5341_v9, %v8327_v59  ;;  %v5430_v35 = vpop.f32.mrf.mxu3  ;;  %v6700_v59 = vld [vmem:[#allocation3 + $0x38c] sm:$0xf0]  ;;  %v1514_v9 = vrot.slane %v1513_v29, 4  ;;  %v1991_v12 = vrot.slane %v1989_v5, 7  ;;  %v6699_v38 = vor.u32 %v7237_v28, %v6698_v60  ;;  %v1084_v46 = vld [vmem:[#allocation2 + $0xe8] sm:$0xf] }
 0x146   : > { %v5519_v26 = vpop.f32.mrf.mxu0  ;;  %v8357_v30 = vpop.f32.mrf.mxu1  ;;  %v1523_v43 = vor.u32 %v1522_v44, %v1518_v49  ;;  %v1985_v56 = vor.u32 %v1983_v17, %v1982_v52  ;;  %v7403_v44 = vunpack.c.h.bf16 %v7498_v50  ;;  %1115 = vst [vmem:[#allocation3 + $0x3f4] sm:$0xf] %v1083_v58  ;;  %v1987_v48 = vrot.slane %v1982_v52, 4  ;;  %v7238_v5 = vld [vmem:[#allocation3 + $0x390] sm:$0xf0] }
 0x147   : > { %v5431_v22 = vadd.f32 %v5430_v35, %v5342_v6  ;;  %v6703_v6 = vor.u32 %v8359_v54, %v6700_v59  ;;  %v1994_v54 = vor.u32 %v1992_v23, %v1991_v12  ;;  %v7241_v60 = vld [vmem:[#allocation3 + $0x3ac] sm:$0xf]  ;;  %1116 = vst [vmem:[#allocation3 + $0x418] sm:$0xf] %v1084_v46  ;;  %v551_v12 = vld [vmem:[#allocation2 + $0xfc] sm:$0x1] }
 0x148   : > { %v1524_v35 = vrot.slane %v1523_v43, 4  ;;  %v6706_v43 = vld [vmem:[#allocation3 + $0x370] sm:$0xf]  ;;  %v1986_v28 = vsel %vm7693_vm5, %v6238_v40, %v1985_v56  ;;  %v2110_v46 = vld [vmem:[#allocation2 + $0xf4] sm:$0xf]  ;;  %v552_v56 = vsel %vm7996_vm7, 0, %v551_v12 }
 0x149   : > { %5558 = vmatmul.bf16.gmra.mxu0 %v6671_v61  ;;  %5296 = vmatmul.bf16.gmra.mxu1 %v6695_v51  ;;  %v1163_v61 = vld [vmem:[#allocation2 + $0xec] sm:$0x1]  ;;  %v1519_v51 = vsel %vm8034_vm10, %v1514_v9, %v1518_v49  ;;  %v7551_v49 = vld [vmem:[%s9070_s0] ss:$0 sm:$0xff]  ;;  %v8373_v50 = vadd.f32 %v5519_v26, %v5431_v22  ;;  %v1995_v52 = vsel %vm7693_vm5, %v1987_v48, %v1994_v54  ;;  %v2111_v22 = vld [vmem:[#allocation2 + $0xf8] sm:$0xf] }
 0x14a   : > { %v1526_v32 = vshll.u32 %v1163_v61, 16  ;;  %v336_v17 = vmul.f32 %v7551_v49, %v7403_v44  ;;  %1614 = vst [vmem:[#allocation3 + $0x3f8] sm:$0xf] %v1519_v51  ;;  %v7552_v40 = vld [vmem:[%s9071_s1] ss:$0 sm:$0xff] }
 0x14b   : > { %2078 = vst [vmem:[#allocation3 + $0x3fc] sm:$0xf] %v1986_v28  ;;  %v1164_v48 = vld [vmem:[#allocation2 + $0xf4] sm:$0xf] }
 0x14c   : > { %v5343_v19 = vpop.f32.mrf.mxu2  ;;  %v1528_v23 = vrot.slane %v1526_v32, 5  ;;  %v372_v61 = vadd.f32 %v7552_v40, %v336_v17  ;;  %2079 = vst [vmem:[#allocation3 + $0x420] sm:$0xf] %v1995_v52  ;;  %v6707_v32 = vor.u32 %v7238_v5, %v6706_v43  ;;  %v1531_v28 = vshrl.u32 %v1164_v48, 16  ;;  %v7316_v43 = vld [vmem:[%s9073_s3 + $0x180] sm:$0xff] }
 0x14d   : > { %v5344_v20 = vadd.f32 %v5343_v19, %v8344_v34  ;;  %v5432_v29 = vpop.f32.mrf.mxu3  ;;  %v335_v34 = vmul.f32 %v7551_v49, %v7402_v63  ;;  %v6728_v19 = vld [vmem:[#allocation3 + $0x3cc] sm:$0xf0]  ;;  %v506_v63 = vld [vmem:[#allocation2 + $0x100] sm:$0x8]  ;;  %2142 = vst [vmem:[#allocation3 + $0x400] sm:$0xf] %v2110_v46  ;;  %5680 = vmatpush.bf16.msra.mxu2 %v7316_v43 }
 0x14e   : > { %v5521_v59 = vpop.f32.mrf.mxu0  ;;  %v8366_v1 = vpop.f32.mrf.mxu1  ;;  %v1529_v26 = vsel %vm8034_vm10, %v1524_v35, %v1528_v23  ;;  %v1165_v35 = vld [vmem:[#allocation2 + $0xf8] sm:$0xf]  ;;  %2143 = vst [vmem:[#allocation3 + $0x424] sm:$0xf] %v2111_v22  ;;  %v1533_v5 = vrot.slane %v1531_v28, 4 }
 0x14f   : > { %v5433_v9 = vadd.f32 %v5432_v29, %v5344_v20  ;;  %v371_v58 = vadd.f32 %v7552_v40, %v335_v34  ;;  %1615 = vst [vmem:[#allocation3 + $0x41c] sm:$0xf] %v1529_v26  ;;  %v404_v20 = vmax.f32 %v372_v61, 0.0  ;;  %v5258_v29 = vadd.f32 %v8357_v30, %v8104_v18  ;;  %v7308_v61 = vld [vmem:[%s9073_s3 + $0x140] sm:$0xff]  ;;  %v6742_v43 = vld [vmem:[#allocation3 + $0x3b8] sm:$0xf] }
 0x150   : > { %553 = vst [vmem:[#allocation2 + $0xfc] sm:$0x1] %v552_v56  ;;  %v1544_v23 = vshrl.u32 %v1165_v35, 16  ;;  %v7246_v56 = vld [vmem:[#allocation3 + $0x3d0] sm:$0xf0]  ;;  %5591 = vmatpush.bf16.msra.mxu1 %v7308_v61 }
 0x151   : > { %5385 = vmatmul.bf16.gmra.mxu2 %v6699_v38  ;;  %v8382_v51 = vadd.f32 %v5521_v59, %v5433_v9  ;;  %v403_v44 = vmax.f32 %v371_v58, 0.0  ;;  %v6731_v38 = vor.u32 %v7241_v60, %v6728_v19  ;;  %v1534_v59 = vshll.u32 %v1164_v48, 16  ;;  %v7324_v58 = vld [vmem:[%s9073_s3 + $0x1c0] sm:$0xff]  ;;  %v1085_v48 = vld [vmem:[#allocation2 + $0xf4] sm:$0xf] }
 0x152   : > { %5474 = vmatmul.bf16.gmra.mxu3 %v6703_v6  ;;  %v507_v6 = vsel %vm7614_vm2, 0, %v506_v63  ;;  %v1540_v9 = vshll.u32 %v1165_v35, 16  ;;  %v436_v52 = vpack.c.bf16 %v404_v20, %v404_v20  ;;  %v1546_v46 = vrot.slane %v1544_v23, 4  ;;  %v6734_v63 = vld [vmem:[#allocation3 + $0x3b0] sm:$0xf] }
 0x153   : > { %v435_v49 = vpack.c.bf16 %v403_v44, %v403_v44  ;;  %v1536_v60 = vrot.slane %v1534_v59, 5  ;;  %508 = vst [vmem:[#allocation2 + $0x100] sm:$0x8] %v507_v6  ;;  %v5260_v20 = vadd.f32 %v8366_v1, %v8122_v57  ;;  %5769 = vmatpush.bf16.msra.mxu3 %v7324_v58  ;;  %v1086_v35 = vld [vmem:[#allocation2 + $0xf8] sm:$0xf]  ;;  %v6735_v6 = vor.u32 %v7246_v56, %v6734_v63  ;;  %v7332_v1 = vld [vmem:[%s9073_s3 + $0x200] sm:$0xff] }
 0x154   : > { %v5346_v54 = vpop.f32.mrf.mxu2  ;;  %v1542_v19 = vrot.slane %v1540_v9, 5  ;;  %588 = vst [vmem:[#allocation2 + $0x108] sm:$0xf] %v436_v52  ;;  %5858 = vmatpush.bf16.msra.mxu0 %v7332_v1 }
 0x155   : > { %v5347_v34 = vadd.f32 %v5346_v54, %v5258_v29  ;;  %v5435_v17 = vpop.f32.mrf.mxu3  ;;  %v1537_v40 = vor.u32 %v1536_v60, %v1533_v5  ;;  %587 = vst [vmem:[#allocation2 + $0x104] sm:$0xf] %v435_v49  ;;  %v7242_v29 = vld [vmem:[#allocation3 + $0x3b4] sm:$0xf]  ;;  %v7247_v5 = vld [vmem:[#allocation3 + $0x3d8] sm:$0xf0] }
 0x156   : > { %v5524_v18 = vpop.f32.mrf.mxu0  ;;  %v8390_v30 = vpop.f32.mrf.mxu1  ;;  %v1547_v26 = vor.u32 %v1546_v46, %v1542_v19  ;;  %1117 = vst [vmem:[#allocation3 + $0x43c] sm:$0xf] %v1085_v48 }
 0x157   : > { %v5436_v12 = vadd.f32 %v5435_v17, %v5347_v34  ;;  %v1538_v44 = vrot.slane %v1537_v40, 4  ;;  %v1166_v54 = vld [vmem:[#allocation2 + $0xfc] sm:$0x1]  ;;  %1118 = vst [vmem:[#allocation3 + $0x460] sm:$0xf] %v1086_v35  ;;  %v5263_v35 = vadd.f32 %v8390_v30, %v8138_v42 }
 0x158   : > { %v1548_v34 = vrot.slane %v1547_v26, 4  ;;  %v1550_v17 = vshll.u32 %v1166_v54, 16  ;;  %v7250_v26 = vld [vmem:[#allocation3 + $0x3f4] sm:$0xf] }
 0x159   : > { %5563 = vmatmul.bf16.gmra.mxu0 %v6707_v32  ;;  %5301 = vmatmul.bf16.gmra.mxu1 %v6731_v38  ;;  %v8401_v22 = vadd.f32 %v5524_v18, %v5436_v12  ;;  %v6736_v32 = vld [vmem:[#allocation3 + $0x3d4] sm:$0xf0]  ;;  %v1543_v28 = vsel %vm8034_vm10, %v1538_v44, %v1542_v19 }
 0x15a   : > { %v6739_v23 = vor.u32 %v7242_v29, %v6736_v32  ;;  %v1663_v52 = vld [vmem:[#allocation2 + $0x100] sm:$0x8]  ;;  %v1552_v60 = vrot.slane %v1550_v17, 5  ;;  %1616 = vst [vmem:[#allocation3 + $0x440] sm:$0xf] %v1543_v28 }
 0x15b   : > { %v1997_v19 = vshrl.u32 %v1663_v52, 16  ;;  %v1665_v46 = vld [vmem:[#allocation2 + $0x108] sm:$0xf]  ;;  %v6764_v29 = vld [vmem:[#allocation3 + $0x414] sm:$0xf0] }
 0x15c   : > { %v5348_v38 = vpop.f32.mrf.mxu2  ;;  %v1664_v12 = vld [vmem:[#allocation2 + $0x104] sm:$0xf]  ;;  %v1553_v63 = vsel %vm8034_vm10, %v1548_v34, %v1552_v60  ;;  %v2011_v56 = vshrl.u32 %v1665_v46, 16  ;;  %v2014_v44 = vshll.u32 %v1665_v46, 16  ;;  %v2146_v28 = vld [vmem:[#allocation2 + $0x14] sm:$0xf]  ;;  %v6767_v52 = vor.u32 %v7250_v26, %v6764_v29 }
 0x15d   : > { %v5349_v59 = vadd.f32 %v5348_v38, %v5260_v20  ;;  %v5437_v49 = vpop.f32.mrf.mxu3  ;;  %v2002_v40 = vshrl.u32 %v1664_v12, 16  ;;  %v2005_v58 = vshll.u32 %v1664_v12, 16  ;;  %v2112_v61 = vld [vmem:[#allocation2 + $0x104] sm:$0xf]  ;;  %v2113_v20 = vld [vmem:[#allocation2 + $0x108] sm:$0xf] }
 0x15e   : > { %v5526_v9 = vpop.f32.mrf.mxu0  ;;  %v8407_v57 = vpop.f32.mrf.mxu1  ;;  %1617 = vst [vmem:[#allocation3 + $0x464] sm:$0xf] %v1553_v63  ;;  %v6239_v32 = vrot.slane %v1997_v19, 11  ;;  %v2013_v54 = vrot.slane %v2011_v56, 7  ;;  %v2195_v17 = vshrl.u32 %v2146_v28, 16  ;;  %v2198_v19 = vshll.u32 %v2146_v28, 16 }
 0x15f   : > { %v5438_v18 = vadd.f32 %v5437_v49, %v5349_v59  ;;  %v2004_v38 = vrot.slane %v2002_v40, 7  ;;  %2144 = vst [vmem:[#allocation3 + $0x448] sm:$0xf] %v2112_v61  ;;  %v6743_v59 = vor.u32 %v7247_v5, %v6742_v43  ;;  %v2147_v12 = vld [vmem:[#allocation2 + $0x18] sm:$0xf]  ;;  %v5265_v28 = vadd.f32 %v8407_v57, %v8155_v24 }
 0x160   : > { %2145 = vst [vmem:[#allocation3 + $0x46c] sm:$0xf] %v2113_v20  ;;  %v2016_v60 = vor.u32 %v2014_v44, %v2013_v54  ;;  %v2197_v30 = vrot.slane %v2195_v17, 4  ;;  %v2204_v46 = vshll.u32 %v2147_v12, 16  ;;  %v2644_v43 = vld [vmem:[#allocation2 + $0x24] sm:$0xf] }
 0x161   : > { %5390 = vmatmul.bf16.gmra.mxu2 %v6735_v6  ;;  %v8414_v48 = vadd.f32 %v5526_v9, %v5438_v18  ;;  %v2007_v6 = vor.u32 %v2005_v58, %v2004_v38  ;;  %v2009_v34 = vrot.slane %v2004_v38, 4  ;;  %v2148_v58 = vld [vmem:[#allocation2 + $0x1c] sm:$0x1]  ;;  %v2200_v61 = vrot.slane %v2198_v19, 5  ;;  %v6770_v26 = vld [vmem:[#allocation3 + $0x3f8] sm:$0xf] }
 0x162   : > { %5479 = vmatmul.bf16.gmra.mxu3 %v6739_v23  ;;  %v2206_v63 = vrot.slane %v2204_v46, 5  ;;  %v2208_v56 = vshrl.u32 %v2147_v12, 16  ;;  %v2214_v44 = vshll.u32 %v2148_v58, 16  ;;  %v2697_v20 = vshrl.u32 %v2644_v43, 16  ;;  %v7251_v29 = vld [vmem:[#allocation3 + $0x3fc] sm:$0xf] }
 0x163   : > { %v2008_v42 = vsel %vm7693_vm5, %v6239_v32, %v2007_v6  ;;  %v2017_v40 = vsel %vm7693_vm5, %v2009_v34, %v2016_v60  ;;  %v2201_v32 = vor.u32 %v2200_v61, %v2197_v30  ;;  %v2643_v38 = vld [vmem:[#allocation2 + $0x20] sm:$0x8]  ;;  %v2700_v12 = vshll.u32 %v2644_v43, 16  ;;  %v3107_v46 = vld [vmem:[#allocation2 + $0x24] sm:$0xf] }
 0x164   : > { %v5351_v49 = vpop.f32.mrf.mxu2  ;;  %2080 = vst [vmem:[#allocation3 + $0x444] sm:$0xf] %v2008_v42  ;;  %v2210_v6 = vrot.slane %v2208_v56, 4  ;;  %v2216_v34 = vrot.slane %v2214_v44, 5  ;;  %v2692_v17 = vshrl.u32 %v2643_v38, 16  ;;  %v2699_v60 = vrot.slane %v2697_v20, 7 }
 0x165   : > { %v5352_v1 = vadd.f32 %v5351_v49, %v5263_v35  ;;  %v5440_v23 = vpop.f32.mrf.mxu3  ;;  %2081 = vst [vmem:[#allocation3 + $0x468] sm:$0xf] %v2017_v40  ;;  %v2645_v35 = vld [vmem:[#allocation2 + $0x28] sm:$0xf]  ;;  %v7255_v49 = vld [vmem:[#allocation3 + $0x418] sm:$0xf0] }
 0x166   : > { %v5529_v9 = vpop.f32.mrf.mxu0  ;;  %v8418_v18 = vpop.f32.mrf.mxu1  ;;  %v2706_v19 = vshrl.u32 %v2645_v35, 16  ;;  %v6240_v42 = vrot.slane %v2692_v17, 11  ;;  %v2709_v30 = vshll.u32 %v2645_v35, 16  ;;  %v3108_v40 = vld [vmem:[#allocation2 + $0x28] sm:$0xf]  ;;  %v6771_v58 = vor.u32 %v7255_v49, %v6770_v26 }
 0x167   : > { %v5441_v5 = vadd.f32 %v5440_v23, %v5352_v1  ;;  %v6772_v1 = vld [vmem:[#allocation3 + $0x41c] sm:$0xf0]  ;;  %v2202_v23 = vrot.slane %v2201_v32, 4  ;;  %v2702_v57 = vor.u32 %v2700_v12, %v2699_v60  ;;  %3139 = vst [vmem:[#allocation3 + $0x1c] sm:$0xf] %v3107_v46  ;;  %v2704_v32 = vrot.slane %v2699_v60, 4 }
 0x168   : > { %v3171_v61 = vld [vmem:[#allocation2 + $0x24] sm:$0xf]  ;;  %v6775_v44 = vor.u32 %v7251_v29, %v6772_v1  ;;  %v2708_v38 = vrot.slane %v2706_v19, 7  ;;  %3140 = vst [vmem:[#allocation3 + $0x40] sm:$0xf] %v3108_v40 }
 0x169   : > { %5568 = vmatmul.bf16.gmra.mxu0 %v6743_v59  ;;  %5306 = vmatmul.bf16.gmra.mxu1 %v6767_v52  ;;  %v8424_v54 = vadd.f32 %v5529_v9, %v5441_v5  ;;  %v2211_v52 = vor.u32 %v2210_v6, %v2206_v63  ;;  %v2207_v24 = vsel %vm8034_vm10, %v2202_v23, %v2206_v63  ;;  %v6778_v6 = vld [vmem:[#allocation3 + $0x400] sm:$0xf]  ;;  %v7256_v17 = vld [vmem:[#allocation3 + $0x420] sm:$0xf0]  ;;  %v3172_v63 = vld [vmem:[#allocation2 + $0x28] sm:$0xf] }
 0x16a   : > { %2610 = vst [vmem:[#allocation3 + $0x14] sm:$0xf] %v2207_v24  ;;  %v2703_v26 = vsel %vm7693_vm5, %v6240_v42, %v2702_v57  ;;  %v2711_v29 = vor.u32 %v2709_v30, %v2708_v38  ;;  %v3173_v1 = vld [vmem:[#allocation2 + $0x2c] sm:$0x1]  ;;  %v3220_v23 = vshrl.u32 %v3171_v61, 16  ;;  %v3223_v60 = vshll.u32 %v3171_v61, 16 }
 0x16b   : > { %v2212_v43 = vrot.slane %v2211_v52, 4  ;;  %3075 = vst [vmem:[#allocation3 + $0x18] sm:$0xf] %v2703_v26  ;;  %v3229_v12 = vshll.u32 %v3172_v63, 16  ;;  %v3233_v19 = vshrl.u32 %v3172_v63, 16  ;;  %v3239_v52 = vshll.u32 %v3173_v1, 16 }
 0x16c   : > { %v5353_v59 = vpop.f32.mrf.mxu2  ;;  %v8436_v46 = vld [vmem:[#allocation3 + $0x440] sm:$0xf]  ;;  %v2712_v42 = vsel %vm7693_vm5, %v2704_v32, %v2711_v29  ;;  %v3222_v40 = vrot.slane %v3220_v23, 4  ;;  %v5268_v30 = vadd.f32 %v8418_v18, %v8178_v16  ;;  %v6779_v57 = vor.u32 %v7256_v17, %v6778_v6  ;;  %v2149_v38 = vld [vmem:[#allocation2 + $0x24] sm:$0xf] }
 0x16d   : > { %v5354_v9 = vadd.f32 %v5353_v59, %v5265_v28  ;;  %v5442_v5 = vpop.f32.mrf.mxu3  ;;  %v7259_v28 = vld [vmem:[#allocation3 + $0x43c] sm:$0xf]  ;;  %v6800_v59 = vld [vmem:[#allocation3 + $0x45c] sm:$0xf0]  ;;  %v2217_v49 = vsel %vm8034_vm10, %v2212_v43, %v2216_v34  ;;  %3076 = vst [vmem:[#allocation3 + $0x3c] sm:$0xf] %v2712_v42 }
 0x16e   : > { %v5531_v56 = vpop.f32.mrf.mxu0  ;;  %v8430_v20 = vpop.f32.mrf.mxu1  ;;  %2611 = vst [vmem:[#allocation3 + $0x38] sm:$0xf] %v2217_v49  ;;  %v3235_v24 = vrot.slane %v3233_v19, 4  ;;  %v3241_v43 = vrot.slane %v3239_v52, 5  ;;  %v2150_v26 = vld [vmem:[#allocation2 + $0x28] sm:$0xf] }
 0x16f   : > { %v5443_v35 = vadd.f32 %v5442_v5, %v5354_v9  ;;  %v8438_v9 = vld [vmem:[#allocation3 + $0x460] sm:$0xf0]  ;;  %v3225_v5 = vrot.slane %v3223_v60, 5  ;;  %v2219_v29 = vshrl.u32 %v2149_v38, 16  ;;  %v2222_v16 = vshll.u32 %v2149_v38, 16 }
 0x170   : > { %v2228_v18 = vshll.u32 %v2150_v26, 16  ;;  %v2232_v60 = vshrl.u32 %v2150_v26, 16  ;;  %v6807_v6 = vor.u32 %v8438_v9, %v8436_v46  ;;  %v8450_v17 = vld [vmem:[#allocation3 + $0x444] sm:$0xf]  ;;  %v8452_v52 = vld [vmem:[#allocation3 + $0x464] sm:$0xf0] }
 0x171   : > { %5395 = vmatmul.bf16.gmra.mxu2 %v6771_v58  ;;  %v8442_v34 = vadd.f32 %v5531_v56, %v5443_v35  ;;  %v3231_v58 = vrot.slane %v3229_v12, 5  ;;  %v3226_v1 = vor.u32 %v3225_v5, %v3222_v40  ;;  %v2647_v56 = vld [vmem:[#allocation2 + $0x34] sm:$0xf]  ;;  %v2221_v40 = vrot.slane %v2219_v29, 4  ;;  %v2646_v9 = vld [vmem:[#allocation2 + $0x30] sm:$0x8] }
 0x172   : > { %5484 = vmatmul.bf16.gmra.mxu3 %v6775_v44  ;;  %v6803_v44 = vor.u32 %v7259_v28, %v6800_v59  ;;  %v2719_v12 = vshrl.u32 %v2647_v56, 16  ;;  %v2151_v59 = vld [vmem:[#allocation2 + $0x2c] sm:$0x1]  ;;  %v2230_v5 = vrot.slane %v2228_v18, 5  ;;  %v2234_v38 = vrot.slane %v2232_v60, 4 }
 0x173   : > { %9088 = vst [vmem:[#allocation8_spill] sm:$0xff] %v8442_v34  ;;  %v3236_v32 = vor.u32 %v3235_v24, %v3231_v58  ;;  %v3227_v28 = vrot.slane %v3226_v1, 4  ;;  %v5270_v24 = vadd.f32 %v8430_v20, %v8196_v55  ;;  %v2238_v46 = vshll.u32 %v2151_v59, 16  ;;  %v2648_v26 = vld [vmem:[#allocation2 + $0x38] sm:$0xf] }
 0x174   : > { %v5356_v61 = vpop.f32.mrf.mxu2  ;;  %v2714_v1 = vshrl.u32 %v2646_v9, 16  ;;  %v2235_v55 = vor.u32 %v2234_v38, %v2230_v5  ;;  %v3174_v29 = vld [vmem:[#allocation2 + $0x34] sm:$0xf] }
 0x175   : > { %v5357_v63 = vadd.f32 %v5356_v61, %v5268_v30  ;;  %v5445_v49 = vpop.f32.mrf.mxu3  ;;  %v3237_v42 = vrot.slane %v3236_v32, 4  ;;  %v2224_v30 = vrot.slane %v2222_v16, 5  ;;  %v3232_v61 = vsel %vm8034_vm10, %v3227_v28, %v3231_v58  ;;  %v3109_v59 = vld [vmem:[#allocation2 + $0x34] sm:$0xf] }
 0x176   : > { %v5534_v35 = vpop.f32.mrf.mxu0  ;;  %v8446_v23 = vpop.f32.mrf.mxu1  ;;  %3635 = vst [vmem:[#allocation3 + $0x20] sm:$0xf] %v3232_v61  ;;  %v2721_v32 = vrot.slane %v2719_v12, 7  ;;  %v2240_v20 = vrot.slane %v2238_v46, 5  ;;  %v6241_v18 = vrot.slane %v2714_v1, 11  ;;  %v2728_v28 = vshrl.u32 %v2648_v26, 16 }
 0x177   : > { %v5446_v19 = vadd.f32 %v5445_v49, %v5357_v63  ;;  %v3242_v63 = vsel %vm8034_vm10, %v3237_v42, %v3241_v43  ;;  %v2225_v49 = vor.u32 %v2224_v30, %v2221_v40  ;;  %v2236_v42 = vrot.slane %v2235_v55, 4  ;;  %v3110_v12 = vld [vmem:[#allocation2 + $0x38] sm:$0xf]  ;;  %3141 = vst [vmem:[#allocation3 + $0x64] sm:$0xf] %v3109_v59 }
 0x178   : > { %3636 = vst [vmem:[#allocation3 + $0x44] sm:$0xf] %v3242_v63  ;;  %v2726_v60 = vrot.slane %v2721_v32, 4  ;;  %v2731_v30 = vshll.u32 %v2648_v26, 16  ;;  %v7126_v38 = vld [vmem:[#allocation3 + $0x14] sm:$0xf] }
 0x179   : > { %5573 = vmatmul.bf16.gmra.mxu0 %v6779_v57  ;;  %5311 = vmatmul.bf16.gmra.mxu1 %v6803_v44  ;;  %v6811_v57 = vor.u32 %v8450_v17, %v8452_v52  ;;  %v2722_v44 = vshll.u32 %v2647_v56, 16  ;;  %v2226_v16 = vrot.slane %v2225_v49, 4  ;;  %v8462_v17 = vld [vmem:[#allocation3 + $0x448] sm:$0xf]  ;;  %v8464_v52 = vld [vmem:[#allocation3 + $0x468] sm:$0xf0]  ;;  %v8470_v49 = vadd.f32 %v5534_v35, %v5446_v19 }
 0x17a   : > { %v2730_v9 = vrot.slane %v2728_v28, 7  ;;  %3142 = vst [vmem:[#allocation3 + $0x88] sm:$0xf] %v3110_v12  ;;  %v3244_v63 = vshrl.u32 %v3174_v29, 16  ;;  %v6276_v1 = vld [vmem:[#allocation3 + $0x34] sm:$0xf0] }
 0x17b   : > { %v2724_v40 = vor.u32 %v2722_v44, %v2721_v32  ;;  %v2231_v46 = vsel %vm8034_vm10, %v2226_v16, %v2230_v5  ;;  %v2241_v32 = vsel %vm8034_vm10, %v2236_v42, %v2240_v20  ;;  %v3176_v44 = vld [vmem:[#allocation2 + $0x3c] sm:$0x1]  ;;  %v3247_v5 = vshll.u32 %v3174_v29, 16 }
 0x17c   : > { %v5358_v58 = vpop.f32.mrf.mxu2  ;;  %2612 = vst [vmem:[#allocation3 + $0x5c] sm:$0xf] %v2231_v46  ;;  %v3246_v59 = vrot.slane %v3244_v63, 4  ;;  %v3263_v35 = vshll.u32 %v3176_v44, 16  ;;  %v6815_v42 = vor.u32 %v8464_v52, %v8462_v17  ;;  %v6279_v29 = vor.u32 %v7126_v38, %v6276_v1  ;;  %v2153_v46 = vld [vmem:[#allocation2 + $0x38] sm:$0xf] }
 0x17d   : > { %v5359_v34 = vadd.f32 %v5358_v58, %v5270_v24  ;;  %v5447_v43 = vpop.f32.mrf.mxu3  ;;  %v3175_v24 = vld [vmem:[#allocation2 + $0x38] sm:$0xf]  ;;  %v2725_v55 = vsel %vm7693_vm5, %v6241_v18, %v2724_v40  ;;  %2613 = vst [vmem:[#allocation3 + $0x80] sm:$0xf] %v2241_v32  ;;  %v2733_v58 = vor.u32 %v2731_v30, %v2730_v9  ;;  %v3249_v20 = vrot.slane %v3247_v5, 5 }
 0x17e   : > { %v5536_v61 = vpop.f32.mrf.mxu0  ;;  %v8466_v56 = vpop.f32.mrf.mxu1  ;;  %v3253_v16 = vshll.u32 %v3175_v24, 16  ;;  %3077 = vst [vmem:[#allocation3 + $0x60] sm:$0xf] %v2725_v55  ;;  %v3257_v28 = vshrl.u32 %v3175_v24, 16  ;;  %v5273_v18 = vadd.f32 %v8446_v23, %v8212_v2  ;;  %v2152_v40 = vld [vmem:[#allocation2 + $0x34] sm:$0xf] }
 0x17f   : > { %v5448_v26 = vadd.f32 %v5447_v43, %v5359_v34  ;;  %v2734_v34 = vsel %vm7693_vm5, %v2726_v60, %v2733_v58  ;;  %v3250_v12 = vor.u32 %v3249_v20, %v3246_v59  ;;  %v2246_v9 = vshll.u32 %v2152_v40, 16  ;;  %v8484_v63 = vld [vmem:[#allocation3 + $0x1c] sm:$0xf]  ;;  %v8488_v17 = vld [vmem:[#allocation3 + $0x3c] sm:$0xf0] }
 0x180   : > { %v3255_v43 = vrot.slane %v3253_v16, 5  ;;  %3078 = vst [vmem:[#allocation3 + $0x84] sm:$0xf] %v2734_v34  ;;  %v2252_v32 = vshll.u32 %v2153_v46, 16  ;;  %v2256_v2 = vshrl.u32 %v2153_v46, 16 }
 0x181   : > { %5400 = vmatmul.bf16.gmra.mxu2 %v6807_v6  ;;  %v8476_v19 = vadd.f32 %v5536_v61, %v5448_v26  ;;  %v3259_v6 = vrot.slane %v3257_v28, 4  ;;  %v3265_v61 = vrot.slane %v3263_v35, 5  ;;  %v3251_v52 = vrot.slane %v3250_v12, 4  ;;  %v2154_v59 = vld [vmem:[#allocation2 + $0x3c] sm:$0x1] }
 0x182   : > { %5489 = vmatmul.bf16.gmra.mxu3 %v6811_v57  ;;  %v2243_v57 = vshrl.u32 %v2152_v40, 16  ;;  %v2248_v1 = vrot.slane %v2246_v9, 5  ;;  %v2254_v5 = vrot.slane %v2252_v32, 5  ;;  %v2650_v16 = vld [vmem:[#allocation2 + $0x44] sm:$0xf]  ;;  %v2258_v20 = vrot.slane %v2256_v2, 4 }
 0x183   : > { %v3260_v26 = vor.u32 %v3259_v6, %v3255_v43  ;;  %v6282_v28 = vld [vmem:[#allocation3 + $0x18] sm:$0xf]  ;;  %v3256_v35 = vsel %vm8034_vm10, %v3251_v52, %v3255_v43  ;;  %v2262_v40 = vshll.u32 %v2154_v59, 16  ;;  %v6287_v9 = vor.u32 %v8484_v63, %v8488_v17  ;;  %v3177_v32 = vld [vmem:[#allocation2 + $0x44] sm:$0xf] }
 0x184   : > { %v5361_v30 = vpop.f32.mrf.mxu2  ;;  %v2245_v38 = vrot.slane %v2243_v57, 4  ;;  %3637 = vst [vmem:[#allocation3 + $0x68] sm:$0xf] %v3256_v35  ;;  %v7131_v57 = vld [vmem:[#allocation3 + $0x38] sm:$0xf0] }
 0x185   : > { %v5362_v24 = vadd.f32 %v5361_v30, %v5273_v18  ;;  %v5450_v60 = vpop.f32.mrf.mxu3  ;;  %v3261_v58 = vrot.slane %v3260_v26, 4  ;;  %v2649_v18 = vld [vmem:[#allocation2 + $0x40] sm:$0x8]  ;;  %v2651_v30 = vld [vmem:[#allocation2 + $0x48] sm:$0xf] }
 0x186   : > { %v5539_v23 = vpop.f32.mrf.mxu0  ;;  %v8486_v55 = vpop.f32.mrf.mxu1  ;;  %v2249_v34 = vor.u32 %v2248_v1, %v2245_v38  ;;  %v2736_v12 = vshrl.u32 %v2649_v18, 16  ;;  %v2750_v1 = vshrl.u32 %v2651_v30, 16  ;;  %v2753_v59 = vshll.u32 %v2651_v30, 16  ;;  %v3112_v35 = vld [vmem:[#allocation2 + $0x48] sm:$0xf] }
 0x187   : > { %v5451_v44 = vadd.f32 %v5450_v60, %v5362_v24  ;;  %v3266_v6 = vsel %vm8034_vm10, %v3261_v58, %v3265_v61  ;;  %v2259_v24 = vor.u32 %v2258_v20, %v2254_v5  ;;  %v2741_v60 = vshrl.u32 %v2650_v16, 16  ;;  %v7132_v20 = vld [vmem:[#allocation3 + $0x40] sm:$0xf0]  ;;  %v7135_v18 = vld [vmem:[#allocation3 + $0x5c] sm:$0xf] }
 0x188   : > { %3638 = vst [vmem:[#allocation3 + $0x8c] sm:$0xf] %v3266_v6  ;;  %v2250_v43 = vrot.slane %v2249_v34, 4  ;;  %v6242_v26 = vrot.slane %v2736_v12, 11  ;;  %v2744_v61 = vshll.u32 %v2650_v16, 16  ;;  %v6283_v58 = vor.u32 %v7131_v57, %v6282_v28 }
 0x189   : > { %5578 = vmatmul.bf16.gmra.mxu0 %v6815_v42  ;;  %5592 = vmatmul.bf16.vlgmr.msra.gmra.mxu1 %v6279_v29  ;;  %v8494_v46 = vadd.f32 %v5539_v23, %v5451_v44  ;;  %v5275_v42 = vadd.f32 %v8466_v56, %v8231_v62  ;;  %v2264_v29 = vrot.slane %v2262_v40, 5  ;;  %v2260_v52 = vrot.slane %v2259_v24, 4  ;;  %v3111_v44 = vld [vmem:[#allocation2 + $0x44] sm:$0xf]  ;;  %v6290_v56 = vld [vmem:[#allocation3 + $0x20] sm:$0xf] }
 0x18a   : > { %v2255_v23 = vsel %vm8034_vm10, %v2250_v43, %v2254_v5  ;;  %v2743_v38 = vrot.slane %v2741_v60, 7  ;;  %v3268_v34 = vshrl.u32 %v3177_v32, 16  ;;  %v2752_v12 = vrot.slane %v2750_v1, 7  ;;  %3143 = vst [vmem:[#allocation3 + $0xac] sm:$0xf] %v3111_v44 }
 0x18b   : > { %9089 = vst [vmem:[#allocation9_spill] sm:$0xff] %v8494_v46  ;;  %v2265_v5 = vsel %vm8034_vm10, %v2260_v52, %v2264_v29  ;;  %v3178_v43 = vld [vmem:[#allocation2 + $0x48] sm:$0xf]  ;;  %v3179_v28 = vld [vmem:[#allocation2 + $0x4c] sm:$0x1]  ;;  %v3271_v57 = vshll.u32 %v3177_v32, 16  ;;  %v5278_v44 = vadd.f32 %v8486_v55, %v8120_v53 }
 0x18c   : > { %v5363_v2 = vpop.f32.mrf.mxu2  ;;  %2614 = vst [vmem:[#allocation3 + $0xa4] sm:$0xf] %v2255_v23  ;;  %v2746_v6 = vor.u32 %v2744_v61, %v2743_v38  ;;  %v2748_v40 = vrot.slane %v2743_v38, 4  ;;  %v3270_v30 = vrot.slane %v3268_v34, 4  ;;  %v6312_v60 = vld [vmem:[#allocation3 + $0x7c] sm:$0xf0] }
 0x18d   : > { %v5364_v63 = vadd.f32 %v5363_v2, %v5275_v42  ;;  %v5452_v17 = vpop.f32.mrf.mxu3  ;;  %2615 = vst [vmem:[#allocation3 + $0xc8] sm:$0xf] %v2265_v5  ;;  %v2755_v2 = vor.u32 %v2753_v59, %v2752_v12  ;;  %v3277_v23 = vshll.u32 %v3178_v43, 16  ;;  %v3281_v46 = vshrl.u32 %v3178_v43, 16  ;;  %v2155_v59 = vld [vmem:[#allocation2 + $0x44] sm:$0xf] }
 0x18e   : > { %v5541_v62 = vpop.f32.mrf.mxu0  ;;  %v8502_v16 = vpop.f32.mrf.mxu1  ;;  %v2747_v42 = vsel %vm7693_vm5, %v6242_v26, %v2746_v6  ;;  %3144 = vst [vmem:[#allocation3 + $0xd0] sm:$0xf] %v3112_v35  ;;  %v3273_v29 = vrot.slane %v3271_v57, 5  ;;  %v3287_v61 = vshll.u32 %v3179_v28, 16  ;;  %v6291_v26 = vor.u32 %v7132_v20, %v6290_v56  ;;  %v2156_v5 = vld [vmem:[#allocation2 + $0x48] sm:$0xf] }
 0x18f   : > { %v5453_v24 = vadd.f32 %v5452_v17, %v5364_v63  ;;  %3079 = vst [vmem:[#allocation3 + $0xa8] sm:$0xf] %v2747_v42  ;;  %v2756_v38 = vsel %vm7693_vm5, %v2748_v40, %v2755_v2  ;;  %v3279_v1 = vrot.slane %v3277_v23, 5  ;;  %v3283_v32 = vrot.slane %v3281_v46, 4  ;;  %v6318_v53 = vld [vmem:[#allocation3 + $0x60] sm:$0xf] }
 0x190   : > { %v6315_v63 = vor.u32 %v7135_v18, %v6312_v60  ;;  %3080 = vst [vmem:[#allocation3 + $0xcc] sm:$0xf] %v2756_v38  ;;  %v3274_v17 = vor.u32 %v3273_v29, %v3270_v30  ;;  %v3289_v34 = vrot.slane %v3287_v61, 5  ;;  %v2270_v6 = vshll.u32 %v2155_v59, 16  ;;  %v7140_v30 = vld [vmem:[#allocation3 + $0x80] sm:$0xf0] }
 0x191   : > { %5681 = vmatmul.bf16.vlgmr.msra.gmra.mxu2 %v6283_v58  ;;  %v8508_v52 = vadd.f32 %v5541_v62, %v5453_v24  ;;  %v3284_v35 = vor.u32 %v3283_v32, %v3279_v1  ;;  %v2267_v62 = vshrl.u32 %v2155_v59, 16  ;;  %v2276_v40 = vshll.u32 %v2156_v5, 16  ;;  %v2157_v60 = vld [vmem:[#allocation2 + $0x4c] sm:$0x1]  ;;  %v2652_v42 = vld [vmem:[#allocation2 + $0x50] sm:$0x8] }
 0x192   : > { %5770 = vmatmul.bf16.vlgmr.msra.gmra.mxu3 %v6287_v9  ;;  %v3275_v43 = vrot.slane %v3274_v17, 4  ;;  %v2280_v24 = vshrl.u32 %v2156_v5, 16  ;;  %v2272_v20 = vrot.slane %v2270_v6, 5  ;;  %v2286_v38 = vshll.u32 %v2157_v60, 16  ;;  %v2653_v32 = vld [vmem:[#allocation2 + $0x54] sm:$0xf] }
 0x193   : > { %v3285_v55 = vrot.slane %v3284_v35, 4  ;;  %v2269_v56 = vrot.slane %v2267_v62, 4  ;;  %v2278_v29 = vrot.slane %v2276_v40, 5  ;;  %v6319_v17 = vor.u32 %v7140_v30, %v6318_v53  ;;  %v7136_v59 = vld [vmem:[#allocation3 + $0x64] sm:$0xf] }
 0x194   : > { %v5366_v58 = vpop.f32.mrf.mxu2  ;;  %v3280_v57 = vsel %vm8034_vm10, %v3275_v43, %v3279_v1  ;;  %v2282_v61 = vrot.slane %v2280_v24, 4  ;;  %v2654_v1 = vld [vmem:[#allocation2 + $0x58] sm:$0xf]  ;;  %v2758_v35 = vshrl.u32 %v2652_v42, 16  ;;  %v5280_v5 = vadd.f32 %v8502_v16, %v8136_v31 }
 0x195   : > { %v5367_v9 = vadd.f32 %v5366_v58, %v5278_v44  ;;  %v5455_v12 = vpop.f32.mrf.mxu3  ;;  %v3290_v2 = vsel %vm8034_vm10, %v3285_v55, %v3289_v34  ;;  %3639 = vst [vmem:[#allocation3 + $0xb0] sm:$0xf] %v3280_v57  ;;  %v2273_v23 = vor.u32 %v2272_v20, %v2269_v56  ;;  %v6320_v34 = vld [vmem:[#allocation3 + $0x84] sm:$0xf0]  ;;  %v2288_v6 = vrot.slane %v2286_v38, 5 }
 0x196   : > { %v5544_v46 = vpop.f32.mrf.mxu0  ;;  %v8514_v28 = vpop.f32.mrf.mxu1  ;;  %3640 = vst [vmem:[#allocation3 + $0xd4] sm:$0xf] %v3290_v2  ;;  %v2283_v62 = vor.u32 %v2282_v61, %v2278_v29  ;;  %v6243_v43 = vrot.slane %v2758_v35, 11  ;;  %v2766_v40 = vshll.u32 %v2653_v32, 16  ;;  %v2772_v24 = vshrl.u32 %v2654_v1, 16 }
 0x197   : > { %v5456_v18 = vadd.f32 %v5455_v12, %v5367_v9  ;;  %v2274_v58 = vrot.slane %v2273_v23, 4  ;;  %v2763_v9 = vshrl.u32 %v2653_v32, 16  ;;  %v3181_v53 = vld [vmem:[#allocation2 + $0x58] sm:$0xf]  ;;  %v2775_v31 = vshll.u32 %v2654_v1, 16 }
 0x198   : > { %v2284_v20 = vrot.slane %v2283_v62, 4  ;;  %v6323_v30 = vor.u32 %v7136_v59, %v6320_v34  ;;  %v2774_v60 = vrot.slane %v2772_v24, 7  ;;  %v3114_v42 = vld [vmem:[#allocation2 + $0x58] sm:$0xf]  ;;  %v7141_v61 = vld [vmem:[#allocation3 + $0x88] sm:$0xf0] }
 0x199   : > { %5859 = vmatmul.bf16.vlgmr.msra.gmra.mxu0 %v6291_v26  ;;  %5597 = vmatmul.bf16.gmra.mxu1 %v6315_v63  ;;  %v8520_v44 = vadd.f32 %v5544_v46, %v5456_v18  ;;  %v3180_v26 = vld [vmem:[#allocation2 + $0x54] sm:$0xf]  ;;  %v2279_v12 = vsel %vm8034_vm10, %v2274_v58, %v2278_v29  ;;  %v2765_v18 = vrot.slane %v2763_v9, 7  ;;  %v6326_v29 = vld [vmem:[#allocation3 + $0x68] sm:$0xf] }
 0x19a   : > { %v3113_v46 = vld [vmem:[#allocation2 + $0x54] sm:$0xf]  ;;  %2616 = vst [vmem:[#allocation3 + $0xec] sm:$0xf] %v2279_v12  ;;  %v3292_v2 = vshrl.u32 %v3180_v26, 16  ;;  %v2289_v38 = vsel %vm8034_vm10, %v2284_v20, %v2288_v6  ;;  %v3295_v9 = vshll.u32 %v3180_v26, 16  ;;  %v6327_v26 = vor.u32 %v7141_v61, %v6326_v29 }
 0x19b   : > { %3145 = vst [vmem:[#allocation3 + $0xf4] sm:$0xf] %v3113_v46  ;;  %v2768_v32 = vor.u32 %v2766_v40, %v2765_v18  ;;  %v3182_v58 = vld [vmem:[#allocation2 + $0x5c] sm:$0x1]  ;;  %v7144_v35 = vld [vmem:[#allocation3 + $0xa4] sm:$0xf] }
 0x19c   : > { %v5368_v63 = vpop.f32.mrf.mxu2  ;;  %3146 = vst [vmem:[#allocation3 + $0x118] sm:$0xf] %v3114_v42  ;;  %v2770_v1 = vrot.slane %v2765_v18, 4  ;;  %v6348_v59 = vld [vmem:[#allocation3 + $0xc4] sm:$0xf0]  ;;  %v3294_v62 = vrot.slane %v3292_v2, 4 }
 0x19d   : > { %v5369_v55 = vadd.f32 %v5368_v63, %v5280_v5  ;;  %v5457_v56 = vpop.f32.mrf.mxu3  ;;  %2617 = vst [vmem:[#allocation3 + $0x110] sm:$0xf] %v2289_v38  ;;  %v2777_v5 = vor.u32 %v2775_v31, %v2774_v60  ;;  %v2769_v34 = vsel %vm7693_vm5, %v6243_v43, %v2768_v32  ;;  %v3301_v63 = vshll.u32 %v3181_v53, 16  ;;  %v8532_v12 = vld [vmem:[#allocation3 + $0xac] sm:$0xf] }
 0x19e   : > { %v5546_v16 = vpop.f32.mrf.mxu0  ;;  %v8526_v57 = vpop.f32.mrf.mxu1  ;;  %3081 = vst [vmem:[#allocation3 + $0xf0] sm:$0xf] %v2769_v34  ;;  %v3305_v40 = vshrl.u32 %v3181_v53, 16  ;;  %v3311_v24 = vshll.u32 %v3182_v58, 16  ;;  %v6351_v18 = vor.u32 %v7144_v35, %v6348_v59  ;;  %v8540_v31 = vld [vmem:[#allocation3 + $0xcc] sm:$0xf0] }
 0x19f   : > { %v5458_v23 = vadd.f32 %v5457_v56, %v5369_v55  ;;  %v2778_v6 = vsel %vm7693_vm5, %v2770_v1, %v2777_v5  ;;  %v3297_v55 = vrot.slane %v3295_v9, 5  ;;  %v3303_v43 = vrot.slane %v3301_v63, 5  ;;  %v2158_v56 = vld [vmem:[#allocation2 + $0x54] sm:$0xf]  ;;  %v2159_v60 = vld [vmem:[#allocation2 + $0x58] sm:$0xf] }
 0x1a0   : > { %3082 = vst [vmem:[#allocation3 + $0x114] sm:$0xf] %v2778_v6  ;;  %v8542_v53 = vld [vmem:[#allocation3 + $0xa8] sm:$0xf]  ;;  %v2291_v38 = vshrl.u32 %v2158_v56, 16  ;;  %v3313_v29 = vrot.slane %v3311_v24, 5  ;;  %v6359_v5 = vor.u32 %v8532_v12, %v8540_v31 }
 0x1a1   : > { %5686 = vmatmul.bf16.gmra.mxu2 %v6319_v17  ;;  %v8536_v46 = vadd.f32 %v5546_v16, %v5458_v23  ;;  %v5283_v17 = vadd.f32 %v8514_v28, %v8151_v13  ;;  %v8544_v16 = vld [vmem:[#allocation3 + $0xc8] sm:$0xf0]  ;;  %v3298_v23 = vor.u32 %v3297_v55, %v3294_v62  ;;  %v2294_v13 = vshll.u32 %v2158_v56, 16  ;;  %v2160_v34 = vld [vmem:[#allocation2 + $0x5c] sm:$0x1] }
 0x1a2   : > { %5775 = vmatmul.bf16.gmra.mxu3 %v6323_v30  ;;  %v3307_v30 = vrot.slane %v3305_v40, 4  ;;  %v2300_v61 = vshll.u32 %v2159_v60, 16  ;;  %v2304_v35 = vshrl.u32 %v2159_v60, 16  ;;  %v2656_v9 = vld [vmem:[#allocation2 + $0x64] sm:$0xf]  ;;  %v6355_v63 = vor.u32 %v8544_v16, %v8542_v53 }
 0x1a3   : > { %v3299_v59 = vrot.slane %v3298_v23, 4  ;;  %v2293_v6 = vrot.slane %v2291_v38, 4  ;;  %v2296_v40 = vrot.slane %v2294_v13, 5  ;;  %v2785_v53 = vshrl.u32 %v2656_v9, 16  ;;  %v3183_v38 = vld [vmem:[#allocation2 + $0x64] sm:$0xf] }
 0x1a4   : > { %v5371_v20 = vpop.f32.mrf.mxu2  ;;  %v3308_v58 = vor.u32 %v3307_v30, %v3303_v43  ;;  %v2302_v55 = vrot.slane %v2300_v61, 5  ;;  %v2306_v56 = vrot.slane %v2304_v35, 4  ;;  %v2657_v30 = vld [vmem:[#allocation2 + $0x68] sm:$0xf]  ;;  %v5285_v16 = vadd.f32 %v8526_v57, %v8176_v10  ;;  %v8560_v57 = vld [vmem:[#allocation3 + $0xb0] sm:$0xf] }
 0x1a5   : > { %v5372_v42 = vadd.f32 %v5371_v20, %v5283_v17  ;;  %v5460_v2 = vpop.f32.mrf.mxu3  ;;  %v2655_v17 = vld [vmem:[#allocation2 + $0x60] sm:$0x8]  ;;  %v3304_v24 = vsel %vm8034_vm10, %v3299_v59, %v3303_v43  ;;  %v2310_v20 = vshll.u32 %v2160_v34, 16  ;;  %v2788_v23 = vshll.u32 %v2656_v9, 16  ;;  %v3115_v59 = vld [vmem:[#allocation2 + $0x64] sm:$0xf] }
 0x1a6   : > { %v5549_v28 = vpop.f32.mrf.mxu0  ;;  %v8546_v32 = vpop.f32.mrf.mxu1  ;;  %v3309_v62 = vrot.slane %v3308_v58, 4  ;;  %3641 = vst [vmem:[#allocation3 + $0xf8] sm:$0xf] %v3304_v24  ;;  %v2787_v61 = vrot.slane %v2785_v53, 7  ;;  %v2794_v35 = vshrl.u32 %v2657_v30, 16  ;;  %v3316_v53 = vshrl.u32 %v3183_v38, 16 }
 0x1a7   : > { %v5461_v1 = vadd.f32 %v5460_v2, %v5372_v42  ;;  %v2297_v42 = vor.u32 %v2296_v40, %v2293_v6  ;;  %v2780_v2 = vshrl.u32 %v2655_v17, 16  ;;  %v2797_v6 = vshll.u32 %v2657_v30, 16  ;;  %v3116_v40 = vld [vmem:[#allocation2 + $0x68] sm:$0xf]  ;;  %3147 = vst [vmem:[#allocation3 + $0x13c] sm:$0xf] %v3115_v59 }
 0x1a8   : > { %v3314_v60 = vsel %vm8034_vm10, %v3309_v62, %v3313_v29  ;;  %v8562_v24 = vld [vmem:[#allocation3 + $0xd0] sm:$0xf0]  ;;  %3148 = vst [vmem:[#allocation3 + $0x160] sm:$0xf] %v3116_v40  ;;  %v3319_v59 = vshll.u32 %v3183_v38, 16  ;;  %v5288_v38 = vadd.f32 %v8546_v32, %v8194_v0 }
 0x1a9   : > { %5864 = vmatmul.bf16.gmra.mxu0 %v6327_v26  ;;  %5602 = vmatmul.bf16.gmra.mxu1 %v6351_v18  ;;  %3642 = vst [vmem:[#allocation3 + $0x11c] sm:$0xf] %v3314_v60  ;;  %v2307_v26 = vor.u32 %v2306_v56, %v2302_v55  ;;  %v2312_v18 = vrot.slane %v2310_v20, 5  ;;  %v2298_v13 = vrot.slane %v2297_v42, 4  ;;  %v6244_v58 = vrot.slane %v2780_v2, 11 }
 0x1aa   : > { %v8558_v17 = vadd.f32 %v5549_v28, %v5461_v1  ;;  %v2790_v20 = vor.u32 %v2788_v23, %v2787_v61  ;;  %v2792_v60 = vrot.slane %v2787_v61, 4  ;;  %v2796_v42 = vrot.slane %v2794_v35, 7  ;;  %v3184_v2 = vld [vmem:[#allocation2 + $0x68] sm:$0xf]  ;;  %v3185_v1 = vld [vmem:[#allocation2 + $0x6c] sm:$0x1] }
 0x1ab   : > { %v2308_v62 = vrot.slane %v2307_v26, 4  ;;  %v2303_v56 = vsel %vm8034_vm10, %v2298_v13, %v2302_v55  ;;  %v3325_v55 = vshll.u32 %v3184_v2, 16  ;;  %v6384_v23 = vld [vmem:[#allocation3 + $0x10c] sm:$0xf0]  ;;  %v3318_v13 = vrot.slane %v3316_v53, 4 }
 0x1ac   : > { %v5373_v43 = vpop.f32.mrf.mxu2  ;;  %2618 = vst [vmem:[#allocation3 + $0x134] sm:$0xf] %v2303_v56  ;;  %v2791_v26 = vsel %vm7693_vm5, %v6244_v58, %v2790_v20  ;;  %v3329_v61 = vshrl.u32 %v3184_v2, 16  ;;  %v3335_v58 = vshll.u32 %v3185_v1, 16  ;;  %v2162_v31 = vld [vmem:[#allocation2 + $0x68] sm:$0xf] }
 0x1ad   : > { %v5374_v34 = vadd.f32 %v5373_v43, %v5285_v16  ;;  %v5462_v29 = vpop.f32.mrf.mxu3  ;;  %v2313_v28 = vsel %vm8034_vm10, %v2308_v62, %v2312_v18  ;;  %v7153_v16 = vld [vmem:[#allocation3 + $0xec] sm:$0xf]  ;;  %v2799_v43 = vor.u32 %v2797_v6, %v2796_v42  ;;  %3083 = vst [vmem:[#allocation3 + $0x138] sm:$0xf] %v2791_v26  ;;  %v2161_v6 = vld [vmem:[#allocation2 + $0x64] sm:$0xf] }
 0x1ae   : > { %v5551_v10 = vpop.f32.mrf.mxu0  ;;  %v8564_v9 = vpop.f32.mrf.mxu1  ;;  %2619 = vst [vmem:[#allocation3 + $0x158] sm:$0xf] %v2313_v28  ;;  %v3331_v62 = vrot.slane %v3329_v61, 4  ;;  %v3337_v12 = vrot.slane %v3335_v58, 5  ;;  %v2318_v2 = vshll.u32 %v2161_v6, 16 }
 0x1af   : > { %v5463_v30 = vadd.f32 %v5462_v29, %v5374_v34  ;;  %v2800_v18 = vsel %vm7693_vm5, %v2792_v60, %v2799_v43  ;;  %v3321_v34 = vrot.slane %v3319_v59, 5  ;;  %v3327_v29 = vrot.slane %v3325_v55, 5  ;;  %v2163_v26 = vld [vmem:[#allocation2 + $0x6c] sm:$0x1]  ;;  %v6390_v59 = vld [vmem:[#allocation3 + $0xf0] sm:$0xf] }
 0x1b0   : > { %3084 = vst [vmem:[#allocation3 + $0x15c] sm:$0xf] %v2800_v18  ;;  %v2320_v43 = vrot.slane %v2318_v2, 5  ;;  %v8585_v55 = vld [vmem:[#allocation3 + $0xf4] sm:$0xf] }
 0x1b1   : > { %5691 = vmatmul.bf16.gmra.mxu2 %v6355_v63  ;;  %v8572_v35 = vadd.f32 %v5551_v10, %v5463_v30  ;;  %v6363_v63 = vor.u32 %v8562_v24, %v8560_v57  ;;  %v6387_v10 = vor.u32 %v7153_v16, %v6384_v23  ;;  %v3322_v56 = vor.u32 %v3321_v34, %v3318_v13  ;;  %v2659_v16 = vld [vmem:[#allocation2 + $0x74] sm:$0xf]  ;;  %v8587_v23 = vld [vmem:[#allocation3 + $0x114] sm:$0xf0]  ;;  %v2658_v34 = vld [vmem:[#allocation2 + $0x70] sm:$0x8] }
 0x1b2   : > { %5780 = vmatmul.bf16.gmra.mxu3 %v6359_v5  ;;  %v2315_v5 = vshrl.u32 %v2161_v6, 16  ;;  %v3332_v42 = vor.u32 %v3331_v62, %v3327_v29  ;;  %v2324_v30 = vshll.u32 %v2162_v31, 16  ;;  %v2328_v57 = vshrl.u32 %v2162_v31, 16  ;;  %v2660_v6 = vld [vmem:[#allocation2 + $0x78] sm:$0xf] }
 0x1b3   : > { %v3323_v0 = vrot.slane %v3322_v56, 4  ;;  %v2334_v62 = vshll.u32 %v2163_v26, 16  ;;  %v7158_v56 = vld [vmem:[#allocation3 + $0x110] sm:$0xf0] }
 0x1b4   : > { %v5376_v40 = vpop.f32.mrf.mxu2  ;;  %v2317_v32 = vrot.slane %v2315_v5, 4  ;;  %v3333_v53 = vrot.slane %v3332_v42, 4  ;;  %v2326_v61 = vrot.slane %v2324_v30, 5  ;;  %v2330_v18 = vrot.slane %v2328_v57, 4  ;;  %v3186_v2 = vld [vmem:[#allocation2 + $0x74] sm:$0xf] }
 0x1b5   : > { %v5377_v20 = vadd.f32 %v5376_v40, %v5288_v38  ;;  %v5465_v60 = vpop.f32.mrf.mxu3  ;;  %v3328_v13 = vsel %vm8034_vm10, %v3323_v0, %v3327_v29  ;;  %v2802_v40 = vshrl.u32 %v2658_v34, 16  ;;  %v2807_v5 = vshrl.u32 %v2659_v16, 16  ;;  %v7159_v34 = vld [vmem:[#allocation3 + $0x118] sm:$0xf0] }
 0x1b6   : > { %v5554_v28 = vpop.f32.mrf.mxu0  ;;  %v8583_v1 = vpop.f32.mrf.mxu1  ;;  %v3338_v58 = vsel %vm8034_vm10, %v3333_v53, %v3337_v12  ;;  %3643 = vst [vmem:[#allocation3 + $0x140] sm:$0xf] %v3328_v13  ;;  %v2321_v38 = vor.u32 %v2320_v43, %v2317_v32  ;;  %v2331_v31 = vor.u32 %v2330_v18, %v2326_v61  ;;  %v5290_v29 = vadd.f32 %v8564_v9, %v8206_v4  ;;  %v3117_v53 = vld [vmem:[#allocation2 + $0x74] sm:$0xf]  ;;  %v3118_v4 = vld [vmem:[#allocation2 + $0x78] sm:$0xf] }
 0x1b7   : > { %v5466_v24 = vadd.f32 %v5465_v60, %v5377_v20  ;;  %3644 = vst [vmem:[#allocation3 + $0x164] sm:$0xf] %v3338_v58  ;;  %v2810_v20 = vshll.u32 %v2659_v16, 16  ;;  %v6245_v42 = vrot.slane %v2802_v40, 11  ;;  %v2809_v0 = vrot.slane %v2807_v5, 7 }
 0x1b8   : > { %v2332_v30 = vrot.slane %v2331_v31, 4  ;;  %v2816_v32 = vshrl.u32 %v2660_v6, 16  ;;  %v2819_v57 = vshll.u32 %v2660_v6, 16  ;;  %v6391_v13 = vor.u32 %v7158_v56, %v6390_v59  ;;  %3149 = vst [vmem:[#allocation3 + $0x184] sm:$0xf] %v3117_v53 }
 0x1b9   : > { %5869 = vmatmul.bf16.gmra.mxu0 %v6363_v63  ;;  %5607 = vmatmul.bf16.gmra.mxu1 %v6387_v10  ;;  %v8593_v60 = vadd.f32 %v5554_v28, %v5466_v24  ;;  %v2322_v63 = vrot.slane %v2321_v38, 4  ;;  %v2336_v10 = vrot.slane %v2334_v62, 5  ;;  %v6395_v28 = vor.u32 %v8585_v55, %v8587_v23  ;;  %v3187_v9 = vld [vmem:[#allocation2 + $0x78] sm:$0xf]  ;;  %v7162_v55 = vld [vmem:[#allocation3 + $0x134] sm:$0xf] }
 0x1ba   : > { %v6398_v18 = vld [vmem:[#allocation3 + $0xf8] sm:$0xf]  ;;  %v2812_v62 = vor.u32 %v2810_v20, %v2809_v0  ;;  %v2814_v59 = vrot.slane %v2809_v0, 4  ;;  %v2818_v6 = vrot.slane %v2816_v32, 7  ;;  %v3340_v23 = vshrl.u32 %v3186_v2, 16 }
 0x1bb   : > { %v2327_v24 = vsel %vm8034_vm10, %v2322_v63, %v2326_v61  ;;  %v2337_v38 = vsel %vm8034_vm10, %v2332_v30, %v2336_v10  ;;  %v3343_v61 = vshll.u32 %v3186_v2, 16  ;;  %3150 = vst [vmem:[#allocation3 + $0x1a8] sm:$0xf] %v3118_v4  ;;  %v3188_v5 = vld [vmem:[#allocation2 + $0x7c] sm:$0x1]  ;;  %v3353_v63 = vshrl.u32 %v3187_v9, 16 }
 0x1bc   : > { %v5378_v12 = vpop.f32.mrf.mxu2  ;;  %2620 = vst [vmem:[#allocation3 + $0x17c] sm:$0xf] %v2327_v24  ;;  %v2813_v56 = vsel %vm7693_vm5, %v6245_v42, %v2812_v62  ;;  %v2821_v31 = vor.u32 %v2819_v57, %v2818_v6  ;;  %v3342_v10 = vrot.slane %v3340_v23, 4  ;;  %v5293_v42 = vadd.f32 %v8583_v1, %v8236_v11  ;;  %v8615_v11 = vld [vmem:[#allocation3 + $0x138] sm:$0xf] }
 0x1bd   : > { %v5379_v26 = vadd.f32 %v5378_v12, %v5290_v29  ;;  %v5467_v43 = vpop.f32.mrf.mxu3  ;;  %2621 = vst [vmem:[#allocation3 + $0x1a0] sm:$0xf] %v2337_v38  ;;  %v3349_v29 = vshll.u32 %v3187_v9, 16  ;;  %v6420_v12 = vld [vmem:[#allocation3 + $0x154] sm:$0xf0]  ;;  %v3345_v20 = vrot.slane %v3343_v61, 5  ;;  %v6399_v57 = vor.u32 %v7159_v34, %v6398_v18 }
 0x1be   : > { %v5556_v16 = vpop.f32.mrf.mxu0  ;;  %v8601_v58 = vpop.f32.mrf.mxu1  ;;  %3085 = vst [vmem:[#allocation3 + $0x180] sm:$0xf] %v2813_v56  ;;  %v2822_v0 = vsel %vm7693_vm5, %v2814_v59, %v2821_v31  ;;  %v3355_v32 = vrot.slane %v3353_v63, 4  ;;  %v6423_v24 = vor.u32 %v7162_v55, %v6420_v12  ;;  %v2165_v9 = vld [vmem:[#allocation2 + $0x78] sm:$0xf] }
 0x1bf   : > { %v5468_v40 = vadd.f32 %v5467_v43, %v5379_v26  ;;  %v3351_v2 = vrot.slane %v3349_v29, 5  ;;  %3086 = vst [vmem:[#allocation3 + $0x1a4] sm:$0xf] %v2822_v0  ;;  %v3346_v53 = vor.u32 %v3345_v20, %v3342_v10  ;;  %v3359_v26 = vshll.u32 %v3188_v5, 16  ;;  %v2164_v43 = vld [vmem:[#allocation2 + $0x74] sm:$0xf] }
 0x1c0   : > { %v2342_v38 = vshll.u32 %v2164_v43, 16  ;;  %v2352_v56 = vshrl.u32 %v2165_v9, 16  ;;  %v7167_v55 = vld [vmem:[#allocation3 + $0x158] sm:$0xf0]  ;;  %v2661_v63 = vld [vmem:[#allocation2 + $0x80] sm:$0x8] }
 0x1c1   : > { %5696 = vmatmul.bf16.gmra.mxu2 %v6391_v13  ;;  %v8607_v30 = vadd.f32 %v5556_v16, %v5468_v40  ;;  %v3356_v4 = vor.u32 %v3355_v32, %v3351_v2  ;;  %v2339_v16 = vshrl.u32 %v2164_v43, 16  ;;  %v3347_v6 = vrot.slane %v3346_v53, 4  ;;  %v2166_v29 = vld [vmem:[#allocation2 + $0x7c] sm:$0x1] }
 0x1c2   : > { %5785 = vmatmul.bf16.gmra.mxu3 %v6395_v28  ;;  %v3361_v59 = vrot.slane %v3359_v26, 5  ;;  %v2348_v40 = vshll.u32 %v2165_v9, 16  ;;  %v2344_v34 = vrot.slane %v2342_v38, 5  ;;  %v2354_v0 = vrot.slane %v2352_v56, 4  ;;  %v7163_v43 = vld [vmem:[#allocation3 + $0x13c] sm:$0xf] }
 0x1c3   : > { %v3357_v1 = vrot.slane %v3356_v4, 4  ;;  %v2341_v18 = vrot.slane %v2339_v16, 4  ;;  %v3352_v5 = vsel %vm8034_vm10, %v3347_v6, %v3351_v2  ;;  %v2358_v32 = vshll.u32 %v2166_v29, 16  ;;  %v6428_v16 = vld [vmem:[#allocation3 + $0x15c] sm:$0xf0] }
 0x1c4   : > { %v5381_v13 = vpop.f32.mrf.mxu2  ;;  %3645 = vst [vmem:[#allocation3 + $0x188] sm:$0xf] %v3352_v5  ;;  %v2350_v20 = vrot.slane %v2348_v40, 5  ;;  %v6427_v26 = vor.u32 %v7167_v55, %v8615_v11  ;;  %v2824_v4 = vshrl.u32 %v2661_v63, 16  ;;  %v5295_v9 = vadd.f32 %v8601_v58, %v8250_v25  ;;  %v3119_v11 = vld [vmem:[#allocation2 + $0x84] sm:$0xf] }
 0x1c5   : > { %v5382_v28 = vadd.f32 %v5381_v13, %v5293_v42  ;;  %v5470_v62 = vpop.f32.mrf.mxu3  ;;  %v3362_v12 = vsel %vm8034_vm10, %v3357_v1, %v3361_v59  ;;  %v2345_v10 = vor.u32 %v2344_v34, %v2341_v18  ;;  %v2662_v42 = vld [vmem:[#allocation2 + $0x84] sm:$0xf]  ;;  %v2663_v13 = vld [vmem:[#allocation2 + $0x88] sm:$0xf]  ;;  %v6431_v55 = vor.u32 %v7163_v43, %v6428_v16  ;;  %3151 = vst [vmem:[#allocation3 + $0x1cc] sm:$0xf] %v3119_v11 }
 0x1c6   : > { %v5559_v23 = vpop.f32.mrf.mxu0  ;;  %v8613_v61 = vpop.f32.mrf.mxu1  ;;  %3646 = vst [vmem:[#allocation3 + $0x1ac] sm:$0xf] %v3362_v12  ;;  %v2355_v38 = vor.u32 %v2354_v0, %v2350_v20  ;;  %v6246_v59 = vrot.slane %v2824_v4, 11  ;;  %v2832_v40 = vshll.u32 %v2662_v42, 16  ;;  %v3190_v1 = vld [vmem:[#allocation2 + $0x88] sm:$0xf] }
 0x1c7   : > { %v5471_v31 = vadd.f32 %v5470_v62, %v5382_v28  ;;  %v2346_v2 = vrot.slane %v2345_v10, 4  ;;  %v2360_v28 = vrot.slane %v2358_v32, 5  ;;  %v2841_v25 = vshll.u32 %v2663_v13, 16  ;;  %v3120_v63 = vld [vmem:[#allocation2 + $0x88] sm:$0xf] }
 0x1c8   : > { %v2356_v56 = vrot.slane %v2355_v38, 4  ;;  %v7168_v0 = vld [vmem:[#allocation3 + $0x160] sm:$0xf0]  ;;  %3152 = vst [vmem:[#allocation3 + $0x1f0] sm:$0xf] %v3120_v63 }
 0x1c9   : > { %5874 = vmatmul.bf16.gmra.mxu0 %v6399_v57  ;;  %5612 = vmatmul.bf16.gmra.mxu1 %v6423_v24  ;;  %v8621_v53 = vadd.f32 %v5559_v23, %v5471_v31  ;;  %v2829_v57 = vshrl.u32 %v2662_v42, 16  ;;  %v3189_v24 = vld [vmem:[#allocation2 + $0x84] sm:$0xf]  ;;  %v2351_v6 = vsel %vm8034_vm10, %v2346_v2, %v2350_v20  ;;  %v2838_v23 = vshrl.u32 %v2663_v13, 16  ;;  %v6434_v20 = vld [vmem:[#allocation3 + $0x140] sm:$0xf] }
 0x1ca   : > { %2622 = vst [vmem:[#allocation3 + $0x1c4] sm:$0xf] %v2351_v6  ;;  %v3364_v12 = vshrl.u32 %v3189_v24, 16  ;;  %v2361_v32 = vsel %vm8034_vm10, %v2356_v56, %v2360_v28  ;;  %v3191_v2 = vld [vmem:[#allocation2 + $0x8c] sm:$0x1] }
 0x1cb   : > { %v2831_v31 = vrot.slane %v2829_v57, 7  ;;  %v2840_v29 = vrot.slane %v2838_v23, 7  ;;  %v7171_v4 = vld [vmem:[#allocation3 + $0x17c] sm:$0xf]  ;;  %2623 = vst [vmem:[#allocation3 + $0x1e8] sm:$0xf] %v2361_v32 }
 0x1cc   : > { %v5383_v62 = vpop.f32.mrf.mxu2  ;;  %v6456_v43 = vld [vmem:[#allocation3 + $0x19c] sm:$0xf0]  ;;  %v3366_v38 = vrot.slane %v3364_v12, 4  ;;  %v3367_v57 = vshll.u32 %v3189_v24, 16  ;;  %v8634_v6 = vld [vmem:[#allocation3 + $0x184] sm:$0xf]  ;;  %v6435_v24 = vor.u32 %v7168_v0, %v6434_v20 }
 0x1cd   : > { %v5384_v18 = vadd.f32 %v5383_v62, %v5295_v9  ;;  %v5472_v34 = vpop.f32.mrf.mxu3  ;;  %v2834_v42 = vor.u32 %v2832_v40, %v2831_v31  ;;  %v2836_v13 = vrot.slane %v2831_v31, 4  ;;  %v2843_v9 = vor.u32 %v2841_v25, %v2840_v29  ;;  %v8642_v25 = vld [vmem:[#allocation3 + $0x1a4] sm:$0xf0] }
 0x1ce   : > { %v5561_v58 = vpop.f32.mrf.mxu0  ;;  %v8628_v5 = vpop.f32.mrf.mxu1  ;;  %v3373_v62 = vshll.u32 %v3190_v1, 16  ;;  %v3377_v40 = vshrl.u32 %v3190_v1, 16  ;;  %v3383_v23 = vshll.u32 %v3191_v2, 16  ;;  %v6459_v31 = vor.u32 %v7171_v4, %v6456_v43  ;;  %v2168_v29 = vld [vmem:[#allocation2 + $0x88] sm:$0xf] }
 0x1cf   : > { %v5473_v10 = vadd.f32 %v5472_v34, %v5384_v18  ;;  %v2835_v16 = vsel %vm7693_vm5, %v6246_v59, %v2834_v42  ;;  %v2844_v28 = vsel %vm7693_vm5, %v2836_v13, %v2843_v9  ;;  %v3369_v18 = vrot.slane %v3367_v57, 5  ;;  %v2167_v34 = vld [vmem:[#allocation2 + $0x84] sm:$0xf]  ;;  %v8644_v1 = vld [vmem:[#allocation3 + $0x180] sm:$0xf] }
 0x1d0   : > { %3087 = vst [vmem:[#allocation3 + $0x1c8] sm:$0xf] %v2835_v16  ;;  %v3375_v59 = vrot.slane %v3373_v62, 5  ;;  %v2363_v32 = vshrl.u32 %v2167_v34, 16  ;;  %v3385_v20 = vrot.slane %v3383_v23, 5  ;;  %v2372_v0 = vshll.u32 %v2168_v29, 16 }
 0x1d1   : > { %5701 = vmatmul.bf16.gmra.mxu2 %v6427_v26  ;;  %v8638_v11 = vadd.f32 %v5561_v58, %v5473_v10  ;;  %v5298_v26 = vadd.f32 %v8613_v61, %v8126_v14  ;;  %3088 = vst [vmem:[#allocation3 + $0x1ec] sm:$0xf] %v2844_v28  ;;  %v8646_v58 = vld [vmem:[#allocation3 + $0x1a0] sm:$0xf0]  ;;  %v3370_v10 = vor.u32 %v3369_v18, %v3366_v38  ;;  %v2366_v14 = vshll.u32 %v2167_v34, 16 }
 0x1d2   : > { %5790 = vmatmul.bf16.gmra.mxu3 %v6431_v55  ;;  %v3379_v55 = vrot.slane %v3377_v40, 4  ;;  %v2376_v4 = vshrl.u32 %v2168_v29, 16  ;;  %v6467_v9 = vor.u32 %v8634_v6, %v8642_v25  ;;  %v2169_v16 = vld [vmem:[#allocation2 + $0x8c] sm:$0x1]  ;;  %v2665_v57 = vld [vmem:[#allocation2 + $0x94] sm:$0xf]  ;;  %v6463_v62 = vor.u32 %v8646_v58, %v8644_v1 }
 0x1d3   : > { %v3371_v43 = vrot.slane %v3370_v10, 4  ;;  %v2365_v28 = vrot.slane %v2363_v32, 4  ;;  %v2368_v40 = vrot.slane %v2366_v14, 5  ;;  %v2374_v18 = vrot.slane %v2372_v0, 5  ;;  %v3192_v32 = vld [vmem:[#allocation2 + $0x94] sm:$0xf] }
 0x1d4   : > { %v5386_v56 = vpop.f32.mrf.mxu2  ;;  %v3380_v2 = vor.u32 %v3379_v55, %v3375_v59  ;;  %v2378_v34 = vrot.slane %v2376_v4, 4  ;;  %v2666_v55 = vld [vmem:[#allocation2 + $0x98] sm:$0xf]  ;;  %v2851_v1 = vshrl.u32 %v2665_v57, 16  ;;  %v5300_v58 = vadd.f32 %v8628_v5, %v8145_v7  ;;  %v8662_v5 = vld [vmem:[#allocation3 + $0x188] sm:$0xf] }
 0x1d5   : > { %v5387_v63 = vadd.f32 %v5386_v56, %v5298_v26  ;;  %v5475_v12 = vpop.f32.mrf.mxu3  ;;  %v2664_v26 = vld [vmem:[#allocation2 + $0x90] sm:$0x8]  ;;  %v3376_v23 = vsel %vm8034_vm10, %v3371_v43, %v3375_v59  ;;  %v2382_v56 = vshll.u32 %v2169_v16, 16  ;;  %v2854_v10 = vshll.u32 %v2665_v57, 16  ;;  %v3121_v43 = vld [vmem:[#allocation2 + $0x94] sm:$0xf] }
 0x1d6   : > { %v5564_v61 = vpop.f32.mrf.mxu0  ;;  %v8648_v42 = vpop.f32.mrf.mxu1  ;;  %v3381_v38 = vrot.slane %v3380_v2, 4  ;;  %3647 = vst [vmem:[#allocation3 + $0x1d0] sm:$0xf] %v3376_v23  ;;  %v2853_v0 = vrot.slane %v2851_v1, 7  ;;  %v2860_v4 = vshrl.u32 %v2666_v55, 16  ;;  %v3388_v1 = vshrl.u32 %v3192_v32, 16 }
 0x1d7   : > { %v5476_v13 = vadd.f32 %v5475_v12, %v5387_v63  ;;  %v2369_v63 = vor.u32 %v2368_v40, %v2365_v28  ;;  %v2846_v12 = vshrl.u32 %v2664_v26, 16  ;;  %v2863_v28 = vshll.u32 %v2666_v55, 16  ;;  %v3122_v40 = vld [vmem:[#allocation2 + $0x98] sm:$0xf]  ;;  %3153 = vst [vmem:[#allocation3 + $0x214] sm:$0xf] %v3121_v43 }
 0x1d8   : > { %v3386_v29 = vsel %vm8034_vm10, %v3381_v38, %v3385_v20  ;;  %v8664_v23 = vld [vmem:[#allocation3 + $0x1a8] sm:$0xf0]  ;;  %3154 = vst [vmem:[#allocation3 + $0x238] sm:$0xf] %v3122_v40  ;;  %v3391_v43 = vshll.u32 %v3192_v32, 16  ;;  %v5303_v32 = vadd.f32 %v8648_v42, %v8172_v45 }
 0x1d9   : > { %5879 = vmatmul.bf16.gmra.mxu0 %v6435_v24  ;;  %5617 = vmatmul.bf16.gmra.mxu1 %v6459_v31  ;;  %3648 = vst [vmem:[#allocation3 + $0x1f4] sm:$0xf] %v3386_v29  ;;  %v2379_v24 = vor.u32 %v2378_v34, %v2374_v18  ;;  %v2384_v31 = vrot.slane %v2382_v56, 5  ;;  %v2370_v14 = vrot.slane %v2369_v63, 4  ;;  %v6247_v2 = vrot.slane %v2846_v12, 11 }
 0x1da   : > { %v8660_v26 = vadd.f32 %v5564_v61, %v5476_v13  ;;  %v2856_v56 = vor.u32 %v2854_v10, %v2853_v0  ;;  %v2858_v29 = vrot.slane %v2853_v0, 4  ;;  %v2862_v63 = vrot.slane %v2860_v4, 7  ;;  %v3193_v12 = vld [vmem:[#allocation2 + $0x98] sm:$0xf]  ;;  %v3194_v13 = vld [vmem:[#allocation2 + $0x9c] sm:$0x1] }
 0x1db   : > { %v2380_v38 = vrot.slane %v2379_v24, 4  ;;  %v2375_v34 = vsel %vm8034_vm10, %v2370_v14, %v2374_v18  ;;  %v3397_v18 = vshll.u32 %v3193_v12, 16  ;;  %v6492_v10 = vld [vmem:[#allocation3 + $0x1e4] sm:$0xf0]  ;;  %v3390_v14 = vrot.slane %v3388_v1, 4 }
 0x1dc   : > { %v5388_v59 = vpop.f32.mrf.mxu2  ;;  %2624 = vst [vmem:[#allocation3 + $0x20c] sm:$0xf] %v2375_v34  ;;  %v2857_v24 = vsel %vm7693_vm5, %v6247_v2, %v2856_v56  ;;  %v3401_v0 = vshrl.u32 %v3193_v12, 16  ;;  %v3407_v2 = vshll.u32 %v3194_v13, 16  ;;  %v2171_v25 = vld [vmem:[#allocation2 + $0x98] sm:$0xf] }
 0x1dd   : > { %v5389_v16 = vadd.f32 %v5388_v59, %v5300_v58  ;;  %v5477_v20 = vpop.f32.mrf.mxu3  ;;  %v2385_v61 = vsel %vm8034_vm10, %v2380_v38, %v2384_v31  ;;  %v7180_v58 = vld [vmem:[#allocation3 + $0x1c4] sm:$0xf]  ;;  %v2865_v59 = vor.u32 %v2863_v28, %v2862_v63  ;;  %3089 = vst [vmem:[#allocation3 + $0x210] sm:$0xf] %v2857_v24  ;;  %v2170_v28 = vld [vmem:[#allocation2 + $0x94] sm:$0xf] }
 0x1de   : > { %v5566_v7 = vpop.f32.mrf.mxu0  ;;  %v8666_v57 = vpop.f32.mrf.mxu1  ;;  %2625 = vst [vmem:[#allocation3 + $0x230] sm:$0xf] %v2385_v61  ;;  %v3403_v38 = vrot.slane %v3401_v0, 4  ;;  %v3409_v6 = vrot.slane %v3407_v2, 5  ;;  %v2390_v12 = vshll.u32 %v2170_v28, 16 }
 0x1df   : > { %v5478_v55 = vadd.f32 %v5477_v20, %v5389_v16  ;;  %v2866_v31 = vsel %vm7693_vm5, %v2858_v29, %v2865_v59  ;;  %v3393_v16 = vrot.slane %v3391_v43, 5  ;;  %v3399_v20 = vrot.slane %v3397_v18, 5  ;;  %v2172_v24 = vld [vmem:[#allocation2 + $0x9c] sm:$0x1]  ;;  %v6498_v43 = vld [vmem:[#allocation3 + $0x1c8] sm:$0xf] }
 0x1e0   : > { %3090 = vst [vmem:[#allocation3 + $0x234] sm:$0xf] %v2866_v31  ;;  %v2392_v59 = vrot.slane %v2390_v12, 5  ;;  %v8687_v18 = vld [vmem:[#allocation3 + $0x1cc] sm:$0xf] }
 0x1e1   : > { %5706 = vmatmul.bf16.gmra.mxu2 %v6463_v62  ;;  %v8674_v4 = vadd.f32 %v5566_v7, %v5478_v55  ;;  %v6471_v62 = vor.u32 %v8664_v23, %v8662_v5  ;;  %v6495_v7 = vor.u32 %v7180_v58, %v6492_v10  ;;  %v3394_v34 = vor.u32 %v3393_v16, %v3390_v14  ;;  %v2668_v58 = vld [vmem:[#allocation2 + $0xa4] sm:$0xf]  ;;  %v8689_v10 = vld [vmem:[#allocation3 + $0x1ec] sm:$0xf0]  ;;  %v2667_v16 = vld [vmem:[#allocation2 + $0xa0] sm:$0x8] }
 0x1e2   : > { %5795 = vmatmul.bf16.gmra.mxu3 %v6467_v9  ;;  %v2387_v9 = vshrl.u32 %v2170_v28, 16  ;;  %v3404_v63 = vor.u32 %v3403_v38, %v3399_v20  ;;  %v2396_v55 = vshll.u32 %v2171_v25, 16  ;;  %v2400_v5 = vshrl.u32 %v2171_v25, 16  ;;  %v2669_v28 = vld [vmem:[#allocation2 + $0xa8] sm:$0xf] }
 0x1e3   : > { %v3395_v45 = vrot.slane %v3394_v34, 4  ;;  %v2406_v38 = vshll.u32 %v2172_v24, 16  ;;  %v7185_v34 = vld [vmem:[#allocation3 + $0x1e8] sm:$0xf0]  ;;  %v3195_v12 = vld [vmem:[#allocation2 + $0xa4] sm:$0xf] }
 0x1e4   : > { %v5391_v40 = vpop.f32.mrf.mxu2  ;;  %v2389_v42 = vrot.slane %v2387_v9, 4  ;;  %v3405_v1 = vrot.slane %v3404_v63, 4  ;;  %v2398_v0 = vrot.slane %v2396_v55, 5  ;;  %v2402_v31 = vrot.slane %v2400_v5, 4 }
 0x1e5   : > { %v5392_v56 = vadd.f32 %v5391_v40, %v5303_v32  ;;  %v5480_v29 = vpop.f32.mrf.mxu3  ;;  %v3400_v14 = vsel %vm8034_vm10, %v3395_v45, %v3399_v20  ;;  %v2868_v40 = vshrl.u32 %v2667_v16, 16  ;;  %v2873_v9 = vshrl.u32 %v2668_v58, 16  ;;  %v7186_v16 = vld [vmem:[#allocation3 + $0x1f0] sm:$0xf0] }
 0x1e6   : > { %v5569_v61 = vpop.f32.mrf.mxu0  ;;  %v8685_v13 = vpop.f32.mrf.mxu1  ;;  %v3410_v2 = vsel %vm8034_vm10, %v3405_v1, %v3409_v6  ;;  %3649 = vst [vmem:[#allocation3 + $0x218] sm:$0xf] %v3400_v14  ;;  %v2393_v32 = vor.u32 %v2392_v59, %v2389_v42  ;;  %v2403_v25 = vor.u32 %v2402_v31, %v2398_v0  ;;  %v5305_v20 = vadd.f32 %v8666_v57, %v8184_v41  ;;  %v3123_v1 = vld [vmem:[#allocation2 + $0xa4] sm:$0xf]  ;;  %v3124_v41 = vld [vmem:[#allocation2 + $0xa8] sm:$0xf] }
 0x1e7   : > { %v5481_v23 = vadd.f32 %v5480_v29, %v5392_v56  ;;  %3650 = vst [vmem:[#allocation3 + $0x23c] sm:$0xf] %v3410_v2  ;;  %v2876_v56 = vshll.u32 %v2668_v58, 16  ;;  %v6248_v63 = vrot.slane %v2868_v40, 11  ;;  %v2875_v45 = vrot.slane %v2873_v9, 7 }
 0x1e8   : > { %v2404_v55 = vrot.slane %v2403_v25, 4  ;;  %v2882_v42 = vshrl.u32 %v2669_v28, 16  ;;  %v2885_v5 = vshll.u32 %v2669_v28, 16  ;;  %v6499_v14 = vor.u32 %v7185_v34, %v6498_v43  ;;  %3155 = vst [vmem:[#allocation3 + $0x25c] sm:$0xf] %v3123_v1 }
 0x1e9   : > { %5884 = vmatmul.bf16.gmra.mxu0 %v6471_v62  ;;  %5622 = vmatmul.bf16.gmra.mxu1 %v6495_v7  ;;  %v8695_v29 = vadd.f32 %v5569_v61, %v5481_v23  ;;  %v2394_v62 = vrot.slane %v2393_v32, 4  ;;  %v2408_v7 = vrot.slane %v2406_v38, 5  ;;  %v6503_v61 = vor.u32 %v8687_v18, %v8689_v10  ;;  %v3196_v57 = vld [vmem:[#allocation2 + $0xa8] sm:$0xf]  ;;  %v6506_v31 = vld [vmem:[#allocation3 + $0x1d0] sm:$0xf] }
 0x1ea   : > { %v2878_v38 = vor.u32 %v2876_v56, %v2875_v45  ;;  %v2880_v43 = vrot.slane %v2875_v45, 4  ;;  %v2884_v28 = vrot.slane %v2882_v42, 7  ;;  %v7189_v18 = vld [vmem:[#allocation3 + $0x20c] sm:$0xf]  ;;  %v3412_v10 = vshrl.u32 %v3195_v12, 16 }
 0x1eb   : > { %v2399_v23 = vsel %vm8034_vm10, %v2394_v62, %v2398_v0  ;;  %v2409_v32 = vsel %vm8034_vm10, %v2404_v55, %v2408_v7  ;;  %v3415_v0 = vshll.u32 %v3195_v12, 16  ;;  %3156 = vst [vmem:[#allocation3 + $0x280] sm:$0xf] %v3124_v41  ;;  %v3197_v9 = vld [vmem:[#allocation2 + $0xac] sm:$0x1]  ;;  %v3425_v62 = vshrl.u32 %v3196_v57, 16 }
 0x1ec   : > { %v5393_v6 = vpop.f32.mrf.mxu2  ;;  %2626 = vst [vmem:[#allocation3 + $0x254] sm:$0xf] %v2399_v23  ;;  %v2879_v34 = vsel %vm7693_vm5, %v6248_v63, %v2878_v38  ;;  %v2887_v25 = vor.u32 %v2885_v5, %v2884_v28  ;;  %v3414_v7 = vrot.slane %v3412_v10, 4  ;;  %v5308_v63 = vadd.f32 %v8685_v13, %v8200_v39  ;;  %v8717_v39 = vld [vmem:[#allocation3 + $0x210] sm:$0xf] }
 0x1ed   : > { %v5394_v24 = vadd.f32 %v5393_v6, %v5305_v20  ;;  %v5482_v59 = vpop.f32.mrf.mxu3  ;;  %2627 = vst [vmem:[#allocation3 + $0x278] sm:$0xf] %v2409_v32  ;;  %v3421_v20 = vshll.u32 %v3196_v57, 16  ;;  %v6528_v6 = vld [vmem:[#allocation3 + $0x22c] sm:$0xf0]  ;;  %v3417_v56 = vrot.slane %v3415_v0, 5  ;;  %v6507_v5 = vor.u32 %v7186_v16, %v6506_v31 }
 0x1ee   : > { %v5571_v58 = vpop.f32.mrf.mxu0  ;;  %v8703_v2 = vpop.f32.mrf.mxu1  ;;  %3091 = vst [vmem:[#allocation3 + $0x258] sm:$0xf] %v2879_v34  ;;  %v2888_v45 = vsel %vm7693_vm5, %v2880_v43, %v2887_v25  ;;  %v3427_v42 = vrot.slane %v3425_v62, 4  ;;  %v6531_v23 = vor.u32 %v7189_v18, %v6528_v6  ;;  %v2174_v57 = vld [vmem:[#allocation2 + $0xa8] sm:$0xf] }
 0x1ef   : > { %v5483_v40 = vadd.f32 %v5482_v59, %v5394_v24  ;;  %v3423_v12 = vrot.slane %v3421_v20, 5  ;;  %3092 = vst [vmem:[#allocation3 + $0x27c] sm:$0xf] %v2888_v45  ;;  %v3418_v1 = vor.u32 %v3417_v56, %v3414_v7  ;;  %v3431_v24 = vshll.u32 %v3197_v9, 16  ;;  %v2173_v59 = vld [vmem:[#allocation2 + $0xa4] sm:$0xf] }
 0x1f0   : > { %v2414_v32 = vshll.u32 %v2173_v59, 16  ;;  %v2424_v34 = vshrl.u32 %v2174_v57, 16  ;;  %v7194_v18 = vld [vmem:[#allocation3 + $0x230] sm:$0xf0]  ;;  %v2175_v20 = vld [vmem:[#allocation2 + $0xac] sm:$0x1] }
 0x1f1   : > { %5711 = vmatmul.bf16.gmra.mxu2 %v6499_v14  ;;  %v8709_v55 = vadd.f32 %v5571_v58, %v5483_v40  ;;  %v3428_v41 = vor.u32 %v3427_v42, %v3423_v12  ;;  %v2411_v58 = vshrl.u32 %v2173_v59, 16  ;;  %v3419_v28 = vrot.slane %v3418_v1, 4  ;;  %v2670_v62 = vld [vmem:[#allocation2 + $0xb0] sm:$0x8]  ;;  %v7190_v59 = vld [vmem:[#allocation3 + $0x214] sm:$0xf] }
 0x1f2   : > { %5800 = vmatmul.bf16.gmra.mxu3 %v6503_v61  ;;  %v3433_v43 = vrot.slane %v3431_v24, 5  ;;  %v2420_v40 = vshll.u32 %v2174_v57, 16  ;;  %v2416_v16 = vrot.slane %v2414_v32, 5  ;;  %v2426_v45 = vrot.slane %v2424_v34, 4 }
 0x1f3   : > { %v3429_v13 = vrot.slane %v3428_v41, 4  ;;  %v2413_v31 = vrot.slane %v2411_v58, 4  ;;  %v3424_v9 = vsel %vm8034_vm10, %v3419_v28, %v3423_v12  ;;  %v2430_v42 = vshll.u32 %v2175_v20, 16  ;;  %v6536_v58 = vld [vmem:[#allocation3 + $0x234] sm:$0xf0] }
 0x1f4   : > { %v5396_v14 = vpop.f32.mrf.mxu2  ;;  %3651 = vst [vmem:[#allocation3 + $0x260] sm:$0xf] %v3424_v9  ;;  %v2422_v56 = vrot.slane %v2420_v40, 5  ;;  %v6535_v24 = vor.u32 %v7194_v18, %v8717_v39  ;;  %v2890_v41 = vshrl.u32 %v2670_v62, 16  ;;  %v5310_v57 = vadd.f32 %v8703_v2, %v8225_v36  ;;  %v3125_v39 = vld [vmem:[#allocation2 + $0xb4] sm:$0xf] }
 0x1f5   : > { %v5397_v61 = vadd.f32 %v5396_v14, %v5308_v63  ;;  %v5485_v38 = vpop.f32.mrf.mxu3  ;;  %v3434_v6 = vsel %vm8034_vm10, %v3429_v13, %v3433_v43  ;;  %v2417_v7 = vor.u32 %v2416_v16, %v2413_v31  ;;  %v2671_v63 = vld [vmem:[#allocation2 + $0xb4] sm:$0xf]  ;;  %v2672_v14 = vld [vmem:[#allocation2 + $0xb8] sm:$0xf]  ;;  %v6539_v18 = vor.u32 %v7190_v59, %v6536_v58  ;;  %3157 = vst [vmem:[#allocation3 + $0x2a4] sm:$0xf] %v3125_v39 }
 0x1f6   : > { %v5574_v10 = vpop.f32.mrf.mxu0  ;;  %v8715_v0 = vpop.f32.mrf.mxu1  ;;  %3652 = vst [vmem:[#allocation3 + $0x284] sm:$0xf] %v3434_v6  ;;  %v2427_v32 = vor.u32 %v2426_v45, %v2422_v56  ;;  %v6249_v43 = vrot.slane %v2890_v41, 11  ;;  %v2898_v40 = vshll.u32 %v2671_v63, 16  ;;  %v3199_v13 = vld [vmem:[#allocation2 + $0xb8] sm:$0xf] }
 0x1f7   : > { %v5486_v25 = vadd.f32 %v5485_v38, %v5397_v61  ;;  %v2418_v12 = vrot.slane %v2417_v7, 4  ;;  %v2432_v61 = vrot.slane %v2430_v42, 5  ;;  %v2907_v36 = vshll.u32 %v2672_v14, 16  ;;  %v3126_v62 = vld [vmem:[#allocation2 + $0xb8] sm:$0xf] }
 0x1f8   : > { %v2428_v34 = vrot.slane %v2427_v32, 4  ;;  %v7195_v45 = vld [vmem:[#allocation3 + $0x238] sm:$0xf0]  ;;  %3158 = vst [vmem:[#allocation3 + $0x2c8] sm:$0xf] %v3126_v62 }
 0x1f9   : > { %5889 = vmatmul.bf16.gmra.mxu0 %v6507_v5  ;;  %5627 = vmatmul.bf16.gmra.mxu1 %v6531_v23  ;;  %v8723_v1 = vadd.f32 %v5574_v10, %v5486_v25  ;;  %v2895_v5 = vshrl.u32 %v2671_v63, 16  ;;  %v3198_v23 = vld [vmem:[#allocation2 + $0xb4] sm:$0xf]  ;;  %v2423_v28 = vsel %vm8034_vm10, %v2418_v12, %v2422_v56  ;;  %v2904_v10 = vshrl.u32 %v2672_v14, 16  ;;  %v6542_v56 = vld [vmem:[#allocation3 + $0x218] sm:$0xf] }
 0x1fa   : > { %2628 = vst [vmem:[#allocation3 + $0x29c] sm:$0xf] %v2423_v28  ;;  %v3436_v6 = vshrl.u32 %v3198_v23, 16  ;;  %v2433_v42 = vsel %vm8034_vm10, %v2428_v34, %v2432_v61  ;;  %v3200_v12 = vld [vmem:[#allocation2 + $0xbc] sm:$0x1] }
 0x1fb   : > { %v2897_v25 = vrot.slane %v2895_v5, 7  ;;  %v2906_v20 = vrot.slane %v2904_v10, 7  ;;  %v7198_v41 = vld [vmem:[#allocation3 + $0x254] sm:$0xf]  ;;  %2629 = vst [vmem:[#allocation3 + $0x2c0] sm:$0xf] %v2433_v42 }
 0x1fc   : > { %v5398_v38 = vpop.f32.mrf.mxu2  ;;  %v6564_v59 = vld [vmem:[#allocation3 + $0x274] sm:$0xf0]  ;;  %v3438_v32 = vrot.slane %v3436_v6, 4  ;;  %v3439_v5 = vshll.u32 %v3198_v23, 16  ;;  %v8736_v28 = vld [vmem:[#allocation3 + $0x25c] sm:$0xf]  ;;  %v6543_v23 = vor.u32 %v7195_v45, %v6542_v56 }
 0x1fd   : > { %v5399_v31 = vadd.f32 %v5398_v38, %v5310_v57  ;;  %v5487_v16 = vpop.f32.mrf.mxu3  ;;  %v2900_v63 = vor.u32 %v2898_v40, %v2897_v25  ;;  %v2902_v14 = vrot.slane %v2897_v25, 4  ;;  %v2909_v57 = vor.u32 %v2907_v36, %v2906_v20  ;;  %v8744_v36 = vld [vmem:[#allocation3 + $0x27c] sm:$0xf0]  ;;  %v2177_v20 = vld [vmem:[#allocation2 + $0xb8] sm:$0xf] }
 0x1fe   : > { %v5576_v2 = vpop.f32.mrf.mxu0  ;;  %v8730_v9 = vpop.f32.mrf.mxu1  ;;  %v3445_v38 = vshll.u32 %v3199_v13, 16  ;;  %v3449_v40 = vshrl.u32 %v3199_v13, 16  ;;  %v3455_v10 = vshll.u32 %v3200_v12, 16  ;;  %v6567_v25 = vor.u32 %v7198_v41, %v6564_v59  ;;  %v8746_v13 = vld [vmem:[#allocation3 + $0x258] sm:$0xf] }
 0x1ff   : > { %v5488_v7 = vadd.f32 %v5487_v16, %v5399_v31  ;;  %v2901_v58 = vsel %vm7693_vm5, %v6249_v43, %v2900_v63  ;;  %v2910_v61 = vsel %vm7693_vm5, %v2902_v14, %v2909_v57  ;;  %v3441_v31 = vrot.slane %v3439_v5, 5  ;;  %v2176_v16 = vld [vmem:[#allocation2 + $0xb4] sm:$0xf]  ;;  %v2674_v5 = vld [vmem:[#allocation2 + $0xc4] sm:$0xf] }
 0x200   : > { %3093 = vst [vmem:[#allocation3 + $0x2a0] sm:$0xf] %v2901_v58  ;;  %v3447_v43 = vrot.slane %v3445_v38, 5  ;;  %v2435_v42 = vshrl.u32 %v2176_v16, 16  ;;  %v3457_v56 = vrot.slane %v3455_v10, 5  ;;  %v2444_v45 = vshll.u32 %v2177_v20, 16 }
 0x201   : > { %5716 = vmatmul.bf16.gmra.mxu2 %v6535_v24  ;;  %v8740_v39 = vadd.f32 %v5576_v2, %v5488_v7  ;;  %v5313_v24 = vadd.f32 %v8715_v0, %v8244_v15  ;;  %3094 = vst [vmem:[#allocation3 + $0x2c4] sm:$0xf] %v2910_v61  ;;  %v8748_v2 = vld [vmem:[#allocation3 + $0x278] sm:$0xf0]  ;;  %v3442_v7 = vor.u32 %v3441_v31, %v3438_v32  ;;  %v2438_v15 = vshll.u32 %v2176_v16, 16 }
 0x202   : > { %5805 = vmatmul.bf16.gmra.mxu3 %v6539_v18  ;;  %v3451_v18 = vrot.slane %v3449_v40, 4  ;;  %v2448_v41 = vshrl.u32 %v2177_v20, 16  ;;  %v2178_v58 = vld [vmem:[#allocation2 + $0xbc] sm:$0x1]  ;;  %v6571_v38 = vor.u32 %v8748_v2, %v8746_v13  ;;  %v2437_v61 = vrot.slane %v2435_v42, 4  ;;  %v9091_v2 = vld [vmem:[#allocation4_spill] sm:$0xff] }
 0x203   : > { %9090 = vst [vmem:[#allocation10_spill] sm:$0xff] %v8740_v39  ;;  %v3443_v59 = vrot.slane %v3442_v7, 4  ;;  %v2440_v40 = vrot.slane %v2438_v15, 5  ;;  %v2446_v31 = vrot.slane %v2444_v45, 5  ;;  %v2917_v13 = vshrl.u32 %v2674_v5, 16 }
 0x204   : > { %v5401_v34 = vpop.f32.mrf.mxu2  ;;  %v3452_v12 = vor.u32 %v3451_v18, %v3447_v43  ;;  %v2450_v16 = vrot.slane %v2448_v41, 4  ;;  %v2675_v18 = vld [vmem:[#allocation2 + $0xc8] sm:$0xf]  ;;  %v5315_v7 = vadd.f32 %v8730_v9, %v9091_v2  ;;  %v2920_v42 = vshll.u32 %v2674_v5, 16  ;;  %v3201_v15 = vld [vmem:[#allocation2 + $0xc4] sm:$0xf] }
 0x205   : > { %v5402_v62 = vadd.f32 %v5401_v34, %v5313_v24  ;;  %v5490_v6 = vpop.f32.mrf.mxu3  ;;  %v2673_v24 = vld [vmem:[#allocation2 + $0xc0] sm:$0x8]  ;;  %v3448_v10 = vsel %vm8034_vm10, %v3443_v59, %v3447_v43  ;;  %v2454_v34 = vshll.u32 %v2178_v58, 16  ;;  %v2919_v41 = vrot.slane %v2917_v13, 7  ;;  %v3127_v58 = vld [vmem:[#allocation2 + $0xc4] sm:$0xf] }
 0x206   : > { %v5579_v0 = vpop.f32.mrf.mxu0  ;;  %v8750_v63 = vpop.f32.mrf.mxu1  ;;  %v3453_v32 = vrot.slane %v3452_v12, 4  ;;  %3653 = vst [vmem:[#allocation3 + $0x2a8] sm:$0xf] %v3448_v10  ;;  %v2926_v59 = vshrl.u32 %v2675_v18, 16  ;;  %v8764_v10 = vld [vmem:[#allocation3 + $0x260] sm:$0xf] }
 0x207   : > { %v5491_v14 = vadd.f32 %v5490_v6, %v5402_v62  ;;  %v2441_v62 = vor.u32 %v2440_v40, %v2437_v61  ;;  %v2912_v6 = vshrl.u32 %v2673_v24, 16  ;;  %v2929_v61 = vshll.u32 %v2675_v18, 16  ;;  %v3128_v40 = vld [vmem:[#allocation2 + $0xc8] sm:$0xf]  ;;  %3159 = vst [vmem:[#allocation3 + $0x2ec] sm:$0xf] %v3127_v58 }
 0x208   : > { %v3458_v20 = vsel %vm8034_vm10, %v3453_v32, %v3457_v56  ;;  %3160 = vst [vmem:[#allocation3 + $0x310] sm:$0xf] %v3128_v40  ;;  %v3202_v13 = vld [vmem:[#allocation2 + $0xc8] sm:$0xf]  ;;  %v3460_v2 = vshrl.u32 %v3201_v15, 16  ;;  %v3463_v58 = vshll.u32 %v3201_v15, 16 }
 0x209   : > { %5894 = vmatmul.bf16.gmra.mxu0 %v6543_v23  ;;  %5632 = vmatmul.bf16.gmra.mxu1 %v6567_v25  ;;  %3654 = vst [vmem:[#allocation3 + $0x2cc] sm:$0xf] %v3458_v20  ;;  %v2451_v23 = vor.u32 %v2450_v16, %v2446_v31  ;;  %v2456_v25 = vrot.slane %v2454_v34, 5  ;;  %v2442_v12 = vrot.slane %v2441_v62, 4  ;;  %v6250_v45 = vrot.slane %v2912_v6, 11 }
 0x20a   : > { %v8762_v24 = vadd.f32 %v5579_v0, %v5491_v14  ;;  %v8766_v16 = vld [vmem:[#allocation3 + $0x280] sm:$0xf0]  ;;  %v2922_v20 = vor.u32 %v2920_v42, %v2919_v41  ;;  %v2924_v62 = vrot.slane %v2919_v41, 4  ;;  %v2928_v6 = vrot.slane %v2926_v59, 7  ;;  %v3203_v14 = vld [vmem:[#allocation2 + $0xcc] sm:$0x1] }
 0x20b   : > { %v2452_v32 = vrot.slane %v2451_v23, 4  ;;  %v2447_v34 = vsel %vm8034_vm10, %v2442_v12, %v2446_v31  ;;  %v3469_v31 = vshll.u32 %v3202_v13, 16  ;;  %v6600_v42 = vld [vmem:[#allocation3 + $0x2bc] sm:$0xf0]  ;;  %v3462_v12 = vrot.slane %v3460_v2, 4 }
 0x20c   : > { %v5403_v43 = vpop.f32.mrf.mxu2  ;;  %9092 = vst [vmem:[#allocation4_spill] sm:$0xff] %v8762_v24  ;;  %v2923_v23 = vsel %vm7693_vm5, %v6250_v45, %v2922_v20  ;;  %v3473_v41 = vshrl.u32 %v3202_v13, 16  ;;  %v3479_v45 = vshll.u32 %v3203_v14, 16  ;;  %v8789_v14 = vld [vmem:[#allocation3 + $0x2c4] sm:$0xf0] }
 0x20d   : > { %v5404_v57 = vadd.f32 %v5403_v43, %v5315_v7  ;;  %v5492_v56 = vpop.f32.mrf.mxu3  ;;  %v2457_v0 = vsel %vm8034_vm10, %v2452_v32, %v2456_v25  ;;  %2630 = vst [vmem:[#allocation3 + $0x2e4] sm:$0xf] %v2447_v34  ;;  %v7207_v7 = vld [vmem:[#allocation3 + $0x29c] sm:$0xf]  ;;  %v2931_v43 = vor.u32 %v2929_v61, %v2928_v6  ;;  %v9094_v25 = vor.u32 %v8736_v28, %v8744_v36  ;;  %v9095_v61 = vld [vmem:[#allocation5_spill] sm:$0xff] }
 0x20e   : > { %v5581_v9 = vpop.f32.mrf.mxu0  ;;  %v8768_v5 = vpop.f32.mrf.mxu1  ;;  %2631 = vst [vmem:[#allocation3 + $0x308] sm:$0xf] %v2457_v0  ;;  %v3471_v32 = vrot.slane %v3469_v31, 5  ;;  %v5594_v15 = vadd.f32 %v8750_v63, %v9095_v61  ;;  %v3475_v40 = vrot.slane %v3473_v41, 4  ;;  %v6603_v20 = vor.u32 %v7207_v7, %v6600_v42  ;;  %v2180_v36 = vld [vmem:[#allocation2 + $0xc8] sm:$0xf] }
 0x20f   : > { %v5493_v18 = vadd.f32 %v5492_v56, %v5404_v57  ;;  %3095 = vst [vmem:[#allocation3 + $0x2e8] sm:$0xf] %v2923_v23  ;;  %v2932_v59 = vsel %vm7693_vm5, %v2924_v62, %v2931_v43  ;;  %v3465_v56 = vrot.slane %v3463_v58, 5  ;;  %v3481_v28 = vrot.slane %v3479_v45, 5  ;;  %v8787_v0 = vld [vmem:[#allocation3 + $0x2a4] sm:$0xf] }
 0x210   : > { %3096 = vst [vmem:[#allocation3 + $0x30c] sm:$0xf] %v2932_v59  ;;  %v3476_v2 = vor.u32 %v3475_v40, %v3471_v32  ;;  %v2468_v23 = vshll.u32 %v2180_v36, 16  ;;  %v2472_v7 = vshrl.u32 %v2180_v36, 16  ;;  %v2677_v40 = vld [vmem:[#allocation2 + $0xd4] sm:$0xf] }
 0x211   : > { %5721 = vmatmul.bf16.gmra.mxu2 %v6571_v38  ;;  %v8776_v57 = vadd.f32 %v5581_v9, %v5493_v18  ;;  %v6579_v38 = vor.u32 %v8766_v16, %v8764_v10  ;;  %v2179_v9 = vld [vmem:[#allocation2 + $0xc4] sm:$0xf]  ;;  %v3466_v6 = vor.u32 %v3465_v56, %v3462_v12  ;;  %v8791_v16 = vld [vmem:[#allocation3 + $0x2a0] sm:$0xf] }
 0x212   : > { %5810 = vmatmul.bf16.gmra.mxu3 %v9094_v25  ;;  %v2459_v13 = vshrl.u32 %v2179_v9, 16  ;;  %v2462_v63 = vshll.u32 %v2179_v9, 16  ;;  %v7212_v12 = vld [vmem:[#allocation3 + $0x2c0] sm:$0xf0]  ;;  %v3477_v41 = vrot.slane %v3476_v2, 4  ;;  %v2470_v45 = vrot.slane %v2468_v23, 5 }
 0x213   : > { %9093 = vst [vmem:[#allocation11_spill] sm:$0xff] %v8776_v57  ;;  %v3467_v58 = vrot.slane %v3466_v6, 4  ;;  %v2181_v25 = vld [vmem:[#allocation2 + $0xcc] sm:$0x1]  ;;  %v2474_v61 = vrot.slane %v2472_v7, 4  ;;  %v6611_v9 = vor.u32 %v8787_v0, %v8789_v14  ;;  %v6607_v36 = vor.u32 %v7212_v12, %v8791_v16 }
 0x214   : > { %v5682_v34 = vpop.f32.mrf.mxu2  ;;  %v2461_v31 = vrot.slane %v2459_v13, 4  ;;  %v2464_v59 = vrot.slane %v2462_v63, 5  ;;  %v8800_v13 = vld [vmem:[#allocation3 + $0x2a8] sm:$0xf]  ;;  %v3204_v14 = vld [vmem:[#allocation2 + $0xd4] sm:$0xf] }
 0x215   : > { %v5683_v18 = vadd.f32 %v5682_v34, %v5594_v15  ;;  %v5771_v62 = vpop.f32.mrf.mxu3  ;;  %v3472_v56 = vsel %vm8034_vm10, %v3467_v58, %v3471_v32  ;;  %v2676_v15 = vld [vmem:[#allocation2 + $0xd0] sm:$0x8]  ;;  %v3482_v34 = vsel %vm8034_vm10, %v3477_v41, %v3481_v28  ;;  %v2475_v32 = vor.u32 %v2474_v61, %v2470_v45  ;;  %v3129_v12 = vld [vmem:[#allocation2 + $0xd4] sm:$0xf]  ;;  %v3205_v41 = vld [vmem:[#allocation2 + $0xd8] sm:$0xf] }
 0x216   : > { %v5860_v43 = vpop.f32.mrf.mxu0  ;;  %v5598_v10 = vpop.f32.mrf.mxu1  ;;  %3655 = vst [vmem:[#allocation3 + $0x2f0] sm:$0xf] %v3472_v56  ;;  %v2465_v6 = vor.u32 %v2464_v59, %v2461_v31  ;;  %v2934_v2 = vshrl.u32 %v2676_v15, 16  ;;  %v2939_v28 = vshrl.u32 %v2677_v40, 16  ;;  %v2942_v7 = vshll.u32 %v2677_v40, 16 }
 0x217   : > { %v5772_v42 = vadd.f32 %v5771_v62, %v5683_v18  ;;  %3656 = vst [vmem:[#allocation3 + $0x314] sm:$0xf] %v3482_v34  ;;  %v2478_v18 = vshll.u32 %v2181_v25, 16  ;;  %v2678_v62 = vld [vmem:[#allocation2 + $0xd8] sm:$0xf]  ;;  %v2476_v58 = vrot.slane %v2475_v32, 4 }
 0x218   : > { %v2466_v0 = vrot.slane %v2465_v6, 4  ;;  %v6251_v31 = vrot.slane %v2934_v2, 11  ;;  %v2948_v56 = vshrl.u32 %v2678_v62, 16  ;;  %3161 = vst [vmem:[#allocation3 + $0x334] sm:$0xf] %v3129_v12  ;;  %v2951_v34 = vshll.u32 %v2678_v62, 16 }
 0x219   : > { %5899 = vmatmul.bf16.gmra.mxu0 %v6579_v38  ;;  %5637 = vmatmul.bf16.gmra.mxu1 %v6603_v20  ;;  %v8802_v63 = vadd.f32 %v5860_v43, %v5772_v42  ;;  %v5596_v38 = vadd.f32 %v8768_v5, %v8292_v37  ;;  %v8806_v20 = vld [vmem:[#allocation3 + $0x2c8] sm:$0xf0]  ;;  %v2480_v16 = vrot.slane %v2478_v18, 5  ;;  %v2941_v42 = vrot.slane %v2939_v28, 7  ;;  %v3130_v37 = vld [vmem:[#allocation2 + $0xd8] sm:$0xf] }
 0x21a   : > { %v2471_v43 = vsel %vm8034_vm10, %v2466_v0, %v2470_v45  ;;  %v3484_v6 = vshrl.u32 %v3204_v14, 16  ;;  %v3487_v40 = vshll.u32 %v3204_v14, 16  ;;  %v6615_v18 = vor.u32 %v8806_v20, %v8800_v13  ;;  %v3206_v2 = vld [vmem:[#allocation2 + $0xdc] sm:$0x1]  ;;  %3162 = vst [vmem:[#allocation3 + $0x358] sm:$0xf] %v3130_v37 }
 0x21b   : > { %v2481_v15 = vsel %vm8034_vm10, %v2476_v58, %v2480_v16  ;;  %2632 = vst [vmem:[#allocation3 + $0x32c] sm:$0xf] %v2471_v43  ;;  %v2944_v45 = vor.u32 %v2942_v7, %v2941_v42  ;;  %v2946_v0 = vrot.slane %v2941_v42, 4  ;;  %v2950_v28 = vrot.slane %v2948_v56, 7  ;;  %v7216_v58 = vld [vmem:[#allocation3 + $0x2e4] sm:$0xf] }
 0x21c   : > { %v5684_v23 = vpop.f32.mrf.mxu2  ;;  %2633 = vst [vmem:[#allocation3 + $0x350] sm:$0xf] %v2481_v15  ;;  %v6636_v62 = vld [vmem:[#allocation3 + $0x304] sm:$0xf0]  ;;  %v3489_v16 = vrot.slane %v3487_v40, 5  ;;  %v5978_v13 = vmul.f32 %v8802_v63, %v8802_v63 }
 0x21d   : > { %v5685_v25 = vadd.f32 %v5684_v23, %v5596_v38  ;;  %v5773_v59 = vpop.f32.mrf.mxu3  ;;  %v5599_v38 = vadd.f32 %v5598_v10, %v8304_v8  ;;  %v3486_v23 = vrot.slane %v3484_v6, 4  ;;  %v2945_v14 = vsel %vm7693_vm5, %v6251_v31, %v2944_v45  ;;  %v2182_v43 = vld [vmem:[#allocation2 + $0xd4] sm:$0xf]  ;;  %v2183_v42 = vld [vmem:[#allocation2 + $0xd8] sm:$0xf] }
 0x21e   : > { %v5862_v5 = vpop.f32.mrf.mxu0  ;;  %v5600_v61 = vpop.f32.mrf.mxu1  ;;  %v2953_v8 = vor.u32 %v2951_v34, %v2950_v28  ;;  %3097 = vst [vmem:[#allocation3 + $0x330] sm:$0xf] %v2945_v14  ;;  %v3497_v10 = vshrl.u32 %v3205_v41, 16  ;;  %v6639_v37 = vor.u32 %v7216_v58, %v6636_v62  ;;  %v8830_v15 = vld [vmem:[#allocation3 + $0x308] sm:$0xf0]  ;;  %v2486_v58 = vshll.u32 %v2182_v43, 16 }
 0x21f   : > { %v5774_v32 = vadd.f32 %v5773_v59, %v5685_v25  ;;  %v3493_v25 = vshll.u32 %v3205_v41, 16  ;;  %v3490_v59 = vor.u32 %v3489_v16, %v3486_v23  ;;  %v2492_v62 = vshll.u32 %v2183_v42, 16 }
 0x220   : > { %v3499_v34 = vrot.slane %v3497_v10, 4 }
 0x221   : > { %v5863_v12 = vadd.f32 %v5862_v5, %v5774_v32  ;;  %5726 = vmatmul.bf16.gmra.mxu2 %v6607_v36  ;;  %v3503_v36 = vshll.u32 %v3206_v2, 16  ;;  %v8828_v5 = vld [vmem:[#allocation3 + $0x2e8] sm:$0xf]  ;;  %v3495_v41 = vrot.slane %v3493_v25, 5  ;;  %v3491_v45 = vrot.slane %v3490_v59, 4 }
 0x222   : > { %5815 = vmatmul.bf16.gmra.mxu3 %v6611_v9  ;;  %v2954_v9 = vsel %vm7693_vm5, %v2946_v0, %v2953_v8  ;;  %v2184_v25 = vld [vmem:[#allocation2 + $0xdc] sm:$0x1]  ;;  %v5601_v8 = vadd.f32 %v5600_v61, %v8318_v47  ;;  %v7217_v59 = vld [vmem:[#allocation3 + $0x2ec] sm:$0xf]  ;;  %v2681_v47 = vld [vmem:[#allocation2 + $0xe8] sm:$0xf]  ;;  %v9096_v39 = vor.u32 %v8830_v15, %v8828_v5 }
 0x223   : > { %v5940_v20 = vadd.f32 %v5863_v12, %v8802_v63  ;;  %v5979_v31 = vmul.f32 %v5863_v12, %v5863_v12  ;;  %v7407_v7 = vpack.c.bf16 %v5863_v12, %v8802_v63  ;;  %v2483_v63 = vshrl.u32 %v2182_v43, 16  ;;  %3098 = vst [vmem:[#allocation3 + $0x354] sm:$0xf] %v2954_v9  ;;  %v6644_v43 = vld [vmem:[#allocation3 + $0x30c] sm:$0xf0] }
 0x224   : > { %v5687_v56 = vpop.f32.mrf.mxu2  ;;  %v3500_v23 = vor.u32 %v3499_v34, %v3495_v41  ;;  %v3505_v12 = vrot.slane %v3503_v36, 5  ;;  %v3496_v16 = vsel %vm8034_vm10, %v3491_v45, %v3495_v41  ;;  %v2496_v9 = vshrl.u32 %v2183_v42, 16  ;;  %v3207_v0 = vld [vmem:[#allocation2 + $0xe4] sm:$0xf] }
 0x225   : > { %v6010_v6 = vadd.f32 %v5979_v31, %v5978_v13  ;;  %7408 = vst [vmem:[%s8824_s9] sm:$0xff] %v7407_v7   ;;  %v5688_v40 = vadd.f32 %v5687_v56, %v5599_v38  ;;  %v5776_v32 = vpop.f32.mrf.mxu3  ;;  %v2679_v38 = vld [vmem:[#allocation2 + $0xe0] sm:$0x8]  ;;  %v2680_v13 = vld [vmem:[#allocation2 + $0xe4] sm:$0xf]  ;;  %v2485_v31 = vrot.slane %v2483_v63, 4  ;;  %v2488_v7 = vrot.slane %v2486_v58, 5 }
 0x226   : > { %v5865_v2 = vpop.f32.mrf.mxu0  ;;  %v8835_v28 = vpop.f32.mrf.mxu1  ;;  %v3501_v10 = vrot.slane %v3500_v23, 4  ;;  %3657 = vst [vmem:[#allocation3 + $0x338] sm:$0xf] %v3496_v16  ;;  %v2494_v56 = vrot.slane %v2492_v62, 5  ;;  %v2502_v34 = vshll.u32 %v2184_v25, 16  ;;  %v2956_v61 = vshrl.u32 %v2679_v38, 16 }
 0x227   : > { %v5777_v14 = vadd.f32 %v5776_v32, %v5688_v40  ;;  %v8844_v40 = vld [vmem:[#allocation3 + $0x2f0] sm:$0xf]  ;;  %v2489_v32 = vor.u32 %v2488_v7, %v2485_v31  ;;  %v2961_v45 = vshrl.u32 %v2680_v13, 16  ;;  %v2964_v16 = vshll.u32 %v2680_v13, 16  ;;  %v2185_v15 = vld [vmem:[#allocation2 + $0xe4] sm:$0xf] }
 0x228   : > { %v3506_v41 = vsel %vm8034_vm10, %v3501_v10, %v3505_v12  ;;  %v2504_v42 = vrot.slane %v2502_v34, 5  ;;  %v6252_v62 = vrot.slane %v2956_v61, 11  ;;  %v3131_v12 = vld [vmem:[#allocation2 + $0xe4] sm:$0xf]  ;;  %v2970_v7 = vshrl.u32 %v2681_v47, 16 }
 0x229   : > { %5904 = vmatmul.bf16.gmra.mxu0 %v6615_v18  ;;  %v8842_v36 = vadd.f32 %v5865_v2, %v5777_v14  ;;  %5642 = vmatmul.bf16.gmra.mxu1 %v6639_v37  ;;  %v8851_v37 = vld [vmem:[#allocation3 + $0x310] sm:$0xf0]  ;;  %3658 = vst [vmem:[#allocation3 + $0x35c] sm:$0xf] %v3506_v41  ;;  %v2498_v2 = vrot.slane %v2496_v9, 4  ;;  %v2490_v58 = vrot.slane %v2489_v32, 4  ;;  %v6647_v24 = vor.u32 %v7217_v59, %v6644_v43 }
 0x22a   : > { %v2963_v14 = vrot.slane %v2961_v45, 7  ;;  %v6651_v41 = vor.u32 %v8851_v37, %v8844_v40  ;;  %v8857_v34 = vld [vmem:[#allocation3 + $0x32c] sm:$0xf]  ;;  %v6672_v32 = vld [vmem:[#allocation3 + $0x34c] sm:$0xf0]  ;;  %v2973_v43 = vshll.u32 %v2681_v47, 16 }
 0x22b   : > { %v5941_v63 = vadd.f32 %v5940_v20, %v8842_v36  ;;  %v5980_v18 = vmul.f32 %v8842_v36, %v8842_v36  ;;  %v2499_v31 = vor.u32 %v2498_v2, %v2494_v56  ;;  %v3132_v20 = vld [vmem:[#allocation2 + $0xe8] sm:$0xf]  ;;  %v2495_v13 = vsel %vm8034_vm10, %v2490_v58, %v2494_v56  ;;  %3163 = vst [vmem:[#allocation3 + $0x37c] sm:$0xf] %v3131_v12 }
 0x22c   : > { %v5689_v23 = vpop.f32.mrf.mxu2  ;;  %2634 = vst [vmem:[#allocation3 + $0x374] sm:$0xf] %v2495_v13  ;;  %v2972_v2 = vrot.slane %v2970_v7, 7  ;;  %v3508_v40 = vshrl.u32 %v3207_v0, 16  ;;  %v3511_v37 = vshll.u32 %v3207_v0, 16  ;;  %v6675_v5 = vor.u32 %v8857_v34, %v6672_v32 }
 0x22d   : > { %v6011_v25 = vadd.f32 %v6010_v6, %v5980_v18  ;;  %v5690_v10 = vadd.f32 %v5689_v23, %v5601_v8  ;;  %v5778_v38 = vpop.f32.mrf.mxu3  ;;  %v2966_v6 = vor.u32 %v2964_v16, %v2963_v14  ;;  %v3208_v8 = vld [vmem:[#allocation2 + $0xe8] sm:$0xf]  ;;  %v2500_v45 = vrot.slane %v2499_v31, 4  ;;  %3164 = vst [vmem:[#allocation3 + $0x3a0] sm:$0xf] %v3132_v20 }
 0x22e   : > { %v5867_v57 = vpop.f32.mrf.mxu0  ;;  %v8855_v9 = vpop.f32.mrf.mxu1  ;;  %v2968_v18 = vrot.slane %v2963_v14, 4  ;;  %v3517_v58 = vshll.u32 %v3208_v8, 16  ;;  %v3521_v16 = vshrl.u32 %v3208_v8, 16  ;;  %v9097_v14 = vld [vmem:[#allocation6_spill] sm:$0xff]  ;;  %v2975_v47 = vor.u32 %v2973_v43, %v2972_v2 }
 0x22f   : > { %v5779_v61 = vadd.f32 %v5778_v38, %v5690_v10  ;;  %v2967_v59 = vsel %vm7693_vm5, %v6252_v62, %v2966_v6  ;;  %v2505_v56 = vsel %vm8034_vm10, %v2500_v45, %v2504_v42  ;;  %v5604_v12 = vadd.f32 %v8835_v28, %v9097_v14  ;;  %v3209_v62 = vld [vmem:[#allocation2 + $0xec] sm:$0x1]  ;;  %v8872_v31 = vld [vmem:[#allocation3 + $0x330] sm:$0xf] }
 0x230   : > { %3099 = vst [vmem:[#allocation3 + $0x378] sm:$0xf] %v2967_v59  ;;  %v3510_v0 = vrot.slane %v3508_v40, 4  ;;  %v2976_v28 = vsel %vm7693_vm5, %v2968_v18, %v2975_v47  ;;  %v3519_v7 = vrot.slane %v3517_v58, 5  ;;  %v3523_v20 = vrot.slane %v3521_v16, 4 }
 0x231   : > { %v5868_v23 = vadd.f32 %v5867_v57, %v5779_v61  ;;  %5731 = vmatmul.bf16.gmra.mxu2 %v9096_v39  ;;  %2635 = vst [vmem:[#allocation3 + $0x398] sm:$0xf] %v2505_v56  ;;  %v3513_v57 = vrot.slane %v3511_v37, 5  ;;  %v3527_v61 = vshll.u32 %v3209_v62, 16  ;;  %v2186_v59 = vld [vmem:[#allocation2 + $0xe8] sm:$0xf] }
 0x232   : > { %5820 = vmatmul.bf16.gmra.mxu3 %v6647_v24  ;;  %3100 = vst [vmem:[#allocation3 + $0x39c] sm:$0xf] %v2976_v28  ;;  %v3524_v2 = vor.u32 %v3523_v20, %v3519_v7  ;;  %v2510_v43 = vshll.u32 %v2185_v15, 16  ;;  %v2187_v37 = vld [vmem:[#allocation2 + $0xec] sm:$0x1]  ;;  %v2516_v47 = vshll.u32 %v2186_v59, 16 }
 0x233   : > { %v5942_v10 = vadd.f32 %v5941_v63, %v5868_v23  ;;  %v5981_v38 = vmul.f32 %v5868_v23, %v5868_v23  ;;  %v7412_v39 = vpack.c.bf16 %v5868_v23, %v8842_v36  ;;  %v3514_v24 = vor.u32 %v3513_v57, %v3510_v0  ;;  %v8877_v63 = vld [vmem:[#allocation3 + $0x350] sm:$0xf0]  ;;  %v2682_v0 = vld [vmem:[#allocation2 + $0xf0] sm:$0x8]  ;;  %v9098_v57 = vld [vmem:[#allocation7_spill] sm:$0xff] }
 0x234   : > { %v5692_v42 = vpop.f32.mrf.mxu2  ;;  %v2507_v36 = vshrl.u32 %v2185_v15, 16  ;;  %v3529_v18 = vrot.slane %v3527_v61, 5  ;;  %v3525_v56 = vrot.slane %v3524_v2, 4  ;;  %v2512_v58 = vrot.slane %v2510_v43, 5  ;;  %v2683_v28 = vld [vmem:[#allocation2 + $0xf4] sm:$0xf] }
 0x235   : > { %v6012_v13 = vadd.f32 %v6011_v25, %v5981_v38  ;;  %7499 = vst [vmem:[%s8824_s9 + $0x8] sm:$0xff] %v7412_v39   ;;  %v5693_v6 = vadd.f32 %v5692_v42, %v5604_v12  ;;  %v5781_v8 = vpop.f32.mrf.mxu3  ;;  %v3515_v32 = vrot.slane %v3514_v24, 4  ;;  %v6679_v14 = vor.u32 %v8877_v63, %v8872_v31  ;;  %v7226_v12 = vld [vmem:[#allocation3 + $0x334] sm:$0xf]  ;;  %v6680_v39 = vld [vmem:[#allocation3 + $0x354] sm:$0xf0] }
 0x236   : > { %v5870_v45 = vpop.f32.mrf.mxu0  ;;  %v5608_v34 = vpop.f32.mrf.mxu1  ;;  %v2509_v23 = vrot.slane %v2507_v36, 4  ;;  %v2520_v62 = vshrl.u32 %v2186_v59, 16  ;;  %v5606_v38 = vadd.f32 %v8855_v9, %v9098_v57  ;;  %v3530_v15 = vsel %vm8034_vm10, %v3525_v56, %v3529_v18  ;;  %v8892_v24 = vld [vmem:[#allocation3 + $0x338] sm:$0xf]  ;;  %v8894_v43 = vld [vmem:[#allocation3 + $0x358] sm:$0xf0] }
 0x237   : > { %v5782_v40 = vadd.f32 %v5781_v8, %v5693_v6  ;;  %v3520_v25 = vsel %vm8034_vm10, %v3515_v32, %v3519_v7  ;;  %3660 = vst [vmem:[#allocation3 + $0x3a4] sm:$0xf] %v3530_v15  ;;  %v2518_v7 = vrot.slane %v2516_v47, 5  ;;  %v2684_v6 = vld [vmem:[#allocation2 + $0xf8] sm:$0xf]  ;;  %v2978_v61 = vshrl.u32 %v2682_v0, 16 }
 0x238   : > { %3659 = vst [vmem:[#allocation3 + $0x380] sm:$0xf] %v3520_v25  ;;  %v2513_v42 = vor.u32 %v2512_v58, %v2509_v23  ;;  %v2522_v20 = vrot.slane %v2520_v62, 4  ;;  %v2983_v36 = vshrl.u32 %v2683_v28, 16  ;;  %v3134_v18 = vld [vmem:[#allocation2 + $0xf8] sm:$0xf]  ;;  %v6683_v23 = vor.u32 %v7226_v12, %v6680_v39 }
 0x239   : > { %5909 = vmatmul.bf16.gmra.mxu0 %v6651_v41  ;;  %v8881_v16 = vadd.f32 %v5870_v45, %v5782_v40  ;;  %5647 = vmatmul.bf16.gmra.mxu1 %v6675_v5  ;;  %v2526_v41 = vshll.u32 %v2187_v37, 16  ;;  %v3133_v45 = vld [vmem:[#allocation2 + $0xf4] sm:$0xf]  ;;  %v2986_v40 = vshll.u32 %v2683_v28, 16  ;;  %v6253_v47 = vrot.slane %v2978_v61, 11 }
 0x23a   : > { %v2514_v9 = vrot.slane %v2513_v42, 4  ;;  %v8898_v56 = vld [vmem:[#allocation3 + $0x374] sm:$0xf]  ;;  %v2985_v62 = vrot.slane %v2983_v36, 7  ;;  %3165 = vst [vmem:[#allocation3 + $0x3c4] sm:$0xf] %v3133_v45  ;;  %v5609_v42 = vadd.f32 %v5608_v34, %v8373_v50  ;;  %v6687_v12 = vor.u32 %v8894_v43, %v8892_v24 }
 0x23b   : > { %v5943_v5 = vadd.f32 %v5942_v10, %v8881_v16  ;;  %v5982_v31 = vmul.f32 %v8881_v16, %v8881_v16  ;;  %v2528_v63 = vrot.slane %v2526_v41, 5  ;;  %v2523_v10 = vor.u32 %v2522_v20, %v2518_v7  ;;  %v3211_v15 = vld [vmem:[#allocation2 + $0xf8] sm:$0xf]  ;;  %3166 = vst [vmem:[#allocation3 + $0x3e8] sm:$0xf] %v3134_v18 }
 0x23c   : > { %v5694_v8 = vpop.f32.mrf.mxu2  ;;  %v2519_v58 = vsel %vm8034_vm10, %v2514_v9, %v2518_v7  ;;  %v6708_v39 = vld [vmem:[#allocation3 + $0x394] sm:$0xf0]  ;;  %v2988_v41 = vor.u32 %v2986_v40, %v2985_v62  ;;  %v2995_v28 = vshll.u32 %v2684_v6, 16  ;;  %v8907_v61 = vld [vmem:[#allocation3 + $0x37c] sm:$0xf]  ;;  %v2990_v34 = vrot.slane %v2985_v62, 4 }
 0x23d   : > { %v6013_v32 = vadd.f32 %v6012_v13, %v5982_v31  ;;  %v5695_v2 = vadd.f32 %v5694_v8, %v5606_v38  ;;  %v5783_v59 = vpop.f32.mrf.mxu3  ;;  %v3210_v13 = vld [vmem:[#allocation2 + $0xf4] sm:$0xf]  ;;  %v2524_v57 = vrot.slane %v2523_v10, 4  ;;  %2636 = vst [vmem:[#allocation3 + $0x3bc] sm:$0xf] %v2519_v58  ;;  %v2992_v38 = vshrl.u32 %v2684_v6, 16 }
 0x23e   : > { %v5872_v37 = vpop.f32.mrf.mxu0  ;;  %v8896_v25 = vpop.f32.mrf.mxu1  ;;  %v3212_v8 = vld [vmem:[#allocation2 + $0xfc] sm:$0x1]  ;;  %v3532_v9 = vshrl.u32 %v3210_v13, 16  ;;  %v8909_v36 = vld [vmem:[#allocation3 + $0x39c] sm:$0xf0]  ;;  %v2989_v50 = vsel %vm7693_vm5, %v6253_v47, %v2988_v41  ;;  %v3535_v24 = vshll.u32 %v3210_v13, 16 }
 0x23f   : > { %v5784_v0 = vadd.f32 %v5783_v59, %v5695_v2  ;;  %v2529_v7 = vsel %vm8034_vm10, %v2524_v57, %v2528_v63  ;;  %v2994_v20 = vrot.slane %v2992_v38, 7  ;;  %v3541_v6 = vshll.u32 %v3211_v15, 16  ;;  %v8915_v59 = vld [vmem:[#allocation3 + $0x378] sm:$0xf]  ;;  %3101 = vst [vmem:[#allocation3 + $0x3c0] sm:$0xf] %v2989_v50 }
 0x240   : > { %2637 = vst [vmem:[#allocation3 + $0x3e0] sm:$0xf] %v2529_v7  ;;  %v6711_v2 = vor.u32 %v8898_v56, %v6708_v39  ;;  %v2188_v43 = vld [vmem:[#allocation2 + $0xf4] sm:$0xf]  ;;  %v8917_v40 = vld [vmem:[#allocation3 + $0x398] sm:$0xf0] }
 0x241   : > { %v5873_v31 = vadd.f32 %v5872_v37, %v5784_v0  ;;  %5736 = vmatmul.bf16.gmra.mxu2 %v6679_v14  ;;  %v2997_v18 = vor.u32 %v2995_v28, %v2994_v20  ;;  %v3534_v37 = vrot.slane %v3532_v9, 4  ;;  %v3543_v58 = vrot.slane %v3541_v6, 5  ;;  %v2189_v39 = vld [vmem:[#allocation2 + $0xf8] sm:$0xf]  ;;  %v2190_v9 = vld [vmem:[#allocation2 + $0xfc] sm:$0x1] }
 0x242   : > { %5825 = vmatmul.bf16.gmra.mxu3 %v6683_v23  ;;  %v3537_v23 = vrot.slane %v3535_v24, 5  ;;  %v3545_v13 = vshrl.u32 %v3211_v15, 16  ;;  %v3551_v0 = vshll.u32 %v3212_v8, 16  ;;  %v2531_v41 = vshrl.u32 %v2188_v43, 16  ;;  %v8930_v6 = vld [vmem:[#allocation3 + $0x3a0] sm:$0xf0] }
 0x243   : > { %v5944_v14 = vadd.f32 %v5943_v5, %v5873_v31  ;;  %v5983_v45 = vmul.f32 %v5873_v31, %v5873_v31  ;;  %v7417_v63 = vpack.c.bf16 %v5873_v31, %v8881_v16  ;;  %v2998_v56 = vsel %vm7693_vm5, %v2990_v34, %v2997_v18 }
 0x244   : > { %v5697_v10 = vpop.f32.mrf.mxu2  ;;  %v3538_v38 = vor.u32 %v3537_v23, %v3534_v37  ;;  %v2534_v31 = vshll.u32 %v2188_v43, 16  ;;  %v6715_v28 = vor.u32 %v8917_v40, %v8915_v59  ;;  %3102 = vst [vmem:[#allocation3 + $0x3e4] sm:$0xf] %v2998_v56  ;;  %v3547_v15 = vrot.slane %v3545_v13, 4  ;;  %v554_v56 = vld [vmem:[#allocation2 + $0x10c] sm:$0x1] }
 0x245   : > { %v6014_v47 = vadd.f32 %v6013_v32, %v5983_v45  ;;  %7500 = vst [vmem:[%s8824_s9 + $0x10] sm:$0xff] %v7417_v63   ;;  %v5698_v62 = vadd.f32 %v5697_v10, %v5609_v42  ;;  %v5786_v5 = vpop.f32.mrf.mxu3  ;;  %v6719_v32 = vor.u32 %v8907_v61, %v8909_v36  ;;  %v8926_v42 = vld [vmem:[#allocation3 + $0x380] sm:$0xf]  ;;  %v3553_v8 = vrot.slane %v3551_v0, 5  ;;  %v8961_v61 = vld [vmem:[#allocation3 + $0x3c4] sm:$0xf] }
 0x246   : > { %v5875_v16 = vpop.f32.mrf.mxu0  ;;  %v5613_v57 = vpop.f32.mrf.mxu1  ;;  %v3539_v20 = vrot.slane %v3538_v38, 4  ;;  %v2533_v50 = vrot.slane %v2531_v41, 4  ;;  %v2536_v34 = vrot.slane %v2534_v31, 5  ;;  %v3548_v45 = vor.u32 %v3547_v15, %v3543_v58  ;;  %v2685_v10 = vld [vmem:[#allocation2 + $0x100] sm:$0x8] }
 0x247   : > { %v5787_v7 = vadd.f32 %v5786_v5, %v5698_v62  ;;  %v2540_v63 = vshll.u32 %v2189_v39, 16  ;;  %v2544_v43 = vshrl.u32 %v2189_v39, 16  ;;  %v5611_v18 = vadd.f32 %v8896_v25, %v8382_v51  ;;  %v2686_v5 = vld [vmem:[#allocation2 + $0x104] sm:$0xf] }
 0x248   : > { %v3544_v37 = vsel %vm8034_vm10, %v3539_v20, %v3543_v58  ;;  %v2537_v23 = vor.u32 %v2536_v34, %v2533_v50  ;;  %v2550_v62 = vshll.u32 %v2190_v9, 16  ;;  %v3549_v13 = vrot.slane %v3548_v45, 4  ;;  %v3135_v41 = vld [vmem:[#allocation2 + $0x104] sm:$0xf]  ;;  %v3136_v9 = vld [vmem:[#allocation2 + $0x108] sm:$0xf] }
 0x249   : > { %5914 = vmatmul.bf16.gmra.mxu0 %v6687_v12  ;;  %v8928_v24 = vadd.f32 %v5875_v16, %v5787_v7  ;;  %5652 = vmatmul.bf16.gmra.mxu1 %v6711_v2  ;;  %3661 = vst [vmem:[#allocation3 + $0x3c8] sm:$0xf] %v3544_v37  ;;  %v2542_v0 = vrot.slane %v2540_v63, 5  ;;  %v2687_v16 = vld [vmem:[#allocation2 + $0x108] sm:$0xf]  ;;  %v2546_v39 = vrot.slane %v2544_v43, 4 }
 0x24a   : > { %v2538_v25 = vrot.slane %v2537_v23, 4  ;;  %v3000_v58 = vshrl.u32 %v2685_v10, 16  ;;  %v3005_v20 = vshrl.u32 %v2686_v5, 16  ;;  %3167 = vst [vmem:[#allocation3 + $0x40c] sm:$0xf] %v3135_v41  ;;  %v2552_v43 = vrot.slane %v2550_v62, 5 }
 0x24b   : > { %v5945_v12 = vadd.f32 %v5944_v14, %v8928_v24  ;;  %v5984_v2 = vmul.f32 %v8928_v24, %v8928_v24  ;;  %v3554_v14 = vsel %vm8034_vm10, %v3549_v13, %v3553_v8  ;;  %v2547_v63 = vor.u32 %v2546_v39, %v2542_v0  ;;  %v3213_v37 = vld [vmem:[#allocation2 + $0x104] sm:$0xf]  ;;  %v7243_v23 = vld [vmem:[#allocation3 + $0x3bc] sm:$0xf]  ;;  %v3214_v13 = vld [vmem:[#allocation2 + $0x108] sm:$0xf] }
 0x24c   : > { %v5699_v38 = vpop.f32.mrf.mxu2  ;;  %3662 = vst [vmem:[#allocation3 + $0x3ec] sm:$0xf] %v3554_v14  ;;  %v2543_v45 = vsel %vm8034_vm10, %v2538_v25, %v2542_v0  ;;  %v3008_v10 = vshll.u32 %v2686_v5, 16  ;;  %v6254_v8 = vrot.slane %v3000_v58, 11  ;;  %v3014_v41 = vshrl.u32 %v2687_v16, 16 }
 0x24d   : > { %v6015_v31 = vadd.f32 %v6014_v47, %v5984_v2  ;;  %v5700_v7 = vadd.f32 %v5699_v38, %v5611_v18  ;;  %v5788_v15 = vpop.f32.mrf.mxu3  ;;  %v5614_v18 = vadd.f32 %v5613_v57, %v8401_v22  ;;  %2638 = vst [vmem:[#allocation3 + $0x404] sm:$0xf] %v2543_v45  ;;  %v3007_v2 = vrot.slane %v3005_v20, 7  ;;  %v6744_v62 = vld [vmem:[#allocation3 + $0x3dc] sm:$0xf0] }
 0x24e   : > { %v5877_v50 = vpop.f32.mrf.mxu0  ;;  %v8943_v34 = vpop.f32.mrf.mxu1  ;;  %v2548_v38 = vrot.slane %v2547_v63, 4  ;;  %v3017_v51 = vshll.u32 %v2687_v16, 16  ;;  %3168 = vst [vmem:[#allocation3 + $0x430] sm:$0xf] %v3136_v9  ;;  %v555_v14 = vsel %vm7996_vm7, 0, %v554_v56  ;;  %v3556_v57 = vshrl.u32 %v3213_v37, 16 }
 0x24f   : > { %v5789_v47 = vadd.f32 %v5788_v15, %v5700_v7  ;;  %v3010_v5 = vor.u32 %v3008_v10, %v3007_v2  ;;  %v3012_v22 = vrot.slane %v3007_v2, 4  ;;  %556 = vst [vmem:[#allocation2 + $0x10c] sm:$0x1] %v555_v14  ;;  %v3016_v16 = vrot.slane %v3014_v41, 7  ;;  %v8964_v63 = vld [vmem:[#allocation3 + $0x3e4] sm:$0xf0] }
 0x250   : > { %v2553_v0 = vsel %vm8034_vm10, %v2548_v38, %v2552_v43  ;;  %v3559_v39 = vshll.u32 %v3213_v37, 16  ;;  %v3565_v56 = vshll.u32 %v3214_v13, 16  ;;  %v6747_v20 = vor.u32 %v7243_v23, %v6744_v62  ;;  %v8970_v23 = vld [vmem:[#allocation3 + $0x3e0] sm:$0xf0]  ;;  %v2192_v38 = vld [vmem:[#allocation2 + $0x108] sm:$0xf] }
 0x251   : > { %v5878_v25 = vadd.f32 %v5877_v50, %v5789_v47  ;;  %5741 = vmatmul.bf16.gmra.mxu2 %v6715_v28  ;;  %2639 = vst [vmem:[#allocation3 + $0x428] sm:$0xf] %v2553_v0  ;;  %v3011_v40 = vsel %vm7693_vm5, %v6254_v8, %v3010_v5  ;;  %v2191_v28 = vld [vmem:[#allocation2 + $0x104] sm:$0xf]  ;;  %v3019_v36 = vor.u32 %v3017_v51, %v3016_v16  ;;  %v3569_v43 = vshrl.u32 %v3214_v13, 16 }
 0x252   : > { %5830 = vmatmul.bf16.gmra.mxu3 %v6719_v32  ;;  %3103 = vst [vmem:[#allocation3 + $0x408] sm:$0xf] %v3011_v40  ;;  %v3558_v32 = vrot.slane %v3556_v57, 4  ;;  %v3561_v9 = vrot.slane %v3559_v39, 5  ;;  %v8968_v47 = vld [vmem:[#allocation3 + $0x3c0] sm:$0xf]  ;;  %v5616_v13 = vadd.f32 %v8943_v34, %v8414_v48  ;;  %v6755_v14 = vor.u32 %v8961_v61, %v8964_v63 }
 0x253   : > { %v5946_v58 = vadd.f32 %v5945_v12, %v5878_v25  ;;  %v5985_v7 = vmul.f32 %v5878_v25, %v5878_v25  ;;  %v7422_v59 = vpack.c.bf16 %v5878_v25, %v8928_v24  ;;  %v3567_v24 = vrot.slane %v3565_v56, 5  ;;  %v8985_v48 = vld [vmem:[#allocation3 + $0x3e8] sm:$0xf0] }
 0x254   : > { %v5702_v15 = vpop.f32.mrf.mxu2  ;;  %v3020_v51 = vsel %vm7693_vm5, %v3012_v22, %v3019_v36  ;;  %v3562_v8 = vor.u32 %v3561_v9, %v3558_v32  ;;  %v2555_v2 = vshrl.u32 %v2191_v28, 16  ;;  %v2558_v41 = vshll.u32 %v2191_v28, 16  ;;  %v8989_v36 = vld [vmem:[#allocation2 + $0x114] sm:$0xf]  ;;  %v2690_v9 = vld [vmem:[#allocation2 + $0x118] sm:$0xf] }
 0x255   : > { %v6016_v50 = vadd.f32 %v6015_v31, %v5985_v7  ;;  %7501 = vst [vmem:[%s8824_s9 + $0x18] sm:$0xff] %v7422_v59   ;;  %v5703_v45 = vadd.f32 %v5702_v15, %v5614_v18  ;;  %v5791_v12 = vpop.f32.mrf.mxu3  ;;  %v3571_v18 = vrot.slane %v3569_v43, 4  ;;  %v9099_v22 = vor.u32 %v8930_v6, %v8926_v42  ;;  %v452_v7 = vld [vmem:[#allocation2 + $0x110] sm:$0x8]  ;;  %v8983_v59 = vld [vmem:[#allocation3 + $0x3c8] sm:$0xf] }
 0x256   : > { %v5880_v10 = vpop.f32.mrf.mxu0  ;;  %v8966_v37 = vpop.f32.mrf.mxu1  ;;  %3104 = vst [vmem:[#allocation3 + $0x42c] sm:$0xf] %v3020_v51  ;;  %v3215_v25 = vld [vmem:[#allocation2 + $0x10c] sm:$0x1]  ;;  %v3563_v62 = vrot.slane %v3562_v8, 4  ;;  %v2557_v57 = vrot.slane %v2555_v2, 4 }
 0x257   : > { %v5792_v31 = vadd.f32 %v5791_v12, %v5703_v45  ;;  %v2193_v5 = vld [vmem:[#allocation2 + $0x10c] sm:$0x1]  ;;  %v3572_v16 = vor.u32 %v3571_v18, %v3567_v24  ;;  %v3575_v39 = vshll.u32 %v3215_v25, 16  ;;  %v2560_v56 = vrot.slane %v2558_v41, 5  ;;  %v3137_v51 = vld [vmem:[#allocation2 + $0x114] sm:$0xf] }
 0x258   : > { %v3568_v34 = vsel %vm8034_vm10, %v3563_v62, %v3567_v24  ;;  %v2564_v40 = vshll.u32 %v2192_v38, 16  ;;  %v2568_v28 = vshrl.u32 %v2192_v38, 16  ;;  %v2574_v15 = vshll.u32 %v2193_v5, 16  ;;  %v457_v8 = vld [vmem:[#allocation2 + $0x11c] sm:$0x1] }
 0x259   : > { %5919 = vmatmul.bf16.gmra.mxu0 %v9099_v22  ;;  %v8981_v0 = vadd.f32 %v5880_v10, %v5792_v31  ;;  %5657 = vmatmul.bf16.gmra.mxu1 %v6747_v20  ;;  %v6751_v20 = vor.u32 %v8970_v23, %v8968_v47  ;;  %v3573_v32 = vrot.slane %v3572_v16, 4  ;;  %3663 = vst [vmem:[#allocation3 + $0x410] sm:$0xf] %v3568_v34  ;;  %v3577_v12 = vrot.slane %v3575_v39, 5  ;;  %v3138_v47 = vld [vmem:[#allocation2 + $0x118] sm:$0xf] }
 0x25a   : > { %v2561_v43 = vor.u32 %v2560_v56, %v2557_v57  ;;  %v2566_v24 = vrot.slane %v2564_v40, 5  ;;  %v2570_v10 = vrot.slane %v2568_v28, 4  ;;  %v2576_v38 = vrot.slane %v2574_v15, 5  ;;  %3169 = vst [vmem:[#allocation3 + $0x454] sm:$0xf] %v3137_v51 }
 0x25b   : > { %v5947_v42 = vadd.f32 %v5946_v58, %v8981_v0  ;;  %v5986_v6 = vmul.f32 %v8981_v0, %v8981_v0  ;;  %v8996_v58 = vld [vmem:[#allocation3 + $0x404] sm:$0xf]  ;;  %v453_v41 = vsel %vm7614_vm2, 0, %v452_v7  ;;  %v6780_v62 = vld [vmem:[#allocation3 + $0x424] sm:$0xf0]  ;;  %v3578_v5 = vsel %vm8034_vm10, %v3573_v32, %v3577_v12 }
 0x25c   : > { %v5704_v45 = vpop.f32.mrf.mxu2  ;;  %v2562_v57 = vrot.slane %v2561_v43, 4  ;;  %v2571_v22 = vor.u32 %v2570_v10, %v2566_v24  ;;  %454 = vst [vmem:[#allocation2 + $0x110] sm:$0x8] %v453_v41  ;;  %v6759_v16 = vor.u32 %v8985_v48, %v8983_v59  ;;  %v3030_v3 = vshll.u32 %v8989_v36, 16  ;;  %v3216_v39 = vld [vmem:[#allocation2 + $0x114] sm:$0xf] }
 0x25d   : > { %v6017_v2 = vadd.f32 %v6016_v50, %v5986_v6  ;;  %v5705_v31 = vadd.f32 %v5704_v45, %v5616_v13  ;;  %v5793_v18 = vpop.f32.mrf.mxu3  ;;  %v3027_v50 = vshrl.u32 %v8989_v36, 16  ;;  %3664 = vst [vmem:[#allocation3 + $0x434] sm:$0xf] %v3578_v5  ;;  %v3036_v40 = vshrl.u32 %v2690_v9, 16  ;;  %v3217_v48 = vld [vmem:[#allocation2 + $0x118] sm:$0xf] }
 0x25e   : > { %v5882_v23 = vpop.f32.mrf.mxu0  ;;  %v9000_v25 = vpop.f32.mrf.mxu1  ;;  %v2567_v56 = vsel %vm8034_vm10, %v2562_v57, %v2566_v24  ;;  %v2572_v7 = vrot.slane %v2571_v22, 4  ;;  %3170 = vst [vmem:[#allocation3 + $0x478] sm:$0xf] %v3138_v47  ;;  %v5619_v15 = vadd.f32 %v8966_v37, %v8424_v54  ;;  %v3039_v6 = vshll.u32 %v2690_v9, 16  ;;  %v7253_v22 = vld [vmem:[#allocation3 + $0x40c] sm:$0xf] }
 0x25f   : > { %v5794_v13 = vadd.f32 %v5793_v18, %v5705_v31  ;;  %v3029_v34 = vrot.slane %v3027_v50, 7  ;;  %2640 = vst [vmem:[#allocation3 + $0x44c] sm:$0xf] %v2567_v56  ;;  %v458_v59 = vsel %vm7996_vm7, 0, %v457_v8  ;;  %v6783_v36 = vor.u32 %v8996_v58, %v6780_v62 }
 0x260   : > { %v2577_v32 = vsel %vm8034_vm10, %v2572_v7, %v2576_v38  ;;  %v3038_v12 = vrot.slane %v3036_v40, 7  ;;  %459 = vst [vmem:[#allocation2 + $0x11c] sm:$0x1] %v458_v59  ;;  %v3580_v21 = vshrl.u32 %v3216_v39, 16  ;;  %v3583_v24 = vshll.u32 %v3216_v39, 16 }
 0x261   : > { %v5883_v28 = vadd.f32 %v5882_v23, %v5794_v13  ;;  %5746 = vmatmul.bf16.gmra.mxu2 %v6751_v20  ;;  %v3034_v45 = vrot.slane %v3029_v34, 4  ;;  %2641 = vst [vmem:[#allocation3 + $0x470] sm:$0xf] %v2577_v32  ;;  %v3589_v61 = vshll.u32 %v3217_v48, 16  ;;  %v3593_v63 = vshrl.u32 %v3217_v48, 16 }
 0x262   : > { %5835 = vmatmul.bf16.gmra.mxu3 %v6755_v14  ;;  %v3041_v43 = vor.u32 %v3039_v6, %v3038_v12  ;;  %v3032_v31 = vor.u32 %v3030_v3, %v3029_v34  ;;  %v3582_v18 = vrot.slane %v3580_v21, 4  ;;  %v3585_v41 = vrot.slane %v3583_v24, 5  ;;  %v6786_v3 = vld [vmem:[#allocation3 + $0x408] sm:$0xf]  ;;  %v7257_v39 = vld [vmem:[#allocation3 + $0x428] sm:$0xf0] }
 0x263   : > { %v5948_v54 = vadd.f32 %v5947_v42, %v5883_v28  ;;  %v5987_v37 = vmul.f32 %v5883_v28, %v5883_v28  ;;  %v7427_v20 = vpack.c.bf16 %v5883_v28, %v8981_v0  ;;  %v2688_v8 = vld [vmem:[#allocation2 + $0x110] sm:$0x8]  ;;  %v3591_v47 = vrot.slane %v3589_v61, 5 }
 0x264   : > { %v5707_v9 = vpop.f32.mrf.mxu2  ;;  %v3022_v42 = vshrl.u32 %v2688_v8, 16  ;;  %v3042_v0 = vsel %vm7693_vm5, %v3034_v45, %v3041_v43  ;;  %v3595_v62 = vrot.slane %v3593_v63, 4  ;;  %v3586_v57 = vor.u32 %v3585_v41, %v3582_v18  ;;  %v6788_v59 = vld [vmem:[#allocation3 + $0x42c] sm:$0xf0]  ;;  %v7258_v61 = vld [vmem:[#allocation3 + $0x430] sm:$0xf0] }
 0x265   : > { %v6018_v14 = vadd.f32 %v6017_v2, %v5987_v37  ;;  %7502 = vst [vmem:[%s8824_s9 + $0x20] sm:$0xff] %v7427_v20   ;;  %v5708_v10 = vadd.f32 %v5707_v9, %v5619_v15  ;;  %v5796_v51 = vpop.f32.mrf.mxu3  ;;  %v9100_v15 = vld [vmem:[#allocation8_spill] sm:$0xff]  ;;  %v6787_v33 = vor.u32 %v7257_v39, %v6786_v3  ;;  %v6791_v21 = vor.u32 %v7253_v22, %v6788_v59  ;;  %v6794_v24 = vld [vmem:[#allocation3 + $0x410] sm:$0xf] }
 0x266   : > { %v5885_v58 = vpop.f32.mrf.mxu0  ;;  %v5623_v38 = vpop.f32.mrf.mxu1  ;;  %3106 = vst [vmem:[#allocation3 + $0x474] sm:$0xf] %v3042_v0  ;;  %v6255_v5 = vrot.slane %v3022_v42, 11  ;;  %v3596_v13 = vor.u32 %v3595_v62, %v3591_v47  ;;  %v3587_v7 = vrot.slane %v3586_v57, 4  ;;  %v5621_v6 = vadd.f32 %v9000_v25, %v9100_v15  ;;  %v7261_v63 = vld [vmem:[#allocation3 + $0x44c] sm:$0xf] }
 0x267   : > { %v5797_v23 = vadd.f32 %v5796_v51, %v5708_v10  ;;  %v3218_v50 = vld [vmem:[#allocation2 + $0x11c] sm:$0x1]  ;;  %v6795_v27 = vor.u32 %v7258_v61, %v6794_v24 }
 0x268   : > { %v3033_v56 = vsel %vm7693_vm5, %v6255_v5, %v3032_v31  ;;  %v3599_v34 = vshll.u32 %v3218_v50, 16  ;;  %v5624_v31 = vadd.f32 %v5623_v38, %v8470_v49  ;;  %v7262_v49 = vld [vmem:[#allocation3 + $0x454] sm:$0xf]  ;;  %v6824_v38 = vld [vmem:[#allocation3 + $0x474] sm:$0xf0] }
 0x269   : > { %5924 = vmatmul.bf16.gmra.mxu0 %v6759_v16  ;;  %v5886_v2 = vadd.f32 %v5885_v58, %v5797_v23  ;;  %5662 = vmatmul.bf16.gmra.mxu1 %v6783_v36  ;;  %3105 = vst [vmem:[#allocation3 + $0x450] sm:$0xf] %v3033_v56  ;;  %v3597_v16 = vrot.slane %v3596_v13, 4  ;;  %v3592_v36 = vsel %vm8034_vm10, %v3587_v7, %v3591_v47 }
 0x26a   : > { %v3601_v32 = vrot.slane %v3599_v34, 5  ;;  %3665 = vst [vmem:[#allocation3 + $0x458] sm:$0xf] %v3592_v36 }
 0x26b   : > { %v5949_v40 = vadd.f32 %v5948_v54, %v5886_v2  ;;  %v5988_v28 = vmul.f32 %v5886_v2, %v5886_v2 }
 0x26c   : > { %v5709_v48 = vpop.f32.mrf.mxu2  ;;  %v3602_v9 = vsel %vm8034_vm10, %v3597_v16, %v3601_v32 }
 0x26d   : > { %v6019_v45 = vadd.f32 %v6018_v14, %v5988_v28  ;;  %v5710_v12 = vadd.f32 %v5709_v48, %v5621_v6  ;;  %v5798_v37 = vpop.f32.mrf.mxu3  ;;  %3666 = vst [vmem:[#allocation3 + $0x47c] sm:$0xf] %v3602_v9  ;;  %v6816_v14 = vld [vmem:[#allocation3 + $0x46c] sm:$0xf0]  ;;  %v7266_v22 = vld [vmem:[#allocation3 + $0x470] sm:$0xf0]  ;;  %v6827_v28 = vor.u32 %v7262_v49, %v6824_v38 }
 0x26e   : > { %v5887_v20 = vpop.f32.mrf.mxu0  ;;  %v5625_v54 = vpop.f32.mrf.mxu1  ;;  %v6819_v41 = vor.u32 %v7261_v63, %v6816_v14 }
 0x26f   : > { %v5799_v25 = vadd.f32 %v5798_v37, %v5710_v12 }
 0x270   : > { %v6822_v57 = vld [vmem:[#allocation3 + $0x450] sm:$0xf] }
 0x271   : > { %v5888_v43 = vadd.f32 %v5887_v20, %v5799_v25  ;;  %5751 = vmatmul.bf16.gmra.mxu2 %v6787_v33  ;;  %v6823_v34 = vor.u32 %v7266_v22, %v6822_v57  ;;  %v6830_v16 = vld [vmem:[#allocation3 + $0x458] sm:$0xf] }
 0x272   : > { %5840 = vmatmul.bf16.gmra.mxu3 %v6791_v21 }
 0x273   : > { %v5950_v10 = vadd.f32 %v5949_v40, %v5888_v43  ;;  %v5989_v51 = vmul.f32 %v5888_v43, %v5888_v43  ;;  %v7432_v8 = vpack.c.bf16 %v5888_v43, %v5886_v2  ;;  %v5626_v2 = vadd.f32 %v5625_v54, %v8476_v19 }
 0x274   : > { %v5712_v18 = vpop.f32.mrf.mxu2  ;;  %v7267_v48 = vld [vmem:[#allocation3 + $0x478] sm:$0xf0] }
 0x275   : > { %v6020_v58 = vadd.f32 %v6019_v45, %v5989_v51  ;;  %7503 = vst [vmem:[%s8824_s9 + $0x28] sm:$0xff] %v7432_v8   ;;  %v5713_v42 = vadd.f32 %v5712_v18, %v5624_v31  ;;  %v5801_v0 = vpop.f32.mrf.mxu3  ;;  %v9101_v45 = vld [vmem:[#allocation9_spill] sm:$0xff]  ;;  %v6831_v20 = vor.u32 %v7267_v48, %v6830_v16 }
 0x276   : > { %v5890_v47 = vpop.f32.mrf.mxu0  ;;  %v5628_v23 = vpop.f32.mrf.mxu1 }
 0x277   : > { %v5802_v62 = vadd.f32 %v5801_v0, %v5713_v42  ;;  %v5629_v12 = vadd.f32 %v5628_v23, %v9101_v45 }
 0x279   : > { %5929 = vmatmul.bf16.gmra.mxu0 %v6795_v27  ;;  %v5891_v5 = vadd.f32 %v5890_v47, %v5802_v62  ;;  %5667 = vmatmul.bf16.gmra.mxu1 %v6819_v41 }
 0x27b   : > { %v5951_v50 = vadd.f32 %v5950_v10, %v5891_v5  ;;  %v5990_v13 = vmul.f32 %v5891_v5, %v5891_v5 }
 0x27c   : > { %v5714_v3 = vpop.f32.mrf.mxu2 }
 0x27d   : > { %v6021_v39 = vadd.f32 %v6020_v58, %v5990_v13  ;;  %v5715_v56 = vadd.f32 %v5714_v3, %v5626_v2  ;;  %v5803_v7 = vpop.f32.mrf.mxu3 }
 0x27e   : > { %v5892_v40 = vpop.f32.mrf.mxu0  ;;  %v5630_v15 = vpop.f32.mrf.mxu1 }
 0x27f   : > { %v5804_v6 = vadd.f32 %v5803_v7, %v5715_v56  ;;  %v5631_v14 = vadd.f32 %v5630_v15, %v8508_v52 }
 0x281   : > { %v5893_v59 = vadd.f32 %v5892_v40, %v5804_v6  ;;  %5756 = vmatmul.bf16.gmra.mxu2 %v6823_v34 }
 0x282   : > { %5845 = vmatmul.bf16.gmra.mxu3 %v6827_v28 }
 0x283   : > { %v5952_v36 = vadd.f32 %v5951_v50, %v5893_v59  ;;  %v5991_v32 = vmul.f32 %v5893_v59, %v5893_v59  ;;  %v7437_v19 = vpack.c.bf16 %v5893_v59, %v5891_v5 }
 0x284   : > { %v5717_v37 = vpop.f32.mrf.mxu2 }
 0x285   : > { %v6022_v33 = vadd.f32 %v6021_v39, %v5991_v32  ;;  %7504 = vst [vmem:[%s8824_s9 + $0x30] sm:$0xff] %v7437_v19   ;;  %v5718_v21 = vadd.f32 %v5717_v37, %v5629_v12  ;;  %v5806_v54 = vpop.f32.mrf.mxu3 }
 0x286   : > { %v5895_v9 = vpop.f32.mrf.mxu0  ;;  %v5633_v25 = vpop.f32.mrf.mxu1 }
 0x287   : > { %v5807_v43 = vadd.f32 %v5806_v54, %v5718_v21  ;;  %v5634_v23 = vadd.f32 %v5633_v25, %v8520_v44 }
 0x289   : > { %5934 = vmatmul.bf16.gmra.mxu0 %v6831_v20  ;;  %v5896_v24 = vadd.f32 %v5895_v9, %v5807_v43 }
 0x28b   : > { %v5953_v61 = vadd.f32 %v5952_v36, %v5896_v24  ;;  %v5992_v63 = vmul.f32 %v5896_v24, %v5896_v24 }
 0x28c   : > { %v5719_v10 = vpop.f32.mrf.mxu2 }
 0x28d   : > { %v6023_v51 = vadd.f32 %v6022_v33, %v5992_v63  ;;  %v5720_v8 = vadd.f32 %v5719_v10, %v5631_v14  ;;  %v5808_v31 = vpop.f32.mrf.mxu3 }
 0x28e   : > { %v5897_v18 = vpop.f32.mrf.mxu0  ;;  %v5635_v58 = vpop.f32.mrf.mxu1 }
 0x28f   : > { %v5809_v27 = vadd.f32 %v5808_v31, %v5720_v8  ;;  %v5636_v3 = vadd.f32 %v5635_v58, %v8536_v46 }
 0x291   : > { %v5898_v42 = vadd.f32 %v5897_v18, %v5809_v27 }
 0x293   : > { %v5954_v0 = vadd.f32 %v5953_v61, %v5898_v42  ;;  %v5993_v41 = vmul.f32 %v5898_v42, %v5898_v42  ;;  %v7442_v47 = vpack.c.bf16 %v5898_v42, %v5896_v24 }
 0x294   : > { %v5722_v62 = vpop.f32.mrf.mxu2 }
 0x295   : > { %v6024_v5 = vadd.f32 %v6023_v51, %v5993_v41  ;;  %7505 = vst [vmem:[%s8824_s9 + $0x38] sm:$0xff] %v7442_v47   ;;  %v5723_v57 = vadd.f32 %v5722_v62, %v5634_v23  ;;  %v5811_v22 = vpop.f32.mrf.mxu3 }
 0x296   : > { %v5900_v50 = vpop.f32.mrf.mxu0  ;;  %v5638_v52 = vpop.f32.mrf.mxu1 }
 0x297   : > { %v5812_v13 = vadd.f32 %v5811_v22, %v5723_v57  ;;  %v5639_v48 = vadd.f32 %v5638_v52, %v8558_v17 }
 0x299   : > { %v5901_v2 = vadd.f32 %v5900_v50, %v5812_v13 }
 0x29b   : > { %v5955_v49 = vadd.f32 %v5954_v0, %v5901_v2  ;;  %v5994_v38 = vmul.f32 %v5901_v2, %v5901_v2 }
 0x29c   : > { %v5724_v39 = vpop.f32.mrf.mxu2 }
 0x29d   : > { %v6025_v56 = vadd.f32 %v6024_v5, %v5994_v38  ;;  %v5725_v7 = vadd.f32 %v5724_v39, %v5636_v3  ;;  %v5813_v34 = vpop.f32.mrf.mxu3 }
 0x29e   : > { %v5902_v40 = vpop.f32.mrf.mxu0  ;;  %v5640_v44 = vpop.f32.mrf.mxu1 }
 0x29f   : > { %v5814_v28 = vadd.f32 %v5813_v34, %v5725_v7  ;;  %v5641_v54 = vadd.f32 %v5640_v44, %v8572_v35 }
 0x2a1   : > { %v5903_v15 = vadd.f32 %v5902_v40, %v5814_v28 }
 0x2a3   : > { %v5956_v6 = vadd.f32 %v5955_v49, %v5903_v15  ;;  %v5995_v59 = vmul.f32 %v5903_v15, %v5903_v15  ;;  %v7447_v16 = vpack.c.bf16 %v5903_v15, %v5901_v2 }
 0x2a4   : > { %v5727_v36 = vpop.f32.mrf.mxu2 }
 0x2a5   : > { %v6026_v32 = vadd.f32 %v6025_v56, %v5995_v59  ;;  %7506 = vst [vmem:[%s8824_s9 + $0x40] sm:$0xff] %v7447_v16   ;;  %v5728_v19 = vadd.f32 %v5727_v36, %v5639_v48  ;;  %v5816_v45 = vpop.f32.mrf.mxu3 }
 0x2a6   : > { %v5905_v12 = vpop.f32.mrf.mxu0  ;;  %v5643_v46 = vpop.f32.mrf.mxu1 }
 0x2a7   : > { %v5817_v37 = vadd.f32 %v5816_v45, %v5728_v19  ;;  %v5644_v31 = vadd.f32 %v5643_v46, %v8593_v60 }
 0x2a9   : > { %v5906_v33 = vadd.f32 %v5905_v12, %v5817_v37 }
 0x2ab   : > { %v5957_v20 = vadd.f32 %v5956_v6, %v5906_v33  ;;  %v5996_v21 = vmul.f32 %v5906_v33, %v5906_v33 }
 0x2ac   : > { %v5729_v9 = vpop.f32.mrf.mxu2 }
 0x2ad   : > { %v6027_v25 = vadd.f32 %v6026_v32, %v5996_v21  ;;  %v5730_v43 = vadd.f32 %v5729_v9, %v5641_v54  ;;  %v5818_v24 = vpop.f32.mrf.mxu3 }
 0x2ae   : > { %v5907_v61 = vpop.f32.mrf.mxu0  ;;  %v5645_v17 = vpop.f32.mrf.mxu1 }
 0x2af   : > { %v5819_v63 = vadd.f32 %v5818_v24, %v5730_v43  ;;  %v5646_v5 = vadd.f32 %v5645_v17, %v8607_v30 }
 0x2b1   : > { %v5908_v14 = vadd.f32 %v5907_v61, %v5819_v63 }
 0x2b3   : > { %v5958_v10 = vadd.f32 %v5957_v20, %v5908_v14  ;;  %v5997_v51 = vmul.f32 %v5908_v14, %v5908_v14  ;;  %v7452_v8 = vpack.c.bf16 %v5908_v14, %v5906_v33 }
 0x2b4   : > { %v5732_v18 = vpop.f32.mrf.mxu2 }
 0x2b5   : > { %v6028_v58 = vadd.f32 %v6027_v25, %v5997_v51  ;;  %7507 = vst [vmem:[%s8824_s9 + $0x48] sm:$0xff] %v7452_v8   ;;  %v5733_v27 = vadd.f32 %v5732_v18, %v5644_v31  ;;  %v5821_v42 = vpop.f32.mrf.mxu3 }
 0x2b6   : > { %v5910_v0 = vpop.f32.mrf.mxu0  ;;  %v5648_v35 = vpop.f32.mrf.mxu1 }
 0x2b7   : > { %v5822_v41 = vadd.f32 %v5821_v42, %v5733_v27  ;;  %v5649_v56 = vadd.f32 %v5648_v35, %v8621_v53 }
 0x2b9   : > { %v5911_v47 = vadd.f32 %v5910_v0, %v5822_v41 }
 0x2bb   : > { %v5959_v23 = vadd.f32 %v5958_v10, %v5911_v47  ;;  %v5998_v62 = vmul.f32 %v5911_v47, %v5911_v47 }
 0x2bc   : > { %v5734_v57 = vpop.f32.mrf.mxu2 }
 0x2bd   : > { %v6029_v22 = vadd.f32 %v6028_v58, %v5998_v62  ;;  %v5735_v50 = vadd.f32 %v5734_v57, %v5646_v5  ;;  %v5823_v52 = vpop.f32.mrf.mxu3 }
 0x2be   : > { %v5912_v13 = vpop.f32.mrf.mxu0  ;;  %v5650_v60 = vpop.f32.mrf.mxu1 }
 0x2bf   : > { %v5824_v2 = vadd.f32 %v5823_v52, %v5735_v50  ;;  %v5651_v48 = vadd.f32 %v5650_v60, %v8638_v11 }
 0x2c1   : > { %v5913_v49 = vadd.f32 %v5912_v13, %v5824_v2 }
 0x2c3   : > { %v5960_v38 = vadd.f32 %v5959_v23, %v5913_v49  ;;  %v5999_v3 = vmul.f32 %v5913_v49, %v5913_v49  ;;  %v7457_v39 = vpack.c.bf16 %v5913_v49, %v5911_v47 }
 0x2c4   : > { %v5737_v7 = vpop.f32.mrf.mxu2 }
 0x2c5   : > { %v6030_v34 = vadd.f32 %v6029_v22, %v5999_v3  ;;  %7508 = vst [vmem:[%s8824_s9 + $0x50] sm:$0xff] %v7457_v39   ;;  %v5738_v40 = vadd.f32 %v5737_v7, %v5649_v56  ;;  %v5826_v44 = vpop.f32.mrf.mxu3 }
 0x2c6   : > { %v5915_v28 = vpop.f32.mrf.mxu0  ;;  %v5653_v30 = vpop.f32.mrf.mxu1 }
 0x2c7   : > { %v5827_v15 = vadd.f32 %v5826_v44, %v5738_v40  ;;  %v5654_v54 = vadd.f32 %v5653_v30, %v8660_v26 }
 0x2c9   : > { %v5916_v6 = vadd.f32 %v5915_v28, %v5827_v15 }
 0x2cb   : > { %v5961_v59 = vadd.f32 %v5960_v38, %v5916_v6  ;;  %v6000_v16 = vmul.f32 %v5916_v6, %v5916_v6 }
 0x2cc   : > { %v5739_v36 = vpop.f32.mrf.mxu2 }
 0x2cd   : > { %v6031_v32 = vadd.f32 %v6030_v34, %v6000_v16  ;;  %v5740_v19 = vadd.f32 %v5739_v36, %v5651_v48  ;;  %v5828_v45 = vpop.f32.mrf.mxu3 }
 0x2ce   : > { %v5917_v12 = vpop.f32.mrf.mxu0  ;;  %v5655_v53 = vpop.f32.mrf.mxu1 }
 0x2cf   : > { %v5829_v46 = vadd.f32 %v5828_v45, %v5740_v19  ;;  %v5656_v51 = vadd.f32 %v5655_v53, %v8674_v4 }
 0x2d1   : > { %v5918_v37 = vadd.f32 %v5917_v12, %v5829_v46  ;;  %v9102_v12 = vld [vmem:[#allocation10_spill] sm:$0xff] }
 0x2d3   : > { %v5962_v33 = vadd.f32 %v5961_v59, %v5918_v37  ;;  %v6001_v20 = vmul.f32 %v5918_v37, %v5918_v37  ;;  %v7462_v21 = vpack.c.bf16 %v5918_v37, %v5916_v6 }
 0x2d4   : > { %v5742_v9 = vpop.f32.mrf.mxu2 }
 0x2d5   : > { %v6032_v25 = vadd.f32 %v6031_v32, %v6001_v20  ;;  %7509 = vst [vmem:[%s8824_s9 + $0x58] sm:$0xff] %v7462_v21   ;;  %v5743_v43 = vadd.f32 %v5742_v9, %v5654_v54  ;;  %v5831_v24 = vpop.f32.mrf.mxu3 }
 0x2d6   : > { %v5920_v61 = vpop.f32.mrf.mxu0  ;;  %v5658_v11 = vpop.f32.mrf.mxu1 }
 0x2d7   : > { %v5832_v17 = vadd.f32 %v5831_v24, %v5743_v43  ;;  %v5659_v23 = vadd.f32 %v5658_v11, %v8695_v29 }
 0x2d9   : > { %v5921_v63 = vadd.f32 %v5920_v61, %v5832_v17  ;;  %v9103_v61 = vld [vmem:[#allocation4_spill] sm:$0xff] }
 0x2db   : > { %v5963_v14 = vadd.f32 %v5962_v33, %v5921_v63  ;;  %v6002_v10 = vmul.f32 %v5921_v63, %v5921_v63 }
 0x2dc   : > { %v5744_v8 = vpop.f32.mrf.mxu2 }
 0x2dd   : > { %v6033_v31 = vadd.f32 %v6032_v25, %v6002_v10  ;;  %v5745_v18 = vadd.f32 %v5744_v8, %v5656_v51  ;;  %v5833_v58 = vpop.f32.mrf.mxu3 }
 0x2de   : > { %v5922_v27 = vpop.f32.mrf.mxu0  ;;  %v5660_v42 = vpop.f32.mrf.mxu1 }
 0x2df   : > { %v5834_v26 = vadd.f32 %v5833_v58, %v5745_v18  ;;  %v5661_v49 = vadd.f32 %v5660_v42, %v8709_v55 }
 0x2e1   : > { %v5923_v0 = vadd.f32 %v5922_v27, %v5834_v26  ;;  %v9104_v26 = vld [vmem:[#allocation11_spill] sm:$0xff] }
 0x2e3   : > { %v5964_v35 = vadd.f32 %v5963_v14, %v5923_v0  ;;  %v6003_v41 = vmul.f32 %v5923_v0, %v5923_v0  ;;  %v7467_v47 = vpack.c.bf16 %v5923_v0, %v5921_v63 }
 0x2e4   : > { %v5747_v62 = vpop.f32.mrf.mxu2 }
 0x2e5   : > { %v6034_v5 = vadd.f32 %v6033_v31, %v6003_v41  ;;  %7510 = vst [vmem:[%s8824_s9 + $0x60] sm:$0xff] %v7467_v47   ;;  %v5748_v57 = vadd.f32 %v5747_v62, %v5659_v23  ;;  %v5836_v22 = vpop.f32.mrf.mxu3 }
 0x2e6   : > { %v5925_v50 = vpop.f32.mrf.mxu0  ;;  %v5663_v13 = vpop.f32.mrf.mxu1 }
 0x2e7   : > { %v5837_v4 = vadd.f32 %v5836_v22, %v5748_v57  ;;  %v5664_v30 = vadd.f32 %v5663_v13, %v8723_v1 }
 0x2e9   : > { %v5926_v52 = vadd.f32 %v5925_v50, %v5837_v4 }
 0x2eb   : > { %v5965_v60 = vadd.f32 %v5964_v35, %v5926_v52  ;;  %v6004_v2 = vmul.f32 %v5926_v52, %v5926_v52 }
 0x2ec   : > { %v5749_v38 = vpop.f32.mrf.mxu2 }
 0x2ed   : > { %v6035_v3 = vadd.f32 %v6034_v5, %v6004_v2  ;;  %v5750_v39 = vadd.f32 %v5749_v38, %v5661_v49  ;;  %v5838_v56 = vpop.f32.mrf.mxu3 }
 0x2ee   : > { %v5927_v7 = vpop.f32.mrf.mxu0  ;;  %v5665_v6 = vpop.f32.mrf.mxu1 }
 0x2ef   : > { %v5839_v29 = vadd.f32 %v5838_v56, %v5750_v39  ;;  %v5666_v53 = vadd.f32 %v5665_v6, %v9102_v12 }
 0x2f1   : > { %v5928_v34 = vadd.f32 %v5927_v7, %v5839_v29 }
 0x2f3   : > { %v5966_v40 = vadd.f32 %v5965_v60, %v5928_v34  ;;  %v6005_v44 = vmul.f32 %v5928_v34, %v5928_v34  ;;  %v7472_v28 = vpack.c.bf16 %v5928_v34, %v5926_v52 }
 0x2f4   : > { %v5752_v15 = vpop.f32.mrf.mxu2 }
 0x2f5   : > { %v6036_v59 = vadd.f32 %v6035_v3, %v6005_v44  ;;  %7511 = vst [vmem:[%s8824_s9 + $0x68] sm:$0xff] %v7472_v28   ;;  %v5753_v16 = vadd.f32 %v5752_v15, %v5664_v30  ;;  %v5841_v48 = vpop.f32.mrf.mxu3 }
 0x2f6   : > { %v5930_v36 = vpop.f32.mrf.mxu0  ;;  %v5668_v1 = vpop.f32.mrf.mxu1 }
 0x2f7   : > { %v5842_v55 = vadd.f32 %v5841_v48, %v5753_v16  ;;  %v5669_v11 = vadd.f32 %v5668_v1, %v9103_v61 }
 0x2f9   : > { %v5931_v32 = vadd.f32 %v5930_v36, %v5842_v55 }
 0x2fb   : > { %v5967_v19 = vadd.f32 %v5966_v40, %v5931_v32  ;;  %v6006_v45 = vmul.f32 %v5931_v32, %v5931_v32 }
 0x2fc   : > { %v5754_v46 = vpop.f32.mrf.mxu2 }
 0x2fd   : > { %v6037_v37 = vadd.f32 %v6036_v59, %v6006_v45  ;;  %v5755_v33 = vadd.f32 %v5754_v46, %v5666_v53  ;;  %v5843_v20 = vpop.f32.mrf.mxu3 }
 0x2fe   : > { %v5932_v21 = vpop.f32.mrf.mxu0  ;;  %v5670_v31 = vpop.f32.mrf.mxu1 }
 0x2ff   : > { %v5844_v54 = vadd.f32 %v5843_v20, %v5755_v33  ;;  %v5671_v42 = vadd.f32 %v5670_v31, %v9104_v26 }
 0x301   : > { %v5933_v9 = vadd.f32 %v5932_v21, %v5844_v54 }
 0x303   : > { %v5968_v25 = vadd.f32 %v5967_v19, %v5933_v9  ;;  %v6007_v43 = vmul.f32 %v5933_v9, %v5933_v9  ;;  %v7477_v24 = vpack.c.bf16 %v5933_v9, %v5931_v32 }
 0x304   : > { %v5757_v17 = vpop.f32.mrf.mxu2 }
 0x305   : > { %v6038_v63 = vadd.f32 %v6037_v37, %v6007_v43  ;;  %7512 = vst [vmem:[%s8824_s9 + $0x70] sm:$0xff] %v7477_v24   ;;  %v5758_v14 = vadd.f32 %v5757_v17, %v5669_v11  ;;  %v5846_v10 = vpop.f32.mrf.mxu3 }
 0x306   : > { %v5935_v51 = vpop.f32.mrf.mxu0 }
 0x307   : > { %v5847_v8 = vadd.f32 %v5846_v10, %v5758_v14 }
 0x309   : > { %v5936_v18 = vadd.f32 %v5935_v51, %v5847_v8 }
 0x30b   : > { %v5969_v58 = vadd.f32 %v5968_v25, %v5936_v18  ;;  %v6008_v27 = vmul.f32 %v5936_v18, %v5936_v18 }
 0x30c   : > { %v5759_v0 = vpop.f32.mrf.mxu2 }
 0x30d   : > { %v6039_v35 = vadd.f32 %v6038_v63, %v6008_v27  ;;  %v5760_v41 = vadd.f32 %v5759_v0, %v5671_v42  ;;  %v5848_v47 = vpop.f32.mrf.mxu3 }
 0x30e   : > { %v5937_v62 = vpop.f32.mrf.mxu0 }
 0x30f   : > { %v5849_v23 = vadd.f32 %v5848_v47, %v5760_v41 }
 0x311   : > { %v5938_v5 = vadd.f32 %v5937_v62, %v5849_v23 }
 0x313   : > { %v5970_v57 = vadd.f32 %v5969_v58, %v5938_v5  ;;  %v6009_v22 = vmul.f32 %v5938_v5, %v5938_v5  ;;  %v7482_v50 = vpack.c.bf16 %v5938_v5, %v5936_v18 }
 0x315   : > { %v5971_v4 = vrot.slane %v5970_v57, 4  ;;  %v6040_v52 = vadd.f32 %v6039_v35, %v6009_v22  ;;  %7513 = vst [vmem:[%s8824_s9 + $0x78] sm:$0xff] %v7482_v50  }
 0x317   : > { %v5972_v13 = vadd.f32 %v5971_v4, %v5970_v57  ;;  %v6041_v60 = vrot.slane %v6040_v52, 4 }
 0x319   : > { %v5973_v2 = vrot.slane %v5972_v13, 2  ;;  %v6042_v49 = vadd.f32 %v6041_v60, %v6040_v52 }
 0x31b   : > { %v5974_v38 = vadd.f32 %v5973_v2, %v5972_v13  ;;  %v6043_v3 = vrot.slane %v6042_v49, 2 }
 0x31d   : > { %v5975_v39 = vrot.slane %v5974_v38, 1  ;;  %v6044_v56 = vadd.f32 %v6043_v3, %v6042_v49 }
 0x31f   : > { %v5976_v7 = vadd.f32 %v5975_v39, %v5974_v38  ;;  %v6045_v29 = vrot.slane %v6044_v56, 1 }
 0x321   : > { %5977 = vst [vmem:[%s235_s12] sm:$0x1] %v5976_v7  ;;  %v6046_v34 = vadd.f32 %v6045_v29, %v6044_v56 }
 0x323   : > { %6047 = vst [vmem:[%s235_s12 + $0x1] sm:$0x1] %v6046_v34 }
 0x324 PF: > { %s16_s18 = sadd.s32 1, %s7559_s18  }
 0x325   : > { %p13_p4 = scmp.ge.s32.totalorder %s16_s18, 4  }
 0x327   :  { %15 = sbr.rel (!%p13_p4) target bundleno = 1 (0x1), region = 81 }

</bundles_post_ra>
